<compile_context>
chip_gen: v6e
topology: v6e:2x2x1
jax: 0.10.0
libtpu: 0.0.40
codegen_flags: <defaults>
</compile_context>

<pallas_src>
import functools

import jax
import jax.numpy as jnp
from jax import lax
from jax.experimental import pallas as pl
from jax.experimental.pallas import tpu as pltpu


def _attn_kernel(xq_ref, xkv_ref, w_ref, o_ref,
                 qn_scr, acc_scr, m_scr, l_scr,
                 *, num_heads, c_head):
    # xq_ref:  (1, tq, C)   query-side tokens (also the residual)
    # xkv_ref: (1, tk, C)   key/value-side tokens
    # w_ref:   (3C, C)      fused qkv Conv3d-1x1x1 weight
    # o_ref:   (1, tq, C)   output tokens (head*c_head + c channel order)
    # qn_scr:  (tq, C)      bf16 normalized Q (all heads)
    # acc_scr: (tq, C)      f32 output accumulator (all heads)
    # m_scr:   (tq, heads)  f32 running max per head
    # l_scr:   (tq, heads)  f32 running softmax denominator per head
    C = num_heads * c_head
    kv_i = pl.program_id(2)

    @pl.when(kv_i == 0)
    def _init():
        xq = xq_ref[0]
        # Fused Q projection: one wide (tq, C) x (C, C) matmul for all heads.
        q = lax.dot_general(xq, w_ref[0:C, :], (((1,), (1,)), ((), ())),
                            preferred_element_type=jnp.float32)          # (tq, C)
        for h in range(num_heads):
            sl = slice(h * c_head, (h + 1) * c_head)
            qh = q[:, sl]
            # torch.nn.functional.normalize(dim=-1): x / max(||x||, 1e-12)
            inv = lax.rsqrt(jnp.maximum(
                jnp.sum(qh * qh, axis=-1, keepdims=True), 1e-24))
            qn_scr[:, sl] = (qh * inv).astype(qn_scr.dtype)
        m_scr[...] = jnp.full_like(m_scr, -jnp.inf)
        l_scr[...] = jnp.zeros_like(l_scr)
        acc_scr[...] = jnp.zeros_like(acc_scr)

    # Fused K|V projection for this kv tile: one (tk, C) x (C, 2C) matmul.
    xkv = xkv_ref[0]
    kv = lax.dot_general(xkv, w_ref[C:3 * C, :], (((1,), (1,)), ((), ())),
                         preferred_element_type=jnp.float32)              # (tk, 2C)

    for h in range(num_heads):
        sl = slice(h * c_head, (h + 1) * c_head)
        kh = kv[:, h * c_head:(h + 1) * c_head]                           # (tk, ch)
        vh = kv[:, C + h * c_head:C + (h + 1) * c_head]                   # (tk, ch)
        kinv = lax.rsqrt(jnp.maximum(
            jnp.sum(kh * kh, axis=-1, keepdims=True), 1e-24))
        khn = (kh * kinv).astype(jnp.bfloat16)

        qh = qn_scr[:, sl]                                                # bf16
        # Cosine-similarity scores on the MXU (bf16 in, f32 accumulate).
        s = lax.dot_general(qh, khn, (((1,), (1,)), ((), ())),
                            preferred_element_type=jnp.float32)           # (tq, tk)

        m_prev = m_scr[:, h:h + 1]
        m_new = jnp.maximum(m_prev, jnp.max(s, axis=-1, keepdims=True))
        alpha = jnp.exp(m_prev - m_new)
        p = jnp.exp(s - m_new)
        l_scr[:, h:h + 1] = alpha * l_scr[:, h:h + 1] + jnp.sum(
            p, axis=-1, keepdims=True)
        acc_scr[:, sl] = alpha * acc_scr[:, sl] + jnp.dot(
            p.astype(jnp.bfloat16), vh.astype(jnp.bfloat16),
            preferred_element_type=jnp.float32)
        m_scr[:, h:h + 1] = m_new

    @pl.when(kv_i == pl.num_programs(2) - 1)
    def _finalize():
        x_res = xq_ref[0].astype(jnp.float32)     # residual, already in VMEM
        for h in range(num_heads):
            sl = slice(h * c_head, (h + 1) * c_head)
            inv_l = pl.reciprocal(l_scr[:, h:h + 1], approx=True)
            o_ref[0, :, sl] = (acc_scr[:, sl] * inv_l
                               + x_res[:, sl]).astype(o_ref.dtype)


def _pick_tile(n, target):
    """Largest divisor of n that is <= target and a multiple of 8 (or n itself)."""
    # TODO(synk): add kv-padding masks to support tiles that don't divide N;
    # currently we fall back to a single full-N block in that case.
    if n <= target:
        return n
    for t in range(min(target, n), 0, -1):
        if n % t == 0 and t % 8 == 0:
            return t
    return n


def attention_forward(x, qkv_weight, num_heads, *, q_tile=256, kv_tile=256):
    """x: (B, C, D, H, W); qkv_weight: (3*C, C) (Conv3d 1x1x1 weight, squeezed)."""
    B, C, D, H, W = x.shape
    N = D * H * W
    assert C % num_heads == 0
    c_head = C // num_heads
    assert qkv_weight.shape == (3 * C, C)

    # Glue: flatten spatial dims -> tokens (channels on the lane axis). The inverse
    # transpose at the end is the only other wrapper-side copy; the residual and
    # per-head regrouping are handled inside the kernel.
    x_tokens = jnp.transpose(x.reshape(B, C, N), (0, 2, 1))               # (B, N, C)

    tq = _pick_tile(N, q_tile)
    tk = _pick_tile(N, kv_tile)
    grid = (B, N // tq, N // tk)

    kernel = functools.partial(_attn_kernel, num_heads=num_heads, c_head=c_head)

    # VMEM budget (double-buffered blocks + scratch + in-flight temporaries),
    # with headroom; clamped so it stays within v7x's 64 MiB physical VMEM.
    isz = x.dtype.itemsize
    est = (2 * tq * C * isz            # xq block (double buffered)
           + 2 * tk * C * isz          # xkv block
           + 2 * 3 * C * C * qkv_weight.dtype.itemsize
           + 2 * tq * C * isz          # output block
           + tq * C * 2 + tq * C * 4 + 2 * tq * 128 * 4     # scratch
           + 2 * tq * tk * 4 + 3 * tk * C * 4)              # score/kv temporaries
    vmem_limit = int(min(max(2 * est, 32 * 1024 * 1024), 64 * 1024 * 1024))

    out_tokens = pl.pallas_call(
        kernel,
        out_shape=jax.ShapeDtypeStruct((B, N, C), x.dtype),
        grid_spec=pltpu.PrefetchScalarGridSpec(
            num_scalar_prefetch=0,
            grid=grid,
            in_specs=[
                # q-side tokens: block index constant across kv -> no re-DMA per kv step
                pl.BlockSpec((1, tq, C), lambda b, qi, ki: (b, qi, 0)),
                # kv-side tokens
                pl.BlockSpec((1, tk, C), lambda b, qi, ki: (b, ki, 0)),
                # fused qkv weight (constant across the whole grid)
                pl.BlockSpec((3 * C, C), lambda b, qi, ki: (0, 0)),
            ],
            out_specs=pl.BlockSpec((1, tq, C), lambda b, qi, ki: (b, qi, 0)),
            scratch_shapes=[
                pltpu.VMEM((tq, C), jnp.bfloat16),          # normalized Q
                pltpu.VMEM((tq, C), jnp.float32),           # output accumulator
                pltpu.VMEM((tq, num_heads), jnp.float32),   # running max
                pltpu.VMEM((tq, num_heads), jnp.float32),   # running denominator
            ],
        ),
        compiler_params=pltpu.CompilerParams(
            dimension_semantics=("parallel", "parallel", "arbitrary"),
            vmem_limit_bytes=vmem_limit,
        ),
    )(x_tokens, x_tokens, qkv_weight)

    # (B, N, C) -> (B, C, D, H, W); channel order head*c_head + c already matches.
    return jnp.transpose(out_tokens, (0, 2, 1)).reshape(B, C, D, H, W)


def _reference(x, qkv_weight, num_heads):
    B, C, D, H, W = x.shape
    N = D * H * W
    c_head = C // num_heads
    xt = x.reshape(B, C, N).transpose(0, 2, 1)                     # (B, N, C)
    qkv = jnp.einsum('bnc,oc->bno', xt, qkv_weight)                # (B, N, 3C)
    q, k, v = jnp.split(qkv, 3, axis=-1)

    def heads(t):
        return t.reshape(B, N, num_heads, c_head).transpose(0, 2, 1, 3)

    q, k, v = heads(q), heads(k), heads(v)
    q = q / jnp.maximum(jnp.linalg.norm(q, axis=-1, keepdims=True), 1e-12)
    k = k / jnp.maximum(jnp.linalg.norm(k, axis=-1, keepdims=True), 1e-12)
    attn = jax.nn.softmax(jnp.einsum('bhnc,bhmc->bhnm', q, k), axis=-1)
    out = jnp.einsum('bhnm,bhmc->bhnc', attn, v)                   # (B, heads, N, ch)
    out = out.transpose(0, 1, 3, 2).reshape(B, C, D, H, W)
    return out + x


if __name__ == "__main__":
    key = jax.random.PRNGKey(0)
    B, C, D, H, W = 2, 32, 4, 8, 8        # N = 256 tokens
    num_heads = 4

    kx, kw = jax.random.split(key)
    x = jax.random.normal(kx, (B, C, D, H, W), dtype=jnp.float32)
    # Conv3d(in_ch, 3*in_ch, kernel_size=1, bias=False) weight: (3C, C, 1, 1, 1) -> (3C, C)
    bound = 1.0 / jnp.sqrt(C)
    qkv_weight = jax.random.uniform(kw, (3 * C, C), jnp.float32, -bound, bound)

    # Small tiles so the test exercises the multi-tile online-softmax path
    # (grid = (2, 2, 2): 2 q-tiles x 2 kv-tiles per batch).
    out = attention_forward(x, qkv_weight, num_heads, q_tile=128, kv_tile=128)
    out = jax.block_until_ready(out)

    ref = _reference(x, qkv_weight, num_heads)
    assert out.shape == (B, C, D, H, W)
    max_err = float(jnp.max(jnp.abs(out - ref)))
    # bf16 MXU inputs (f32 accumulation) -> slightly looser tolerance than pure f32.
    assert jnp.allclose(out, ref, atol=2e-2, rtol=2e-2), \
        f"mismatch vs reference (max abs err {max_err})"
    print("KERNEL_OK")
</pallas_src>

<mosaic_0001>
module attributes {stable_mosaic.version = 11 : i64} {
  func.func @_attn_kernel(%arg0: i32, %arg1: i32, %arg2: i32, %arg3: memref<1x128x32xf32, #tpu.memory_space<vmem>>, %arg4: memref<1x128x32xf32, #tpu.memory_space<vmem>>, %arg5: memref<96x32xf32, #tpu.memory_space<vmem>>, %arg6: memref<1x128x32xf32, #tpu.memory_space<vmem>>, %arg7: memref<128x32xbf16, #tpu.memory_space<vmem>>, %arg8: memref<128x32xf32, #tpu.memory_space<vmem>>, %arg9: memref<128x4xf32, #tpu.memory_space<vmem>>, %arg10: memref<128x4xf32, #tpu.memory_space<vmem>>) attributes {dimension_semantics = [#tpu.dimension_semantics<parallel>, #tpu.dimension_semantics<parallel>, #tpu.dimension_semantics<arbitrary>], iteration_bounds = array<i64: 2, 2, 2>, scalar_prefetch = 0 : i64, scratch_operands = 4 : i64, tpu.core_type = #tpu.core_type<tc>, window_params = [{transform_indices = @transform_0, window_bounds = array<i64: 1, 128, 32>}, {transform_indices = @transform_1, window_bounds = array<i64: 1, 128, 32>}, {pipeline_mode = #tpu.pipeline_mode<synchronous>, transform_indices = @transform_2, window_bounds = array<i64: 96, 32>}, {transform_indices = @transform_3, window_bounds = array<i64: 1, 128, 32>}]} {
    %c0_i32 = arith.constant 0 : i32
    %0 = arith.cmpi eq, %arg2, %c0_i32 : i32
    %1 = arith.extui %0 : i1 to i32
    %c0_i32_0 = arith.constant 0 : i32
    %2 = arith.cmpi ne, %1, %c0_i32_0 : i32
    scf.if %2 {
      %c0_79 = arith.constant 0 : index
      %c0_80 = arith.constant 0 : index
      %c0_81 = arith.constant 0 : index
      %158 = vector.load %arg3[%c0_79, %c0_80, %c0_81] : memref<1x128x32xf32, #tpu.memory_space<vmem>>, vector<1x128x32xf32>
      %159 = vector.shape_cast %158 : vector<1x128x32xf32> to vector<128x32xf32>
      %c0_82 = arith.constant 0 : index
      %c0_83 = arith.constant 0 : index
      %160 = vector.load %arg5[%c0_82, %c0_83] : memref<96x32xf32, #tpu.memory_space<vmem>>, vector<32x32xf32>
      %cst_84 = arith.constant dense<0.000000e+00> : vector<128x32xf32>
      %161 = tpu.matmul %159, %160, %cst_84 {dimension_numbers = #tpu.dot_dimension_numbers<[1], [1], [0], [0], [0, 0, 1, 0], [], []>} : vector<128x32xf32>, vector<32x32xf32>, vector<128x32xf32> -> vector<128x32xf32>
      %162 = vector.extract_strided_slice %161 {offsets = [0, 0], sizes = [128, 8], strides = [1, 1]} : vector<128x32xf32> to vector<128x8xf32>
      %163 = arith.mulf %162, %162 : vector<128x8xf32>
      %cst_85 = arith.constant dense<0.000000e+00> : vector<128xf32>
      %164 = vector.multi_reduction <add>, %163, %cst_85 [1] : vector<128x8xf32> to vector<128xf32>
      %165 = vector.shape_cast %164 : vector<128xf32> to vector<128x1xf32>
      %cst_86 = arith.constant 1.000000e-24 : f32
      %166 = vector.broadcast %cst_86 : f32 to vector<128x1xf32>
      %167 = arith.maximumf %165, %166 : vector<128x1xf32>
      %168 = math.rsqrt %167 : vector<128x1xf32>
      %169 = vector.broadcast %168 : vector<128x1xf32> to vector<128x8xf32>
      %170 = arith.mulf %162, %169 : vector<128x8xf32>
      %171 = arith.truncf %170 : vector<128x8xf32> to vector<128x8xbf16>
      %c0_87 = arith.constant 0 : index
      %c0_88 = arith.constant 0 : index
      %172 = vector.load %arg7[%c0_87, %c0_88] : memref<128x32xbf16, #tpu.memory_space<vmem>>, vector<128x8xbf16>
      tpu.vector_store %arg7[%c0_87, %c0_88], %171 {strides = array<i32>} : memref<128x32xbf16, #tpu.memory_space<vmem>>, vector<128x8xbf16>,
      %173 = vector.extract_strided_slice %161 {offsets = [0, 8], sizes = [128, 8], strides = [1, 1]} : vector<128x32xf32> to vector<128x8xf32>
      %174 = arith.mulf %173, %173 : vector<128x8xf32>
      %cst_89 = arith.constant dense<0.000000e+00> : vector<128xf32>
      %175 = vector.multi_reduction <add>, %174, %cst_89 [1] : vector<128x8xf32> to vector<128xf32>
      %176 = vector.shape_cast %175 : vector<128xf32> to vector<128x1xf32>
      %cst_90 = arith.constant 1.000000e-24 : f32
      %177 = vector.broadcast %cst_90 : f32 to vector<128x1xf32>
      %178 = arith.maximumf %176, %177 : vector<128x1xf32>
      %179 = math.rsqrt %178 : vector<128x1xf32>
      %180 = vector.broadcast %179 : vector<128x1xf32> to vector<128x8xf32>
      %181 = arith.mulf %173, %180 : vector<128x8xf32>
      %182 = arith.truncf %181 : vector<128x8xf32> to vector<128x8xbf16>
      %c0_91 = arith.constant 0 : index
      %c8_92 = arith.constant 8 : index
      %183 = vector.load %arg7[%c0_91, %c8_92] : memref<128x32xbf16, #tpu.memory_space<vmem>>, vector<128x8xbf16>
      tpu.vector_store %arg7[%c0_91, %c8_92], %182 {strides = array<i32>} : memref<128x32xbf16, #tpu.memory_space<vmem>>, vector<128x8xbf16>,
      %184 = vector.extract_strided_slice %161 {offsets = [0, 16], sizes = [128, 8], strides = [1, 1]} : vector<128x32xf32> to vector<128x8xf32>
      %185 = arith.mulf %184, %184 : vector<128x8xf32>
      %cst_93 = arith.constant dense<0.000000e+00> : vector<128xf32>
      %186 = vector.multi_reduction <add>, %185, %cst_93 [1] : vector<128x8xf32> to vector<128xf32>
      %187 = vector.shape_cast %186 : vector<128xf32> to vector<128x1xf32>
      %cst_94 = arith.constant 1.000000e-24 : f32
      %188 = vector.broadcast %cst_94 : f32 to vector<128x1xf32>
      %189 = arith.maximumf %187, %188 : vector<128x1xf32>
      %190 = math.rsqrt %189 : vector<128x1xf32>
      %191 = vector.broadcast %190 : vector<128x1xf32> to vector<128x8xf32>
      %192 = arith.mulf %184, %191 : vector<128x8xf32>
      %193 = arith.truncf %192 : vector<128x8xf32> to vector<128x8xbf16>
      %c0_95 = arith.constant 0 : index
      %c16_96 = arith.constant 16 : index
      %194 = vector.load %arg7[%c0_95, %c16_96] : memref<128x32xbf16, #tpu.memory_space<vmem>>, vector<128x8xbf16>
      tpu.vector_store %arg7[%c0_95, %c16_96], %193 {strides = array<i32>} : memref<128x32xbf16, #tpu.memory_space<vmem>>, vector<128x8xbf16>,
      %195 = vector.extract_strided_slice %161 {offsets = [0, 24], sizes = [128, 8], strides = [1, 1]} : vector<128x32xf32> to vector<128x8xf32>
      %196 = arith.mulf %195, %195 : vector<128x8xf32>
      %cst_97 = arith.constant dense<0.000000e+00> : vector<128xf32>
      %197 = vector.multi_reduction <add>, %196, %cst_97 [1] : vector<128x8xf32> to vector<128xf32>
      %198 = vector.shape_cast %197 : vector<128xf32> to vector<128x1xf32>
      %cst_98 = arith.constant 1.000000e-24 : f32
      %199 = vector.broadcast %cst_98 : f32 to vector<128x1xf32>
      %200 = arith.maximumf %198, %199 : vector<128x1xf32>
      %201 = math.rsqrt %200 : vector<128x1xf32>
      %202 = vector.broadcast %201 : vector<128x1xf32> to vector<128x8xf32>
      %203 = arith.mulf %195, %202 : vector<128x8xf32>
      %204 = arith.truncf %203 : vector<128x8xf32> to vector<128x8xbf16>
      %c0_99 = arith.constant 0 : index
      %c24_100 = arith.constant 24 : index
      %205 = vector.load %arg7[%c0_99, %c24_100] : memref<128x32xbf16, #tpu.memory_space<vmem>>, vector<128x8xbf16>
      tpu.vector_store %arg7[%c0_99, %c24_100], %204 {strides = array<i32>} : memref<128x32xbf16, #tpu.memory_space<vmem>>, vector<128x8xbf16>,
      %cst_101 = arith.constant 0xFF800000 : f32
      %206 = vector.broadcast %cst_101 : f32 to vector<128x4xf32>
      %c0_102 = arith.constant 0 : index
      %c0_103 = arith.constant 0 : index
      %207 = vector.load %arg9[%c0_102, %c0_103] : memref<128x4xf32, #tpu.memory_space<vmem>>, vector<128x4xf32>
      tpu.vector_store %arg9[%c0_102, %c0_103], %206 {strides = array<i32>} : memref<128x4xf32, #tpu.memory_space<vmem>>, vector<128x4xf32>,
      %cst_104 = arith.constant 0.000000e+00 : f32
      %208 = vector.broadcast %cst_104 : f32 to vector<128x4xf32>
      %c0_105 = arith.constant 0 : index
      %c0_106 = arith.constant 0 : index
      %209 = vector.load %arg10[%c0_105, %c0_106] : memref<128x4xf32, #tpu.memory_space<vmem>>, vector<128x4xf32>
      tpu.vector_store %arg10[%c0_105, %c0_106], %208 {strides = array<i32>} : memref<128x4xf32, #tpu.memory_space<vmem>>, vector<128x4xf32>,
      %cst_107 = arith.constant 0.000000e+00 : f32
      %210 = vector.broadcast %cst_107 : f32 to vector<128x32xf32>
      %c0_108 = arith.constant 0 : index
      %c0_109 = arith.constant 0 : index
      %211 = vector.load %arg8[%c0_108, %c0_109] : memref<128x32xf32, #tpu.memory_space<vmem>>, vector<128x32xf32>
      tpu.vector_store %arg8[%c0_108, %c0_109], %210 {strides = array<i32>} : memref<128x32xf32, #tpu.memory_space<vmem>>, vector<128x32xf32>,
    } else {
    }
    %c0 = arith.constant 0 : index
    %c0_1 = arith.constant 0 : index
    %c0_2 = arith.constant 0 : index
    %3 = vector.load %arg4[%c0, %c0_1, %c0_2] : memref<1x128x32xf32, #tpu.memory_space<vmem>>, vector<1x128x32xf32>
    %4 = vector.shape_cast %3 : vector<1x128x32xf32> to vector<128x32xf32>
    %c32 = arith.constant 32 : index
    %c0_3 = arith.constant 0 : index
    %5 = vector.load %arg5[%c32, %c0_3] : memref<96x32xf32, #tpu.memory_space<vmem>>, vector<64x32xf32>
    %cst = arith.constant dense<0.000000e+00> : vector<128x64xf32>
    %6 = tpu.matmul %4, %5, %cst {dimension_numbers = #tpu.dot_dimension_numbers<[1], [1], [0], [0], [0, 0, 1, 0], [], []>} : vector<128x32xf32>, vector<64x32xf32>, vector<128x64xf32> -> vector<128x64xf32>
    %7 = vector.extract_strided_slice %6 {offsets = [0, 0], sizes = [128, 8], strides = [1, 1]} : vector<128x64xf32> to vector<128x8xf32>
    %8 = vector.extract_strided_slice %6 {offsets = [0, 32], sizes = [128, 8], strides = [1, 1]} : vector<128x64xf32> to vector<128x8xf32>
    %9 = arith.mulf %7, %7 : vector<128x8xf32>
    %cst_4 = arith.constant dense<0.000000e+00> : vector<128xf32>
    %10 = vector.multi_reduction <add>, %9, %cst_4 [1] : vector<128x8xf32> to vector<128xf32>
    %11 = vector.shape_cast %10 : vector<128xf32> to vector<128x1xf32>
    %cst_5 = arith.constant 1.000000e-24 : f32
    %12 = vector.broadcast %cst_5 : f32 to vector<128x1xf32>
    %13 = arith.maximumf %11, %12 : vector<128x1xf32>
    %14 = math.rsqrt %13 : vector<128x1xf32>
    %15 = vector.broadcast %14 : vector<128x1xf32> to vector<128x8xf32>
    %16 = arith.mulf %7, %15 : vector<128x8xf32>
    %17 = arith.truncf %16 : vector<128x8xf32> to vector<128x8xbf16>
    %c0_6 = arith.constant 0 : index
    %c0_7 = arith.constant 0 : index
    %18 = vector.load %arg7[%c0_6, %c0_7] : memref<128x32xbf16, #tpu.memory_space<vmem>>, vector<128x8xbf16>
    %cst_8 = arith.constant dense<0.000000e+00> : vector<128x128xf32>
    %19 = tpu.matmul %18, %17, %cst_8 {dimension_numbers = #tpu.dot_dimension_numbers<[1], [1], [0], [0], [0, 0, 1, 0], [], []>} : vector<128x8xbf16>, vector<128x8xbf16>, vector<128x128xf32> -> vector<128x128xf32>
    %c0_9 = arith.constant 0 : index
    %c0_10 = arith.constant 0 : index
    %20 = vector.load %arg9[%c0_9, %c0_10] : memref<128x4xf32, #tpu.memory_space<vmem>>, vector<128x1xf32>
    %cst_11 = arith.constant dense<0xFF800000> : vector<128xf32>
    %21 = vector.multi_reduction <maximumf>, %19, %cst_11 [1] : vector<128x128xf32> to vector<128xf32>
    %22 = vector.shape_cast %21 : vector<128xf32> to vector<128x1xf32>
    %23 = arith.maximumf %20, %22 : vector<128x1xf32>
    %24 = arith.subf %20, %23 : vector<128x1xf32>
    %25 = math.exp %24 : vector<128x1xf32>
    %26 = vector.broadcast %23 : vector<128x1xf32> to vector<128x128xf32>
    %27 = arith.subf %19, %26 : vector<128x128xf32>
    %28 = math.exp %27 : vector<128x128xf32>
    %c0_12 = arith.constant 0 : index
    %c0_13 = arith.constant 0 : index
    %29 = vector.load %arg10[%c0_12, %c0_13] : memref<128x4xf32, #tpu.memory_space<vmem>>, vector<128x1xf32>
    %30 = arith.mulf %25, %29 : vector<128x1xf32>
    %cst_14 = arith.constant dense<0.000000e+00> : vector<128xf32>
    %31 = vector.multi_reduction <add>, %28, %cst_14 [1] : vector<128x128xf32> to vector<128xf32>
    %32 = vector.shape_cast %31 : vector<128xf32> to vector<128x1xf32>
    %33 = arith.addf %30, %32 : vector<128x1xf32>
    %c0_15 = arith.constant 0 : index
    %c0_16 = arith.constant 0 : index
    %34 = vector.load %arg10[%c0_15, %c0_16] : memref<128x4xf32, #tpu.memory_space<vmem>>, vector<128x1xf32>
    tpu.vector_store %arg10[%c0_15, %c0_16], %33 {strides = array<i32>} : memref<128x4xf32, #tpu.memory_space<vmem>>, vector<128x1xf32>,
    %c0_17 = arith.constant 0 : index
    %c0_18 = arith.constant 0 : index
    %35 = vector.load %arg8[%c0_17, %c0_18] : memref<128x32xf32, #tpu.memory_space<vmem>>, vector<128x8xf32>
    %36 = vector.broadcast %25 : vector<128x1xf32> to vector<128x8xf32>
    %37 = arith.mulf %36, %35 : vector<128x8xf32>
    %38 = arith.truncf %28 : vector<128x128xf32> to vector<128x128xbf16>
    %39 = arith.truncf %8 : vector<128x8xf32> to vector<128x8xbf16>
    %cst_19 = arith.constant dense<0.000000e+00> : vector<128x8xf32>
    %40 = tpu.matmul %38, %39, %cst_19 {dimension_numbers = #tpu.dot_dimension_numbers<[1], [0], [0], [1], [0, 0, 1, 1], [], []>} : vector<128x128xbf16>, vector<128x8xbf16>, vector<128x8xf32> -> vector<128x8xf32>
    %41 = arith.addf %37, %40 : vector<128x8xf32>
    %c0_20 = arith.constant 0 : index
    %c0_21 = arith.constant 0 : index
    %42 = vector.load %arg8[%c0_20, %c0_21] : memref<128x32xf32, #tpu.memory_space<vmem>>, vector<128x8xf32>
    tpu.vector_store %arg8[%c0_20, %c0_21], %41 {strides = array<i32>} : memref<128x32xf32, #tpu.memory_space<vmem>>, vector<128x8xf32>,
    %c0_22 = arith.constant 0 : index
    %c0_23 = arith.constant 0 : index
    %43 = vector.load %arg9[%c0_22, %c0_23] : memref<128x4xf32, #tpu.memory_space<vmem>>, vector<128x1xf32>
    tpu.vector_store %arg9[%c0_22, %c0_23], %23 {strides = array<i32>} : memref<128x4xf32, #tpu.memory_space<vmem>>, vector<128x1xf32>,
    %44 = vector.extract_strided_slice %6 {offsets = [0, 8], sizes = [128, 8], strides = [1, 1]} : vector<128x64xf32> to vector<128x8xf32>
    %45 = vector.extract_strided_slice %6 {offsets = [0, 40], sizes = [128, 8], strides = [1, 1]} : vector<128x64xf32> to vector<128x8xf32>
    %46 = arith.mulf %44, %44 : vector<128x8xf32>
    %cst_24 = arith.constant dense<0.000000e+00> : vector<128xf32>
    %47 = vector.multi_reduction <add>, %46, %cst_24 [1] : vector<128x8xf32> to vector<128xf32>
    %48 = vector.shape_cast %47 : vector<128xf32> to vector<128x1xf32>
    %cst_25 = arith.constant 1.000000e-24 : f32
    %49 = vector.broadcast %cst_25 : f32 to vector<128x1xf32>
    %50 = arith.maximumf %48, %49 : vector<128x1xf32>
    %51 = math.rsqrt %50 : vector<128x1xf32>
    %52 = vector.broadcast %51 : vector<128x1xf32> to vector<128x8xf32>
    %53 = arith.mulf %44, %52 : vector<128x8xf32>
    %54 = arith.truncf %53 : vector<128x8xf32> to vector<128x8xbf16>
    %c0_26 = arith.constant 0 : index
    %c8 = arith.constant 8 : index
    %55 = vector.load %arg7[%c0_26, %c8] : memref<128x32xbf16, #tpu.memory_space<vmem>>, vector<128x8xbf16>
    %cst_27 = arith.constant dense<0.000000e+00> : vector<128x128xf32>
    %56 = tpu.matmul %55, %54, %cst_27 {dimension_numbers = #tpu.dot_dimension_numbers<[1], [1], [0], [0], [0, 0, 1, 0], [], []>} : vector<128x8xbf16>, vector<128x8xbf16>, vector<128x128xf32> -> vector<128x128xf32>
    %c0_28 = arith.constant 0 : index
    %c1 = arith.constant 1 : index
    %57 = vector.load %arg9[%c0_28, %c1] : memref<128x4xf32, #tpu.memory_space<vmem>>, vector<128x1xf32>
    %cst_29 = arith.constant dense<0xFF800000> : vector<128xf32>
    %58 = vector.multi_reduction <maximumf>, %56, %cst_29 [1] : vector<128x128xf32> to vector<128xf32>
    %59 = vector.shape_cast %58 : vector<128xf32> to vector<128x1xf32>
    %60 = arith.maximumf %57, %59 : vector<128x1xf32>
    %61 = arith.subf %57, %60 : vector<128x1xf32>
    %62 = math.exp %61 : vector<128x1xf32>
    %63 = vector.broadcast %60 : vector<128x1xf32> to vector<128x128xf32>
    %64 = arith.subf %56, %63 : vector<128x128xf32>
    %65 = math.exp %64 : vector<128x128xf32>
    %c0_30 = arith.constant 0 : index
    %c1_31 = arith.constant 1 : index
    %66 = vector.load %arg10[%c0_30, %c1_31] : memref<128x4xf32, #tpu.memory_space<vmem>>, vector<128x1xf32>
    %67 = arith.mulf %62, %66 : vector<128x1xf32>
    %cst_32 = arith.constant dense<0.000000e+00> : vector<128xf32>
    %68 = vector.multi_reduction <add>, %65, %cst_32 [1] : vector<128x128xf32> to vector<128xf32>
    %69 = vector.shape_cast %68 : vector<128xf32> to vector<128x1xf32>
    %70 = arith.addf %67, %69 : vector<128x1xf32>
    %c0_33 = arith.constant 0 : index
    %c1_34 = arith.constant 1 : index
    %71 = vector.load %arg10[%c0_33, %c1_34] : memref<128x4xf32, #tpu.memory_space<vmem>>, vector<128x1xf32>
    tpu.vector_store %arg10[%c0_33, %c1_34], %70 {strides = array<i32>} : memref<128x4xf32, #tpu.memory_space<vmem>>, vector<128x1xf32>,
    %c0_35 = arith.constant 0 : index
    %c8_36 = arith.constant 8 : index
    %72 = vector.load %arg8[%c0_35, %c8_36] : memref<128x32xf32, #tpu.memory_space<vmem>>, vector<128x8xf32>
    %73 = vector.broadcast %62 : vector<128x1xf32> to vector<128x8xf32>
    %74 = arith.mulf %73, %72 : vector<128x8xf32>
    %75 = arith.truncf %65 : vector<128x128xf32> to vector<128x128xbf16>
    %76 = arith.truncf %45 : vector<128x8xf32> to vector<128x8xbf16>
    %cst_37 = arith.constant dense<0.000000e+00> : vector<128x8xf32>
    %77 = tpu.matmul %75, %76, %cst_37 {dimension_numbers = #tpu.dot_dimension_numbers<[1], [0], [0], [1], [0, 0, 1, 1], [], []>} : vector<128x128xbf16>, vector<128x8xbf16>, vector<128x8xf32> -> vector<128x8xf32>
    %78 = arith.addf %74, %77 : vector<128x8xf32>
    %c0_38 = arith.constant 0 : index
    %c8_39 = arith.constant 8 : index
    %79 = vector.load %arg8[%c0_38, %c8_39] : memref<128x32xf32, #tpu.memory_space<vmem>>, vector<128x8xf32>
    tpu.vector_store %arg8[%c0_38, %c8_39], %78 {strides = array<i32>} : memref<128x32xf32, #tpu.memory_space<vmem>>, vector<128x8xf32>,
    %c0_40 = arith.constant 0 : index
    %c1_41 = arith.constant 1 : index
    %80 = vector.load %arg9[%c0_40, %c1_41] : memref<128x4xf32, #tpu.memory_space<vmem>>, vector<128x1xf32>
    tpu.vector_store %arg9[%c0_40, %c1_41], %60 {strides = array<i32>} : memref<128x4xf32, #tpu.memory_space<vmem>>, vector<128x1xf32>,
    %81 = vector.extract_strided_slice %6 {offsets = [0, 16], sizes = [128, 8], strides = [1, 1]} : vector<128x64xf32> to vector<128x8xf32>
    %82 = vector.extract_strided_slice %6 {offsets = [0, 48], sizes = [128, 8], strides = [1, 1]} : vector<128x64xf32> to vector<128x8xf32>
    %83 = arith.mulf %81, %81 : vector<128x8xf32>
    %cst_42 = arith.constant dense<0.000000e+00> : vector<128xf32>
    %84 = vector.multi_reduction <add>, %83, %cst_42 [1] : vector<128x8xf32> to vector<128xf32>
    %85 = vector.shape_cast %84 : vector<128xf32> to vector<128x1xf32>
    %cst_43 = arith.constant 1.000000e-24 : f32
    %86 = vector.broadcast %cst_43 : f32 to vector<128x1xf32>
    %87 = arith.maximumf %85, %86 : vector<128x1xf32>
    %88 = math.rsqrt %87 : vector<128x1xf32>
    %89 = vector.broadcast %88 : vector<128x1xf32> to vector<128x8xf32>
    %90 = arith.mulf %81, %89 : vector<128x8xf32>
    %91 = arith.truncf %90 : vector<128x8xf32> to vector<128x8xbf16>
    %c0_44 = arith.constant 0 : index
    %c16 = arith.constant 16 : index
    %92 = vector.load %arg7[%c0_44, %c16] : memref<128x32xbf16, #tpu.memory_space<vmem>>, vector<128x8xbf16>
    %cst_45 = arith.constant dense<0.000000e+00> : vector<128x128xf32>
    %93 = tpu.matmul %92, %91, %cst_45 {dimension_numbers = #tpu.dot_dimension_numbers<[1], [1], [0], [0], [0, 0, 1, 0], [], []>} : vector<128x8xbf16>, vector<128x8xbf16>, vector<128x128xf32> -> vector<128x128xf32>
    %c0_46 = arith.constant 0 : index
    %c2 = arith.constant 2 : index
    %94 = vector.load %arg9[%c0_46, %c2] : memref<128x4xf32, #tpu.memory_space<vmem>>, vector<128x1xf32>
    %cst_47 = arith.constant dense<0xFF800000> : vector<128xf32>
    %95 = vector.multi_reduction <maximumf>, %93, %cst_47 [1] : vector<128x128xf32> to vector<128xf32>
    %96 = vector.shape_cast %95 : vector<128xf32> to vector<128x1xf32>
    %97 = arith.maximumf %94, %96 : vector<128x1xf32>
    %98 = arith.subf %94, %97 : vector<128x1xf32>
    %99 = math.exp %98 : vector<128x1xf32>
    %100 = vector.broadcast %97 : vector<128x1xf32> to vector<128x128xf32>
    %101 = arith.subf %93, %100 : vector<128x128xf32>
    %102 = math.exp %101 : vector<128x128xf32>
    %c0_48 = arith.constant 0 : index
    %c2_49 = arith.constant 2 : index
    %103 = vector.load %arg10[%c0_48, %c2_49] : memref<128x4xf32, #tpu.memory_space<vmem>>, vector<128x1xf32>
    %104 = arith.mulf %99, %103 : vector<128x1xf32>
    %cst_50 = arith.constant dense<0.000000e+00> : vector<128xf32>
    %105 = vector.multi_reduction <add>, %102, %cst_50 [1] : vector<128x128xf32> to vector<128xf32>
    %106 = vector.shape_cast %105 : vector<128xf32> to vector<128x1xf32>
    %107 = arith.addf %104, %106 : vector<128x1xf32>
    %c0_51 = arith.constant 0 : index
    %c2_52 = arith.constant 2 : index
    %108 = vector.load %arg10[%c0_51, %c2_52] : memref<128x4xf32, #tpu.memory_space<vmem>>, vector<128x1xf32>
    tpu.vector_store %arg10[%c0_51, %c2_52], %107 {strides = array<i32>} : memref<128x4xf32, #tpu.memory_space<vmem>>, vector<128x1xf32>,
    %c0_53 = arith.constant 0 : index
    %c16_54 = arith.constant 16 : index
    %109 = vector.load %arg8[%c0_53, %c16_54] : memref<128x32xf32, #tpu.memory_space<vmem>>, vector<128x8xf32>
    %110 = vector.broadcast %99 : vector<128x1xf32> to vector<128x8xf32>
    %111 = arith.mulf %110, %109 : vector<128x8xf32>
    %112 = arith.truncf %102 : vector<128x128xf32> to vector<128x128xbf16>
    %113 = arith.truncf %82 : vector<128x8xf32> to vector<128x8xbf16>
    %cst_55 = arith.constant dense<0.000000e+00> : vector<128x8xf32>
    %114 = tpu.matmul %112, %113, %cst_55 {dimension_numbers = #tpu.dot_dimension_numbers<[1], [0], [0], [1], [0, 0, 1, 1], [], []>} : vector<128x128xbf16>, vector<128x8xbf16>, vector<128x8xf32> -> vector<128x8xf32>
    %115 = arith.addf %111, %114 : vector<128x8xf32>
    %c0_56 = arith.constant 0 : index
    %c16_57 = arith.constant 16 : index
    %116 = vector.load %arg8[%c0_56, %c16_57] : memref<128x32xf32, #tpu.memory_space<vmem>>, vector<128x8xf32>
    tpu.vector_store %arg8[%c0_56, %c16_57], %115 {strides = array<i32>} : memref<128x32xf32, #tpu.memory_space<vmem>>, vector<128x8xf32>,
    %c0_58 = arith.constant 0 : index
    %c2_59 = arith.constant 2 : index
    %117 = vector.load %arg9[%c0_58, %c2_59] : memref<128x4xf32, #tpu.memory_space<vmem>>, vector<128x1xf32>
    tpu.vector_store %arg9[%c0_58, %c2_59], %97 {strides = array<i32>} : memref<128x4xf32, #tpu.memory_space<vmem>>, vector<128x1xf32>,
    %118 = vector.extract_strided_slice %6 {offsets = [0, 24], sizes = [128, 8], strides = [1, 1]} : vector<128x64xf32> to vector<128x8xf32>
    %119 = vector.extract_strided_slice %6 {offsets = [0, 56], sizes = [128, 8], strides = [1, 1]} : vector<128x64xf32> to vector<128x8xf32>
    %120 = arith.mulf %118, %118 : vector<128x8xf32>
    %cst_60 = arith.constant dense<0.000000e+00> : vector<128xf32>
    %121 = vector.multi_reduction <add>, %120, %cst_60 [1] : vector<128x8xf32> to vector<128xf32>
    %122 = vector.shape_cast %121 : vector<128xf32> to vector<128x1xf32>
    %cst_61 = arith.constant 1.000000e-24 : f32
    %123 = vector.broadcast %cst_61 : f32 to vector<128x1xf32>
    %124 = arith.maximumf %122, %123 : vector<128x1xf32>
    %125 = math.rsqrt %124 : vector<128x1xf32>
    %126 = vector.broadcast %125 : vector<128x1xf32> to vector<128x8xf32>
    %127 = arith.mulf %118, %126 : vector<128x8xf32>
    %128 = arith.truncf %127 : vector<128x8xf32> to vector<128x8xbf16>
    %c0_62 = arith.constant 0 : index
    %c24 = arith.constant 24 : index
    %129 = vector.load %arg7[%c0_62, %c24] : memref<128x32xbf16, #tpu.memory_space<vmem>>, vector<128x8xbf16>
    %cst_63 = arith.constant dense<0.000000e+00> : vector<128x128xf32>
    %130 = tpu.matmul %129, %128, %cst_63 {dimension_numbers = #tpu.dot_dimension_numbers<[1], [1], [0], [0], [0, 0, 1, 0], [], []>} : vector<128x8xbf16>, vector<128x8xbf16>, vector<128x128xf32> -> vector<128x128xf32>
    %c0_64 = arith.constant 0 : index
    %c3 = arith.constant 3 : index
    %131 = vector.load %arg9[%c0_64, %c3] : memref<128x4xf32, #tpu.memory_space<vmem>>, vector<128x1xf32>
    %cst_65 = arith.constant dense<0xFF800000> : vector<128xf32>
    %132 = vector.multi_reduction <maximumf>, %130, %cst_65 [1] : vector<128x128xf32> to vector<128xf32>
    %133 = vector.shape_cast %132 : vector<128xf32> to vector<128x1xf32>
    %134 = arith.maximumf %131, %133 : vector<128x1xf32>
    %135 = arith.subf %131, %134 : vector<128x1xf32>
    %136 = math.exp %135 : vector<128x1xf32>
    %137 = vector.broadcast %134 : vector<128x1xf32> to vector<128x128xf32>
    %138 = arith.subf %130, %137 : vector<128x128xf32>
    %139 = math.exp %138 : vector<128x128xf32>
    %c0_66 = arith.constant 0 : index
    %c3_67 = arith.constant 3 : index
    %140 = vector.load %arg10[%c0_66, %c3_67] : memref<128x4xf32, #tpu.memory_space<vmem>>, vector<128x1xf32>
    %141 = arith.mulf %136, %140 : vector<128x1xf32>
    %cst_68 = arith.constant dense<0.000000e+00> : vector<128xf32>
    %142 = vector.multi_reduction <add>, %139, %cst_68 [1] : vector<128x128xf32> to vector<128xf32>
    %143 = vector.shape_cast %142 : vector<128xf32> to vector<128x1xf32>
    %144 = arith.addf %141, %143 : vector<128x1xf32>
    %c0_69 = arith.constant 0 : index
    %c3_70 = arith.constant 3 : index
    %145 = vector.load %arg10[%c0_69, %c3_70] : memref<128x4xf32, #tpu.memory_space<vmem>>, vector<128x1xf32>
    tpu.vector_store %arg10[%c0_69, %c3_70], %144 {strides = array<i32>} : memref<128x4xf32, #tpu.memory_space<vmem>>, vector<128x1xf32>,
    %c0_71 = arith.constant 0 : index
    %c24_72 = arith.constant 24 : index
    %146 = vector.load %arg8[%c0_71, %c24_72] : memref<128x32xf32, #tpu.memory_space<vmem>>, vector<128x8xf32>
    %147 = vector.broadcast %136 : vector<128x1xf32> to vector<128x8xf32>
    %148 = arith.mulf %147, %146 : vector<128x8xf32>
    %149 = arith.truncf %139 : vector<128x128xf32> to vector<128x128xbf16>
    %150 = arith.truncf %119 : vector<128x8xf32> to vector<128x8xbf16>
    %cst_73 = arith.constant dense<0.000000e+00> : vector<128x8xf32>
    %151 = tpu.matmul %149, %150, %cst_73 {dimension_numbers = #tpu.dot_dimension_numbers<[1], [0], [0], [1], [0, 0, 1, 1], [], []>} : vector<128x128xbf16>, vector<128x8xbf16>, vector<128x8xf32> -> vector<128x8xf32>
    %152 = arith.addf %148, %151 : vector<128x8xf32>
    %c0_74 = arith.constant 0 : index
    %c24_75 = arith.constant 24 : index
    %153 = vector.load %arg8[%c0_74, %c24_75] : memref<128x32xf32, #tpu.memory_space<vmem>>, vector<128x8xf32>
    tpu.vector_store %arg8[%c0_74, %c24_75], %152 {strides = array<i32>} : memref<128x32xf32, #tpu.memory_space<vmem>>, vector<128x8xf32>,
    %c0_76 = arith.constant 0 : index
    %c3_77 = arith.constant 3 : index
    %154 = vector.load %arg9[%c0_76, %c3_77] : memref<128x4xf32, #tpu.memory_space<vmem>>, vector<128x1xf32>
    tpu.vector_store %arg9[%c0_76, %c3_77], %134 {strides = array<i32>} : memref<128x4xf32, #tpu.memory_space<vmem>>, vector<128x1xf32>,
    %c1_i32 = arith.constant 1 : i32
    %155 = arith.cmpi eq, %arg2, %c1_i32 : i32
    %156 = arith.extui %155 : i1 to i32
    %c0_i32_78 = arith.constant 0 : i32
    %157 = arith.cmpi ne, %156, %c0_i32_78 : i32
    scf.if %157 {
      %c0_79 = arith.constant 0 : index
      %c0_80 = arith.constant 0 : index
      %c0_81 = arith.constant 0 : index
      %158 = vector.load %arg3[%c0_79, %c0_80, %c0_81] : memref<1x128x32xf32, #tpu.memory_space<vmem>>, vector<1x128x32xf32>
      %159 = vector.shape_cast %158 : vector<1x128x32xf32> to vector<128x32xf32>
      %c0_82 = arith.constant 0 : index
      %c0_83 = arith.constant 0 : index
      %160 = vector.load %arg10[%c0_82, %c0_83] : memref<128x4xf32, #tpu.memory_space<vmem>>, vector<128x1xf32>
      %161 = tpu.reciprocal %160 {approx = true} : vector<128x1xf32> -> vector<128x1xf32>
      %c0_84 = arith.constant 0 : index
      %c0_85 = arith.constant 0 : index
      %162 = vector.load %arg8[%c0_84, %c0_85] : memref<128x32xf32, #tpu.memory_space<vmem>>, vector<128x8xf32>
      %163 = vector.broadcast %161 : vector<128x1xf32> to vector<128x8xf32>
      %164 = arith.mulf %162, %163 : vector<128x8xf32>
      %165 = vector.extract_strided_slice %159 {offsets = [0, 0], sizes = [128, 8], strides = [1, 1]} : vector<128x32xf32> to vector<128x8xf32>
      %166 = arith.addf %164, %165 : vector<128x8xf32>
      %c0_86 = arith.constant 0 : index
      %c0_87 = arith.constant 0 : index
      %c0_88 = arith.constant 0 : index
      %167 = vector.load %arg6[%c0_86, %c0_87, %c0_88] : memref<1x128x32xf32, #tpu.memory_space<vmem>>, vector<1x128x8xf32>
      %168 = vector.shape_cast %167 : vector<1x128x8xf32> to vector<128x8xf32>
      %169 = vector.shape_cast %166 : vector<128x8xf32> to vector<1x128x8xf32>
      tpu.vector_store %arg6[%c0_86, %c0_87, %c0_88], %169 {strides = array<i32>} : memref<1x128x32xf32, #tpu.memory_space<vmem>>, vector<1x128x8xf32>,
      %c0_89 = arith.constant 0 : index
      %c1_90 = arith.constant 1 : index
      %170 = vector.load %arg10[%c0_89, %c1_90] : memref<128x4xf32, #tpu.memory_space<vmem>>, vector<128x1xf32>
      %171 = tpu.reciprocal %170 {approx = true} : vector<128x1xf32> -> vector<128x1xf32>
      %c0_91 = arith.constant 0 : index
      %c8_92 = arith.constant 8 : index
      %172 = vector.load %arg8[%c0_91, %c8_92] : memref<128x32xf32, #tpu.memory_space<vmem>>, vector<128x8xf32>
      %173 = vector.broadcast %171 : vector<128x1xf32> to vector<128x8xf32>
      %174 = arith.mulf %172, %173 : vector<128x8xf32>
      %175 = vector.extract_strided_slice %159 {offsets = [0, 8], sizes = [128, 8], strides = [1, 1]} : vector<128x32xf32> to vector<128x8xf32>
      %176 = arith.addf %174, %175 : vector<128x8xf32>
      %c0_93 = arith.constant 0 : index
      %c0_94 = arith.constant 0 : index
      %c8_95 = arith.constant 8 : index
      %177 = vector.load %arg6[%c0_93, %c0_94, %c8_95] : memref<1x128x32xf32, #tpu.memory_space<vmem>>, vector<1x128x8xf32>
      %178 = vector.shape_cast %177 : vector<1x128x8xf32> to vector<128x8xf32>
      %179 = vector.shape_cast %176 : vector<128x8xf32> to vector<1x128x8xf32>
      tpu.vector_store %arg6[%c0_93, %c0_94, %c8_95], %179 {strides = array<i32>} : memref<1x128x32xf32, #tpu.memory_space<vmem>>, vector<1x128x8xf32>,
      %c0_96 = arith.constant 0 : index
      %c2_97 = arith.constant 2 : index
      %180 = vector.load %arg10[%c0_96, %c2_97] : memref<128x4xf32, #tpu.memory_space<vmem>>, vector<128x1xf32>
      %181 = tpu.reciprocal %180 {approx = true} : vector<128x1xf32> -> vector<128x1xf32>
      %c0_98 = arith.constant 0 : index
      %c16_99 = arith.constant 16 : index
      %182 = vector.load %arg8[%c0_98, %c16_99] : memref<128x32xf32, #tpu.memory_space<vmem>>, vector<128x8xf32>
      %183 = vector.broadcast %181 : vector<128x1xf32> to vector<128x8xf32>
      %184 = arith.mulf %182, %183 : vector<128x8xf32>
      %185 = vector.extract_strided_slice %159 {offsets = [0, 16], sizes = [128, 8], strides = [1, 1]} : vector<128x32xf32> to vector<128x8xf32>
      %186 = arith.addf %184, %185 : vector<128x8xf32>
      %c0_100 = arith.constant 0 : index
      %c0_101 = arith.constant 0 : index
      %c16_102 = arith.constant 16 : index
      %187 = vector.load %arg6[%c0_100, %c0_101, %c16_102] : memref<1x128x32xf32, #tpu.memory_space<vmem>>, vector<1x128x8xf32>
      %188 = vector.shape_cast %187 : vector<1x128x8xf32> to vector<128x8xf32>
      %189 = vector.shape_cast %186 : vector<128x8xf32> to vector<1x128x8xf32>
      tpu.vector_store %arg6[%c0_100, %c0_101, %c16_102], %189 {strides = array<i32>} : memref<1x128x32xf32, #tpu.memory_space<vmem>>, vector<1x128x8xf32>,
      %c0_103 = arith.constant 0 : index
      %c3_104 = arith.constant 3 : index
      %190 = vector.load %arg10[%c0_103, %c3_104] : memref<128x4xf32, #tpu.memory_space<vmem>>, vector<128x1xf32>
      %191 = tpu.reciprocal %190 {approx = true} : vector<128x1xf32> -> vector<128x1xf32>
      %c0_105 = arith.constant 0 : index
      %c24_106 = arith.constant 24 : index
      %192 = vector.load %arg8[%c0_105, %c24_106] : memref<128x32xf32, #tpu.memory_space<vmem>>, vector<128x8xf32>
      %193 = vector.broadcast %191 : vector<128x1xf32> to vector<128x8xf32>
      %194 = arith.mulf %192, %193 : vector<128x8xf32>
      %195 = vector.extract_strided_slice %159 {offsets = [0, 24], sizes = [128, 8], strides = [1, 1]} : vector<128x32xf32> to vector<128x8xf32>
      %196 = arith.addf %194, %195 : vector<128x8xf32>
      %c0_107 = arith.constant 0 : index
      %c0_108 = arith.constant 0 : index
      %c24_109 = arith.constant 24 : index
      %197 = vector.load %arg6[%c0_107, %c0_108, %c24_109] : memref<1x128x32xf32, #tpu.memory_space<vmem>>, vector<1x128x8xf32>
      %198 = vector.shape_cast %197 : vector<1x128x8xf32> to vector<128x8xf32>
      %199 = vector.shape_cast %196 : vector<128x8xf32> to vector<1x128x8xf32>
      tpu.vector_store %arg6[%c0_107, %c0_108, %c24_109], %199 {strides = array<i32>} : memref<1x128x32xf32, #tpu.memory_space<vmem>>, vector<1x128x8xf32>,
    } else {
    }
    return
  }
  func.func @transform_0(%arg0: i32, %arg1: i32, %arg2: i32) -> (i32, i32, i32) {
    %c0_i32 = arith.constant 0 : i32
    %c0_i32_0 = arith.constant 0 : i32
    return %arg0, %arg1, %c0_i32 : i32, i32, i32
  }
  func.func @transform_1(%arg0: i32, %arg1: i32, %arg2: i32) -> (i32, i32, i32) {
    %c0_i32 = arith.constant 0 : i32
    %c0_i32_0 = arith.constant 0 : i32
    return %arg0, %arg2, %c0_i32 : i32, i32, i32
  }
  func.func @transform_2(%arg0: i32, %arg1: i32, %arg2: i32) -> (i32, i32) {
    %c0_i32 = arith.constant 0 : i32
    %c0_i32_0 = arith.constant 0 : i32
    %c0_i32_1 = arith.constant 0 : i32
    return %c0_i32, %c0_i32_0 : i32, i32
  }
  func.func @transform_3(%arg0: i32, %arg1: i32, %arg2: i32) -> (i32, i32, i32) {
    %c0_i32 = arith.constant 0 : i32
    %c0_i32_0 = arith.constant 0 : i32
    return %arg0, %arg1, %c0_i32 : i32, i32, i32
  }
}

</mosaic_0001>

<bundles_post_ra>
// kernel: tpu_custom_call.1
= control target key start
LH: loop header
LB: loop body
LE: loop exit
PB: predicated region body
PF: predicated region fallthrough
CT: control target
= control target key end

     0   :  { %s8302_s12 = smov 0   ;;  %s8304_s13 = smov 0   ;;  %s11990_s0 = inlined_call_operand.vmem [shape: f32[2,256,32], index: 0, kind: input, shape index: {}]   ;;  %s11991_s1 = inlined_call_operand.vmem [shape: f32[2,256,32], index: 1, kind: input, shape index: {}]   ;;  %s11992_s2 = inlined_call_operand.vmem [shape: f32[96,32], index: 2, kind: input, shape index: {}]   ;;  %s11993_s3 = inlined_call_operand.vmem [shape: f32[2,256,32], index: 3, kind: output, shape index: {}]  }
   0x1   :  { %s8306_s14 = smov 0   ;;  %s8308_s15 = smov 0  }
   0x2   :  { %s8310_s16 = smov 0   ;;  %s8312_s17 = smov 0  }
   0x3   :  { %s8314_s18 = smov 0  }
   0x4 LB: > { %s25_s19 = sadd.s32 1, %s8245_s15  ;;  %s28_s20 = sadd.s32 1, %s8249_s16  ;;  %s8257_s18 = sphi %s8314_s18, %s13_s18   ;;  %s8253_s17 = sphi %s8312_s17, %s12635_s17   ;;  %s8249_s16 = sphi %s8310_s16, %s12634_s16   ;;  %s8245_s15 = sphi %s8308_s15, %s12633_s15   ;;  %s8241_s14 = sphi %s8306_s14, %s12632_s14   ;;  %s8237_s13 = sphi %s8304_s13, %s12631_s13   ;;  %s8233_s12 = sphi %s8302_s12, %s12630_s12  }
   0x5   : > { %p26_p0 = scmp.ge.s32.totalorder %s25_s19, 2  ;;  %p6734_p1 = scmp.ge.s32.totalorder %s8257_s18, 1 }
   0x6   : > { %p182_p2 = scmp.lt.s32.totalorder %s8257_s18, 9  ;;  %s32_s21 = sadd.s32 1, %s8253_s17 }
   0x7   : > { %s12637_s19 = smov (%p26_p0, %s25_s19), 0  ;;  %s12639_s20 = smov (!%p26_p0, %s28_s20), %s8249_s16 }
   0x8   : > { %p183_p3 = pnand %p6734_p1, %p182_p2  ;;  %p30_p4 = scmp.ge.s32.totalorder %s12639_s20, 2 }
   0xa   : > { %s12641_s20 = smov (%p30_p4, %s12639_s20), 0  ;;  %s12643_s21 = smov (!%p30_p4, %s32_s21), %s8253_s17 }
   0xb   : > { %p34_p5 = scmp.ge.s32.totalorder %s12643_s21, 2  ;;  %186 = sbr.rel (%p183_p3) target bundleno = 4235 (0x108b), region = 32 }
   0xd   : > { %s12645_s21 = smov (%p34_p5, %s12643_s21), 0 }
  0x10   : > { %s6735_s22 = sshll.u32 %s8237_s13, 4  ;;  %p224_p6 = scmp.lt.s32.totalorder %s8241_s14, 1 }
  0x11   : > { %p226_p7 = scmp.lt.s32.totalorder %s6735_s22, 31  ;;  %s6738_s23 = sshll.u32 %s8233_s12, 4 }
  0x12   : > { %s12647_s14 = smov (!%p224_p6, %s8241_s14), 1  ;;  %p236_p8 = scmp.lt.s32.totalorder %s6738_s23, 31 }
  0x13   : > { %s12649_s22 = smov (!%p226_p7, %s6735_s22), 31  ;;  %s6736_s24 = sshll.u32 %s12647_s14, 5 }
  0x14   : > { %s229_s25 = sadd.s32 %s6736_s24, %s12649_s22  ;;  %s12651_s23 = smov (!%p236_p8, %s6738_s23), 31 }
  0x15   : > { %s6737_s26 = sshll.u32 %s229_s25, 3  ;;  %s239_s6 = sadd.s32 %s6736_s24, %s12651_s23 }
  0x16   : > { %s8350_s29 = scalar_lea.vmem %s11990_s0, %s6737_s26  ;;  %s8355_s5 = scalar_lea.vmem %s11993_s3, %s6737_s26 }
  0x17   : > { %s6740_s7 = sshll.u32 %s239_s6, 3  ;;  %p6744_p9 = scmp.ne.s32.totalorder %s8233_s12, 0 }
  0x18   : > { %s8360_s10 = scalar_lea.vmem %s11991_s1, %s6740_s7  ;;  %s8259_s27 = smov (!%p6744_p9), 120  }
  0x19   : > { %257 = sbr.rel (%p6744_p9) target bundleno = 833 (0x341), region = 36  ;;  %s8260_s28 = smov (!%p6744_p9), 112  }
  0x1a   : > { %s8261_s30 = smov (!%p6744_p9), 104  }
  0x1e   : > { %v277_v0 = vld [vmem:[%s11992_s2 + $0x18] sm:$0xff]  ;;  %vm278_vm0 = vcmask 261120   ;;  %v276_v1 = vld [vmem:[%s11992_s2 + $0x10] sm:$0xff]  ;;  %v258_v2 = vld [vmem:[%s8350_s29] sm:$0xff]  ;;  %vm500_vm1 = vcmask 64512   ;;  %vm661_vm2 = vcmask 60416  }
  0x1f   : > { %7156 = vmatprep.subr.msk.mxu0 %vm278_vm0, %v277_v0  ;;  %7484 = vmatprep.subr.msk.mxu1 %vm278_vm0, %v277_v0  ;;  %v266_v3 = vld [vmem:[%s8350_s29 + $0x40] sm:$0xff]  ;;  %v275_v4 = vld [vmem:[%s11992_s2 + $0x8] sm:$0xff]  ;;  %v260_v8 = vld [vmem:[%s8350_s29 + $0x10] sm:$0xff]  ;;  %vm902_vm3 = vcmask 126016   ;;  %vm1369_vm4 = vcmask 31744   ;;  %vm1127_vm5 = vcmask 191616  }
  0x20   : > { %7157 = vmatpush3.xpose.msk.msra.mxu0 %vm278_vm0, %v277_v0  ;;  %7488 = vmatpush3.xpose.msk.msra.mxu1 %vm278_vm0, %v277_v0  ;;  %v274_v5 = vld [vmem:[%s11992_s2] sm:$0xff]  ;;  %v259_v6 = vld [vmem:[%s8350_s29 + $0x8] sm:$0xff]  ;;  %v268_v9 = vld [vmem:[%s8350_s29 + $0x50] sm:$0xff]  ;;  %vm1352_vm6 = vcmask 257216  }
  0x21   : > { %7158 = vmatprep.subr.msk.mxu0 %vm278_vm0, %v276_v1  ;;  %7485 = vmatprep.subr.msk.mxu1 %vm278_vm0, %v276_v1  ;;  %v267_v7 = vld [vmem:[%s8350_s29 + $0x48] sm:$0xff]  ;;  %v261_v10 = vld [vmem:[%s8350_s29 + $0x18] sm:$0xff]  ;;  %v262_v12 = vld [vmem:[%s8350_s29 + $0x20] sm:$0xff] }
  0x22   : > { %7164 = vmatprep.mubr.msk.f32.mxu0 %vm278_vm0, %v258_v2  ;;  %7176 = vmatprep.mubr.msk.f32.mxu1 %vm278_vm0, %v266_v3  ;;  %v269_v11 = vld [vmem:[%s8350_s29 + $0x58] sm:$0xff]  ;;  %v270_v13 = vld [vmem:[%s8350_s29 + $0x60] sm:$0xff]  ;;  %v263_v14 = vld [vmem:[%s8350_s29 + $0x28] sm:$0xff] }
  0x23   : > { %v271_v15 = vld [vmem:[%s8350_s29 + $0x68] sm:$0xff]  ;;  %v264_v16 = vld [vmem:[%s8350_s29 + $0x30] sm:$0xff]  ;;  %v265_v17 = vld [vmem:[%s8350_s29 + $0x38] sm:$0xff] }
  0x24   : > { %7159 = vmatpush3.xpose.msk.msra.mxu0 %vm278_vm0, %v276_v1  ;;  %7489 = vmatpush3.xpose.msk.msra.mxu1 %vm278_vm0, %v276_v1  ;;  %v272_v18 = vld [vmem:[%s8350_s29 + $0x70] sm:$0xff]  ;;  %v273_v19 = vld [vmem:[%s8350_s29 + $0x78] sm:$0xff] }
  0x25   : > { %7160 = vmatprep.subr.msk.mxu0 %vm278_vm0, %v275_v4  ;;  %7486 = vmatprep.subr.msk.mxu1 %vm278_vm0, %v275_v4 }
  0x28   : > { %7161 = vmatpush3.xpose.msk.msra.mxu0 %vm278_vm0, %v275_v4  ;;  %7490 = vmatpush3.xpose.msk.msra.mxu1 %vm278_vm0, %v275_v4 }
  0x29   : > { %7162 = vmatprep.subr.msk.mxu0 %vm278_vm0, %v274_v5  ;;  %7487 = vmatprep.subr.msk.mxu1 %vm278_vm0, %v274_v5 }
  0x2c   : > { %7163 = vmatpush3.xpose.msk.msra.mxu0 %vm278_vm0, %v274_v5  ;;  %7491 = vmatpush3.xpose.msk.msra.mxu1 %vm278_vm0, %v274_v5 }
  0x2f   : > { %7165 = vmatmul.mubr.msk.f32.vlgmr.msra.gmra.mxu0 %vm278_vm0, %v259_v6  ;;  %7177 = vmatmul.mubr.msk.f32.vlgmr.msra.gmra.mxu1 %vm278_vm0, %v267_v7 }
  0x30   : > { %7167 = vmatprep.mubr.msk.f32.mxu0 %vm278_vm0, %v260_v8  ;;  %7179 = vmatprep.mubr.msk.f32.mxu1 %vm278_vm0, %v268_v9 }
  0x33   : > { %7168 = vmatmul.mubr.msk.f32.gmra.mxu0 %vm278_vm0, %v261_v10  ;;  %7180 = vmatmul.mubr.msk.f32.gmra.mxu1 %vm278_vm0, %v269_v11 }
  0x34   : > { %7170 = vmatprep.mubr.msk.f32.mxu0 %vm278_vm0, %v262_v12  ;;  %7182 = vmatprep.mubr.msk.f32.mxu1 %vm278_vm0, %v270_v13 }
  0x37   : > { %7171 = vmatmul.mubr.msk.f32.gmra.mxu0 %vm278_vm0, %v263_v14  ;;  %7183 = vmatmul.mubr.msk.f32.gmra.mxu1 %vm278_vm0, %v271_v15 }
  0x38   : > { %7173 = vmatprep.mubr.msk.f32.mxu0 %vm278_vm0, %v264_v16  ;;  %7185 = vmatprep.mubr.msk.f32.mxu1 %vm278_vm0, %v272_v18 }
  0x3b   : > { %7174 = vmatmul.mubr.msk.f32.gmra.mxu0 %vm278_vm0, %v265_v17  ;;  %7186 = vmatmul.mubr.msk.f32.gmra.mxu1 %vm278_vm0, %v273_v19 }
  0xef   : > { %v8423_v20 = vpop.f32.mrf.mxu0  ;;  %v8427_v22 = vpop.f32.mrf.mxu1 }
  0xf0   : > { %v485_v21 = vmul.f32 %v8423_v20, %v8423_v20  ;;  %v493_v24 = vmul.f32 %v8427_v22, %v8427_v22 }
  0xf1   : > { %v8437_v25 = vpop.f32.mrf.mxu0  ;;  %v8442_v27 = vpop.f32.mrf.mxu1 }
  0xf2   : > { %696 = vrot.lane.b32.xlu1 %v485_v21, %s8259_s27  ;;  %v504_v23 = vsel %vm500_vm1, %v485_v21, 0.0  ;;  %v484_v26 = vmul.f32 %v8437_v25, %v8437_v25  ;;  %v492_v28 = vmul.f32 %v8442_v27, %v8442_v27  ;;  %v528_v29 = vsel %vm500_vm1, %v493_v24, 0.0 }
  0xf3   : > { %505 = vadd.xlane.f32.xlu0 %v504_v23  ;;  %v8453_v30 = vpop.f32.mrf.mxu0  ;;  %v8457_v32 = vpop.f32.mrf.mxu1 }
  0xf4   : > { %v487_v31 = vmul.f32 %v8453_v30, %v8453_v30  ;;  %v501_v33 = vsel %vm500_vm1, %v484_v26, 0.0  ;;  %v495_v34 = vmul.f32 %v8457_v32, %v8457_v32  ;;  %v525_v35 = vsel %vm500_vm1, %v492_v28, 0.0 }
  0xf5   : > { %v8469_v36 = vpop.f32.mrf.mxu1  ;;  %v8474_v38 = vpop.f32.mrf.mxu0 }
  0xf6   : > { %712 = vrot.lane.b32.xlu1 %v493_v24, %s8259_s27  ;;  %v494_v37 = vmul.f32 %v8469_v36, %v8469_v36  ;;  %v486_v39 = vmul.f32 %v8474_v38, %v8474_v38  ;;  %v510_v40 = vsel %vm500_vm1, %v487_v31, 0.0  ;;  %v534_v41 = vsel %vm500_vm1, %v495_v34, 0.0 }
  0xf7   : > { %v8486_v46 = vpop.f32.mrf.mxu0  ;;  %v8491_v50 = vpop.f32.mrf.mxu1 }
  0xf8   : > { %v531_v44 = vsel %vm500_vm1, %v494_v37, 0.0  ;;  %v507_v63 = vsel %vm500_vm1, %v486_v39, 0.0  ;;  %v489_v4 = vmul.f32 %v8486_v46, %v8486_v46  ;;  %v497_v7 = vmul.f32 %v8491_v50, %v8491_v50 }
  0xf9   : > { %v8489_v49 = vpop.f32.mrf.mxu0  ;;  %v8498_v53 = vpop.f32.mrf.mxu1 }
  0xfa   : > { %921 = vrot.lane.b32.xlu1 %v485_v21, %s8260_s28  ;;  %v488_v52 = vmul.f32 %v8489_v49, %v8489_v49  ;;  %v496_v55 = vmul.f32 %v8498_v53, %v8498_v53 }
  0xfc   : > { %v513_v13 = vsel %vm500_vm1, %v488_v52, 0.0  ;;  %v537_v15 = vsel %vm500_vm1, %v496_v55, 0.0 }
  0xfe   : > { %937 = vrot.lane.b32.xlu1 %v493_v24, %s8260_s28 }
 0x102   : > { %1146 = vrot.lane.b32.xlu1 %v485_v21, %s8261_s30  ;;  %v8546_v21 = vpop.f32.mrf.mxu0 }
 0x106   : > { %1162 = vrot.lane.b32.xlu1 %v493_v24, %s8261_s30 }
 0x109   : > { %694 = vrot.lane.b32.xlu0 %v484_v26, %s8259_s27 }
 0x10d   : > { %710 = vrot.lane.b32.xlu0 %v492_v28, %s8259_s27 }
 0x111   : > { %919 = vrot.lane.b32.xlu0 %v484_v26, %s8260_s28 }
 0x115   : > { %935 = vrot.lane.b32.xlu0 %v492_v28, %s8260_s28 }
 0x119   : > { %1144 = vrot.lane.b32.xlu0 %v484_v26, %s8261_s30 }
 0x11d   : > { %1160 = vrot.lane.b32.xlu0 %v492_v28, %s8261_s30  ;;  %v8552_v28 = vpop.f32.mrf.mxu0 }
 0x12a   : > { %529 = vadd.xlane.f32.xlu1 %v528_v29  ;;  %v8554_v29 = vpop.f32.mrf.mxu1 }
 0x13b   : > { %700 = vrot.lane.b32.xlu1 %v487_v31, %s8259_s27 }
 0x13c   : > { %502 = vadd.xlane.f32.xlu0 %v501_v33  ;;  %v490_v33 = vmul.f32 %v8552_v28, %v8552_v28 }
 0x13f   : > { %716 = vrot.lane.b32.xlu1 %v495_v34, %s8259_s27 }
 0x140   : > { %526 = vadd.xlane.f32.xlu0 %v525_v35 }
 0x143   : > { %925 = vrot.lane.b32.xlu1 %v487_v31, %s8260_s28 }
 0x147   : > { %941 = vrot.lane.b32.xlu1 %v495_v34, %s8260_s28 }
 0x14b   : > { %1150 = vrot.lane.b32.xlu1 %v487_v31, %s8261_s30 }
 0x14f   : > { %1166 = vrot.lane.b32.xlu1 %v495_v34, %s8261_s30  ;;  %v8561_v34 = vpop.f32.mrf.mxu1 }
 0x150   : > { %v498_v35 = vmul.f32 %v8561_v34, %v8561_v34 }
 0x156   : > { %714 = vrot.lane.b32.xlu0 %v494_v37, %s8259_s27 }
 0x15a   : > { %939 = vrot.lane.b32.xlu0 %v494_v37, %s8260_s28 }
 0x15e   : > { %1148 = vrot.lane.b32.xlu0 %v486_v39, %s8261_s30 }
 0x162   : > { %1164 = vrot.lane.b32.xlu0 %v494_v37, %s8261_s30 }
 0x164   : > { %v8493_v51 = vpop.permute.xlu1 %696 }
 0x168   : > { %v8500_v54 = vpop.permute.xlu1 %712 }
 0x16c   : > { %v8506_v56 = vpop.permute.xlu1 %921 }
 0x170   : > { %v8509_v57 = vpop.permute.xlu1 %937 }
 0x173   : > { %511 = vadd.xlane.f32.xlu1 %v510_v40 }
 0x174   : > { %v8515_v59 = vpop.permute.xlu1 %1146 }
 0x177   : > { %535 = vadd.xlane.f32.xlu1 %v534_v41 }
 0x178   : > { %v8520_v61 = vpop.permute.xlu1 %1162 }
 0x17c   : > { %v506_v42 = vpop.xlane.xlu0 %505 }
 0x17d   : > { %v550_v43 = vmax.f32 %v506_v42, 1e-24 }
 0x17f   : > { %7603 = vrsqrt.f32 %v550_v43  ;;  %v516_v43 = vsel %vm500_vm1, %v489_v4, 0.0 }
 0x180   : > { %v8511_v58 = vpop.permute.xlu0 %694 }
 0x181   : > { %532 = vadd.xlane.f32.xlu0 %v531_v44 }
 0x184   : > { %v8517_v60 = vpop.permute.xlu0 %710 }
 0x188   : > { %698 = vrot.lane.b32.xlu1 %v486_v39, %s8259_s27  ;;  %v8522_v62 = vpop.permute.xlu0 %919 }
 0x18c   : > { %v7604_v45 = vpop.eup %7603  ;;  %923 = vrot.lane.b32.xlu1 %v486_v39, %s8260_s28  ;;  %v8525_v2 = vpop.permute.xlu0 %935 }
 0x18d   : > { %v582_v47 = vmul.f32 %v7604_v45, %v8423_v20 }
 0x18f   : > { %v6921_v48 = vpack.c.bf16 %v582_v47, %v582_v47  ;;  %v540_v47 = vsel %vm500_vm1, %v497_v7, 0.0 }
 0x190   : > { %v8527_v3 = vpop.permute.xlu0 %1144 }
 0x191   : > { %663 = vst.msk [vmem:[#allocation2 + $0x4] sm:$0xf] %vm661_vm2, %v6921_v48 }
 0x194   : > { %v8531_v5 = vpop.permute.xlu0 %1160 }
 0x197   : > { %702 = vrot.lane.b32.xlu0 %v488_v52, %s8259_s27 }
 0x19b   : > { %718 = vrot.lane.b32.xlu0 %v496_v55, %s8259_s27 }
 0x19f   : > { %927 = vrot.lane.b32.xlu0 %v488_v52, %s8260_s28 }
 0x1a3   : > { %943 = vrot.lane.b32.xlu0 %v496_v55, %s8260_s28 }
 0x1a7   : > { %1152 = vrot.lane.b32.xlu0 %v488_v52, %s8261_s30 }
 0x1ab   : > { %1168 = vrot.lane.b32.xlu0 %v496_v55, %s8261_s30 }
 0x1b0   : > { %508 = vadd.xlane.f32.xlu1 %v507_v63 }
 0x1b3   : > { %v530_v0 = vpop.xlane.xlu1 %529 }
 0x1b4   : > { %v558_v1 = vmax.f32 %v530_v0, 1e-24 }
 0x1b6   : > { %7605 = vrsqrt.f32 %v558_v1 }
 0x1b7   : > { %v8548_v23 = vpop.permute.xlu1 %700 }
 0x1bb   : > { %v8557_v31 = vpop.permute.xlu1 %716 }
 0x1bf   : > { %v8566_v37 = vpop.permute.xlu1 %925 }
 0x1c1   : > { %704 = vrot.lane.b32.xlu1 %v489_v4, %s8259_s27 }
 0x1c3   : > { %v7606_v6 = vpop.eup %7605  ;;  %v8569_v39 = vpop.permute.xlu1 %941 }
 0x1c4   : > { %v590_v8 = vmul.f32 %v7606_v6, %v8427_v22 }
 0x1c5   : > { %v503_v9 = vpop.xlane.xlu0 %502  ;;  %720 = vrot.lane.b32.xlu1 %v497_v7, %s8259_s27 }
 0x1c6   : > { %v6929_v10 = vpack.c.bf16 %v590_v8, %v590_v8  ;;  %v549_v11 = vmax.f32 %v503_v9, 1e-24 }
 0x1c7   : > { %v8573_v40 = vpop.permute.xlu1 %1150 }
 0x1c8   : > { %671 = vst.msk [vmem:[#allocation2 + $0x24] sm:$0xf] %vm661_vm2, %v6929_v10  ;;  %7607 = vrsqrt.f32 %v549_v11  ;;  %v499_v11 = vmul.f32 %v8554_v29, %v8554_v29 }
 0x1c9   : > { %v527_v12 = vpop.xlane.xlu0 %526  ;;  %929 = vrot.lane.b32.xlu1 %v489_v4, %s8260_s28 }
 0x1ca   : > { %v557_v14 = vmax.f32 %v527_v12, 1e-24  ;;  %514 = vadd.xlane.f32.xlu0 %v513_v13 }
 0x1cb   : > { %v8578_v42 = vpop.permute.xlu1 %1166 }
 0x1cc   : > { %7609 = vrsqrt.f32 %v557_v14  ;;  %v519_v14 = vsel %vm500_vm1, %v490_v33, 0.0 }
 0x1cd   : > { %945 = vrot.lane.b32.xlu1 %v497_v7, %s8260_s28  ;;  %v8575_v41 = vpop.permute.xlu0 %714 }
 0x1ce   : > { %538 = vadd.xlane.f32.xlu0 %v537_v15 }
 0x1d1   : > { %1154 = vrot.lane.b32.xlu1 %v489_v4, %s8261_s30  ;;  %v8582_v44 = vpop.permute.xlu0 %939  ;;  %v491_v4 = vmul.f32 %v8546_v21, %v8546_v21 }
 0x1d5   : > { %v7608_v16 = vpop.eup %7607  ;;  %1170 = vrot.lane.b32.xlu1 %v497_v7, %s8261_s30  ;;  %v8585_v52 = vpop.permute.xlu0 %1148 }
 0x1d6   : > { %v581_v17 = vmul.f32 %v7608_v16, %v8437_v25  ;;  %v543_v16 = vsel %vm500_vm1, %v498_v35, 0.0 }
 0x1d8   : > { %v6920_v18 = vpack.c.bf16 %v581_v17, %v581_v17 }
 0x1d9   : > { %v7610_v19 = vpop.eup %7609  ;;  %v8587_v0 = vpop.permute.xlu0 %1164 }
 0x1da   : > { %662 = vst.msk [vmem:[#allocation2] sm:$0xf] %vm661_vm2, %v6920_v18  ;;  %v589_v24 = vmul.f32 %v7610_v19, %v8442_v27  ;;  %v742_v19 = vsel %vm500_vm1, %v8511_v58, 0.0  ;;  %v1192_v58 = vsel %vm500_vm1, %v8527_v3, 0.0 }
 0x1dc   : > { %v6928_v26 = vpack.c.bf16 %v589_v24, %v589_v24  ;;  %v766_v24 = vsel %vm500_vm1, %v8517_v60, 0.0 }
 0x1de   : > { %670 = vst.msk [vmem:[#allocation2 + $0x20] sm:$0xf] %vm661_vm2, %v6928_v26  ;;  %v967_v26 = vsel %vm500_vm1, %v8522_v62, 0.0 }
 0x1e4   : > { %706 = vrot.lane.b32.xlu0 %v490_v33, %s8259_s27 }
 0x1e8   : > { %722 = vrot.lane.b32.xlu0 %v498_v35, %s8259_s27 }
 0x1ec   : > { %931 = vrot.lane.b32.xlu0 %v490_v33, %s8260_s28 }
 0x1f0   : > { %947 = vrot.lane.b32.xlu0 %v498_v35, %s8260_s28 }
 0x1f4   : > { %1156 = vrot.lane.b32.xlu0 %v490_v33, %s8261_s30  ;;  %v991_v33 = vsel %vm500_vm1, %v8525_v2, 0.0  ;;  %v976_v2 = vsel %vm500_vm1, %v8566_v37, 0.0  ;;  %v546_v37 = vsel %vm500_vm1, %v499_v11, 0.0 }
 0x1f8   : > { %1172 = vrot.lane.b32.xlu0 %v498_v35, %s8261_s30 }
 0x1f9   : > { %517 = vadd.xlane.f32.xlu1 %v516_v43 }
 0x1fc   : > { %v512_v45 = vpop.xlane.xlu1 %511 }
 0x1fd   : > { %v552_v48 = vmax.f32 %v512_v45, 1e-24  ;;  %541 = vadd.xlane.f32.xlu1 %v540_v47  ;;  %v1216_v45 = vsel %vm500_vm1, %v8531_v5, 0.0  ;;  %v751_v47 = vsel %vm500_vm1, %v8548_v23, 0.0  ;;  %v772_v5 = vsel %vm500_vm1, %v8575_v41, 0.0 }
 0x1fe   : > { %v522_v23 = vsel %vm500_vm1, %v491_v4, 0.0 }
 0x1ff   : > { %7611 = vrsqrt.f32 %v552_v48 }
 0x200   : > { %v536_v55 = vpop.xlane.xlu1 %535 }
 0x201   : > { %v560_v63 = vmax.f32 %v536_v55, 1e-24 }
 0x203   : > { %7613 = vrsqrt.f32 %v560_v63 }
 0x204   : > { %v699_v35 = vpop.permute.xlu1 %698 }
 0x205   : > { %v748_v63 = vsel %vm500_vm1, %v699_v35, 0.0  ;;  %v775_v35 = vsel %vm500_vm1, %v8557_v31, 0.0 }
 0x208   : > { %v924_v60 = vpop.permute.xlu1 %923 }
 0x20a   : > { %v533_v1 = vpop.xlane.xlu0 %532 }
 0x20b   : > { %v559_v6 = vmax.f32 %v533_v1, 1e-24 }
 0x20c   : > { %v7612_v8 = vpop.eup %7611 }
 0x20d   : > { %v584_v9 = vmul.f32 %v7612_v8, %v8453_v30  ;;  %7615 = vrsqrt.f32 %v559_v6  ;;  %v973_v6 = vsel %vm500_vm1, %v924_v60, 0.0 }
 0x20e   : > { %708 = vrot.lane.b32.xlu1 %v491_v4, %s8259_s27  ;;  %v703_v43 = vpop.permute.xlu0 %702 }
 0x20f   : > { %v6923_v7 = vpack.c.bf16 %v584_v9, %v584_v9 }
 0x210   : > { %v7614_v10 = vpop.eup %7613 }
 0x211   : > { %665 = vst.msk [vmem:[#allocation2 + $0xc] sm:$0xf] %vm661_vm2, %v6923_v7  ;;  %v592_v12 = vmul.f32 %v7614_v10, %v8457_v32  ;;  %v997_v10 = vsel %vm500_vm1, %v8582_v44, 0.0  ;;  %v1222_v44 = vsel %vm500_vm1, %v8587_v0, 0.0 }
 0x212   : > { %724 = vrot.lane.b32.xlu1 %v499_v11, %s8259_s27  ;;  %v719_v62 = vpop.permute.xlu0 %718 }
 0x213   : > { %v6931_v13 = vpack.c.bf16 %v592_v12, %v592_v12  ;;  %v745_v12 = vsel %vm500_vm1, %v8493_v51, 0.0  ;;  %v970_v51 = vsel %vm500_vm1, %v8506_v56, 0.0  ;;  %v778_v0 = vsel %vm500_vm1, %v719_v62, 0.0 }
 0x214   : > { %v1000_v62 = vsel %vm500_vm1, %v8569_v39, 0.0  ;;  %v1225_v39 = vsel %vm500_vm1, %v8578_v42, 0.0 }
 0x215   : > { %673 = vst.msk [vmem:[#allocation2 + $0x2c] sm:$0xf] %vm661_vm2, %v6931_v13 }
 0x216   : > { %933 = vrot.lane.b32.xlu1 %v491_v4, %s8260_s28  ;;  %v928_v3 = vpop.permute.xlu0 %927 }
 0x217   : > { %520 = vadd.xlane.f32.xlu0 %v519_v14  ;;  %v979_v56 = vsel %vm500_vm1, %v928_v3, 0.0 }
 0x21a   : > { %v7616_v15 = vpop.eup %7615  ;;  %949 = vrot.lane.b32.xlu1 %v499_v11, %s8260_s28  ;;  %v944_v1 = vpop.permute.xlu0 %943 }
 0x21b   : > { %v591_v17 = vmul.f32 %v7616_v15, %v8469_v36  ;;  %544 = vadd.xlane.f32.xlu0 %v543_v16  ;;  %v754_v16 = vsel %vm500_vm1, %v703_v43, 0.0 }
 0x21d   : > { %v6930_v18 = vpack.c.bf16 %v591_v17, %v591_v17 }
 0x21e   : > { %1158 = vrot.lane.b32.xlu1 %v491_v4, %s8261_s30  ;;  %v1153_v9 = vpop.permute.xlu0 %1152  ;;  %v1198_v4 = vsel %vm500_vm1, %v8585_v52, 0.0 }
 0x21f   : > { %672 = vst.msk [vmem:[#allocation2 + $0x28] sm:$0xf] %vm661_vm2, %v6930_v18  ;;  %743 = vadd.xlane.f32.xlu0 %v742_v19  ;;  %v1195_v18 = vsel %vm500_vm1, %v8515_v59, 0.0 }
 0x222   : > { %1174 = vrot.lane.b32.xlu1 %v499_v11, %s8261_s30  ;;  %v1169_v13 = vpop.permute.xlu0 %1168  ;;  %v769_v11 = vsel %vm500_vm1, %v8500_v54, 0.0  ;;  %v994_v54 = vsel %vm500_vm1, %v8509_v57, 0.0  ;;  %v1003_v57 = vsel %vm500_vm1, %v944_v1, 0.0 }
 0x223   : > { %767 = vadd.xlane.f32.xlu0 %v766_v24  ;;  %v1219_v24 = vsel %vm500_vm1, %v8520_v61, 0.0 }
 0x227   : > { %968 = vadd.xlane.f32.xlu0 %v967_v26 }
 0x22b   : > { %992 = vadd.xlane.f32.xlu0 %v991_v33 }
 0x22f   : > { %1193 = vadd.xlane.f32.xlu0 %v1192_v58 }
 0x233   : > { %1217 = vadd.xlane.f32.xlu0 %v1216_v45  ;;  %v1204_v45 = vsel %vm500_vm1, %v1153_v9, 0.0 }
 0x237   : > { %752 = vadd.xlane.f32.xlu0 %v751_v47 }
 0x239   : > { %v509_v48 = vpop.xlane.xlu1 %508 }
 0x23a   : > { %v551_v55 = vmax.f32 %v509_v48, 1e-24  ;;  %v1228_v48 = vsel %vm500_vm1, %v1169_v13, 0.0 }
 0x23b   : > { %977 = vadd.xlane.f32.xlu0 %v976_v2 }
 0x23c   : > { %7617 = vrsqrt.f32 %v551_v55 }
 0x23d   : > { %v705_v19 = vpop.permute.xlu1 %704 }
 0x23f   : > { %749 = vadd.xlane.f32.xlu0 %v748_v63  ;;  %v1201_v63 = vsel %vm500_vm1, %v8573_v40, 0.0 }
 0x241   : > { %v721_v59 = vpop.permute.xlu1 %720 }
 0x242   : > { %v781_v40 = vsel %vm500_vm1, %v721_v59, 0.0 }
 0x243   : > { %773 = vadd.xlane.f32.xlu0 %v772_v5 }
 0x245   : > { %v930_v31 = vpop.permute.xlu1 %929 }
 0x246   : > { %523 = vadd.xlane.f32.xlu1 %v522_v23  ;;  %v982_v42 = vsel %vm500_vm1, %v930_v31, 0.0 }
 0x247   : > { %974 = vadd.xlane.f32.xlu0 %v973_v6  ;;  %v757_v6 = vsel %vm500_vm1, %v705_v19, 0.0 }
 0x249   : > { %v7618_v8 = vpop.eup %7617  ;;  %v946_v1 = vpop.permute.xlu1 %945 }
 0x24a   : > { %v583_v7 = vmul.f32 %v7618_v8, %v8474_v38  ;;  %547 = vadd.xlane.f32.xlu1 %v546_v37 }
 0x24b   : > { %998 = vadd.xlane.f32.xlu0 %v997_v10 }
 0x24c   : > { %v6922_v41 = vpack.c.bf16 %v583_v7, %v583_v7 }
 0x24d   : > { %v1155_v9 = vpop.permute.xlu1 %1154 }
 0x24e   : > { %664 = vst.msk [vmem:[#allocation2 + $0x8] sm:$0xf] %vm661_vm2, %v6922_v41  ;;  %746 = vadd.xlane.f32.xlu1 %v745_v12 }
 0x24f   : > { %1199 = vadd.xlane.f32.xlu0 %v1198_v4  ;;  %v1006_v4 = vsel %vm500_vm1, %v946_v1, 0.0 }
 0x251   : > { %v1171_v10 = vpop.permute.xlu1 %1170 }
 0x252   : > { %770 = vadd.xlane.f32.xlu1 %v769_v11 }
 0x253   : > { %v515_v14 = vpop.xlane.xlu0 %514  ;;  %1223 = vadd.xlane.f32.xlu0 %v1222_v44 }
 0x254   : > { %v553_v15 = vmax.f32 %v515_v14, 1e-24  ;;  %v1207_v14 = vsel %vm500_vm1, %v1155_v9, 0.0 }
 0x256   : > { %7619 = vrsqrt.f32 %v553_v15  ;;  %971 = vadd.xlane.f32.xlu1 %v970_v51 }
 0x257   : > { %v539_v52 = vpop.xlane.xlu0 %538  ;;  %755 = vadd.xlane.f32.xlu0 %v754_v16  ;;  %v1231_v16 = vsel %vm500_vm1, %v1171_v10, 0.0 }
 0x258   : > { %v561_v17 = vmax.f32 %v539_v52, 1e-24 }
 0x25a   : > { %7621 = vrsqrt.f32 %v561_v17  ;;  %995 = vadd.xlane.f32.xlu1 %v994_v54 }
 0x25b   : > { %779 = vadd.xlane.f32.xlu0 %v778_v0  ;;  %v707_v26 = vpop.permute.xlu0 %706 }
 0x25c   : > { %v760_v2 = vsel %vm500_vm1, %v707_v26, 0.0 }
 0x25e   : > { %1196 = vadd.xlane.f32.xlu1 %v1195_v18 }
 0x25f   : > { %980 = vadd.xlane.f32.xlu0 %v979_v56  ;;  %v723_v47 = vpop.permute.xlu0 %722 }
 0x260   : > { %v784_v5 = vsel %vm500_vm1, %v723_v47, 0.0 }
 0x262   : > { %1220 = vadd.xlane.f32.xlu1 %v1219_v24 }
 0x263   : > { %v7620_v33 = vpop.eup %7619  ;;  %1004 = vadd.xlane.f32.xlu0 %v1003_v57  ;;  %v932_v3 = vpop.permute.xlu0 %931 }
 0x264   : > { %v585_v58 = vmul.f32 %v7620_v33, %v8489_v49  ;;  %v985_v8 = vsel %vm500_vm1, %v932_v3, 0.0 }
 0x266   : > { %v6924_v43 = vpack.c.bf16 %v585_v58, %v585_v58  ;;  %776 = vadd.xlane.f32.xlu1 %v775_v35 }
 0x267   : > { %v7622_v60 = vpop.eup %7621  ;;  %1205 = vadd.xlane.f32.xlu0 %v1204_v45  ;;  %v948_v23 = vpop.permute.xlu0 %947 }
 0x268   : > { %666 = vst.msk [vmem:[#allocation2 + $0x10] sm:$0xf] %vm661_vm2, %v6924_v43  ;;  %v593_v61 = vmul.f32 %v7622_v60, %v8498_v53  ;;  %v1009_v7 = vsel %vm500_vm1, %v948_v23, 0.0 }
 0x26a   : > { %v6932_v55 = vpack.c.bf16 %v593_v61, %v593_v61  ;;  %1001 = vadd.xlane.f32.xlu1 %v1000_v62 }
 0x26b   : > { %1229 = vadd.xlane.f32.xlu0 %v1228_v48  ;;  %v1157_v37 = vpop.permute.xlu0 %1156 }
 0x26c   : > { %674 = vst.msk [vmem:[#allocation2 + $0x30] sm:$0xf] %vm661_vm2, %v6932_v55  ;;  %v1210_v41 = vsel %vm500_vm1, %v1157_v37, 0.0 }
 0x26e   : > { %1202 = vadd.xlane.f32.xlu1 %v1201_v63 }
 0x26f   : > { %761 = vadd.xlane.f32.xlu0 %v760_v2  ;;  %v1173_v12 = vpop.permute.xlu0 %1172 }
 0x270   : > { %v1234_v13 = vsel %vm500_vm1, %v1173_v12, 0.0 }
 0x272   : > { %1226 = vadd.xlane.f32.xlu1 %v1225_v39 }
 0x273   : > { %785 = vadd.xlane.f32.xlu0 %v784_v5 }
 0x276   : > { %758 = vadd.xlane.f32.xlu1 %v757_v6 }
 0x277   : > { %986 = vadd.xlane.f32.xlu0 %v985_v8 }
 0x27a   : > { %782 = vadd.xlane.f32.xlu1 %v781_v40 }
 0x27b   : > { %1010 = vadd.xlane.f32.xlu0 %v1009_v7 }
 0x27e   : > { %983 = vadd.xlane.f32.xlu1 %v982_v42 }
 0x27f   : > { %1211 = vadd.xlane.f32.xlu0 %v1210_v41 }
 0x282   : > { %v518_v11 = vpop.xlane.xlu1 %517  ;;  %1007 = vadd.xlane.f32.xlu1 %v1006_v4 }
 0x283   : > { %v554_v44 = vmax.f32 %v518_v11, 1e-24  ;;  %1235 = vadd.xlane.f32.xlu0 %v1234_v13 }
 0x285   : > { %7623 = vrsqrt.f32 %v554_v44 }
 0x286   : > { %v542_v15 = vpop.xlane.xlu1 %541  ;;  %1208 = vadd.xlane.f32.xlu1 %v1207_v14 }
 0x287   : > { %v562_v51 = vmax.f32 %v542_v15, 1e-24 }
 0x289   : > { %7625 = vrsqrt.f32 %v562_v51 }
 0x28a   : > { %v709_v52 = vpop.permute.xlu1 %708  ;;  %1232 = vadd.xlane.f32.xlu1 %v1231_v16 }
 0x28b   : > { %v763_v17 = vsel %vm500_vm1, %v709_v52, 0.0  ;;  %v8262_v52 = vmov -inf  }
 0x28c   : > { %1370 = vst.msk [vmem:[#allocation4] sm:$0xff] %vm1369_vm4, %v8262_v52  ;;  %1371 = vst.msk [vmem:[#allocation4 + $0x8] sm:$0xff] %vm1369_vm4, %v8262_v52 }
 0x28d   : > { %1372 = vst.msk [vmem:[#allocation4 + $0x10] sm:$0xff] %vm1369_vm4, %v8262_v52  ;;  %1373 = vst.msk [vmem:[#allocation4 + $0x18] sm:$0xff] %vm1369_vm4, %v8262_v52 }
 0x28e   : > { %v725_v54 = vpop.permute.xlu1 %724  ;;  %764 = vadd.xlane.f32.xlu1 %v763_v17  ;;  %1374 = vst.msk [vmem:[#allocation4 + $0x20] sm:$0xff] %vm1369_vm4, %v8262_v52  ;;  %1375 = vst.msk [vmem:[#allocation4 + $0x28] sm:$0xff] %vm1369_vm4, %v8262_v52 }
 0x28f   : > { %v787_v0 = vsel %vm500_vm1, %v725_v54, 0.0  ;;  %1376 = vst.msk [vmem:[#allocation4 + $0x30] sm:$0xff] %vm1369_vm4, %v8262_v52  ;;  %1377 = vst.msk [vmem:[#allocation4 + $0x38] sm:$0xff] %vm1369_vm4, %v8262_v52 }
 0x290   : > { %1378 = vst.msk [vmem:[#allocation4 + $0x40] sm:$0xff] %vm1369_vm4, %v8262_v52  ;;  %1379 = vst.msk [vmem:[#allocation4 + $0x48] sm:$0xff] %vm1369_vm4, %v8262_v52 }
 0x291   : > { %1380 = vst.msk [vmem:[#allocation4 + $0x50] sm:$0xff] %vm1369_vm4, %v8262_v52  ;;  %1381 = vst.msk [vmem:[#allocation4 + $0x58] sm:$0xff] %vm1369_vm4, %v8262_v52 }
 0x292   : > { %v7624_v18 = vpop.eup %7623  ;;  %v934_v56 = vpop.permute.xlu1 %933  ;;  %788 = vadd.xlane.f32.xlu1 %v787_v0  ;;  %1382 = vst.msk [vmem:[#allocation4 + $0x60] sm:$0xff] %vm1369_vm4, %v8262_v52  ;;  %1383 = vst.msk [vmem:[#allocation4 + $0x68] sm:$0xff] %vm1369_vm4, %v8262_v52  ;;  %v8263_v0 = vmov 0.0  }
 0x293   : > { %v586_v19 = vmul.f32 %v7624_v18, %v8486_v46  ;;  %v988_v26 = vsel %vm500_vm1, %v934_v56, 0.0  ;;  %1384 = vst.msk [vmem:[#allocation4 + $0x70] sm:$0xff] %vm1369_vm4, %v8262_v52  ;;  %1385 = vst.msk [vmem:[#allocation4 + $0x78] sm:$0xff] %vm1369_vm4, %v8262_v52 }
 0x294   : > { %1386 = vst.msk [vmem:[#allocation5] sm:$0xff] %vm1369_vm4, %v8263_v0  ;;  %1387 = vst.msk [vmem:[#allocation5 + $0x8] sm:$0xff] %vm1369_vm4, %v8263_v0 }
 0x295   : > { %v6925_v24 = vpack.c.bf16 %v586_v19, %v586_v19  ;;  %1388 = vst.msk [vmem:[#allocation5 + $0x10] sm:$0xff] %vm1369_vm4, %v8263_v0  ;;  %1389 = vst.msk [vmem:[#allocation5 + $0x18] sm:$0xff] %vm1369_vm4, %v8263_v0 }
 0x296   : > { %v7626_v57 = vpop.eup %7625  ;;  %v950_v33 = vpop.permute.xlu1 %949  ;;  %989 = vadd.xlane.f32.xlu1 %v988_v26  ;;  %1390 = vst.msk [vmem:[#allocation5 + $0x20] sm:$0xff] %vm1369_vm4, %v8263_v0  ;;  %1391 = vst.msk [vmem:[#allocation5 + $0x28] sm:$0xff] %vm1369_vm4, %v8263_v0 }
 0x297   : > { %667 = vst.msk [vmem:[#allocation2 + $0x14] sm:$0xf] %vm661_vm2, %v6925_v24  ;;  %v594_v58 = vmul.f32 %v7626_v57, %v8491_v50  ;;  %v1012_v59 = vsel %vm500_vm1, %v950_v33, 0.0 }
 0x298   : > { %1392 = vst.msk [vmem:[#allocation5 + $0x30] sm:$0xff] %vm1369_vm4, %v8263_v0  ;;  %1393 = vst.msk [vmem:[#allocation5 + $0x38] sm:$0xff] %vm1369_vm4, %v8263_v0 }
 0x299   : > { %v6933_v35 = vpack.c.bf16 %v594_v58, %v594_v58  ;;  %1394 = vst.msk [vmem:[#allocation5 + $0x40] sm:$0xff] %vm1369_vm4, %v8263_v0  ;;  %1395 = vst.msk [vmem:[#allocation5 + $0x48] sm:$0xff] %vm1369_vm4, %v8263_v0 }
 0x29a   : > { %v1159_v43 = vpop.permute.xlu1 %1158  ;;  %1013 = vadd.xlane.f32.xlu1 %v1012_v59  ;;  %1396 = vst.msk [vmem:[#allocation5 + $0x50] sm:$0xff] %vm1369_vm4, %v8263_v0  ;;  %1397 = vst.msk [vmem:[#allocation5 + $0x58] sm:$0xff] %vm1369_vm4, %v8263_v0 }
 0x29b   : > { %675 = vst.msk [vmem:[#allocation2 + $0x34] sm:$0xf] %vm661_vm2, %v6933_v35  ;;  %v1213_v45 = vsel %vm500_vm1, %v1159_v43, 0.0 }
 0x29c   : > { %1398 = vst.msk [vmem:[#allocation5 + $0x60] sm:$0xff] %vm1369_vm4, %v8263_v0  ;;  %1399 = vst.msk [vmem:[#allocation5 + $0x68] sm:$0xff] %vm1369_vm4, %v8263_v0 }
 0x29d   : > { %1400 = vst.msk [vmem:[#allocation5 + $0x70] sm:$0xff] %vm1369_vm4, %v8263_v0  ;;  %1401 = vst.msk [vmem:[#allocation5 + $0x78] sm:$0xff] %vm1369_vm4, %v8263_v0 }
 0x29e   : > { %v1175_v60 = vpop.permute.xlu1 %1174  ;;  %1214 = vadd.xlane.f32.xlu1 %v1213_v45  ;;  %1402 = vst.msk [vmem:[#allocation3] sm:$0xff] %vm278_vm0, %v8263_v0  ;;  %1403 = vst.msk [vmem:[#allocation3 + $0x8] sm:$0xff] %vm278_vm0, %v8263_v0 }
 0x29f   : > { %v1237_v61 = vsel %vm500_vm1, %v1175_v60, 0.0  ;;  %1404 = vst.msk [vmem:[#allocation3 + $0x10] sm:$0xff] %vm278_vm0, %v8263_v0  ;;  %1405 = vst.msk [vmem:[#allocation3 + $0x18] sm:$0xff] %vm278_vm0, %v8263_v0 }
 0x2a0   : > { %v521_v47 = vpop.xlane.xlu0 %520  ;;  %1406 = vst.msk [vmem:[#allocation3 + $0x20] sm:$0xff] %vm278_vm0, %v8263_v0  ;;  %1407 = vst.msk [vmem:[#allocation3 + $0x28] sm:$0xff] %vm278_vm0, %v8263_v0 }
 0x2a1   : > { %v555_v62 = vmax.f32 %v521_v47, 1e-24  ;;  %1408 = vst.msk [vmem:[#allocation3 + $0x30] sm:$0xff] %vm278_vm0, %v8263_v0  ;;  %1409 = vst.msk [vmem:[#allocation3 + $0x38] sm:$0xff] %vm278_vm0, %v8263_v0 }
 0x2a2   : > { %1238 = vadd.xlane.f32.xlu1 %v1237_v61  ;;  %1410 = vst.msk [vmem:[#allocation3 + $0x40] sm:$0xff] %vm278_vm0, %v8263_v0  ;;  %1411 = vst.msk [vmem:[#allocation3 + $0x48] sm:$0xff] %vm278_vm0, %v8263_v0 }
 0x2a3   : > { %7627 = vrsqrt.f32 %v555_v62  ;;  %1412 = vst.msk [vmem:[#allocation3 + $0x50] sm:$0xff] %vm278_vm0, %v8263_v0  ;;  %1413 = vst.msk [vmem:[#allocation3 + $0x58] sm:$0xff] %vm278_vm0, %v8263_v0 }
 0x2a4   : > { %v545_v48 = vpop.xlane.xlu0 %544  ;;  %1414 = vst.msk [vmem:[#allocation3 + $0x60] sm:$0xff] %vm278_vm0, %v8263_v0  ;;  %1415 = vst.msk [vmem:[#allocation3 + $0x68] sm:$0xff] %vm278_vm0, %v8263_v0 }
 0x2a5   : > { %v563_v55 = vmax.f32 %v545_v48, 1e-24  ;;  %1416 = vst.msk [vmem:[#allocation3 + $0x70] sm:$0xff] %vm278_vm0, %v8263_v0  ;;  %1417 = vst.msk [vmem:[#allocation3 + $0x78] sm:$0xff] %vm278_vm0, %v8263_v0 }
 0x2a7   : > { %7629 = vrsqrt.f32 %v563_v55 }
 0x2a8   : > { %v744_v31 = vpop.xlane.xlu0 %743 }
 0x2a9   : > { %v790_v2 = vmax.f32 %v744_v31, 1e-24 }
 0x2ab   : > { %7631 = vrsqrt.f32 %v790_v2 }
 0x2ac   : > { %v768_v3 = vpop.xlane.xlu0 %767 }
 0x2ad   : > { %v798_v63 = vmax.f32 %v768_v3, 1e-24 }
 0x2af   : > { %7633 = vrsqrt.f32 %v798_v63 }
 0x2b0   : > { %v7628_v5 = vpop.eup %7627  ;;  %v969_v39 = vpop.xlane.xlu0 %968 }
 0x2b1   : > { %v587_v1 = vmul.f32 %v7628_v5, %v8552_v28  ;;  %v1015_v23 = vmax.f32 %v969_v39, 1e-24 }
 0x2b3   : > { %v6926_v6 = vpack.c.bf16 %v587_v1, %v587_v1  ;;  %7635 = vrsqrt.f32 %v1015_v23 }
 0x2b4   : > { %v7630_v8 = vpop.eup %7629  ;;  %v993_v9 = vpop.xlane.xlu0 %992 }
 0x2b5   : > { %668 = vst.msk [vmem:[#allocation2 + $0x18] sm:$0xf] %vm661_vm2, %v6926_v6  ;;  %v595_v37 = vmul.f32 %v7630_v8, %v8561_v34  ;;  %v1023_v40 = vmax.f32 %v993_v9, 1e-24 }
 0x2b7   : > { %v6934_v7 = vpack.c.bf16 %v595_v37, %v595_v37  ;;  %7637 = vrsqrt.f32 %v1023_v40 }
 0x2b8   : > { %v7632_v42 = vpop.eup %7631  ;;  %v1194_v10 = vpop.xlane.xlu0 %1193 }
 0x2b9   : > { %676 = vst.msk [vmem:[#allocation2 + $0x38] sm:$0xf] %vm661_vm2, %v6934_v7  ;;  %v822_v41 = vmul.f32 %v7632_v42, %v8437_v25  ;;  %v1240_v12 = vmax.f32 %v1194_v10, 1e-24 }
 0x2bb   : > { %v6936_v4 = vpack.c.bf16 %v822_v41, %v822_v41  ;;  %7639 = vrsqrt.f32 %v1240_v12 }
 0x2bc   : > { %v7634_v13 = vpop.eup %7633  ;;  %v1218_v11 = vpop.xlane.xlu0 %1217 }
 0x2bd   : > { %903 = vst.msk [vmem:[#allocation2] sm:$0xf] %vm902_vm3, %v6936_v4  ;;  %v830_v44 = vmul.f32 %v7634_v13, %v8442_v27  ;;  %v1248_v14 = vmax.f32 %v1218_v11, 1e-24 }
 0x2bf   : > { %v6944_v15 = vpack.c.bf16 %v830_v44, %v830_v44  ;;  %7641 = vrsqrt.f32 %v1248_v14 }
 0x2c0   : > { %v7636_v51 = vpop.eup %7635  ;;  %v753_v16 = vpop.xlane.xlu0 %752 }
 0x2c1   : > { %911 = vst.msk [vmem:[#allocation2 + $0x20] sm:$0xf] %vm902_vm3, %v6944_v15  ;;  %v1047_v17 = vmul.f32 %v7636_v51, %v8437_v25  ;;  %v793_v54 = vmax.f32 %v753_v16, 1e-24 }
 0x2c3   : > { %v6952_v18 = vpack.c.bf16 %v1047_v17, %v1047_v17  ;;  %7643 = vrsqrt.f32 %v793_v54 }
 0x2c4   : > { %v7638_v56 = vpop.eup %7637  ;;  %v978_v19 = vpop.xlane.xlu0 %977 }
 0x2c5   : > { %1128 = vst.msk [vmem:[#allocation2] sm:$0xf] %vm1127_vm5, %v6952_v18  ;;  %v1055_v24 = vmul.f32 %v7638_v56, %v8442_v27  ;;  %v1018_v26 = vmax.f32 %v978_v19, 1e-24 }
 0x2c7   : > { %v6960_v57 = vpack.c.bf16 %v1055_v24, %v1055_v24  ;;  %7645 = vrsqrt.f32 %v1018_v26 }
 0x2c8   : > { %v7640_v33 = vpop.eup %7639  ;;  %v750_v58 = vpop.xlane.xlu0 %749 }
 0x2c9   : > { %1136 = vst.msk [vmem:[#allocation2 + $0x20] sm:$0xf] %vm1127_vm5, %v6960_v57  ;;  %v1272_v35 = vmul.f32 %v7640_v33, %v8437_v25  ;;  %v792_v59 = vmax.f32 %v750_v58, 1e-24 }
 0x2cb   : > { %v6968_v43 = vpack.c.bf16 %v1272_v35, %v1272_v35  ;;  %7647 = vrsqrt.f32 %v792_v59 }
 0x2cc   : > { %v7642_v45 = vpop.eup %7641  ;;  %v774_v60 = vpop.xlane.xlu0 %773 }
 0x2cd   : > { %1353 = vst.msk [vmem:[#allocation2] sm:$0xf] %vm1352_vm6, %v6968_v43  ;;  %v1280_v47 = vmul.f32 %v7642_v45, %v8442_v27  ;;  %v800_v61 = vmax.f32 %v774_v60, 1e-24 }
 0x2cf   : > { %v6976_v62 = vpack.c.bf16 %v1280_v47, %v1280_v47  ;;  %7649 = vrsqrt.f32 %v800_v61  ;;  %v524_v48 = vpop.xlane.xlu1 %523 }
 0x2d0   : > { %v7644_v55 = vpop.eup %7643  ;;  %v556_v31 = vmax.f32 %v524_v48, 1e-24  ;;  %v975_v2 = vpop.xlane.xlu0 %974 }
 0x2d1   : > { %1361 = vst.msk [vmem:[#allocation2 + $0x20] sm:$0xf] %vm1352_vm6, %v6976_v62  ;;  %v825_v25 = vmul.f32 %v7644_v55, %v8453_v30  ;;  %v1017_v3 = vmax.f32 %v975_v2, 1e-24 }
 0x2d2   : > { %7651 = vrsqrt.f32 %v556_v31 }
 0x2d3   : > { %v6939_v63 = vpack.c.bf16 %v825_v25, %v825_v25  ;;  %7653 = vrsqrt.f32 %v1017_v3  ;;  %v548_v5 = vpop.xlane.xlu1 %547 }
 0x2d4   : > { %v7646_v39 = vpop.eup %7645  ;;  %v564_v1 = vmax.f32 %v548_v5, 1e-24  ;;  %v999_v23 = vpop.xlane.xlu0 %998 }
 0x2d5   : > { %906 = vst.msk [vmem:[#allocation2 + $0xc] sm:$0xf] %vm902_vm3, %v6939_v63  ;;  %v1050_v27 = vmul.f32 %v7646_v39, %v8453_v30  ;;  %v1025_v6 = vmax.f32 %v999_v23, 1e-24 }
 0x2d6   : > { %7655 = vrsqrt.f32 %v564_v1 }
 0x2d7   : > { %v6955_v8 = vpack.c.bf16 %v1050_v27, %v1050_v27  ;;  %7657 = vrsqrt.f32 %v1025_v6  ;;  %v747_v9 = vpop.xlane.xlu1 %746 }
 0x2d8   : > { %v7648_v37 = vpop.eup %7647  ;;  %v791_v40 = vmax.f32 %v747_v9, 1e-24  ;;  %v1200_v7 = vpop.xlane.xlu0 %1199 }
 0x2d9   : > { %1131 = vst.msk [vmem:[#allocation2 + $0xc] sm:$0xf] %vm1127_vm5, %v6955_v8  ;;  %v824_v42 = vmul.f32 %v7648_v37, %v8474_v38  ;;  %v1242_v10 = vmax.f32 %v1200_v7, 1e-24 }
 0x2da   : > { %7659 = vrsqrt.f32 %v791_v40 }
 0x2db   : > { %v6938_v41 = vpack.c.bf16 %v824_v42, %v824_v42  ;;  %7661 = vrsqrt.f32 %v1242_v10  ;;  %v771_v12 = vpop.xlane.xlu1 %770 }
 0x2dc   : > { %v7650_v4 = vpop.eup %7649  ;;  %v799_v13 = vmax.f32 %v771_v12, 1e-24  ;;  %v1224_v11 = vpop.xlane.xlu0 %1223 }
 0x2dd   : > { %905 = vst.msk [vmem:[#allocation2 + $0x8] sm:$0xf] %vm902_vm3, %v6938_v41  ;;  %v832_v44 = vmul.f32 %v7650_v4, %v8469_v36  ;;  %v1250_v14 = vmax.f32 %v1224_v11, 1e-24 }
 0x2de   : > { %7663 = vrsqrt.f32 %v799_v13 }
 0x2df   : > { %v7652_v15 = vpop.eup %7651  ;;  %v6946_v51 = vpack.c.bf16 %v832_v44, %v832_v44  ;;  %7665 = vrsqrt.f32 %v1250_v14  ;;  %v972_v16 = vpop.xlane.xlu1 %971 }
 0x2e0   : > { %v7654_v52 = vpop.eup %7653  ;;  %v588_v17 = vmul.f32 %v7652_v15, %v8546_v21  ;;  %v1016_v54 = vmax.f32 %v972_v16, 1e-24  ;;  %v756_v0 = vpop.xlane.xlu0 %755 }
 0x2e1   : > { %913 = vst.msk [vmem:[#allocation2 + $0x28] sm:$0xf] %vm902_vm3, %v6946_v51  ;;  %v1049_v18 = vmul.f32 %v7654_v52, %v8474_v38  ;;  %v794_v56 = vmax.f32 %v756_v0, 1e-24 }
 0x2e2   : > { %v6927_v19 = vpack.c.bf16 %v588_v17, %v588_v17  ;;  %7667 = vrsqrt.f32 %v1016_v54 }
 0x2e3   : > { %v7656_v24 = vpop.eup %7655  ;;  %v6954_v26 = vpack.c.bf16 %v1049_v18, %v1049_v18  ;;  %7669 = vrsqrt.f32 %v794_v56  ;;  %v996_v57 = vpop.xlane.xlu1 %995 }
 0x2e4   : > { %v7658_v33 = vpop.eup %7657  ;;  %669 = vst.msk [vmem:[#allocation2 + $0x1c] sm:$0xf] %vm661_vm2, %v6927_v19  ;;  %v596_v58 = vmul.f32 %v7656_v24, %v8554_v29  ;;  %v1024_v35 = vmax.f32 %v996_v57, 1e-24  ;;  %v780_v59 = vpop.xlane.xlu0 %779 }
 0x2e5   : > { %1130 = vst.msk [vmem:[#allocation2 + $0x8] sm:$0xf] %vm1127_vm5, %v6954_v26  ;;  %v1057_v43 = vmul.f32 %v7658_v33, %v8469_v36  ;;  %v802_v45 = vmax.f32 %v780_v59, 1e-24 }
 0x2e6   : > { %v6935_v60 = vpack.c.bf16 %v596_v58, %v596_v58  ;;  %7671 = vrsqrt.f32 %v1024_v35 }
 0x2e7   : > { %v7660_v47 = vpop.eup %7659  ;;  %v6962_v61 = vpack.c.bf16 %v1057_v43, %v1057_v43  ;;  %7673 = vrsqrt.f32 %v802_v45  ;;  %v1197_v62 = vpop.xlane.xlu1 %1196 }
 0x2e8   : > { %v7662_v48 = vpop.eup %7661  ;;  %677 = vst.msk [vmem:[#allocation2 + $0x3c] sm:$0xf] %vm661_vm2, %v6935_v60  ;;  %v823_v55 = vmul.f32 %v7660_v47, %v8423_v20  ;;  %v1241_v31 = vmax.f32 %v1197_v62, 1e-24  ;;  %v981_v2 = vpop.xlane.xlu0 %980 }
 0x2e9   : > { %1138 = vst.msk [vmem:[#allocation2 + $0x28] sm:$0xf] %vm1127_vm5, %v6962_v61  ;;  %v1274_v25 = vmul.f32 %v7662_v48, %v8474_v38  ;;  %v1019_v3 = vmax.f32 %v981_v2, 1e-24 }
 0x2ea   : > { %v6937_v63 = vpack.c.bf16 %v823_v55, %v823_v55  ;;  %7675 = vrsqrt.f32 %v1241_v31 }
 0x2eb   : > { %v7664_v5 = vpop.eup %7663  ;;  %v6970_v39 = vpack.c.bf16 %v1274_v25, %v1274_v25  ;;  %7677 = vrsqrt.f32 %v1019_v3  ;;  %v1221_v1 = vpop.xlane.xlu1 %1220 }
 0x2ec   : > { %v7666_v23 = vpop.eup %7665  ;;  %904 = vst.msk [vmem:[#allocation2 + $0x4] sm:$0xf] %vm902_vm3, %v6937_v63  ;;  %v831_v27 = vmul.f32 %v7664_v5, %v8427_v22  ;;  %v1249_v6 = vmax.f32 %v1221_v1, 1e-24  ;;  %v1005_v8 = vpop.xlane.xlu0 %1004 }
 0x2ed   : > { %1355 = vst.msk [vmem:[#allocation2 + $0x8] sm:$0xf] %vm1352_vm6, %v6970_v39  ;;  %v1282_v9 = vmul.f32 %v7666_v23, %v8469_v36  ;;  %v1027_v37 = vmax.f32 %v1005_v8, 1e-24 }
 0x2ee   : > { %v6945_v38 = vpack.c.bf16 %v831_v27, %v831_v27  ;;  %7679 = vrsqrt.f32 %v1249_v6 }
 0x2ef   : > { %v7668_v40 = vpop.eup %7667  ;;  %v6978_v7 = vpack.c.bf16 %v1282_v9, %v1282_v9  ;;  %7681 = vrsqrt.f32 %v1027_v37  ;;  %v777_v42 = vpop.xlane.xlu1 %776 }
 0x2f0   : > { %v7670_v10 = vpop.eup %7669  ;;  %912 = vst.msk [vmem:[#allocation2 + $0x24] sm:$0xf] %vm902_vm3, %v6945_v38  ;;  %v1048_v41 = vmul.f32 %v7668_v40, %v8423_v20  ;;  %v801_v12 = vmax.f32 %v777_v42, 1e-24  ;;  %v1206_v4 = vpop.xlane.xlu0 %1205 }
 0x2f1   : > { %1363 = vst.msk [vmem:[#allocation2 + $0x28] sm:$0xf] %vm1352_vm6, %v6978_v7  ;;  %v826_v13 = vmul.f32 %v7670_v10, %v8489_v49  ;;  %v1244_v11 = vmax.f32 %v1206_v4, 1e-24 }
 0x2f2   : > { %v6953_v36 = vpack.c.bf16 %v1048_v41, %v1048_v41  ;;  %7683 = vrsqrt.f32 %v801_v12 }
 0x2f3   : > { %v7672_v44 = vpop.eup %7671  ;;  %v6940_v14 = vpack.c.bf16 %v826_v13, %v826_v13  ;;  %7685 = vrsqrt.f32 %v1244_v11  ;;  %v1002_v15 = vpop.xlane.xlu1 %1001 }
 0x2f4   : > { %v7674_v51 = vpop.eup %7673  ;;  %1129 = vst.msk [vmem:[#allocation2 + $0x4] sm:$0xf] %vm1127_vm5, %v6953_v36  ;;  %v1056_v16 = vmul.f32 %v7672_v44, %v8427_v22  ;;  %v1026_v52 = vmax.f32 %v1002_v15, 1e-24  ;;  %v1230_v17 = vpop.xlane.xlu0 %1229 }
 0x2f5   : > { %907 = vst.msk [vmem:[#allocation2 + $0x10] sm:$0xf] %vm902_vm3, %v6940_v14  ;;  %v834_v54 = vmul.f32 %v7674_v51, %v8498_v53  ;;  %v1252_v0 = vmax.f32 %v1230_v17, 1e-24 }
 0x2f6   : > { %v6961_v18 = vpack.c.bf16 %v1056_v16, %v1056_v16  ;;  %7687 = vrsqrt.f32 %v1026_v52 }
 0x2f7   : > { %v7676_v56 = vpop.eup %7675  ;;  %v6948_v19 = vpack.c.bf16 %v834_v54, %v834_v54  ;;  %7689 = vrsqrt.f32 %v1252_v0  ;;  %v1203_v24 = vpop.xlane.xlu1 %1202 }
 0x2f8   : > { %v7678_v26 = vpop.eup %7677  ;;  %1137 = vst.msk [vmem:[#allocation2 + $0x24] sm:$0xf] %vm1127_vm5, %v6961_v18  ;;  %v1273_v57 = vmul.f32 %v7676_v56, %v8423_v20  ;;  %v1243_v33 = vmax.f32 %v1203_v24, 1e-24  ;;  %v762_v58 = vpop.xlane.xlu0 %761 }
 0x2f9   : > { %915 = vst.msk [vmem:[#allocation2 + $0x30] sm:$0xf] %vm902_vm3, %v6948_v19  ;;  %v1051_v35 = vmul.f32 %v7678_v26, %v8489_v49  ;;  %v796_v59 = vmax.f32 %v762_v58, 1e-24 }
 0x2fa   : > { %v6969_v43 = vpack.c.bf16 %v1273_v57, %v1273_v57  ;;  %7691 = vrsqrt.f32 %v1243_v33 }
 0x2fb   : > { %v7680_v45 = vpop.eup %7679  ;;  %v6956_v60 = vpack.c.bf16 %v1051_v35, %v1051_v35  ;;  %7693 = vrsqrt.f32 %v796_v59  ;;  %v1227_v47 = vpop.xlane.xlu1 %1226 }
 0x2fc   : > { %v7682_v61 = vpop.eup %7681  ;;  %1354 = vst.msk [vmem:[#allocation2 + $0x4] sm:$0xf] %vm1352_vm6, %v6969_v43  ;;  %v1281_v62 = vmul.f32 %v7680_v45, %v8427_v22  ;;  %v1251_v48 = vmax.f32 %v1227_v47, 1e-24  ;;  %v786_v20 = vpop.xlane.xlu0 %785 }
 0x2fd   : > { %1132 = vst.msk [vmem:[#allocation2 + $0x10] sm:$0xf] %vm1127_vm5, %v6956_v60  ;;  %v1059_v55 = vmul.f32 %v7682_v61, %v8498_v53  ;;  %v804_v31 = vmax.f32 %v786_v20, 1e-24 }
 0x2fe   : > { %v6977_v2 = vpack.c.bf16 %v1281_v62, %v1281_v62  ;;  %7695 = vrsqrt.f32 %v1251_v48 }
 0x2ff   : > { %v7684_v25 = vpop.eup %7683  ;;  %v6964_v3 = vpack.c.bf16 %v1059_v55, %v1059_v55  ;;  %7697 = vrsqrt.f32 %v804_v31  ;;  %v759_v63 = vpop.xlane.xlu1 %758 }
 0x300   : > { %v7686_v5 = vpop.eup %7685  ;;  %1362 = vst.msk [vmem:[#allocation2 + $0x24] sm:$0xf] %vm1352_vm6, %v6977_v2  ;;  %v833_v39 = vmul.f32 %v7684_v25, %v8457_v32  ;;  %v795_v1 = vmax.f32 %v759_v63, 1e-24  ;;  %v987_v22 = vpop.xlane.xlu0 %986 }
 0x301   : > { %1140 = vst.msk [vmem:[#allocation2 + $0x30] sm:$0xf] %vm1127_vm5, %v6964_v3  ;;  %v1276_v23 = vmul.f32 %v7686_v5, %v8489_v49  ;;  %v1021_v27 = vmax.f32 %v987_v22, 1e-24 }
 0x302   : > { %v6947_v6 = vpack.c.bf16 %v833_v39, %v833_v39  ;;  %7699 = vrsqrt.f32 %v795_v1 }
 0x303   : > { %v7688_v8 = vpop.eup %7687  ;;  %v6972_v9 = vpack.c.bf16 %v1276_v23, %v1276_v23  ;;  %7701 = vrsqrt.f32 %v1021_v27  ;;  %v783_v37 = vpop.xlane.xlu1 %782 }
 0x304   : > { %v7690_v38 = vpop.eup %7689  ;;  %914 = vst.msk [vmem:[#allocation2 + $0x2c] sm:$0xf] %vm902_vm3, %v6947_v6  ;;  %v1058_v40 = vmul.f32 %v7688_v8, %v8457_v32  ;;  %v803_v7 = vmax.f32 %v783_v37, 1e-24  ;;  %v1011_v42 = vpop.xlane.xlu0 %1010 }
 0x305   : > { %1357 = vst.msk [vmem:[#allocation2 + $0x10] sm:$0xf] %vm1352_vm6, %v6972_v9  ;;  %v1284_v10 = vmul.f32 %v7690_v38, %v8498_v53  ;;  %v1029_v41 = vmax.f32 %v1011_v42, 1e-24 }
 0x306   : > { %v6963_v49 = vpack.c.bf16 %v1058_v40, %v1058_v40  ;;  %7703 = vrsqrt.f32 %v803_v7 }
 0x307   : > { %v7692_v12 = vpop.eup %7691  ;;  %v6980_v4 = vpack.c.bf16 %v1284_v10, %v1284_v10  ;;  %7705 = vrsqrt.f32 %v1029_v41  ;;  %v984_v13 = vpop.xlane.xlu1 %983 }
 0x308   : > { %v7694_v11 = vpop.eup %7693  ;;  %1139 = vst.msk [vmem:[#allocation2 + $0x2c] sm:$0xf] %vm1127_vm5, %v6963_v49  ;;  %v1275_v36 = vmul.f32 %v7692_v12, %v8453_v30  ;;  %v1020_v44 = vmax.f32 %v984_v13, 1e-24  ;;  %v1212_v14 = vpop.xlane.xlu0 %1211 }
 0x309   : > { %1365 = vst.msk [vmem:[#allocation2 + $0x30] sm:$0xf] %vm1352_vm6, %v6980_v4  ;;  %v828_v15 = vmul.f32 %v7694_v11, %v8552_v28  ;;  %v1246_v51 = vmax.f32 %v1212_v14, 1e-24 }
 0x30a   : > { %v6971_v53 = vpack.c.bf16 %v1275_v36, %v1275_v36  ;;  %7707 = vrsqrt.f32 %v1020_v44 }
 0x30b   : > { %v7696_v16 = vpop.eup %7695  ;;  %v6942_v52 = vpack.c.bf16 %v828_v15, %v828_v15  ;;  %7709 = vrsqrt.f32 %v1246_v51  ;;  %v1008_v17 = vpop.xlane.xlu1 %1007 }
 0x30c   : > { %v7698_v54 = vpop.eup %7697  ;;  %1356 = vst.msk [vmem:[#allocation2 + $0xc] sm:$0xf] %vm1352_vm6, %v6971_v53  ;;  %v1283_v0 = vmul.f32 %v7696_v16, %v8457_v32  ;;  %v1028_v18 = vmax.f32 %v1008_v17, 1e-24  ;;  %v1236_v30 = vpop.xlane.xlu0 %1235 }
 0x30d   : > { %909 = vst.msk [vmem:[#allocation2 + $0x18] sm:$0xf] %vm902_vm3, %v6942_v52  ;;  %v836_v56 = vmul.f32 %v7698_v54, %v8561_v34  ;;  %v1254_v19 = vmax.f32 %v1236_v30, 1e-24 }
 0x30e   : > { %v6979_v24 = vpack.c.bf16 %v1283_v0, %v1283_v0  ;;  %7711 = vrsqrt.f32 %v1028_v18 }
 0x30f   : > { %v7700_v26 = vpop.eup %7699  ;;  %v6950_v57 = vpack.c.bf16 %v836_v56, %v836_v56  ;;  %7713 = vrsqrt.f32 %v1254_v19  ;;  %v1209_v33 = vpop.xlane.xlu1 %1208 }
 0x310   : > { %v7702_v58 = vpop.eup %7701  ;;  %1364 = vst.msk [vmem:[#allocation2 + $0x2c] sm:$0xf] %vm1352_vm6, %v6979_v24  ;;  %v827_v35 = vmul.f32 %v7700_v26, %v8486_v46  ;;  %v1245_v59 = vmax.f32 %v1209_v33, 1e-24 }
 0x311   : > { %917 = vst.msk [vmem:[#allocation2 + $0x38] sm:$0xf] %vm902_vm3, %v6950_v57  ;;  %v1053_v32 = vmul.f32 %v7702_v58, %v8552_v28 }
 0x312   : > { %v6941_v43 = vpack.c.bf16 %v827_v35, %v827_v35  ;;  %7715 = vrsqrt.f32 %v1245_v59 }
 0x313   : > { %v7704_v45 = vpop.eup %7703  ;;  %v6958_v60 = vpack.c.bf16 %v1053_v32, %v1053_v32  ;;  %v1233_v47 = vpop.xlane.xlu1 %1232 }
 0x314   : > { %v7706_v61 = vpop.eup %7705  ;;  %908 = vst.msk [vmem:[#allocation2 + $0x14] sm:$0xf] %vm902_vm3, %v6941_v43  ;;  %v835_v62 = vmul.f32 %v7704_v45, %v8491_v50  ;;  %v1253_v48 = vmax.f32 %v1233_v47, 1e-24 }
 0x315   : > { %1134 = vst.msk [vmem:[#allocation2 + $0x18] sm:$0xf] %vm1127_vm5, %v6958_v60  ;;  %v1061_v20 = vmul.f32 %v7706_v61, %v8561_v34 }
 0x316   : > { %v6949_v55 = vpack.c.bf16 %v835_v62, %v835_v62  ;;  %7717 = vrsqrt.f32 %v1253_v48 }
 0x317   : > { %v7708_v31 = vpop.eup %7707  ;;  %v6966_v2 = vpack.c.bf16 %v1061_v20, %v1061_v20  ;;  %v765_v25 = vpop.xlane.xlu1 %764 }
 0x318   : > { %v7710_v3 = vpop.eup %7709  ;;  %916 = vst.msk [vmem:[#allocation2 + $0x34] sm:$0xf] %vm902_vm3, %v6949_v55  ;;  %v1052_v63 = vmul.f32 %v7708_v31, %v8486_v46  ;;  %v797_v5 = vmax.f32 %v765_v25, 1e-24 }
 0x319   : > { %1142 = vst.msk [vmem:[#allocation2 + $0x38] sm:$0xf] %vm1127_vm5, %v6966_v2  ;;  %v1278_v39 = vmul.f32 %v7710_v3, %v8552_v28 }
 0x31a   : > { %v6957_v1 = vpack.c.bf16 %v1052_v63, %v1052_v63  ;;  %7719 = vrsqrt.f32 %v797_v5 }
 0x31b   : > { %v7712_v22 = vpop.eup %7711  ;;  %v6974_v23 = vpack.c.bf16 %v1278_v39, %v1278_v39  ;;  %v789_v27 = vpop.xlane.xlu1 %788 }
 0x31c   : > { %v7714_v6 = vpop.eup %7713  ;;  %1133 = vst.msk [vmem:[#allocation2 + $0x14] sm:$0xf] %vm1127_vm5, %v6957_v1  ;;  %v1060_v8 = vmul.f32 %v7712_v22, %v8491_v50  ;;  %v805_v9 = vmax.f32 %v789_v27, 1e-24 }
 0x31d   : > { %1359 = vst.msk [vmem:[#allocation2 + $0x18] sm:$0xf] %vm1352_vm6, %v6974_v23  ;;  %v1286_v37 = vmul.f32 %v7714_v6, %v8561_v34 }
 0x31e   : > { %v6965_v38 = vpack.c.bf16 %v1060_v8, %v1060_v8  ;;  %7721 = vrsqrt.f32 %v805_v9 }
 0x31f   : > { %v7716_v40 = vpop.eup %7715  ;;  %v6982_v7 = vpack.c.bf16 %v1286_v37, %v1286_v37  ;;  %v990_v28 = vpop.xlane.xlu1 %989 }
 0x320   : > { %1141 = vst.msk [vmem:[#allocation2 + $0x34] sm:$0xf] %vm1127_vm5, %v6965_v38  ;;  %v1277_v42 = vmul.f32 %v7716_v40, %v8486_v46  ;;  %v1022_v10 = vmax.f32 %v990_v28, 1e-24 }
 0x321   : > { %1367 = vst.msk [vmem:[#allocation2 + $0x38] sm:$0xf] %vm1352_vm6, %v6982_v7 }
 0x322   : > { %v6973_v41 = vpack.c.bf16 %v1277_v42, %v1277_v42  ;;  %7723 = vrsqrt.f32 %v1022_v10 }
 0x323   : > { %v7718_v49 = vpop.eup %7717  ;;  %v1014_v12 = vpop.xlane.xlu1 %1013 }
 0x324   : > { %1358 = vst.msk [vmem:[#allocation2 + $0x14] sm:$0xf] %vm1352_vm6, %v6973_v41  ;;  %v1285_v34 = vmul.f32 %v7718_v49, %v8491_v50  ;;  %v1030_v4 = vmax.f32 %v1014_v12, 1e-24 }
 0x326   : > { %v6981_v13 = vpack.c.bf16 %v1285_v34, %v1285_v34  ;;  %7725 = vrsqrt.f32 %v1030_v4 }
 0x327   : > { %v7720_v11 = vpop.eup %7719  ;;  %v1215_v36 = vpop.xlane.xlu1 %1214 }
 0x328   : > { %1366 = vst.msk [vmem:[#allocation2 + $0x34] sm:$0xf] %vm1352_vm6, %v6981_v13  ;;  %v829_v46 = vmul.f32 %v7720_v11, %v8546_v21  ;;  %v1247_v44 = vmax.f32 %v1215_v36, 1e-24 }
 0x32a   : > { %v6943_v14 = vpack.c.bf16 %v829_v46, %v829_v46  ;;  %7727 = vrsqrt.f32 %v1247_v44 }
 0x32b   : > { %v7722_v15 = vpop.eup %7721  ;;  %v1239_v51 = vpop.xlane.xlu1 %1238 }
 0x32c   : > { %910 = vst.msk [vmem:[#allocation2 + $0x1c] sm:$0xf] %vm902_vm3, %v6943_v14  ;;  %v837_v53 = vmul.f32 %v7722_v15, %v8554_v29  ;;  %v1255_v16 = vmax.f32 %v1239_v51, 1e-24 }
 0x32e   : > { %v6951_v50 = vpack.c.bf16 %v837_v53, %v837_v53  ;;  %7729 = vrsqrt.f32 %v1255_v16 }
 0x32f   : > { %v7724_v52 = vpop.eup %7723 }
 0x330   : > { %918 = vst.msk [vmem:[#allocation2 + $0x3c] sm:$0xf] %vm902_vm3, %v6951_v50  ;;  %v1054_v17 = vmul.f32 %v7724_v52, %v8546_v21 }
 0x332   : > { %v6959_v54 = vpack.c.bf16 %v1054_v17, %v1054_v17 }
 0x333   : > { %v7726_v0 = vpop.eup %7725 }
 0x334   : > { %1135 = vst.msk [vmem:[#allocation2 + $0x1c] sm:$0xf] %vm1127_vm5, %v6959_v54  ;;  %v1062_v18 = vmul.f32 %v7726_v0, %v8554_v29 }
 0x336   : > { %v6967_v30 = vpack.c.bf16 %v1062_v18, %v1062_v18 }
 0x337   : > { %v7728_v56 = vpop.eup %7727 }
 0x338   : > { %1143 = vst.msk [vmem:[#allocation2 + $0x3c] sm:$0xf] %vm1127_vm5, %v6967_v30  ;;  %v1279_v19 = vmul.f32 %v7728_v56, %v8546_v21 }
 0x33a   : > { %v6975_v24 = vpack.c.bf16 %v1279_v19, %v1279_v19 }
 0x33b   : > { %v7730_v26 = vpop.eup %7729 }
 0x33c   : > { %1360 = vst.msk [vmem:[#allocation2 + $0x1c] sm:$0xf] %vm1352_vm6, %v6975_v24  ;;  %v1287_v57 = vmul.f32 %v7730_v26, %v8554_v29 }
 0x33e   : > { %v6983_v33 = vpack.c.bf16 %v1287_v57, %v1287_v57 }
 0x340   : > { %1368 = vst.msk [vmem:[#allocation2 + $0x3c] sm:$0xf] %vm1352_vm6, %v6983_v33 }
 0x341 PF: > { %v1441_v58 = vld [vmem:[%s11992_s2 + $0x58] sm:$0xff]  ;;  %vm1442_vm7 = vcmask 261120   ;;  %v1440_v21 = vld [vmem:[%s11992_s2 + $0x50] sm:$0xff]  ;;  %v1418_v35 = vld [vmem:[%s8360_s10] sm:$0xff]  ;;  %vm1676_vm8 = vcmask 64512   ;;  %s8266_s4 = smov 96  }
 0x342   : > { %7188 = vmatprep.subr.msk.mxu0 %vm1442_vm7, %v1441_v58  ;;  %7204 = vmatprep.mubr.msk.f32.mxu0 %vm1442_vm7, %v1418_v35  ;;  %v1439_v29 = vld [vmem:[%s11992_s2 + $0x48] sm:$0xff]  ;;  %v1438_v59 = vld [vmem:[%s11992_s2 + $0x40] sm:$0xff]  ;;  %v1437_v32 = vld [vmem:[%s11992_s2 + $0x38] sm:$0xff]  ;;  %vm2302_vm9 = vcmask 7168   ;;  %s8267_s6 = smov 112   ;;  %s8269_s7 = smov 88  }
 0x343   : > { %7189 = vmatpush3.xpose.msk.msra.mxu0 %vm1442_vm7, %v1441_v58  ;;  %v1436_v43 = vld [vmem:[%s11992_s2 + $0x30] sm:$0xff]  ;;  %v1435_v45 = vld [vmem:[%s11992_s2 + $0x28] sm:$0xff]  ;;  %v1434_v60 = vld [vmem:[%s11992_s2 + $0x20] sm:$0xff]  ;;  %vm3353_vm10 = vcmask 15368   ;;  %s8270_s8 = smov 104   ;;  %s8272_s9 = smov 80  }
 0x344   : > { %7190 = vmatprep.subr.msk.mxu0 %vm1442_vm7, %v1440_v21  ;;  %v1419_v47 = vld [vmem:[%s8360_s10 + $0x8] sm:$0xff]  ;;  %v1420_v61 = vld [vmem:[%s8360_s10 + $0x10] sm:$0xff]  ;;  %v1421_v62 = vld [vmem:[%s8360_s10 + $0x18] sm:$0xff]  ;;  %vm4437_vm11 = vcmask 23568   ;;  %s8273_s11 = smov 8   ;;  %vm3691_vm12 = vcmask 130112  }
 0x345   : > { %v1422_v48 = vld [vmem:[%s8360_s10 + $0x20] sm:$0xff]  ;;  %v1423_v20 = vld [vmem:[%s8360_s10 + $0x28] sm:$0xff]  ;;  %v1424_v55 = vld [vmem:[%s8360_s10 + $0x30] sm:$0xff]  ;;  %s8275_s13 = smov 72   ;;  %vm5521_vm13 = vcmask 31768   ;;  %s8276_s14 = smov 16  }
 0x346   : > { %v1425_v31 = vld [vmem:[%s8360_s10 + $0x38] sm:$0xff]  ;;  %v1426_v2 = vld [vmem:[%s8360_s10 + $0x40] sm:$0xff]  ;;  %v1427_v25 = vld [vmem:[%s8360_s10 + $0x48] sm:$0xff]  ;;  %vm4775_vm14 = vcmask 195712   ;;  %s8277_s22 = smov 24   ;;  %vm5859_vm15 = vcmask 261312  }
 0x347   : > { %7191 = vmatpush3.xpose.msk.msra.mxu0 %vm1442_vm7, %v1440_v21  ;;  %v1428_v3 = vld [vmem:[%s8360_s10 + $0x50] sm:$0xff]  ;;  %v1429_v63 = vld [vmem:[%s8360_s10 + $0x58] sm:$0xff]  ;;  %v1430_v5 = vld [vmem:[%s8360_s10 + $0x60] sm:$0xff]  ;;  %p6917_p10 = scmp.ne.s32.totalorder %s8233_s12, 1 }
 0x348   : > { %7192 = vmatprep.subr.msk.mxu0 %vm1442_vm7, %v1439_v29  ;;  %v1431_v39 = vld [vmem:[%s8360_s10 + $0x68] sm:$0xff]  ;;  %v1432_v1 = vld [vmem:[%s8360_s10 + $0x70] sm:$0xff]  ;;  %v1433_v22 = vld [vmem:[%s8360_s10 + $0x78] sm:$0xff]  ;;  %s8264_s10 = smov 120  }
 0x34b   : > { %7193 = vmatpush3.xpose.msk.msra.mxu0 %vm1442_vm7, %v1439_v29 }
 0x34c   : > { %7194 = vmatprep.subr.msk.mxu0 %vm1442_vm7, %v1438_v59 }
 0x34f   : > { %7195 = vmatpush3.xpose.msk.msra.mxu0 %vm1442_vm7, %v1438_v59 }
 0x350   : > { %7196 = vmatprep.subr.msk.mxu0 %vm1442_vm7, %v1437_v32 }
 0x353   : > { %7197 = vmatpush3.xpose.msk.msra.mxu0 %vm1442_vm7, %v1437_v32 }
 0x354   : > { %7198 = vmatprep.subr.msk.mxu0 %vm1442_vm7, %v1436_v43 }
 0x357   : > { %7199 = vmatpush3.xpose.msk.msra.mxu0 %vm1442_vm7, %v1436_v43 }
 0x358   : > { %7200 = vmatprep.subr.msk.mxu0 %vm1442_vm7, %v1435_v45 }
 0x35b   : > { %7201 = vmatpush3.xpose.msk.msra.mxu0 %vm1442_vm7, %v1435_v45 }
 0x35c   : > { %7202 = vmatprep.subr.msk.mxu0 %vm1442_vm7, %v1434_v60 }
 0x35f   : > { %7203 = vmatpush3.xpose.msk.msra.mxu0 %vm1442_vm7, %v1434_v60  ;;  %v7747_v60 = vld [vmem:[#allocation2] sm:$0xff]  }
 0x360   : > { %7244 = vmatprep.mubr.msk.bf16.mxu1 %vm1676_vm8, %v7747_v60 }
 0x362   : > { %7205 = vmatmul.mubr.msk.f32.vlgmr.msra.gmra.mxu0 %vm1442_vm7, %v1419_v47 }
 0x363   : > { %7207 = vmatprep.mubr.msk.f32.mxu0 %vm1442_vm7, %v1420_v61 }
 0x366   : > { %7208 = vmatmul.mubr.msk.f32.gmra.mxu0 %vm1442_vm7, %v1421_v62 }
 0x367   : > { %7210 = vmatprep.mubr.msk.f32.mxu0 %vm1442_vm7, %v1422_v48 }
 0x36a   : > { %7211 = vmatmul.mubr.msk.f32.gmra.mxu0 %vm1442_vm7, %v1423_v20 }
 0x36b   : > { %7213 = vmatprep.mubr.msk.f32.mxu0 %vm1442_vm7, %v1424_v55 }
 0x36e   : > { %7214 = vmatmul.mubr.msk.f32.gmra.mxu0 %vm1442_vm7, %v1425_v31 }
 0x36f   : > { %7216 = vmatprep.mubr.msk.f32.mxu0 %vm1442_vm7, %v1426_v2 }
 0x372   : > { %7217 = vmatmul.mubr.msk.f32.gmra.mxu0 %vm1442_vm7, %v1427_v25 }
 0x373   : > { %7219 = vmatprep.mubr.msk.f32.mxu0 %vm1442_vm7, %v1428_v3 }
 0x376   : > { %7220 = vmatmul.mubr.msk.f32.gmra.mxu0 %vm1442_vm7, %v1429_v63 }
 0x377   : > { %7222 = vmatprep.mubr.msk.f32.mxu0 %vm1442_vm7, %v1430_v5 }
 0x37a   : > { %7223 = vmatmul.mubr.msk.f32.gmra.mxu0 %vm1442_vm7, %v1431_v39 }
 0x37b   : > { %7225 = vmatprep.mubr.msk.f32.mxu0 %vm1442_vm7, %v1432_v1 }
 0x37e   : > { %7226 = vmatmul.mubr.msk.f32.gmra.mxu0 %vm1442_vm7, %v1433_v22 }
 0x422   : > { %v8913_v23 = vpop.f32.mrf.mxu0 }
 0x423   : > { %v9025_v35 = vmul.f32 %v8913_v23, %v8913_v23 }
 0x424   : > { %v8915_v27 = vpop.f32.mrf.mxu0 }
 0x425   : > { %12182 = vst [vmem:[#allocation22_spill] sm:$0xff] %v9025_v35  ;;  %v1680_v59 = vsel %vm1676_vm8, %v9025_v35, 0.0  ;;  %v9037_v43 = vmul.f32 %v8915_v27, %v8915_v27 }
 0x426   : > { %v8917_v6 = vpop.f32.mrf.mxu0 }
 0x427   : > { %v9013_v57 = vmul.f32 %v8917_v6, %v8917_v6  ;;  %12184 = vst [vmem:[#allocation24_spill] sm:$0xff] %v9037_v43  ;;  %v1677_v45 = vsel %vm1676_vm8, %v9037_v43, 0.0 }
 0x428   : > { %v8919_v8 = vpop.f32.mrf.mxu0 }
 0x429   : > { %12180 = vst [vmem:[#allocation20_spill] sm:$0xff] %v9013_v57  ;;  %v1686_v58 = vsel %vm1676_vm8, %v9013_v57, 0.0  ;;  %v9029_v29 = vmul.f32 %v8919_v8, %v8919_v8 }
 0x42a   : > { %v8921_v9 = vpop.f32.mrf.mxu0 }
 0x42b   : > { %v9001_v56 = vmul.f32 %v8921_v9, %v8921_v9  ;;  %12183 = vst [vmem:[#allocation23_spill] sm:$0xff] %v9029_v29  ;;  %v1683_v32 = vsel %vm1676_vm8, %v9029_v29, 0.0 }
 0x42c   : > { %v8923_v37 = vpop.f32.mrf.mxu0 }
 0x42d   : > { %12178 = vst [vmem:[#allocation18_spill] sm:$0xff] %v9001_v56  ;;  %v1692_v24 = vsel %vm1676_vm8, %v9001_v56, 0.0  ;;  %v9017_v33 = vmul.f32 %v8923_v37, %v8923_v37 }
 0x42e   : > { %v8925_v38 = vpop.f32.mrf.mxu0 }
 0x42f   : > { %v8989_v54 = vmul.f32 %v8925_v38, %v8925_v38  ;;  %12181 = vst [vmem:[#allocation21_spill] sm:$0xff] %v9017_v33  ;;  %v1689_v21 = vsel %vm1676_vm8, %v9017_v33, 0.0 }
 0x430   : > { %v8927_v40 = vpop.f32.mrf.mxu0 }
 0x431   : > { %12176 = vst [vmem:[#allocation16_spill] sm:$0xff] %v8989_v54  ;;  %v1698_v18 = vsel %vm1676_vm8, %v8989_v54, 0.0  ;;  %v9005_v19 = vmul.f32 %v8927_v40, %v8927_v40 }
 0x432   : > { %v8929_v7 = vpop.f32.mrf.mxu0 }
 0x433   : > { %v8977_v16 = vmul.f32 %v8929_v7, %v8929_v7  ;;  %12179 = vst [vmem:[#allocation19_spill] sm:$0xff] %v9005_v19  ;;  %v1695_v26 = vsel %vm1676_vm8, %v9005_v19, 0.0 }
 0x434   : > { %v8931_v28 = vpop.f32.mrf.mxu0 }
 0x435   : > { %12174 = vst [vmem:[#allocation14_spill] sm:$0xff] %v8977_v16  ;;  %v1704_v52 = vsel %vm1676_vm8, %v8977_v16, 0.0  ;;  %v8993_v0 = vmul.f32 %v8931_v28, %v8931_v28 }
 0x436   : > { %v8933_v42 = vpop.f32.mrf.mxu0 }
 0x437   : > { %12166 = vst [vmem:[#allocation6_spill] sm:$0xff] %v8933_v42  ;;  %v8965_v14 = vmul.f32 %v8933_v42, %v8933_v42  ;;  %12177 = vst [vmem:[#allocation17_spill] sm:$0xff] %v8993_v0  ;;  %v1701_v30 = vsel %vm1676_vm8, %v8993_v0, 0.0 }
 0x438   : > { %v8935_v10 = vpop.f32.mrf.mxu0 }
 0x439   : > { %12172 = vst [vmem:[#allocation12_spill] sm:$0xff] %v8965_v14  ;;  %v1710_v51 = vsel %vm1676_vm8, %v8965_v14, 0.0  ;;  %v8981_v50 = vmul.f32 %v8935_v10, %v8935_v10 }
 0x43a   : > { %v8937_v41 = vpop.f32.mrf.mxu0 }
 0x43b   : > { %12167 = vst [vmem:[#allocation7_spill] sm:$0xff] %v8937_v41  ;;  %v8951_v13 = vmul.f32 %v8937_v41, %v8937_v41  ;;  %12175 = vst [vmem:[#allocation15_spill] sm:$0xff] %v8981_v50  ;;  %v1707_v17 = vsel %vm1676_vm8, %v8981_v50, 0.0 }
 0x43c   : > { %v8939_v49 = vpop.f32.mrf.mxu0 }
 0x43d   : > { %12168 = vst [vmem:[#allocation8_spill] sm:$0xff] %v8939_v49  ;;  %v8943_v12 = vmul.f32 %v8939_v49, %v8939_v49  ;;  %12170 = vst [vmem:[#allocation10_spill] sm:$0xff] %v8951_v13  ;;  %v1716_v46 = vsel %vm1676_vm8, %v8951_v13, 0.0 }
 0x43e   : > { %v8945_v34 = vpop.f32.mrf.mxu0 }
 0x43f   : > { %12169 = vst [vmem:[#allocation9_spill] sm:$0xff] %v8943_v12  ;;  %v1713_v4 = vsel %vm1676_vm8, %v8943_v12, 0.0  ;;  %v8969_v15 = vmul.f32 %v8945_v34, %v8945_v34 }
 0x440   : > { %1714 = vadd.xlane.f32.xlu1 %v1713_v4  ;;  %v8953_v11 = vpop.f32.mrf.mxu0 }
 0x441   : > { %v8957_v36 = vmul.f32 %v8953_v11, %v8953_v11  ;;  %12173 = vst [vmem:[#allocation13_spill] sm:$0xff] %v8969_v15  ;;  %v1722_v53 = vsel %vm1676_vm8, %v8969_v15, 0.0 }
 0x443   : > { %12171 = vst [vmem:[#allocation11_spill] sm:$0xff] %v8957_v36  ;;  %v1719_v44 = vsel %vm1676_vm8, %v8957_v36, 0.0 }
 0x444   : > { %1717 = vadd.xlane.f32.xlu1 %v1716_v46  ;;  %1720 = vadd.xlane.f32.xlu0 %v1719_v44 }
 0x448   : > { %1711 = vadd.xlane.f32.xlu1 %v1710_v51  ;;  %1723 = vadd.xlane.f32.xlu0 %v1722_v53 }
 0x44c   : > { %1705 = vadd.xlane.f32.xlu1 %v1704_v52  ;;  %1708 = vadd.xlane.f32.xlu0 %v1707_v17 }
 0x450   : > { %1699 = vadd.xlane.f32.xlu1 %v1698_v18  ;;  %1702 = vadd.xlane.f32.xlu0 %v1701_v30 }
 0x454   : > { %1693 = vadd.xlane.f32.xlu1 %v1692_v24  ;;  %1696 = vadd.xlane.f32.xlu0 %v1695_v26 }
 0x458   : > { %1687 = vadd.xlane.f32.xlu1 %v1686_v58  ;;  %1690 = vadd.xlane.f32.xlu0 %v1689_v21 }
 0x45c   : > { %1681 = vadd.xlane.f32.xlu1 %v1680_v59  ;;  %1684 = vadd.xlane.f32.xlu0 %v1683_v32 }
 0x460   : > { %1678 = vadd.xlane.f32.xlu0 %v1677_v45 }
 0x46d   : > { %2670 = vrot.lane.b32.xlu1 %v8969_v15, %s8264_s10 }
 0x471   : > { %2664 = vrot.lane.b32.xlu1 %v8943_v12, %s8264_s10 }
 0x475   : > { %2666 = vrot.lane.b32.xlu1 %v8951_v13, %s8264_s10 }
 0x476   : > { %2668 = vrot.lane.b32.xlu0 %v8957_v36, %s8264_s10 }
 0x479   : > { %2662 = vrot.lane.b32.xlu1 %v8965_v14, %s8264_s10 }
 0x47a   : > { %2660 = vrot.lane.b32.xlu0 %v8981_v50, %s8264_s10 }
 0x47d   : > { %2658 = vrot.lane.b32.xlu1 %v8977_v16, %s8264_s10 }
 0x47e   : > { %2656 = vrot.lane.b32.xlu0 %v8993_v0, %s8264_s10 }
 0x481   : > { %2654 = vrot.lane.b32.xlu1 %v8989_v54, %s8264_s10 }
 0x482   : > { %2652 = vrot.lane.b32.xlu0 %v9005_v19, %s8264_s10 }
 0x485   : > { %2650 = vrot.lane.b32.xlu1 %v9001_v56, %s8264_s10 }
 0x486   : > { %2648 = vrot.lane.b32.xlu0 %v9017_v33, %s8264_s10 }
 0x489   : > { %2646 = vrot.lane.b32.xlu1 %v9013_v57, %s8264_s10 }
 0x48a   : > { %2644 = vrot.lane.b32.xlu0 %v9029_v29, %s8264_s10 }
 0x48d   : > { %2642 = vrot.lane.b32.xlu1 %v9025_v35, %s8264_s10 }
 0x48e   : > { %2640 = vrot.lane.b32.xlu0 %v9037_v43, %s8264_s10 }
 0x4c9   : > { %v1715_v47 = vpop.xlane.xlu1 %1714 }
 0x4ca   : > { %v1737_v55 = vmax.f32 %v1715_v47, 1e-24 }
 0x4cd   : > { %v1718_v61 = vpop.xlane.xlu1 %1717  ;;  %v1721_v62 = vpop.xlane.xlu0 %1720 }
 0x4ce   : > { %v1738_v48 = vmax.f32 %v1718_v61, 1e-24  ;;  %v1739_v20 = vmax.f32 %v1721_v62, 1e-24 }
 0x4d0   : > { %7779 = vrsqrt.f32 %v1738_v48 }
 0x4d1   : > { %v1712_v31 = vpop.xlane.xlu1 %1711  ;;  %v1724_v2 = vpop.xlane.xlu0 %1723  ;;  %7781 = vrsqrt.f32 %v1739_v20 }
 0x4d2   : > { %v1740_v25 = vmax.f32 %v1724_v2, 1e-24  ;;  %7783 = vrsqrt.f32 %v1737_v55  ;;  %v1736_v39 = vmax.f32 %v1712_v31, 1e-24 }
 0x4d4   : > { %7785 = vrsqrt.f32 %v1740_v25 }
 0x4d5   : > { %v1706_v3 = vpop.xlane.xlu1 %1705  ;;  %v1709_v63 = vpop.xlane.xlu0 %1708 }
 0x4d6   : > { %v1735_v5 = vmax.f32 %v1709_v63, 1e-24  ;;  %v1734_v17 = vmax.f32 %v1706_v3, 1e-24 }
 0x4d8   : > { %7787 = vrsqrt.f32 %v1735_v5 }
 0x4d9   : > { %v1700_v1 = vpop.xlane.xlu1 %1699  ;;  %v1703_v22 = vpop.xlane.xlu0 %1702  ;;  %7789 = vrsqrt.f32 %v1736_v39 }
 0x4da   : > { %v1733_v51 = vmax.f32 %v1703_v22, 1e-24  ;;  %v1732_v20 = vmax.f32 %v1700_v1, 1e-24 }
 0x4dc   : > { %7791 = vrsqrt.f32 %v1733_v51 }
 0x4dd   : > { %v1694_v4 = vpop.xlane.xlu1 %1693  ;;  %v1697_v46 = vpop.xlane.xlu0 %1696  ;;  %7793 = vrsqrt.f32 %v1734_v17 }
 0x4de   : > { %v7780_v44 = vpop.eup %7779  ;;  %v1731_v47 = vmax.f32 %v1697_v46, 1e-24 }
 0x4df   : > { %v7782_v53 = vpop.eup %7781  ;;  %v1770_v21 = vmul.f32 %v7780_v44, %v8937_v41  ;;  %v1730_v44 = vmax.f32 %v1694_v4, 1e-24 }
 0x4e0   : > { %v7784_v52 = vpop.eup %7783  ;;  %v1771_v26 = vmul.f32 %v7782_v53, %v8953_v11  ;;  %7795 = vrsqrt.f32 %v1731_v47 }
 0x4e1   : > { %v1688_v18 = vpop.xlane.xlu1 %1687  ;;  %v1691_v30 = vpop.xlane.xlu0 %1690  ;;  %v1769_v60 = vmul.f32 %v7784_v52, %v8939_v49  ;;  %7797 = vrsqrt.f32 %v1732_v20 }
 0x4e2   : > { %v7786_v24 = vpop.eup %7785  ;;  %v1729_v39 = vmax.f32 %v1691_v30, 1e-24 }
 0x4e3   : > { %v1772_v58 = vmul.f32 %v7786_v24, %v8945_v34  ;;  %v1779_v62 = vpack.c.bf16 %v1770_v21, %v1769_v60  ;;  %v1728_v60 = vmax.f32 %v1688_v18, 1e-24 }
 0x4e4   : > { %7799 = vrsqrt.f32 %v1729_v39 }
 0x4e5   : > { %v9077_v59 = vpop.xlane.xlu1 %1681  ;;  %v1685_v32 = vpop.xlane.xlu0 %1684  ;;  %v1780_v45 = vpack.c.bf16 %v1772_v58, %v1771_v26  ;;  %v1880_v22 = vsel %vm1676_vm8, %v1779_v62, 0  ;;  %7801 = vrsqrt.f32 %v1730_v44 }
 0x4e6   : > { %v7788_v48 = vpop.eup %7787  ;;  %v1727_v58 = vmax.f32 %v1685_v32, 1e-24  ;;  %v1726_v18 = vmax.f32 %v9077_v59, 1e-24 }
 0x4e7   : > { %7492 = vmatprep.subr.msk.bf16.mxu1 %vm1676_vm8, %v1780_v45  ;;  %v1883_v61 = vsel %vm1676_vm8, %v1780_v45, 0  ;;  %v7790_v2 = vpop.eup %7789  ;;  %v1767_v25 = vmul.f32 %v7788_v48, %v8935_v10 }
 0x4e8   : > { %7229 = vmatpush3.bf16.xpose.msra.mxu1 %v1883_v61  ;;  %v1768_v5 = vmul.f32 %v7790_v2, %v8933_v42  ;;  %7803 = vrsqrt.f32 %v1727_v58 }
 0x4e9   : > { %7493 = vmatprep.subr.msk.bf16.mxu1 %vm1676_vm8, %v1779_v62  ;;  %v9083_v55 = vpop.permute.xlu1 %2670  ;;  %v1679_v31 = vpop.xlane.xlu0 %1678  ;;  %7805 = vrsqrt.f32 %v1728_v60 }
 0x4ea   : > { %v1778_v1 = vpack.c.bf16 %v1768_v5, %v1767_v25  ;;  %v7792_v46 = vpop.eup %7791  ;;  %v1725_v25 = vmax.f32 %v1679_v31, 1e-24 }
 0x4eb   : > { %v7794_v52 = vpop.eup %7793  ;;  %v1765_v17 = vmul.f32 %v7792_v46, %v8931_v28 }
 0x4ec   : > { %v1766_v26 = vmul.f32 %v7794_v52, %v8929_v7  ;;  %v1877_v4 = vsel %vm1676_vm8, %v1778_v1, 0  ;;  %7807 = vrsqrt.f32 %v1725_v25 }
 0x4ed   : > { %v9086_v3 = vpop.permute.xlu1 %2664  ;;  %v9088_v63 = vpop.permute.xlu0 %2668  ;;  %7809 = vrsqrt.f32 %v1726_v18 }
 0x4ee   : > { %v1777_v21 = vpack.c.bf16 %v1766_v26, %v1765_v17  ;;  %v7796_v45 = vpop.eup %7795 }
 0x4ef   : > { %v7798_v62 = vpop.eup %7797  ;;  %v1763_v48 = vmul.f32 %v7796_v45, %v8927_v40 }
 0x4f0   : > { %7231 = vmatpush3.bf16.xpose.msra.mxu1 %v1880_v22  ;;  %v1764_v32 = vmul.f32 %v7798_v62, %v8925_v38  ;;  %v1874_v5 = vsel %vm1676_vm8, %v1777_v21, 0 }
 0x4f1   : > { %7494 = vmatprep.subr.msk.bf16.mxu1 %vm1676_vm8, %v1778_v1  ;;  %v9093_v51 = vpop.permute.xlu1 %2666  ;;  %v9095_v53 = vpop.permute.xlu0 %2660 }
 0x4f2   : > { %v1776_v39 = vpack.c.bf16 %v1764_v32, %v1763_v48  ;;  %v7800_v22 = vpop.eup %7799 }
 0x4f3   : > { %v7802_v44 = vpop.eup %7801  ;;  %v1761_v52 = vmul.f32 %v7800_v22, %v8923_v37 }
 0x4f4   : > { %v1762_v31 = vmul.f32 %v7802_v44, %v8921_v9 }
 0x4f5   : > { %v9098_v24 = vpop.permute.xlu1 %2662  ;;  %v9100_v30 = vpop.permute.xlu0 %2656 }
 0x4f6   : > { %v7804_v59 = vpop.eup %7803 }
 0x4f7   : > { %v7806_v60 = vpop.eup %7805  ;;  %v1759_v32 = vmul.f32 %v7804_v59, %v8919_v8 }
 0x4f8   : > { %7233 = vmatpush3.bf16.xpose.msra.mxu1 %v1877_v4  ;;  %v1871_v4 = vsel %vm1676_vm8, %v1776_v39, 0  ;;  %v1760_v25 = vmul.f32 %v7806_v60, %v8917_v6  ;;  %v7749_v60 = vld [vmem:[#allocation2 + $0x10] sm:$0xff]  }
 0x4f9   : > { %7495 = vmatprep.subr.msk.bf16.mxu1 %vm1676_vm8, %v1777_v21  ;;  %v9105_v47 = vpop.permute.xlu1 %2658  ;;  %v2653_v61 = vpop.permute.xlu0 %2652  ;;  %v1775_v21 = vpack.c.bf16 %v1762_v31, %v1761_v52 }
 0x4fa   : > { %v1774_v18 = vpack.c.bf16 %v1760_v25, %v1759_v32  ;;  %v7808_v44 = vpop.eup %7807 }
 0x4fb   : > { %v1868_v22 = vsel %vm1676_vm8, %v1775_v21, 0 }
 0x4fd   : > { %v2655_v20 = vpop.permute.xlu1 %2654  ;;  %v2649_v2 = vpop.permute.xlu0 %2648 }
 0x4fe   : > { %v2709_v31 = vsel %vm1676_vm8, %v2655_v20, 0.0  ;;  %v2721_v20 = vsel %vm1676_vm8, %v9098_v24, 0.0  ;;  %v2730_v24 = vsel %vm1676_vm8, %v9088_v63, 0.0 }
 0x500   : > { %7235 = vmatpush3.bf16.xpose.msra.mxu1 %v1874_v5 }
 0x501   : > { %7496 = vmatprep.subr.msk.bf16.mxu1 %vm1676_vm8, %v1776_v39  ;;  %v2651_v1 = vpop.permute.xlu1 %2650  ;;  %v2645_v46 = vpop.permute.xlu0 %2644  ;;  %v2700_v39 = vsel %vm1676_vm8, %v2649_v2, 0.0 }
 0x502   : > { %v2694_v48 = vsel %vm1676_vm8, %v2645_v46, 0.0  ;;  %v7810_v46 = vpop.eup %7809  ;;  %v2703_v52 = vsel %vm1676_vm8, %v2651_v1, 0.0  ;;  %v2718_v1 = vsel %vm1676_vm8, %v9095_v53, 0.0  ;;  %v7748_v53 = vld [vmem:[#allocation2 + $0x8] sm:$0xff]  }
 0x503   : > { %v1758_v2 = vmul.f32 %v7810_v46, %v8913_v23 }
 0x505   : > { %v2647_v17 = vpop.permute.xlu1 %2646  ;;  %v2641_v26 = vpop.permute.xlu0 %2640 }
 0x506   : > { %v2688_v58 = vsel %vm1676_vm8, %v2641_v26, 0.0  ;;  %v2697_v5 = vsel %vm1676_vm8, %v2647_v17, 0.0  ;;  %v2706_v26 = vsel %vm1676_vm8, %v2653_v61, 0.0  ;;  %v1757_v17 = vmul.f32 %v7808_v44, %v8915_v27 }
 0x507   : > { %2689 = vadd.xlane.f32.xlu0 %v2688_v58  ;;  %v2712_v58 = vsel %vm1676_vm8, %v9100_v30, 0.0  ;;  %v2715_v61 = vsel %vm1676_vm8, %v9105_v47, 0.0  ;;  %v2724_v30 = vsel %vm1676_vm8, %v9086_v3, 0.0  ;;  %v2733_v47 = vsel %vm1676_vm8, %v9083_v55, 0.0  ;;  %v7750_v3 = vld [vmem:[#allocation2 + $0x18] sm:$0xff]   ;;  %v7753_v55 = vld [vmem:[#allocation2 + $0x30] sm:$0xff]  }
 0x508   : > { %7237 = vmatpush3.bf16.xpose.msra.mxu1 %v1871_v4  ;;  %v1865_v4 = vsel %vm1676_vm8, %v1774_v18, 0 }
 0x509   : > { %7497 = vmatprep.subr.msk.bf16.mxu1 %vm1676_vm8, %v1775_v21  ;;  %v2643_v45 = vpop.permute.xlu1 %2642  ;;  %v1773_v21 = vpack.c.bf16 %v1758_v2, %v1757_v17 }
 0x50a   : > { %v2691_v62 = vsel %vm1676_vm8, %v2643_v45, 0.0  ;;  %v2727_v45 = vsel %vm1676_vm8, %v9093_v51, 0.0  ;;  %v7752_v51 = vld [vmem:[#allocation2 + $0x28] sm:$0xff]  }
 0x50b   : > { %2692 = vadd.xlane.f32.xlu1 %v2691_v62  ;;  %2695 = vadd.xlane.f32.xlu0 %v2694_v48  ;;  %v1862_v59 = vsel %vm1676_vm8, %v1773_v21, 0  ;;  %v7751_v62 = vld [vmem:[#allocation2 + $0x20] sm:$0xff]   ;;  %v7754_v48 = vld [vmem:[#allocation2 + $0x38] sm:$0xff]  }
 0x50f   : > { %2698 = vadd.xlane.f32.xlu1 %v2697_v5  ;;  %2701 = vadd.xlane.f32.xlu0 %v2700_v39  ;;  %v11994_v39 = vmov 0  }
 0x510   : > { %7239 = vmatpush3.bf16.xpose.msra.mxu1 %v1868_v22  ;;  %7731 = vset.pattern.permute.xlu0 %v11994_v39  ;;  %v9172_v22 = vpack.c.bf16 %v8937_v41, %v8939_v49 }
 0x511   : > { %7498 = vmatprep.subr.msk.bf16.mxu1 %vm1676_vm8, %v1774_v18  ;;  %7732 = vset.pattern.permute.xlu1 %v11994_v39  ;;  %v9178_v18 = vpack.c.bf16 %v8945_v34, %v8953_v11 }
 0x512   : > { %12185 = vst [vmem:[#allocation25_spill] sm:$0xff] %v9172_v22 }
 0x513   : > { %2704 = vadd.xlane.f32.xlu1 %v2703_v52  ;;  %2707 = vadd.xlane.f32.xlu0 %v2706_v26  ;;  %12186 = vst [vmem:[#allocation26_spill] sm:$0xff] %v9178_v18 }
 0x517   : > { %2710 = vadd.xlane.f32.xlu1 %v2709_v31  ;;  %2713 = vadd.xlane.f32.xlu0 %v2712_v58 }
 0x518   : > { %7241 = vmatpush3.bf16.xpose.msra.mxu1 %v1865_v4 }
 0x519   : > { %7499 = vmatprep.subr.msk.bf16.mxu1 %vm1676_vm8, %v1773_v21 }
 0x51b   : > { %2716 = vadd.xlane.f32.xlu1 %v2715_v61  ;;  %2719 = vadd.xlane.f32.xlu0 %v2718_v1 }
 0x51f   : > { %2722 = vadd.xlane.f32.xlu1 %v2721_v20  ;;  %2725 = vadd.xlane.f32.xlu0 %v2724_v30 }
 0x520   : > { %7243 = vmatpush3.bf16.xpose.msra.mxu1 %v1862_v59 }
 0x523   : > { %2728 = vadd.xlane.f32.xlu1 %v2727_v45  ;;  %2734 = vadd.xlane.f32.xlu0 %v2733_v47 }
 0x527   : > { %7245 = vmatmul.mubr.msk.bf16.vlgmr.msra.gmra.mxu1 %vm1676_vm8, %v7748_v53  ;;  %2731 = vadd.xlane.f32.xlu1 %v2730_v24 }
 0x528   : > { %7248 = vmatprep.mubr.msk.bf16.mxu1 %vm1676_vm8, %v7749_v60 }
 0x52f   : > { %7249 = vmatmul.mubr.msk.bf16.gmra.mxu1 %vm1676_vm8, %v7750_v3 }
 0x530   : > { %7252 = vmatprep.mubr.msk.bf16.mxu1 %vm1676_vm8, %v7751_v62 }
 0x537   : > { %7253 = vmatmul.mubr.msk.bf16.gmra.mxu1 %vm1676_vm8, %v7752_v51 }
 0x538   : > { %7256 = vmatprep.mubr.msk.bf16.mxu1 %vm1676_vm8, %v7753_v55 }
 0x53f   : > { %7257 = vmatmul.mubr.msk.bf16.gmra.mxu1 %vm1676_vm8, %v7754_v48 }
 0x590   : > { %v9218_v20 = vpop.xlane.xlu0 %2689 }
 0x594   : > { %v9220_v30 = vpop.xlane.xlu1 %2692  ;;  %v9222_v59 = vpop.xlane.xlu0 %2695 }
 0x598   : > { %v9224_v45 = vpop.xlane.xlu1 %2698  ;;  %v9226_v47 = vpop.xlane.xlu0 %2701 }
 0x59c   : > { %v9228_v53 = vpop.xlane.xlu1 %2704  ;;  %v9230_v60 = vpop.xlane.xlu0 %2707 }
 0x5a0   : > { %v9232_v24 = vpop.xlane.xlu1 %2710  ;;  %v9234_v3 = vpop.xlane.xlu0 %2713 }
 0x5a4   : > { %v9236_v62 = vpop.xlane.xlu1 %2716  ;;  %v2720_v51 = vpop.xlane.xlu0 %2719 }
 0x5a8   : > { %v2723_v55 = vpop.xlane.xlu1 %2722  ;;  %v2726_v48 = vpop.xlane.xlu0 %2725 }
 0x5ac   : > { %v2729_v39 = vpop.xlane.xlu1 %2728 }
 0x5e7   : > { %v9156_v63 = vpop.f32.mrf.mxu1 }
 0x5e8   : > { %2002 = vmax.xlane.f32.xlu0 %v9156_v63 }
 0x5e9   : > { %v9159_v32 = vpop.f32.mrf.mxu1 }
 0x5eb   : > { %v9161_v25 = vpop.f32.mrf.mxu1 }
 0x5ec   : > { %1998 = vmax.xlane.f32.xlu0 %v9159_v32 }
 0x5ed   : > { %v9164_v5 = vpop.f32.mrf.mxu1 }
 0x5ee   : > { %2000 = vmax.xlane.f32.xlu1 %v9164_v5 }
 0x5ef   : > { %v9182_v44 = vpop.f32.mrf.mxu1 }
 0x5f0   : > { %2004 = vmax.xlane.f32.xlu0 %v9161_v25 }
 0x5f1   : > { %v9184_v46 = vpop.f32.mrf.mxu1 }
 0x5f2   : > { %12187 = vst [vmem:[#allocation27_spill] sm:$0xff] %v9184_v46 }
 0x5f3   : > { %v9186_v52 = vpop.f32.mrf.mxu1 }
 0x5f5   : > { %v9188_v26 = vpop.f32.mrf.mxu1 }
 0x5f7   : > { %v9190_v17 = vpop.f32.mrf.mxu1 }
 0x5f8   : > { %12188 = vst [vmem:[#allocation28_spill] sm:$0xff] %v9190_v17 }
 0x5f9   : > { %v9192_v2 = vpop.f32.mrf.mxu1 }
 0x5fa   : > { %12189 = vst [vmem:[#allocation29_spill] sm:$0xff] %v9192_v2 }
 0x5fb   : > { %v9194_v31 = vpop.f32.mrf.mxu1 }
 0x5fc   : > { %12190 = vst [vmem:[#allocation30_spill] sm:$0xff] %v9194_v31 }
 0x5fd   : > { %v9198_v58 = vpop.f32.mrf.mxu1 }
 0x5fe   : > { %12191 = vst [vmem:[#allocation31_spill] sm:$0xff] %v9198_v58 }
 0x5ff   : > { %2467 = vrot.lane.b32.xlu1 %v9172_v22, %s8266_s4  ;;  %v9201_v4 = vpop.f32.mrf.mxu1  ;;  %v2749_v22 = vmax.f32 %v2729_v39, 1e-24 }
 0x600   : > { %12192 = vst [vmem:[#allocation32_spill] sm:$0xff] %v9201_v4 }
 0x601   : > { %v9205_v21 = vpop.f32.mrf.mxu1  ;;  %7811 = vrsqrt.f32 %v2749_v22  ;;  %v9250_v22 = vld [vmem:[#allocation4 + $0x8] sm:$0xff] }
 0x602   : > { %12193 = vst [vmem:[#allocation33_spill] sm:$0xff] %v9205_v21  ;;  %12199 = vst [vmem:[#allocation39_spill] sm:$0xff] %v9250_v22 }
 0x603   : > { %v9209_v61 = vpop.f32.mrf.mxu1 }
 0x604   : > { %12194 = vst [vmem:[#allocation34_spill] sm:$0xff] %v9209_v61 }
 0x605   : > { %v9214_v1 = vpop.f32.mrf.mxu1 }
 0x606   : > { %2469 = vrot.lane.b32.xlu0 %v9178_v18, %s8266_s4  ;;  %12195 = vst [vmem:[#allocation35_spill] sm:$0xff] %v9214_v1  ;;  %v2748_v18 = vmax.f32 %v2726_v48, 1e-24 }
 0x608   : > { %7813 = vrsqrt.f32 %v2748_v18 }
 0x623   : > { %2012 = vmax.xlane.f32.xlu1 %v9186_v52 }
 0x625   : > { %2010 = vmax.xlane.f32.xlu0 %v9182_v44 }
 0x627   : > { %2008 = vmax.xlane.f32.xlu1 %v9188_v26 }
 0x629   : > { %2006 = vmax.xlane.f32.xlu0 %v9184_v46  ;;  %v9259_v46 = vld [vmem:[#allocation4 + $0x18] sm:$0xff] }
 0x62a   : > { %12202 = vst [vmem:[#allocation42_spill] sm:$0xff] %v9259_v46 }
 0x62b   : > { %2020 = vmax.xlane.f32.xlu1 %v9194_v31 }
 0x62d   : > { %2018 = vmax.xlane.f32.xlu0 %v9190_v17 }
 0x62f   : > { %2016 = vmax.xlane.f32.xlu1 %v9198_v58  ;;  %v9243_v58 = vld [vmem:[#allocation4] sm:$0xff] }
 0x630   : > { %12198 = vst [vmem:[#allocation38_spill] sm:$0xff] %v9243_v58 }
 0x631   : > { %2014 = vmax.xlane.f32.xlu0 %v9192_v2  ;;  %v2732_v2 = vpop.xlane.xlu1 %2731 }
 0x632   : > { %v2750_v18 = vmax.f32 %v2732_v2, 1e-24 }
 0x633   : > { %2028 = vmax.xlane.f32.xlu1 %v9209_v61  ;;  %v2735_v61 = vpop.xlane.xlu0 %2734 }
 0x634   : > { %v2751_v17 = vmax.f32 %v2735_v61, 1e-24  ;;  %v2747_v61 = vmax.f32 %v2723_v55, 1e-24  ;;  %7815 = vrsqrt.f32 %v2750_v18 }
 0x635   : > { %2026 = vmax.xlane.f32.xlu0 %v9201_v4 }
 0x636   : > { %7817 = vrsqrt.f32 %v2751_v17 }
 0x637   : > { %2024 = vmax.xlane.f32.xlu1 %v9214_v1  ;;  %v9238_v1 = vld [vmem:[#allocation4 + $0x10] sm:$0xff]  ;;  %7819 = vrsqrt.f32 %v2747_v61  ;;  %v9300_v61 = vpack.c.bf16 %v8933_v42, %v8935_v10 }
 0x638   : > { %12196 = vst [vmem:[#allocation36_spill] sm:$0xff] %v9238_v1 }
 0x639   : > { %2022 = vmax.xlane.f32.xlu0 %v9205_v21  ;;  %12207 = vst [vmem:[#allocation47_spill] sm:$0xff] %v9300_v61 }
 0x671   : > { %v2003_v21 = vpop.xlane.xlu0 %2002 }
 0x672   : > { %v9241_v4 = vmax.f32 %v9238_v1, %v2003_v21  ;;  %v9257_v21 = vpack.c.bf16 %v8929_v7, %v8931_v28 }
 0x674   : > { %12197 = vst [vmem:[#allocation37_spill] sm:$0xff] %v9241_v4  ;;  %2610 = vst.msk [vmem:[#allocation4 + $0x10] sm:$0xff] %vm2302_vm9, %v9241_v4  ;;  %2106 = vperm.xlu0 %7731, %v9241_v4  }
 0x675   : > { %v1999_v39 = vpop.xlane.xlu0 %1998  ;;  %12201 = vst [vmem:[#allocation41_spill] sm:$0xff] %v9257_v21 }
 0x676   : > { %v9253_v48 = vmax.f32 %v9243_v58, %v1999_v39  ;;  %v9273_v39 = vpack.c.bf16 %v8921_v9, %v8923_v37  ;;  %v7812_v58 = vpop.eup %7811 }
 0x677   : > { %v2001_v31 = vpop.xlane.xlu1 %2000  ;;  %v7814_v55 = vpop.eup %7813  ;;  %v2781_v17 = vmul.f32 %v7812_v58, %v8937_v41  ;;  %v9307_v58 = vpack.c.bf16 %v8925_v38, %v8927_v40 }
 0x678   : > { %12200 = vst [vmem:[#allocation40_spill] sm:$0xff] %v9253_v48  ;;  %2608 = vst.msk [vmem:[#allocation4] sm:$0xff] %vm2302_vm9, %v9253_v48  ;;  %v9266_v4 = vmax.f32 %v9250_v22, %v2001_v31  ;;  %2463 = vrot.lane.b32.xlu0 %v9257_v21, %s8266_s4  ;;  %2096 = vperm.xlu1 %7732, %v9253_v48   ;;  %v2746_v21 = vmax.f32 %v2720_v51, 1e-24  ;;  %v2780_v48 = vmul.f32 %v7814_v55, %v8939_v49 }
 0x679   : > { %v2005_v2 = vpop.xlane.xlu0 %2004  ;;  %12204 = vst [vmem:[#allocation44_spill] sm:$0xff] %v9273_v39  ;;  %12208 = vst [vmem:[#allocation48_spill] sm:$0xff] %v9307_v58  ;;  %v2745_v49 = vmax.f32 %v9236_v62, 1e-24  ;;  %v9343_v62 = vld [vmem:[#allocation4 + $0x20] sm:$0xff] }
 0x67a   : > { %12203 = vst [vmem:[#allocation43_spill] sm:$0xff] %v9266_v4  ;;  %2609 = vst.msk [vmem:[#allocation4 + $0x8] sm:$0xff] %vm2302_vm9, %v9266_v4  ;;  %v9280_v31 = vmax.f32 %v9259_v46, %v2005_v2  ;;  %v9291_v2 = vpack.c.bf16 %v8913_v23, %v8915_v27  ;;  %7821 = vrsqrt.f32 %v2746_v21  ;;  %v2790_v1 = vpack.c.bf16 %v2781_v17, %v2780_v48  ;;  %v7816_v21 = vpop.eup %7815 }
 0x67b   : > { %v2468_v51 = vpop.permute.xlu1 %2467  ;;  %v7818_v55 = vpop.eup %7817  ;;  %v9313_v48 = vpack.c.bf16 %v8917_v6, %v8919_v8  ;;  %7823 = vrsqrt.f32 %v2745_v49  ;;  %12215 = vst [vmem:[#allocation55_spill] sm:$0xff] %v9343_v62 }
 0x67c   : > { %12205 = vst [vmem:[#allocation45_spill] sm:$0xff] %v9280_v31  ;;  %2611 = vst.msk [vmem:[#allocation4 + $0x18] sm:$0xff] %vm2302_vm9, %v9280_v31  ;;  %2459 = vrot.lane.b32.xlu0 %v9273_v39, %s8266_s4  ;;  %2111 = vperm.xlu1 %7732, %v9280_v31   ;;  %v7820_v17 = vpop.eup %7819 }
 0x67d   : > { %v2470_v18 = vpop.permute.xlu0 %2469  ;;  %12206 = vst [vmem:[#allocation46_spill] sm:$0xff] %v9291_v2  ;;  %12209 = vst [vmem:[#allocation49_spill] sm:$0xff] %v9313_v48  ;;  %v2779_v46 = vmul.f32 %v7820_v17, %v8933_v42  ;;  %v9332_v17 = vld [vmem:[#allocation4 + $0x28] sm:$0xff] }
 0x67e   : > { %7260 = vmatprep.subr.bf16.mxu0 %v2470_v18  ;;  %12213 = vst [vmem:[#allocation53_spill] sm:$0xff] %v9332_v17 }
 0x67f   : > { %7261 = vmatpush3.bf16.msra.mxu0 %v2470_v18  ;;  %v2782_v18 = vmul.f32 %v7816_v21, %v8953_v11  ;;  %v2744_v21 = vmax.f32 %v9234_v3, 1e-24 }
 0x680   : > { %2455 = vrot.lane.b32.xlu0 %v9291_v2, %s8266_s4  ;;  %2101 = vperm.xlu1 %7732, %v9266_v4   ;;  %v9325_v2 = vld [vmem:[#allocation4 + $0x38] sm:$0xff] }
 0x681   : > { %7262 = vmatprep.subr.bf16.mxu0 %v2468_v51  ;;  %12210 = vst [vmem:[#allocation50_spill] sm:$0xff] %v9325_v2  ;;  %7825 = vrsqrt.f32 %v2744_v21  ;;  %v9355_v21 = vld [vmem:[#allocation4 + $0x58] sm:$0xff] }
 0x682   : > { %12217 = vst [vmem:[#allocation57_spill] sm:$0xff] %v9355_v21 }
 0x683   : > { %7263 = vmatpush3.bf16.msra.mxu0 %v2468_v51 }
 0x684   : > { %2884 = vrot.lane.b32.xlu0 %v2790_v1, %s8264_s10  ;;  %2465 = vrot.lane.b32.xlu1 %v9300_v61, %s8266_s4  ;;  %v2783_v1 = vmul.f32 %v7818_v55, %v8945_v34  ;;  %v9327_v55 = vld [vmem:[#allocation4 + $0x30] sm:$0xff] }
 0x685   : > { %12211 = vst [vmem:[#allocation51_spill] sm:$0xff] %v9327_v55 }
 0x686   : > { %v2791_v31 = vpack.c.bf16 %v2783_v1, %v2782_v18  ;;  %v2739_v1 = vmax.f32 %v9224_v45, 1e-24 }
 0x687   : > { %v7822_v51 = vpop.eup %7821 }
 0x688   : > { %2461 = vrot.lane.b32.xlu1 %v9307_v58, %s8266_s4  ;;  %v2778_v4 = vmul.f32 %v7822_v51, %v8935_v10 }
 0x68a   : > { %v2789_v22 = vpack.c.bf16 %v2779_v46, %v2778_v4  ;;  %v2743_v46 = vmax.f32 %v9232_v24, 1e-24 }
 0x68c   : > { %2457 = vrot.lane.b32.xlu1 %v9313_v48, %s8266_s4  ;;  %7827 = vrsqrt.f32 %v2743_v46 }
 0x690   : > { %2886 = vrot.lane.b32.xlu1 %v2791_v31, %s8264_s10 }
 0x694   : > { %2882 = vrot.lane.b32.xlu1 %v2789_v22, %s8264_s10  ;;  %v9367_v22 = vld [vmem:[#allocation4 + $0x50] sm:$0xff] }
 0x695   : > { %12219 = vst [vmem:[#allocation59_spill] sm:$0xff] %v9367_v22 }
 0x6ac   : > { %v2013_v41 = vpop.xlane.xlu1 %2012 }
 0x6ad   : > { %v9330_v18 = vmax.f32 %v9325_v2, %v2013_v41  ;;  %v2742_v41 = vmax.f32 %v9230_v60, 1e-24  ;;  %v2737_v60 = vmax.f32 %v9220_v30, 1e-24  ;;  %v9388_v2 = vld [vmem:[#allocation4 + $0x40] sm:$0xff] }
 0x6ae   : > { %v2011_v31 = vpop.xlane.xlu0 %2010  ;;  %12222 = vst [vmem:[#allocation62_spill] sm:$0xff] %v9388_v2 }
 0x6af   : > { %12212 = vst [vmem:[#allocation52_spill] sm:$0xff] %v9330_v18  ;;  %2615 = vst.msk [vmem:[#allocation4 + $0x38] sm:$0xff] %vm2302_vm9, %v9330_v18  ;;  %v9340_v49 = vmax.f32 %v9327_v55, %v2011_v31  ;;  %2131 = vperm.xlu0 %7731, %v9330_v18   ;;  %v2741_v31 = vmax.f32 %v9228_v53, 1e-24  ;;  %v2740_v18 = vmax.f32 %v9226_v47, 1e-24  ;;  %7829 = vrsqrt.f32 %v2742_v41 }
 0x6b0   : > { %v2009_v3 = vpop.xlane.xlu1 %2008  ;;  %7831 = vrsqrt.f32 %v2739_v1  ;;  %v2736_v1 = vmax.f32 %v9218_v20, 1e-24  ;;  %v9400_v47 = vld [vmem:[#allocation4 + $0x78] sm:$0xff]  ;;  %v9422_v20 = vld [vmem:[#allocation4 + $0x68] sm:$0xff] }
 0x6b1   : > { %12214 = vst [vmem:[#allocation54_spill] sm:$0xff] %v9340_v49  ;;  %2614 = vst.msk [vmem:[#allocation4 + $0x30] sm:$0xff] %vm2302_vm9, %v9340_v49  ;;  %v9351_v24 = vmax.f32 %v9332_v17, %v2009_v3  ;;  %2126 = vperm.xlu1 %7732, %v9340_v49   ;;  %v2738_v3 = vmax.f32 %v9222_v59, 1e-24  ;;  %v9378_v59 = vld [vmem:[#allocation4 + $0x48] sm:$0xff]  ;;  %7833 = vrsqrt.f32 %v2741_v31  ;;  %v9718_v17 = vld [vmem:[#allocation4 + $0x10] sm:$0xff] }
 0x6b2   : > { %v2007_v51 = vpop.xlane.xlu0 %2006  ;;  %12223 = vst [vmem:[#allocation63_spill] sm:$0xff] %v9400_v47  ;;  %12227 = vst [vmem:[#allocation67_spill] sm:$0xff] %v9422_v20 }
 0x6b3   : > { %12216 = vst [vmem:[#allocation56_spill] sm:$0xff] %v9351_v24  ;;  %2613 = vst.msk [vmem:[#allocation4 + $0x28] sm:$0xff] %vm2302_vm9, %v9351_v24  ;;  %v9363_v4 = vmax.f32 %v9343_v62, %v2007_v51  ;;  %2121 = vperm.xlu0 %7731, %v9351_v24   ;;  %7835 = vrsqrt.f32 %v2738_v3  ;;  %v9723_v62 = vld [vmem:[#allocation4] sm:$0xff] }
 0x6b4   : > { %v2021_v45 = vpop.xlane.xlu1 %2020  ;;  %7837 = vrsqrt.f32 %v2740_v18  ;;  %12271 = vst [vmem:[#allocation91_spill] sm:$0xff] %v9718_v17  ;;  %12273 = vst [vmem:[#allocation93_spill] sm:$0xff] %v9723_v62 }
 0x6b5   : > { %12218 = vst [vmem:[#allocation58_spill] sm:$0xff] %v9363_v4  ;;  %2612 = vst.msk [vmem:[#allocation4 + $0x20] sm:$0xff] %vm2302_vm9, %v9363_v4  ;;  %v9375_v46 = vmax.f32 %v9355_v21, %v2021_v45  ;;  %2116 = vperm.xlu1 %7732, %v9363_v4   ;;  %v7824_v45 = vpop.eup %7823  ;;  %7839 = vrsqrt.f32 %v2737_v60  ;;  %v9431_v21 = vld [vmem:[#allocation4 + $0x60] sm:$0xff] }
 0x6b6   : > { %v2019_v51 = vpop.xlane.xlu0 %2018  ;;  %v7826_v3 = vpop.eup %7825  ;;  %7841 = vrsqrt.f32 %v2736_v1  ;;  %12229 = vst [vmem:[#allocation69_spill] sm:$0xff] %v9431_v21 }
 0x6b7   : > { %12220 = vst [vmem:[#allocation60_spill] sm:$0xff] %v9375_v46  ;;  %2619 = vst.msk [vmem:[#allocation4 + $0x58] sm:$0xff] %vm2302_vm9, %v9375_v46  ;;  %v9386_v41 = vmax.f32 %v9367_v22, %v2019_v51  ;;  %v9410_v22 = vld [vmem:[#allocation4 + $0x70] sm:$0xff] }
 0x6b8   : > { %v2017_v53 = vpop.xlane.xlu1 %2016  ;;  %12225 = vst [vmem:[#allocation65_spill] sm:$0xff] %v9410_v22 }
 0x6b9   : > { %12221 = vst [vmem:[#allocation61_spill] sm:$0xff] %v9386_v41  ;;  %2618 = vst.msk [vmem:[#allocation4 + $0x50] sm:$0xff] %vm2302_vm9, %v9386_v41  ;;  %v9396_v31 = vmax.f32 %v9378_v59, %v2017_v53  ;;  %2151 = vperm.xlu1 %7732, %v9375_v46   ;;  %2146 = vperm.xlu0 %7731, %v9386_v41   ;;  %v2777_v53 = vmul.f32 %v7824_v45, %v8929_v7 }
 0x6ba   : > { %v2015_v51 = vpop.xlane.xlu0 %2014 }
 0x6bb   : > { %2617 = vst.msk [vmem:[#allocation4 + $0x48] sm:$0xff] %vm2302_vm9, %v9396_v31  ;;  %v9407_v18 = vmax.f32 %v9388_v2, %v2015_v51  ;;  %v2776_v51 = vmul.f32 %v7826_v3, %v8931_v28  ;;  %v7828_v2 = vpop.eup %7827 }
 0x6bc   : > { %v2029_v30 = vpop.xlane.xlu1 %2028 }
 0x6bd   : > { %12224 = vst [vmem:[#allocation64_spill] sm:$0xff] %v9407_v18  ;;  %2616 = vst.msk [vmem:[#allocation4 + $0x40] sm:$0xff] %vm2302_vm9, %v9407_v18  ;;  %v9417_v60 = vmax.f32 %v9400_v47, %v2029_v30  ;;  %2141 = vperm.xlu1 %7732, %v9396_v31   ;;  %2136 = vperm.xlu0 %7731, %v9407_v18   ;;  %v2788_v30 = vpack.c.bf16 %v2777_v53, %v2776_v51 }
 0x6be   : > { %v2027_v45 = vpop.xlane.xlu0 %2026 }
 0x6bf   : > { %12226 = vst [vmem:[#allocation66_spill] sm:$0xff] %v9417_v60  ;;  %2623 = vst.msk [vmem:[#allocation4 + $0x78] sm:$0xff] %vm2302_vm9, %v9417_v60  ;;  %v9429_v41 = vmax.f32 %v9410_v22, %v2027_v45  ;;  %v7830_v45 = vpop.eup %7829  ;;  %v2775_v22 = vmul.f32 %v7828_v2, %v8925_v38 }
 0x6c0   : > { %v2025_v46 = vpop.xlane.xlu1 %2024  ;;  %v7832_v53 = vpop.eup %7831  ;;  %v2774_v51 = vmul.f32 %v7830_v45, %v8927_v40 }
 0x6c1   : > { %12228 = vst [vmem:[#allocation68_spill] sm:$0xff] %v9429_v41  ;;  %2622 = vst.msk [vmem:[#allocation4 + $0x70] sm:$0xff] %vm2302_vm9, %v9429_v41  ;;  %v9438_v18 = vmax.f32 %v9422_v20, %v2025_v46  ;;  %2880 = vrot.lane.b32.xlu0 %v2788_v30, %s8264_s10  ;;  %2166 = vperm.xlu1 %7732, %v9429_v41   ;;  %v7834_v46 = vpop.eup %7833  ;;  %v2771_v2 = vmul.f32 %v7832_v53, %v8917_v6  ;;  %v7755_v53 = vld [vmem:[#allocation2] sm:$0xff]  }
 0x6c2   : > { %v2023_v1 = vpop.xlane.xlu0 %2022  ;;  %v7836_v47 = vpop.eup %7835  ;;  %v2787_v20 = vpack.c.bf16 %v2775_v22, %v2774_v51 }
 0x6c3   : > { %12230 = vst [vmem:[#allocation70_spill] sm:$0xff] %v9438_v18  ;;  %2621 = vst.msk [vmem:[#allocation4 + $0x68] sm:$0xff] %vm2302_vm9, %v9438_v18  ;;  %v9447_v3 = vmax.f32 %v9431_v21, %v2023_v1  ;;  %v7838_v41 = vpop.eup %7837  ;;  %v2773_v1 = vmul.f32 %v7834_v46, %v8921_v9  ;;  %v2770_v21 = vmul.f32 %v7836_v47, %v8919_v8  ;;  %v7761_v47 = vld [vmem:[#allocation2 + $0x30] sm:$0xff]  }
 0x6c4   : > { %v7840_v49 = vpop.eup %7839  ;;  %v2772_v30 = vmul.f32 %v7838_v41, %v8923_v37  ;;  %v7756_v41 = vld [vmem:[#allocation2 + $0x8] sm:$0xff]  }
 0x6c5   : > { %12231 = vst [vmem:[#allocation71_spill] sm:$0xff] %v9447_v3  ;;  %2620 = vst.msk [vmem:[#allocation4 + $0x60] sm:$0xff] %vm2302_vm9, %v9447_v3  ;;  %2161 = vperm.xlu0 %7731, %v9438_v18   ;;  %2156 = vperm.xlu1 %7732, %v9447_v3   ;;  %v7842_v18 = vpop.eup %7841  ;;  %v2785_v3 = vpack.c.bf16 %v2771_v2, %v2770_v21  ;;  %v2769_v45 = vmul.f32 %v7840_v49, %v8913_v23  ;;  %v7758_v21 = vld [vmem:[#allocation2 + $0x18] sm:$0xff]   ;;  %v7759_v49 = vld [vmem:[#allocation2 + $0x20] sm:$0xff]  }
 0x6c6   : > { %v2786_v55 = vpack.c.bf16 %v2773_v1, %v2772_v30  ;;  %v2768_v22 = vmul.f32 %v7842_v18, %v8915_v27  ;;  %v7762_v18 = vld [vmem:[#allocation2 + $0x38] sm:$0xff]  }
 0x6c8   : > { %v2784_v51 = vpack.c.bf16 %v2769_v45, %v2768_v22 }
 0x6c9   : > { %2171 = vperm.xlu0 %7731, %v9417_v60   ;;  %2878 = vrot.lane.b32.xlu1 %v2787_v20, %s8264_s10  ;;  %v7757_v20 = vld [vmem:[#allocation2 + $0x10] sm:$0xff]  }
 0x6cd   : > { %2876 = vrot.lane.b32.xlu0 %v2786_v55, %s8264_s10  ;;  %2874 = vrot.lane.b32.xlu1 %v2785_v3, %s8264_s10  ;;  %v7760_v55 = vld [vmem:[#allocation2 + $0x28] sm:$0xff]  }
 0x6d1   : > { %2872 = vrot.lane.b32.xlu0 %v2784_v51, %s8264_s10  ;;  %2848 = vrot.lane.b32.xlu1 %v7755_v53, %s8264_s10 }
 0x6d5   : > { %2850 = vrot.lane.b32.xlu0 %v7756_v41, %s8264_s10  ;;  %2852 = vrot.lane.b32.xlu1 %v7757_v20, %s8264_s10 }
 0x6d9   : > { %2854 = vrot.lane.b32.xlu0 %v7758_v21, %s8264_s10  ;;  %2856 = vrot.lane.b32.xlu1 %v7759_v49, %s8264_s10 }
 0x6dd   : > { %2858 = vrot.lane.b32.xlu0 %v7760_v55, %s8264_s10  ;;  %2860 = vrot.lane.b32.xlu1 %v7761_v47, %s8264_s10 }
 0x6e1   : > { %2862 = vrot.lane.b32.xlu0 %v7762_v18, %s8264_s10  ;;  %3752 = vrot.lane.b32.xlu1 %v8957_v36, %s8267_s6 }
 0x6e5   : > { %3754 = vrot.lane.b32.xlu0 %v8969_v15, %s8267_s6  ;;  %3748 = vrot.lane.b32.xlu1 %v8943_v12, %s8267_s6 }
 0x6e9   : > { %3750 = vrot.lane.b32.xlu0 %v8951_v13, %s8267_s6  ;;  %3744 = vrot.lane.b32.xlu1 %v8981_v50, %s8267_s6 }
 0x6ed   : > { %3746 = vrot.lane.b32.xlu0 %v8965_v14, %s8267_s6  ;;  %3740 = vrot.lane.b32.xlu1 %v8993_v0, %s8267_s6 }
 0x6ef   : > { %v2107_v1 = vpop.permute.xlu0 %2106 }
 0x6f0   : > { %v2176_v41 = vsub.f32 %v9156_v63, %v2107_v1 }
 0x6f1   : > { %3742 = vrot.lane.b32.xlu0 %v8977_v16, %s8267_s6  ;;  %3736 = vrot.lane.b32.xlu1 %v9005_v19, %s8267_s6 }
 0x6f2   : > { %v2194_v21 = vmul.f32 1.442695, %v2176_v41 }
 0x6f3   : > { %v2097_v3 = vpop.permute.xlu1 %2096  ;;  %v2464_v20 = vpop.permute.xlu0 %2463 }
 0x6f4   : > { %v2174_v46 = vsub.f32 %v9159_v32, %v2097_v3 }
 0x6f5   : > { %3738 = vrot.lane.b32.xlu0 %v8989_v54, %s8267_s6  ;;  %3732 = vrot.lane.b32.xlu1 %v9017_v33, %s8267_s6 }
 0x6f6   : > { %v2190_v2 = vmul.f32 1.442695, %v2174_v46 }
 0x6f7   : > { %v2112_v30 = vpop.permute.xlu1 %2111 }
 0x6f8   : > { %v2177_v32 = vsub.f32 %v9161_v25, %v2112_v30  ;;  %7843 = vpow2.f32 %v2190_v2  ;;  %v2460_v25 = vpop.permute.xlu0 %2459 }
 0x6f9   : > { %3734 = vrot.lane.b32.xlu0 %v9001_v56, %s8267_s6  ;;  %3728 = vrot.lane.b32.xlu1 %v9029_v29, %s8267_s6  ;;  %v12236_v29 = vld [vmem:[#allocation29_spill] sm:$0xff] }
 0x6fb   : > { %v2102_v45 = vpop.permute.xlu1 %2101 }
 0x6fc   : > { %v2175_v22 = vsub.f32 %v9164_v5, %v2102_v45  ;;  %v2196_v5 = vmul.f32 1.442695, %v2177_v32  ;;  %v2456_v3 = vpop.permute.xlu0 %2455 }
 0x6fd   : > { %3730 = vrot.lane.b32.xlu0 %v9013_v57, %s8267_s6  ;;  %3724 = vrot.lane.b32.xlu1 %v9037_v43, %s8267_s6 }
 0x6fe   : > { %v2192_v53 = vmul.f32 1.442695, %v2175_v22 }
 0x6ff   : > { %v2466_v51 = vpop.permute.xlu1 %2465 }
 0x700   : > { %7845 = vpow2.f32 %v2192_v53  ;;  %7264 = vmatprep.subr.bf16.mxu0 %v2466_v51  ;;  %v2885_v22 = vpop.permute.xlu0 %2884 }
 0x701   : > { %7265 = vmatpush3.bf16.msra.mxu0 %v2466_v51  ;;  %3726 = vrot.lane.b32.xlu0 %v9025_v35, %s8267_s6  ;;  %7847 = vpow2.f32 %v2196_v5  ;;  %v2931_v32 = vsel %vm1676_vm8, %v2885_v22, 0 }
 0x702   : > { %7266 = vmatprep.subr.bf16.mxu0 %v2464_v20  ;;  %7849 = vpow2.f32 %v2194_v21 }
 0x703   : > { %v2462_v49 = vpop.permute.xlu1 %2461 }
 0x705   : > { %7267 = vmatpush3.bf16.msra.mxu0 %v2464_v20  ;;  %v9512_v55 = vpop.eup %7843 }
 0x706   : > { %7268 = vmatprep.subr.bf16.mxu0 %v2462_v49 }
 0x707   : > { %v2458_v47 = vpop.permute.xlu1 %2457 }
 0x709   : > { %7269 = vmatpush3.bf16.msra.mxu0 %v2462_v49 }
 0x70a   : > { %7270 = vmatprep.subr.bf16.mxu0 %v2460_v25 }
 0x70b   : > { %v2887_v1 = vpop.permute.xlu1 %2886 }
 0x70c   : > { %v2934_v45 = vsel %vm1676_vm8, %v2887_v1, 0 }
 0x70d   : > { %v9514_v63 = vpop.eup %7845  ;;  %7271 = vmatpush3.bf16.msra.mxu0 %v2460_v25 }
 0x70e   : > { %7272 = vmatprep.subr.bf16.mxu0 %v2458_v47  ;;  %v2431_v18 = vpack.c.bf16 %v9514_v63, %v9512_v55  ;;  %v9518_v46 = vpop.eup %7847 }
 0x70f   : > { %v9520_v30 = vpop.eup %7849  ;;  %v2883_v53 = vpop.permute.xlu1 %2882 }
 0x710   : > { %7276 = vmatprep.mubr.bf16.mxu0 %v2431_v18  ;;  %v2432_v2 = vpack.c.bf16 %v9518_v46, %v9520_v30  ;;  %v2928_v51 = vsel %vm1676_vm8, %v2883_v53, 0 }
 0x711   : > { %7273 = vmatpush3.bf16.msra.mxu0 %v2458_v47 }
 0x712   : > { %7274 = vmatprep.subr.bf16.mxu0 %v2456_v3 }
 0x715   : > { %7275 = vmatpush3.bf16.msra.mxu0 %v2456_v3 }
 0x716   : > { %7500 = vmatprep.subr.msk.bf16.mxu0 %vm1676_vm8, %v2887_v1  ;;  %v12232_v1 = vld [vmem:[#allocation27_spill] sm:$0xff] }
 0x718   : > { %7277 = vmatmul.mubr.bf16.vlgmr.msra.gmra.mxu0 %v2432_v2 }
 0x719   : > { %7293 = vmatpush3.bf16.xpose.msra.mxu0 %v2934_v45 }
 0x71a   : > { %7501 = vmatprep.subr.msk.bf16.mxu0 %vm1676_vm8, %v2885_v22 }
 0x721   : > { %7295 = vmatpush3.bf16.xpose.msra.mxu0 %v2931_v32 }
 0x722   : > { %7502 = vmatprep.subr.msk.bf16.mxu0 %vm1676_vm8, %v2883_v53 }
 0x729   : > { %7297 = vmatpush3.bf16.xpose.msra.mxu0 %v2928_v51  ;;  %v12233_v51 = vld [vmem:[#allocation30_spill] sm:$0xff] }
 0x72a   : > { %v2132_v41 = vpop.permute.xlu0 %2131 }
 0x72b   : > { %v2181_v21 = vsub.f32 %v9186_v52, %v2132_v41 }
 0x72c   : > { %v2127_v20 = vpop.permute.xlu1 %2126 }
 0x72d   : > { %v2180_v5 = vsub.f32 %v9182_v44, %v2127_v20  ;;  %v2204_v45 = vmul.f32 1.442695, %v2181_v21  ;;  %v12234_v44 = vld [vmem:[#allocation28_spill] sm:$0xff] }
 0x72e   : > { %v2122_v49 = vpop.permute.xlu0 %2121 }
 0x72f   : > { %v2202_v25 = vmul.f32 1.442695, %v2180_v5  ;;  %v2179_v47 = vsub.f32 %v9188_v26, %v2122_v49  ;;  %v12235_v49 = vld [vmem:[#allocation31_spill] sm:$0xff] }
 0x730   : > { %v2117_v18 = vpop.permute.xlu1 %2116 }
 0x731   : > { %v2200_v3 = vmul.f32 1.442695, %v2179_v47  ;;  %v2178_v2 = vsub.f32 %v12232_v1, %v2117_v18  ;;  %7851 = vpow2.f32 %v2202_v25 }
 0x733   : > { %v2198_v22 = vmul.f32 1.442695, %v2178_v2  ;;  %7853 = vpow2.f32 %v2200_v3 }
 0x734   : > { %v2152_v32 = vpop.permute.xlu1 %2151  ;;  %v2147_v53 = vpop.permute.xlu0 %2146 }
 0x735   : > { %7855 = vpow2.f32 %v2198_v22  ;;  %v2185_v35 = vsub.f32 %v12233_v51, %v2152_v32  ;;  %v2184_v20 = vsub.f32 %v12234_v44, %v2147_v53  ;;  %v12238_v51 = vld [vmem:[#allocation33_spill] sm:$0xff] }
 0x736   : > { %7857 = vpow2.f32 %v2204_v45  ;;  %v12237_v45 = vld [vmem:[#allocation32_spill] sm:$0xff] }
 0x737   : > { %v2212_v52 = vmul.f32 1.442695, %v2185_v35  ;;  %v2210_v41 = vmul.f32 1.442695, %v2184_v20  ;;  %v12239_v20 = vld [vmem:[#allocation35_spill] sm:$0xff] }
 0x738   : > { %v2142_v5 = vpop.permute.xlu1 %2141  ;;  %v2137_v26 = vpop.permute.xlu0 %2136 }
 0x739   : > { %v2183_v47 = vsub.f32 %v12235_v49, %v2142_v5  ;;  %v2182_v18 = vsub.f32 %v12236_v29, %v2137_v26  ;;  %7859 = vpow2.f32 %v2212_v52 }
 0x73a   : > { %7861 = vpow2.f32 %v2210_v41 }
 0x73b   : > { %v2208_v21 = vmul.f32 1.442695, %v2183_v47  ;;  %v2206_v25 = vmul.f32 1.442695, %v2182_v18 }
 0x73c   : > { %v2167_v3 = vpop.permute.xlu1 %2166  ;;  %v2881_v1 = vpop.permute.xlu0 %2880 }
 0x73d   : > { %7863 = vpow2.f32 %v2208_v21  ;;  %7503 = vmatprep.subr.msk.bf16.mxu0 %vm1676_vm8, %v2881_v1  ;;  %v2925_v2 = vsel %vm1676_vm8, %v2881_v1, 0  ;;  %v2188_v22 = vsub.f32 %v12237_v45, %v2167_v3  ;;  %v12240_v1 = vld [vmem:[#allocation34_spill] sm:$0xff] }
 0x73e   : > { %7865 = vpow2.f32 %v2206_v25  ;;  %7299 = vmatpush3.bf16.xpose.msra.mxu0 %v2925_v2  ;;  %v9540_v35 = vpop.eup %7851 }
 0x73f   : > { %v2218_v18 = vmul.f32 1.442695, %v2188_v22 }
 0x740   : > { %v2157_v32 = vpop.permute.xlu1 %2156  ;;  %v2162_v53 = vpop.permute.xlu0 %2161 }
 0x741   : > { %v9543_v29 = vpop.eup %7853  ;;  %v2186_v44 = vsub.f32 %v12238_v51, %v2157_v32  ;;  %v2187_v52 = vsub.f32 %v12239_v20, %v2162_v53 }
 0x742   : > { %v9547_v41 = vpop.eup %7855 }
 0x743   : > { %v9549_v5 = vpop.eup %7857  ;;  %v2214_v26 = vmul.f32 1.442695, %v2186_v44  ;;  %v2216_v49 = vmul.f32 1.442695, %v2187_v52  ;;  %v2433_v47 = vpack.c.bf16 %v9543_v29, %v9547_v41 }
 0x744   : > { %v2879_v21 = vpop.permute.xlu1 %2878  ;;  %v2172_v25 = vpop.permute.xlu0 %2171  ;;  %v2434_v3 = vpack.c.bf16 %v9549_v5, %v9540_v35 }
 0x745   : > { %7867 = vpow2.f32 %v2214_v26  ;;  %v2189_v2 = vsub.f32 %v12240_v1, %v2172_v25  ;;  %7280 = vmatprep.mubr.bf16.mxu0 %v2433_v47  ;;  %7504 = vmatprep.subr.msk.bf16.mxu0 %vm1676_vm8, %v2879_v21  ;;  %v2922_v45 = vsel %vm1676_vm8, %v2879_v21, 0 }
 0x746   : > { %7869 = vpow2.f32 %v2216_v49  ;;  %7281 = vmatmul.mubr.bf16.gmra.mxu0 %v2434_v3  ;;  %v9558_v53 = vpop.eup %7859 }
 0x747   : > { %v2220_v32 = vmul.f32 1.442695, %v2189_v2  ;;  %7301 = vmatpush3.bf16.xpose.msra.mxu0 %v2922_v45  ;;  %7871 = vpow2.f32 %v2218_v18  ;;  %v9560_v44 = vpop.eup %7861 }
 0x748   : > { %v2875_v22 = vpop.permute.xlu1 %2874  ;;  %v2877_v51 = vpop.permute.xlu0 %2876  ;;  %v2436_v21 = vpack.c.bf16 %v9558_v53, %v9560_v44 }
 0x749   : > { %7873 = vpow2.f32 %v2220_v32  ;;  %7505 = vmatprep.subr.msk.bf16.mxu0 %vm1676_vm8, %v2877_v51  ;;  %v2919_v18 = vsel %vm1676_vm8, %v2877_v51, 0  ;;  %v2916_v51 = vsel %vm1676_vm8, %v2875_v22, 0 }
 0x74a   : > { %v9563_v20 = vpop.eup %7863 }
 0x74b   : > { %v9565_v52 = vpop.eup %7865 }
 0x74c   : > { %v2849_v26 = vpop.permute.xlu1 %2848  ;;  %v2873_v47 = vpop.permute.xlu0 %2872  ;;  %v2435_v49 = vpack.c.bf16 %v9563_v20, %v9565_v52 }
 0x74e   : > { %7284 = vmatprep.mubr.bf16.mxu0 %v2435_v49 }
 0x74f   : > { %7285 = vmatmul.mubr.bf16.gmra.mxu0 %v2436_v21 }
 0x750   : > { %7303 = vmatpush3.bf16.xpose.msra.mxu0 %v2919_v18  ;;  %v2853_v25 = vpop.permute.xlu1 %2852  ;;  %v2851_v3 = vpop.permute.xlu0 %2850 }
 0x751   : > { %7506 = vmatprep.subr.msk.bf16.mxu0 %vm1676_vm8, %v2875_v22 }
 0x752   : > { %v9573_v1 = vpop.eup %7867 }
 0x753   : > { %v9575_v2 = vpop.eup %7869 }
 0x754   : > { %v2857_v45 = vpop.permute.xlu1 %2856  ;;  %v2855_v32 = vpop.permute.xlu0 %2854  ;;  %v2437_v56 = vpack.c.bf16 %v9575_v2, %v9573_v1 }
 0x755   : > { %v9579_v19 = vpop.eup %7871 }
 0x756   : > { %v9581_v49 = vpop.eup %7873  ;;  %7288 = vmatprep.mubr.bf16.mxu0 %v2437_v56  ;;  %v2913_v56 = vsel %vm1676_vm8, %v2873_v47, 0 }
 0x757   : > { %v2438_v21 = vpack.c.bf16 %v9581_v49, %v9579_v19 }
 0x758   : > { %7305 = vmatpush3.bf16.xpose.msra.mxu0 %v2916_v51  ;;  %v2861_v18 = vpop.permute.xlu1 %2860  ;;  %v2859_v16 = vpop.permute.xlu0 %2858 }
 0x759   : > { %7507 = vmatprep.subr.msk.bf16.mxu0 %vm1676_vm8, %v2873_v47  ;;  %7289 = vmatmul.mubr.bf16.gmra.mxu0 %v2438_v21 }
 0x75a   : > { %7308 = vmatprep.mubr.msk.bf16.mxu0 %vm1676_vm8, %v2849_v26 }
 0x75c   : > { %v3753_v43 = vpop.permute.xlu1 %3752  ;;  %v2863_v57 = vpop.permute.xlu0 %2862 }
 0x75d   : > { %v3814_v50 = vsel %vm1676_vm8, %v3753_v43, 0.0 }
 0x75e   : > { %3815 = vadd.xlane.f32.xlu1 %v3814_v50 }
 0x760   : > { %7307 = vmatpush3.bf16.xpose.msra.mxu0 %v2913_v56  ;;  %v3749_v22 = vpop.permute.xlu1 %3748  ;;  %v3755_v13 = vpop.permute.xlu0 %3754 }
 0x761   : > { %v3808_v33 = vsel %vm1676_vm8, %v3749_v22, 0.0  ;;  %v3817_v51 = vsel %vm1676_vm8, %v3755_v13, 0.0 }
 0x762   : > { %3809 = vadd.xlane.f32.xlu1 %v3808_v33  ;;  %3818 = vadd.xlane.f32.xlu0 %v3817_v51 }
 0x764   : > { %v3745_v54 = vpop.permute.xlu1 %3744  ;;  %v3751_v21 = vpop.permute.xlu0 %3750 }
 0x765   : > { %v3802_v26 = vsel %vm1676_vm8, %v3745_v54, 0.0  ;;  %v3811_v36 = vsel %vm1676_vm8, %v3751_v21, 0.0 }
 0x766   : > { %3803 = vadd.xlane.f32.xlu1 %v3802_v26  ;;  %3812 = vadd.xlane.f32.xlu0 %v3811_v36 }
 0x767   : > { %7309 = vmatmul.mubr.msk.bf16.vlgmr.msra.gmra.mxu0 %vm1676_vm8, %v2851_v3 }
 0x768   : > { %v3741_v50 = vpop.permute.xlu1 %3740  ;;  %v3747_v43 = vpop.permute.xlu0 %3746  ;;  %7312 = vmatprep.mubr.msk.bf16.mxu0 %vm1676_vm8, %v2853_v25 }
 0x769   : > { %v3796_v47 = vsel %vm1676_vm8, %v3741_v50, 0.0  ;;  %v3805_v13 = vsel %vm1676_vm8, %v3747_v43, 0.0 }
 0x76a   : > { %3797 = vadd.xlane.f32.xlu1 %v3796_v47  ;;  %3806 = vadd.xlane.f32.xlu0 %v3805_v13 }
 0x76c   : > { %v3737_v33 = vpop.permute.xlu1 %3736  ;;  %v3743_v56 = vpop.permute.xlu0 %3742 }
 0x76d   : > { %v3790_v54 = vsel %vm1676_vm8, %v3737_v33, 0.0  ;;  %v3799_v22 = vsel %vm1676_vm8, %v3743_v56, 0.0 }
 0x76e   : > { %3791 = vadd.xlane.f32.xlu1 %v3790_v54  ;;  %3800 = vadd.xlane.f32.xlu0 %v3799_v22 }
 0x76f   : > { %7313 = vmatmul.mubr.msk.bf16.gmra.mxu0 %vm1676_vm8, %v2855_v32 }
 0x770   : > { %v3733_v36 = vpop.permute.xlu1 %3732  ;;  %v3739_v3 = vpop.permute.xlu0 %3738  ;;  %7316 = vmatprep.mubr.msk.bf16.mxu0 %vm1676_vm8, %v2857_v45 }
 0x771   : > { %v3784_v25 = vsel %vm1676_vm8, %v3733_v36, 0.0  ;;  %v3793_v51 = vsel %vm1676_vm8, %v3739_v3, 0.0 }
 0x772   : > { %3785 = vadd.xlane.f32.xlu1 %v3784_v25  ;;  %3794 = vadd.xlane.f32.xlu0 %v3793_v51 }
 0x774   : > { %v3729_v21 = vpop.permute.xlu1 %3728  ;;  %v3735_v26 = vpop.permute.xlu0 %3734 }
 0x775   : > { %v3778_v50 = vsel %vm1676_vm8, %v3729_v21, 0.0  ;;  %v3787_v43 = vsel %vm1676_vm8, %v3735_v26, 0.0 }
 0x776   : > { %3779 = vadd.xlane.f32.xlu1 %v3778_v50  ;;  %3788 = vadd.xlane.f32.xlu0 %v3787_v43 }
 0x777   : > { %7317 = vmatmul.mubr.msk.bf16.gmra.mxu0 %vm1676_vm8, %v2859_v16 }
 0x778   : > { %v3725_v32 = vpop.permute.xlu1 %3724  ;;  %v3731_v47 = vpop.permute.xlu0 %3730  ;;  %7320 = vmatprep.mubr.msk.bf16.mxu0 %vm1676_vm8, %v2861_v18 }
 0x779   : > { %v3772_v45 = vsel %vm1676_vm8, %v3725_v32, 0.0  ;;  %v3781_v13 = vsel %vm1676_vm8, %v3731_v47, 0.0 }
 0x77a   : > { %3773 = vadd.xlane.f32.xlu1 %v3772_v45  ;;  %3782 = vadd.xlane.f32.xlu0 %v3781_v13 }
 0x77c   : > { %v3727_v33 = vpop.permute.xlu0 %3726 }
 0x77d   : > { %v3775_v56 = vsel %vm1676_vm8, %v3727_v33, 0.0 }
 0x77e   : > { %3776 = vadd.xlane.f32.xlu0 %v3775_v56 }
 0x77f   : > { %7321 = vmatmul.mubr.msk.bf16.gmra.mxu0 %vm1676_vm8, %v2863_v57 }
 0x7d8   : > { %v9612_v54 = vpop.f32.mrf.mxu0 }
 0x7d9   : > { %12241 = vst [vmem:[#allocation27_spill] sm:$0xff] %v9612_v54 }
 0x7da   : > { %v9614_v22 = vpop.f32.mrf.mxu0 }
 0x7db   : > { %12242 = vst [vmem:[#allocation30_spill] sm:$0xff] %v9614_v22 }
 0x7dc   : > { %v9616_v16 = vpop.f32.mrf.mxu0 }
 0x7dd   : > { %12243 = vst [vmem:[#allocation28_spill] sm:$0xff] %v9616_v16 }
 0x7de   : > { %v9618_v36 = vpop.f32.mrf.mxu0 }
 0x7df   : > { %12244 = vst [vmem:[#allocation31_spill] sm:$0xff] %v9618_v36 }
 0x7e7   : > { %v3816_v22 = vpop.xlane.xlu1 %3815 }
 0x7eb   : > { %v3819_v54 = vpop.xlane.xlu0 %3818  ;;  %v3810_v0 = vpop.xlane.xlu1 %3809 }
 0x7ef   : > { %v3813_v36 = vpop.xlane.xlu0 %3812  ;;  %v3804_v14 = vpop.xlane.xlu1 %3803 }
 0x7f0   : > { %v3830_v24 = vmax.f32 %v3804_v14, 1e-24  ;;  %v9733_v14 = vld [vmem:[#allocation4 + $0x18] sm:$0xff] }
 0x7f1   : > { %12275 = vst [vmem:[#allocation95_spill] sm:$0xff] %v9733_v14 }
 0x7f3   : > { %v3807_v60 = vpop.xlane.xlu0 %3806  ;;  %v9700_v12 = vpop.xlane.xlu1 %3797 }
 0x806   : > { %v9620_v18 = vpop.f32.mrf.mxu0 }
 0x807   : > { %12245 = vst [vmem:[#allocation29_spill] sm:$0xff] %v9620_v18 }
 0x808   : > { %v9622_v3 = vpop.f32.mrf.mxu0 }
 0x809   : > { %12246 = vst [vmem:[#allocation32_spill] sm:$0xff] %v9622_v3 }
 0x80a   : > { %v9624_v25 = vpop.f32.mrf.mxu0 }
 0x80b   : > { %12247 = vst [vmem:[#allocation33_spill] sm:$0xff] %v9624_v25 }
 0x80c   : > { %v9626_v51 = vpop.f32.mrf.mxu0 }
 0x80d   : > { %12248 = vst [vmem:[#allocation35_spill] sm:$0xff] %v9626_v51 }
 0x80f   : > { %v9628_v21 = vpop.f32.mrf.mxu0 }
 0x810   : > { %12249 = vst [vmem:[#allocation34_spill] sm:$0xff] %v9628_v21 }
 0x811   : > { %v9630_v26 = vpop.f32.mrf.mxu0 }
 0x812   : > { %12250 = vst [vmem:[#allocation72_spill] sm:$0xff] %v9630_v26 }
 0x813   : > { %v9632_v57 = vpop.f32.mrf.mxu0 }
 0x814   : > { %12251 = vst [vmem:[#allocation73_spill] sm:$0xff] %v9632_v57 }
 0x815   : > { %v9634_v50 = vpop.f32.mrf.mxu0 }
 0x816   : > { %12252 = vst [vmem:[#allocation74_spill] sm:$0xff] %v9634_v50 }
 0x819   : > { %v9636_v43 = vpop.f32.mrf.mxu0 }
 0x81a   : > { %12253 = vst [vmem:[#allocation75_spill] sm:$0xff] %v9636_v43  ;;  %v12054_v43 = vmov 1  }
 0x81b   : > { %v9638_v32 = vpop.f32.mrf.mxu0  ;;  %7733 = vset.pattern.permute.xlu1 %v12054_v43  ;;  %7734 = vset.pattern.permute.xlu0 %v12054_v43 }
 0x81c   : > { %12254 = vst [vmem:[#allocation76_spill] sm:$0xff] %v9638_v32  ;;  %v12257_v32 = vld [vmem:[#allocation26_spill] sm:$0xff] }
 0x81d   : > { %v9640_v47 = vpop.f32.mrf.mxu0 }
 0x81e   : > { %12255 = vst [vmem:[#allocation77_spill] sm:$0xff] %v9640_v47  ;;  %v12258_v47 = vld [vmem:[#allocation25_spill] sm:$0xff] }
 0x81f   : > { %v9642_v45 = vpop.f32.mrf.mxu0 }
 0x820   : > { %12256 = vst [vmem:[#allocation78_spill] sm:$0xff] %v9642_v45 }
 0x827   : > { %v9644_v13 = vpop.f32.mrf.mxu0 }
 0x828   : > { %3053 = vmax.xlane.f32.xlu0 %v9644_v13 }
 0x829   : > { %v9647_v33 = vpop.f32.mrf.mxu0 }
 0x82a   : > { %3049 = vmax.xlane.f32.xlu1 %v9647_v33 }
 0x82b   : > { %v9650_v56 = vpop.f32.mrf.mxu0 }
 0x82c   : > { %3055 = vmax.xlane.f32.xlu0 %v9650_v56 }
 0x82d   : > { %v9653_v21 = vpop.f32.mrf.mxu0 }
 0x82f   : > { %v9662_v45 = vpop.f32.mrf.mxu0 }
 0x830   : > { %3051 = vmax.xlane.f32.xlu0 %v9653_v21  ;;  %12259 = vst [vmem:[#allocation79_spill] sm:$0xff] %v9662_v45 }
 0x831   : > { %v9664_v26 = vpop.f32.mrf.mxu0 }
 0x832   : > { %12260 = vst [vmem:[#allocation80_spill] sm:$0xff] %v9664_v26 }
 0x833   : > { %v9666_v25 = vpop.f32.mrf.mxu0 }
 0x834   : > { %12261 = vst [vmem:[#allocation81_spill] sm:$0xff] %v9666_v25 }
 0x835   : > { %v9668_v18 = vpop.f32.mrf.mxu0 }
 0x836   : > { %12262 = vst [vmem:[#allocation82_spill] sm:$0xff] %v9668_v18 }
 0x837   : > { %v9670_v57 = vpop.f32.mrf.mxu0 }
 0x838   : > { %12263 = vst [vmem:[#allocation83_spill] sm:$0xff] %v9670_v57 }
 0x839   : > { %v9673_v43 = vpop.f32.mrf.mxu0 }
 0x83a   : > { %12264 = vst [vmem:[#allocation84_spill] sm:$0xff] %v9673_v43 }
 0x83b   : > { %3504 = vrot.lane.b32.xlu1 %v12257_v32, %s8269_s7  ;;  %v9677_v32 = vpop.f32.mrf.mxu0 }
 0x83c   : > { %12265 = vst [vmem:[#allocation85_spill] sm:$0xff] %v9677_v32 }
 0x846   : > { %3502 = vrot.lane.b32.xlu0 %v12258_v47, %s8269_s7  ;;  %v9681_v47 = vpop.f32.mrf.mxu0 }
 0x847   : > { %12266 = vst [vmem:[#allocation86_spill] sm:$0xff] %v9681_v47 }
 0x848   : > { %v9684_v51 = vpop.f32.mrf.mxu0 }
 0x849   : > { %12267 = vst [vmem:[#allocation87_spill] sm:$0xff] %v9684_v51 }
 0x84a   : > { %v9688_v3 = vpop.f32.mrf.mxu0 }
 0x84b   : > { %12268 = vst [vmem:[#allocation88_spill] sm:$0xff] %v9688_v3 }
 0x84c   : > { %v9692_v16 = vpop.f32.mrf.mxu0 }
 0x84d   : > { %12269 = vst [vmem:[#allocation89_spill] sm:$0xff] %v9692_v16 }
 0x84e   : > { %v9695_v50 = vpop.f32.mrf.mxu0 }
 0x84f   : > { %12270 = vst [vmem:[#allocation90_spill] sm:$0xff] %v9695_v50 }
 0x85f   : > { %3061 = vmax.xlane.f32.xlu1 %v9662_v45  ;;  %v3831_v45 = vmax.f32 %v3807_v60, 1e-24 }
 0x863   : > { %3057 = vmax.xlane.f32.xlu1 %v9664_v26 }
 0x865   : > { %3063 = vmax.xlane.f32.xlu0 %v9666_v25 }
 0x867   : > { %3069 = vmax.xlane.f32.xlu1 %v9670_v57  ;;  %v3834_v57 = vmax.f32 %v3816_v22, 1e-24 }
 0x869   : > { %3059 = vmax.xlane.f32.xlu0 %v9668_v18 }
 0x86b   : > { %3065 = vmax.xlane.f32.xlu1 %v9673_v43 }
 0x86d   : > { %3071 = vmax.xlane.f32.xlu0 %v9677_v32  ;;  %v3835_v32 = vmax.f32 %v3819_v54, 1e-24 }
 0x86f   : > { %3077 = vmax.xlane.f32.xlu1 %v9684_v51  ;;  %v9698_v51 = vpop.xlane.xlu0 %3800  ;;  %7875 = vrsqrt.f32 %v3835_v32 }
 0x870   : > { %7877 = vrsqrt.f32 %v3834_v57  ;;  %v3833_v57 = vmax.f32 %v3813_v36, 1e-24 }
 0x871   : > { %3067 = vmax.xlane.f32.xlu0 %v9681_v47  ;;  %7879 = vrsqrt.f32 %v3831_v45 }
 0x872   : > { %7881 = vrsqrt.f32 %v3830_v24  ;;  %v9748_v24 = vld [vmem:[#allocation4 + $0x8] sm:$0xff] }
 0x873   : > { %3073 = vmax.xlane.f32.xlu1 %v9688_v3  ;;  %v9702_v15 = vpop.xlane.xlu0 %3794  ;;  %v9704_v3 = vpop.xlane.xlu1 %3791  ;;  %12277 = vst [vmem:[#allocation97_spill] sm:$0xff] %v9748_v24  ;;  %7883 = vrsqrt.f32 %v3833_v57 }
 0x875   : > { %3079 = vmax.xlane.f32.xlu0 %v9692_v16 }
 0x877   : > { %v9706_v47 = vpop.xlane.xlu0 %3788  ;;  %v9708_v16 = vpop.xlane.xlu1 %3785 }
 0x879   : > { %3075 = vmax.xlane.f32.xlu0 %v9695_v50 }
 0x87b   : > { %v9710_v43 = vpop.xlane.xlu0 %3782  ;;  %v9712_v50 = vpop.xlane.xlu1 %3779 }
 0x87f   : > { %v9714_v18 = vpop.xlane.xlu0 %3776  ;;  %v9716_v25 = vpop.xlane.xlu1 %3773 }
 0x8b1   : > { %v3054_v26 = vpop.xlane.xlu0 %3053 }
 0x8b2   : > { %v9721_v4 = vmax.f32 %v9718_v17, %v3054_v26  ;;  %v3832_v17 = vmax.f32 %v3810_v0, 1e-24  ;;  %v7876_v0 = vpop.eup %7875 }
 0x8b3   : > { %v3050_v54 = vpop.xlane.xlu1 %3049  ;;  %v7878_v32 = vpop.eup %7877  ;;  %v3867_v57 = vmul.f32 %v7876_v0, %v8945_v34 }
 0x8b4   : > { %12272 = vst [vmem:[#allocation92_spill] sm:$0xff] %v9721_v4  ;;  %3710 = vst.msk [vmem:[#allocation4 + $0x10] sm:$0xff] %vm3353_vm10, %v9721_v4  ;;  %v9730_v60 = vmax.f32 %v9723_v62, %v3050_v54  ;;  %3157 = vperm.xlu1 %7733, %v9721_v4   ;;  %7885 = vrsqrt.f32 %v3832_v17  ;;  %v3866_v17 = vmul.f32 %v7878_v32, %v8953_v11  ;;  %v12280_v32 = vld [vmem:[#allocation7_spill] sm:$0xff] }
 0x8b5   : > { %v3056_v26 = vpop.xlane.xlu0 %3055 }
 0x8b6   : > { %12274 = vst [vmem:[#allocation94_spill] sm:$0xff] %v9730_v60  ;;  %3708 = vst.msk [vmem:[#allocation4] sm:$0xff] %vm3353_vm10, %v9730_v60  ;;  %v9740_v45 = vmax.f32 %v9733_v14, %v3056_v26 }
 0x8b7   : > { %v3505_v22 = vpop.permute.xlu1 %3504 }
 0x8b8   : > { %12276 = vst [vmem:[#allocation96_spill] sm:$0xff] %v9740_v45  ;;  %3711 = vst.msk [vmem:[#allocation4 + $0x18] sm:$0xff] %vm3353_vm10, %v9740_v45  ;;  %7324 = vmatprep.subr.bf16.mxu1 %v3505_v22  ;;  %3147 = vperm.xlu1 %7733, %v9730_v60  }
 0x8b9   : > { %3162 = vperm.xlu0 %7734, %v9740_v45   ;;  %7325 = vmatpush3.bf16.msra.mxu1 %v3505_v22  ;;  %v3052_v36 = vpop.xlane.xlu0 %3051  ;;  %v12279_v45 = vld [vmem:[#allocation41_spill] sm:$0xff] }
 0x8ba   : > { %v9751_v26 = vmax.f32 %v9748_v24, %v3052_v36  ;;  %v7880_v36 = vpop.eup %7879 }
 0x8bb   : > { %v7882_v54 = vpop.eup %7881  ;;  %v3863_v24 = vmul.f32 %v7880_v36, %v8933_v42  ;;  %v12282_v36 = vld [vmem:[#allocation8_spill] sm:$0xff] }
 0x8bc   : > { %12278 = vst [vmem:[#allocation98_spill] sm:$0xff] %v9751_v26  ;;  %3709 = vst.msk [vmem:[#allocation4 + $0x8] sm:$0xff] %vm3353_vm10, %v9751_v26  ;;  %3152 = vperm.xlu1 %7733, %v9751_v26   ;;  %v3875_v26 = vpack.c.bf16 %v3867_v57, %v3866_v17  ;;  %v3862_v0 = vmul.f32 %v7882_v54, %v8935_v10  ;;  %v12281_v57 = vld [vmem:[#allocation46_spill] sm:$0xff]  ;;  %v3829_v54 = vmax.f32 %v9698_v51, 1e-24 }
 0x8bd   : > { %3496 = vrot.lane.b32.xlu0 %v9307_v58, %s8269_s7  ;;  %v3503_v22 = vpop.permute.xlu0 %3502 }
 0x8be   : > { %7326 = vmatprep.subr.bf16.mxu1 %v3503_v22  ;;  %v3873_v14 = vpack.c.bf16 %v3863_v24, %v3862_v0  ;;  %v3828_v0 = vmax.f32 %v9700_v12, 1e-24  ;;  %7887 = vrsqrt.f32 %v3829_v54  ;;  %v9796_v12 = vld [vmem:[#allocation4 + $0x38] sm:$0xff] }
 0x8bf   : > { %7327 = vmatpush3.bf16.msra.mxu1 %v3503_v22  ;;  %v7884_v22 = vpop.eup %7883  ;;  %12287 = vst [vmem:[#allocation101_spill] sm:$0xff] %v9796_v12 }
 0x8c0   : > { %3500 = vrot.lane.b32.xlu1 %v9300_v61, %s8269_s7  ;;  %v3865_v60 = vmul.f32 %v7884_v22, %v12280_v32  ;;  %7889 = vrsqrt.f32 %v3828_v0  ;;  %v3827_v22 = vmax.f32 %v9702_v15, 1e-24 }
 0x8c1   : > { %3492 = vrot.lane.b32.xlu0 %v9313_v48, %s8269_s7  ;;  %v7886_v4 = vpop.eup %7885 }
 0x8c2   : > { %v3864_v17 = vmul.f32 %v7886_v4, %v12282_v36  ;;  %v9791_v4 = vld [vmem:[#allocation4 + $0x20] sm:$0xff]  ;;  %7891 = vrsqrt.f32 %v3827_v22 }
 0x8c3   : > { %12285 = vst [vmem:[#allocation99_spill] sm:$0xff] %v9791_v4 }
 0x8c4   : > { %3498 = vrot.lane.b32.xlu1 %v12279_v45, %s8269_s7  ;;  %v3874_v62 = vpack.c.bf16 %v3865_v60, %v3864_v17  ;;  %v9819_v17 = vld [vmem:[#allocation4 + $0x28] sm:$0xff] }
 0x8c5   : > { %3970 = vrot.lane.b32.xlu0 %v3875_v26, %s8267_s6  ;;  %v9780_v26 = vld [vmem:[#allocation4 + $0x30] sm:$0xff]  ;;  %12291 = vst [vmem:[#allocation105_spill] sm:$0xff] %v9819_v17 }
 0x8c6   : > { %12283 = vst [vmem:[#allocation7_spill] sm:$0xff] %v9780_v26 }
 0x8c8   : > { %3494 = vrot.lane.b32.xlu1 %v9273_v39, %s8269_s7 }
 0x8c9   : > { %3966 = vrot.lane.b32.xlu0 %v3873_v14, %s8267_s6 }
 0x8cc   : > { %3490 = vrot.lane.b32.xlu1 %v12281_v57, %s8269_s7 }
 0x8d0   : > { %3968 = vrot.lane.b32.xlu1 %v3874_v62, %s8267_s6 }
 0x8e8   : > { %v3062_v24 = vpop.xlane.xlu1 %3061 }
 0x8e9   : > { %v9784_v42 = vmax.f32 %v9780_v26, %v3062_v24  ;;  %v9807_v24 = vld [vmem:[#allocation4 + $0x50] sm:$0xff]  ;;  %v3823_v26 = vmax.f32 %v9710_v43, 1e-24 }
 0x8ea   : > { %12289 = vst [vmem:[#allocation103_spill] sm:$0xff] %v9807_v24 }
 0x8eb   : > { %12284 = vst [vmem:[#allocation8_spill] sm:$0xff] %v9784_v42  ;;  %3714 = vst.msk [vmem:[#allocation4 + $0x30] sm:$0xff] %vm3353_vm10, %v9784_v42  ;;  %3177 = vperm.xlu0 %7734, %v9784_v42  }
 0x8ec   : > { %v3058_v62 = vpop.xlane.xlu1 %3057 }
 0x8ed   : > { %v9794_v51 = vmax.f32 %v9791_v4, %v3058_v62  ;;  %v3826_v62 = vmax.f32 %v9704_v3, 1e-24  ;;  %v9851_v3 = vld [vmem:[#allocation4 + $0x70] sm:$0xff] }
 0x8ee   : > { %v3064_v60 = vpop.xlane.xlu0 %3063  ;;  %12297 = vst [vmem:[#allocation111_spill] sm:$0xff] %v9851_v3 }
 0x8ef   : > { %12286 = vst [vmem:[#allocation100_spill] sm:$0xff] %v9794_v51  ;;  %3712 = vst.msk [vmem:[#allocation4 + $0x20] sm:$0xff] %vm3353_vm10, %v9794_v51  ;;  %v9804_v54 = vmax.f32 %v9796_v12, %v3064_v60  ;;  %3167 = vperm.xlu0 %7734, %v9794_v51   ;;  %v3825_v60 = vmax.f32 %v9706_v47, 1e-24  ;;  %7893 = vrsqrt.f32 %v3826_v62  ;;  %v3822_v12 = vmax.f32 %v9712_v50, 1e-24 }
 0x8f0   : > { %v3070_v0 = vpop.xlane.xlu1 %3069  ;;  %v3821_v62 = vmax.f32 %v9714_v18, 1e-24  ;;  %v9873_v18 = vld [vmem:[#allocation4 + $0x60] sm:$0xff] }
 0x8f1   : > { %12288 = vst [vmem:[#allocation102_spill] sm:$0xff] %v9804_v54  ;;  %3715 = vst.msk [vmem:[#allocation4 + $0x38] sm:$0xff] %vm3353_vm10, %v9804_v54  ;;  %v9815_v15 = vmax.f32 %v9807_v24, %v3070_v0  ;;  %3182 = vperm.xlu1 %7733, %v9804_v54   ;;  %v3824_v0 = vmax.f32 %v9708_v16, 1e-24  ;;  %v9830_v54 = vld [vmem:[#allocation4 + $0x40] sm:$0xff]  ;;  %7895 = vrsqrt.f32 %v3825_v60 }
 0x8f2   : > { %v3060_v42 = vpop.xlane.xlu0 %3059  ;;  %12293 = vst [vmem:[#allocation107_spill] sm:$0xff] %v9830_v54  ;;  %7897 = vrsqrt.f32 %v3823_v26  ;;  %12301 = vst [vmem:[#allocation115_spill] sm:$0xff] %v9873_v18 }
 0x8f3   : > { %12290 = vst [vmem:[#allocation104_spill] sm:$0xff] %v9815_v15  ;;  %3718 = vst.msk [vmem:[#allocation4 + $0x50] sm:$0xff] %vm3353_vm10, %v9815_v15  ;;  %v9827_v14 = vmax.f32 %v9819_v17, %v3060_v42  ;;  %v9841_v42 = vld [vmem:[#allocation4 + $0x58] sm:$0xff]  ;;  %7899 = vrsqrt.f32 %v3824_v0  ;;  %v12307_v17 = vmov 0  }
 0x8f4   : > { %v3066_v47 = vpop.xlane.xlu1 %3065  ;;  %12295 = vst [vmem:[#allocation109_spill] sm:$0xff] %v9841_v42  ;;  %7901 = vrsqrt.f32 %v3822_v12 }
 0x8f5   : > { %12292 = vst [vmem:[#allocation106_spill] sm:$0xff] %v9827_v14  ;;  %3713 = vst.msk [vmem:[#allocation4 + $0x28] sm:$0xff] %vm3353_vm10, %v9827_v14  ;;  %v9838_v22 = vmax.f32 %v9830_v54, %v3066_v47  ;;  %3172 = vperm.xlu1 %7733, %v9827_v14   ;;  %v7888_v47 = vpop.eup %7887  ;;  %v3820_v14 = vmax.f32 %v9716_v25, 1e-24  ;;  %7903 = vrsqrt.f32 %v3821_v62 }
 0x8f6   : > { %v3072_v16 = vpop.xlane.xlu0 %3071  ;;  %v7890_v0 = vpop.eup %7889 }
 0x8f7   : > { %12294 = vst [vmem:[#allocation108_spill] sm:$0xff] %v9838_v22  ;;  %3716 = vst.msk [vmem:[#allocation4 + $0x40] sm:$0xff] %vm3353_vm10, %v9838_v22  ;;  %v9849_v43 = vmax.f32 %v9841_v42, %v3072_v16  ;;  %v9863_v16 = vld [vmem:[#allocation4 + $0x48] sm:$0xff]  ;;  %7905 = vrsqrt.f32 %v3820_v14 }
 0x8f8   : > { %v3078_v60 = vpop.xlane.xlu1 %3077  ;;  %12299 = vst [vmem:[#allocation113_spill] sm:$0xff] %v9863_v16  ;;  %v9900_v14 = vld [vmem:[#allocation4 + $0x68] sm:$0xff] }
 0x8f9   : > { %12296 = vst [vmem:[#allocation110_spill] sm:$0xff] %v9849_v43  ;;  %3719 = vst.msk [vmem:[#allocation4 + $0x58] sm:$0xff] %vm3353_vm10, %v9849_v43  ;;  %v9859_v26 = vmax.f32 %v9851_v3, %v3078_v60  ;;  %3197 = vperm.xlu1 %7733, %v9815_v15   ;;  %3202 = vperm.xlu0 %7734, %v9849_v43   ;;  %v3861_v60 = vmul.f32 %v7888_v47, %v8929_v7  ;;  %v9885_v47 = vld [vmem:[#allocation4 + $0x78] sm:$0xff]  ;;  %v12376_v15 = vld [vmem:[#allocation68_spill] sm:$0xff] }
 0x8fa   : > { %v3068_v50 = vpop.xlane.xlu0 %3067  ;;  %12303 = vst [vmem:[#allocation117_spill] sm:$0xff] %v9885_v47  ;;  %12305 = vst [vmem:[#allocation119_spill] sm:$0xff] %v9900_v14 }
 0x8fb   : > { %12298 = vst [vmem:[#allocation112_spill] sm:$0xff] %v9859_v26  ;;  %3722 = vst.msk [vmem:[#allocation4 + $0x70] sm:$0xff] %vm3353_vm10, %v9859_v26  ;;  %v9870_v12 = vmax.f32 %v9863_v16, %v3068_v50  ;;  %v3860_v50 = vmul.f32 %v7890_v0, %v8931_v28  ;;  %v7892_v16 = vpop.eup %7891 }
 0x8fc   : > { %v3074_v42 = vpop.xlane.xlu1 %3073  ;;  %v7894_v0 = vpop.eup %7893 }
 0x8fd   : > { %12300 = vst [vmem:[#allocation114_spill] sm:$0xff] %v9870_v12  ;;  %3717 = vst.msk [vmem:[#allocation4 + $0x48] sm:$0xff] %vm3353_vm10, %v9870_v12  ;;  %v9880_v62 = vmax.f32 %v9873_v18, %v3074_v42  ;;  %3187 = vperm.xlu1 %7733, %v9838_v22   ;;  %3192 = vperm.xlu0 %7734, %v9870_v12   ;;  %v3872_v42 = vpack.c.bf16 %v3861_v60, %v3860_v50 }
 0x8fe   : > { %v3080_v25 = vpop.xlane.xlu0 %3079  ;;  %v7896_v54 = vpop.eup %7895  ;;  %v3859_v60 = vmul.f32 %v7892_v16, %v8925_v38 }
 0x8ff   : > { %12302 = vst [vmem:[#allocation116_spill] sm:$0xff] %v9880_v62  ;;  %3720 = vst.msk [vmem:[#allocation4 + $0x60] sm:$0xff] %vm3353_vm10, %v9880_v62  ;;  %v9892_v43 = vmax.f32 %v9885_v47, %v3080_v25  ;;  %v7898_v50 = vpop.eup %7897  ;;  %v3857_v16 = vmul.f32 %v7896_v54, %v8921_v9  ;;  %v7763_v54 = vld [vmem:[#allocation2] sm:$0xff]  }
 0x900   : > { %v7900_v3 = vpop.eup %7899 }
 0x901   : > { %12304 = vst [vmem:[#allocation118_spill] sm:$0xff] %v9892_v43  ;;  %3723 = vst.msk [vmem:[#allocation4 + $0x78] sm:$0xff] %vm3353_vm10, %v9892_v43  ;;  %3964 = vrot.lane.b32.xlu1 %v3872_v42, %s8267_s6  ;;  %3217 = vperm.xlu0 %7734, %v9859_v26   ;;  %v3858_v42 = vmul.f32 %v7894_v0, %v8927_v40  ;;  %v7902_v47 = vpop.eup %7901 }
 0x902   : > { %v3076_v12 = vpop.xlane.xlu0 %3075  ;;  %v7904_v18 = vpop.eup %7903  ;;  %v3854_v22 = vmul.f32 %v7902_v47, %v8919_v8  ;;  %v7765_v47 = vld [vmem:[#allocation2 + $0x8] sm:$0xff]  }
 0x903   : > { %v9903_v25 = vmax.f32 %v9900_v14, %v3076_v12  ;;  %v3871_v26 = vpack.c.bf16 %v3859_v60, %v3858_v42  ;;  %v3855_v12 = vmul.f32 %v7898_v50, %v8917_v6  ;;  %v3856_v14 = vmul.f32 %v7900_v3, %v8923_v37  ;;  %v7764_v3 = vld [vmem:[#allocation2 + $0x10] sm:$0xff]  }
 0x904   : > { %v3853_v60 = vmul.f32 %v7904_v18, %v8913_v23  ;;  %v7767_v18 = vld [vmem:[#allocation2 + $0x18] sm:$0xff]  }
 0x905   : > { %12306 = vst [vmem:[#allocation120_spill] sm:$0xff] %v9903_v25  ;;  %3721 = vst.msk [vmem:[#allocation4 + $0x68] sm:$0xff] %vm3353_vm10, %v9903_v25  ;;  %3207 = vperm.xlu0 %7734, %v9880_v62   ;;  %3212 = vperm.xlu1 %7733, %v9903_v25   ;;  %v7906_v62 = vpop.eup %7905  ;;  %v3869_v25 = vpack.c.bf16 %v3855_v12, %v3854_v22  ;;  %v3870_v0 = vpack.c.bf16 %v3857_v16, %v3856_v14  ;;  %v7766_v22 = vld [vmem:[#allocation2 + $0x20] sm:$0xff]   ;;  %v7769_v14 = vld [vmem:[#allocation2 + $0x28] sm:$0xff]  }
 0x909   : > { %3962 = vrot.lane.b32.xlu0 %v3871_v26, %s8267_s6  ;;  %3222 = vperm.xlu1 %7733, %v9892_v43   ;;  %v3852_v26 = vmul.f32 %v7906_v62, %v8915_v27  ;;  %v7768_v62 = vld [vmem:[#allocation2 + $0x30] sm:$0xff]   ;;  %v12375_v43 = vld [vmem:[#allocation65_spill] sm:$0xff] }
 0x90a   : > { %7735 = vset.pattern.permute.xlu0 %v12307_v17  ;;  %v12377_v24 = vsub.f32 %v12375_v43, %v12376_v15  ;;  %v12380_v15 = vld [vmem:[#allocation24_spill] sm:$0xff]  ;;  %v12381_v43 = vld [vmem:[#allocation14_spill] sm:$0xff] }
 0x90b   : > { %v3868_v50 = vpack.c.bf16 %v3853_v60, %v3852_v26 }
 0x90d   : > { %3958 = vrot.lane.b32.xlu0 %v3869_v25, %s8267_s6  ;;  %3960 = vrot.lane.b32.xlu1 %v3870_v0, %s8267_s6 }
 0x90e   : > { %7736 = vset.pattern.permute.xlu1 %v12307_v17  ;;  %v7770_v17 = vld [vmem:[#allocation2 + $0x38] sm:$0xff]  }
 0x911   : > { %3932 = vrot.lane.b32.xlu0 %v7763_v54, %s8267_s6  ;;  %3956 = vrot.lane.b32.xlu1 %v3868_v50, %s8267_s6 }
 0x915   : > { %3936 = vrot.lane.b32.xlu0 %v7764_v3, %s8267_s6  ;;  %3934 = vrot.lane.b32.xlu1 %v7765_v47, %s8267_s6 }
 0x919   : > { %3940 = vrot.lane.b32.xlu0 %v7766_v22, %s8267_s6  ;;  %3938 = vrot.lane.b32.xlu1 %v7767_v18, %s8267_s6 }
 0x91d   : > { %3944 = vrot.lane.b32.xlu0 %v7768_v62, %s8267_s6  ;;  %3942 = vrot.lane.b32.xlu1 %v7769_v14, %s8267_s6 }
 0x921   : > { %3946 = vrot.lane.b32.xlu1 %v7770_v17, %s8267_s6 }
 0x92f   : > { %v3158_v25 = vpop.permute.xlu1 %3157 }
 0x930   : > { %v3227_v47 = vsub.f32 %v9644_v13, %v3158_v25 }
 0x933   : > { %v3148_v42 = vpop.permute.xlu1 %3147 }
 0x934   : > { %v3225_v12 = vsub.f32 %v9647_v33, %v3148_v42  ;;  %v3163_v0 = vpop.permute.xlu0 %3162  ;;  %v3245_v33 = vmul.f32 1.442695, %v3227_v47 }
 0x935   : > { %v3228_v26 = vsub.f32 %v9650_v56, %v3163_v0  ;;  %v12314_v0 = vld [vmem:[#allocation38_spill] sm:$0xff] }
 0x936   : > { %v3241_v16 = vmul.f32 1.442695, %v3225_v12  ;;  %v12312_v12 = vld [vmem:[#allocation37_spill] sm:$0xff] }
 0x937   : > { %v3153_v60 = vpop.permute.xlu1 %3152  ;;  %v3247_v22 = vmul.f32 1.442695, %v3228_v26  ;;  %v12317_v26 = vld [vmem:[#allocation42_spill] sm:$0xff] }
 0x938   : > { %v3226_v54 = vsub.f32 %v9653_v21, %v3153_v60  ;;  %7907 = vpow2.f32 %v3241_v16  ;;  %v3497_v62 = vpop.permute.xlu0 %3496 }
 0x93a   : > { %v3243_v50 = vmul.f32 1.442695, %v3226_v54 }
 0x93b   : > { %v3501_v3 = vpop.permute.xlu1 %3500 }
 0x93c   : > { %7909 = vpow2.f32 %v3243_v50  ;;  %7328 = vmatprep.subr.bf16.mxu1 %v3501_v3  ;;  %2254 = vadd.xlane.f32.xlu0 %v9512_v55  ;;  %v3493_v56 = vpop.permute.xlu0 %3492 }
 0x93d   : > { %7329 = vmatpush3.bf16.msra.mxu1 %v3501_v3  ;;  %7911 = vpow2.f32 %v3247_v22 }
 0x93e   : > { %7913 = vpow2.f32 %v3245_v33  ;;  %v12321_v33 = vld [vmem:[#allocation55_spill] sm:$0xff] }
 0x93f   : > { %v3499_v18 = vpop.permute.xlu1 %3498 }
 0x940   : > { %7330 = vmatprep.subr.bf16.mxu1 %v3499_v18  ;;  %2258 = vadd.xlane.f32.xlu0 %v9520_v30 }
 0x941   : > { %7331 = vmatpush3.bf16.msra.mxu1 %v3499_v18 }
 0x942   : > { %7332 = vmatprep.subr.bf16.mxu1 %v3497_v62 }
 0x943   : > { %v3495_v21 = vpop.permute.xlu1 %3494 }
 0x944   : > { %2260 = vadd.xlane.f32.xlu0 %v9518_v46 }
 0x945   : > { %2256 = vadd.xlane.f32.xlu1 %v9514_v63  ;;  %7333 = vmatpush3.bf16.msra.mxu1 %v3497_v62  ;;  %v9942_v55 = vpop.eup %7907  ;;  %v12322_v62 = vld [vmem:[#allocation58_spill] sm:$0xff] }
 0x946   : > { %7334 = vmatprep.subr.bf16.mxu1 %v3495_v21 }
 0x947   : > { %v3491_v63 = vpop.permute.xlu1 %3490 }
 0x948   : > { %2262 = vadd.xlane.f32.xlu0 %v9547_v41 }
 0x949   : > { %v9945_v13 = vpop.eup %7909  ;;  %2264 = vadd.xlane.f32.xlu1 %v9543_v29  ;;  %7335 = vmatpush3.bf16.msra.mxu1 %v3495_v21  ;;  %v3971_v29 = vpop.permute.xlu0 %3970  ;;  %v12323_v21 = vsub.f32 %v12321_v33, %v12322_v62  ;;  %v12337_v62 = vld [vmem:[#allocation50_spill] sm:$0xff] }
 0x94a   : > { %7336 = vmatprep.subr.bf16.mxu1 %v3493_v56  ;;  %v3482_v30 = vpack.c.bf16 %v9945_v13, %v9942_v55  ;;  %v9952_v46 = vpop.eup %7911 }
 0x94b   : > { %v9955_v41 = vpop.eup %7913  ;;  %v3969_v14 = vpop.permute.xlu1 %3968 }
 0x94c   : > { %7340 = vmatprep.mubr.bf16.mxu1 %v3482_v30  ;;  %2266 = vadd.xlane.f32.xlu0 %v9540_v35  ;;  %v3483_v35 = vpack.c.bf16 %v9952_v46, %v9955_v41 }
 0x94d   : > { %2268 = vadd.xlane.f32.xlu1 %v9549_v5  ;;  %7337 = vmatpush3.bf16.msra.mxu1 %v3493_v56  ;;  %v4018_v5 = vsel %vm1676_vm8, %v3971_v29, 0  ;;  %v3967_v42 = vpop.permute.xlu0 %3966  ;;  %v2070_v56 = vmul.f32 1.442695, %v12323_v21  ;;  %v12338_v21 = vld [vmem:[#allocation52_spill] sm:$0xff] }
 0x94e   : > { %7338 = vmatprep.subr.bf16.mxu1 %v3491_v63  ;;  %v4012_v22 = vsel %vm1676_vm8, %v3967_v42, 0 }
 0x950   : > { %2270 = vadd.xlane.f32.xlu0 %v9565_v52  ;;  %v12309_v52 = vld [vmem:[#allocation43_spill] sm:$0xff] }
 0x951   : > { %2272 = vadd.xlane.f32.xlu1 %v9563_v20  ;;  %7339 = vmatpush3.bf16.msra.mxu1 %v3491_v63  ;;  %v12308_v20 = vld [vmem:[#allocation39_spill] sm:$0xff]  ;;  %v12324_v63 = vld [vmem:[#allocation80_spill] sm:$0xff] }
 0x952   : > { %7508 = vmatprep.subr.msk.bf16.mxu1 %vm1676_vm8, %v3971_v29  ;;  %v12310_v17 = vsub.f32 %v12308_v20, %v12309_v52  ;;  %v12328_v52 = vld [vmem:[#allocation51_spill] sm:$0xff] }
 0x954   : > { %2274 = vadd.xlane.f32.xlu0 %v9560_v44  ;;  %7341 = vmatmul.mubr.bf16.vlgmr.msra.gmra.mxu1 %v3483_v35  ;;  %v2064_v25 = vmul.f32 1.442695, %v12310_v17  ;;  %v4015_v44 = vsel %vm1676_vm8, %v3969_v14, 0  ;;  %v12325_v35 = vld [vmem:[#allocation53_spill] sm:$0xff]  ;;  %v12329_v17 = vld [vmem:[#allocation54_spill] sm:$0xff] }
 0x955   : > { %2276 = vadd.xlane.f32.xlu1 %v9558_v53  ;;  %7357 = vmatpush3.bf16.xpose.msra.mxu1 %v4018_v5  ;;  %v12311_v53 = vld [vmem:[#allocation36_spill] sm:$0xff] }
 0x956   : > { %7509 = vmatprep.subr.msk.bf16.mxu1 %vm1676_vm8, %v3969_v14  ;;  %v12313_v16 = vsub.f32 %v12311_v53, %v12312_v12  ;;  %7915 = vpow2.f32 %v2064_v25  ;;  %v12326_v5 = vld [vmem:[#allocation56_spill] sm:$0xff]  ;;  %v12330_v25 = vsub.f32 %v12328_v52, %v12329_v17  ;;  %v12332_v12 = vld [vmem:[#allocation57_spill] sm:$0xff]  ;;  %v12342_v52 = vld [vmem:[#allocation62_spill] sm:$0xff] }
 0x957   : > { %v12327_v14 = vsub.f32 %v12325_v35, %v12326_v5  ;;  %v12340_v5 = vld [vmem:[#allocation83_spill] sm:$0xff]  ;;  %v12343_v17 = vld [vmem:[#allocation64_spill] sm:$0xff] }
 0x958   : > { %2278 = vadd.xlane.f32.xlu0 %v9573_v1  ;;  %v2066_v1 = vmul.f32 1.442695, %v12313_v16  ;;  %v12333_v16 = vld [vmem:[#allocation60_spill] sm:$0xff] }
 0x959   : > { %2280 = vadd.xlane.f32.xlu1 %v9575_v2  ;;  %v12315_v2 = vld [vmem:[#allocation40_spill] sm:$0xff]  ;;  %v2072_v20 = vmul.f32 1.442695, %v12327_v14 }
 0x95a   : > { %v12316_v60 = vsub.f32 %v12314_v0, %v12315_v2  ;;  %7917 = vpow2.f32 %v2066_v1  ;;  %v12334_v1 = vsub.f32 %v12332_v12, %v12333_v16  ;;  %v12335_v2 = vld [vmem:[#allocation79_spill] sm:$0xff] }
 0x95c   : > { %2282 = vadd.xlane.f32.xlu0 %v9579_v19  ;;  %v2062_v54 = vmul.f32 1.442695, %v12316_v60  ;;  %v12318_v19 = vld [vmem:[#allocation45_spill] sm:$0xff]  ;;  %v2084_v0 = vmul.f32 1.442695, %v12334_v1 }
 0x95d   : > { %2284 = vadd.xlane.f32.xlu1 %v9581_v49  ;;  %7359 = vmatpush3.bf16.xpose.msra.mxu1 %v4015_v44  ;;  %v12319_v50 = vsub.f32 %v12317_v26, %v12318_v19  ;;  %v12320_v49 = vsub.f32 %v9378_v59, %v9396_v31  ;;  %v2074_v44 = vmul.f32 1.442695, %v12330_v25  ;;  %v12344_v25 = vsub.f32 %v12342_v52, %v12343_v17  ;;  %v12353_v52 = vld [vmem:[#allocation61_spill] sm:$0xff] }
 0x95e   : > { %7510 = vmatprep.subr.msk.bf16.mxu1 %vm1676_vm8, %v3967_v42  ;;  %7919 = vpow2.f32 %v2062_v54  ;;  %v12331_v42 = vld [vmem:[#allocation81_spill] sm:$0xff] }
 0x95f   : > { %v2068_v3 = vmul.f32 1.442695, %v12319_v50  ;;  %v2080_v47 = vmul.f32 1.442695, %v12320_v49  ;;  %v12336_v49 = vld [vmem:[#allocation82_spill] sm:$0xff] }
 0x961   : > { %7921 = vpow2.f32 %v2068_v3 }
 0x962   : > { %7923 = vpow2.f32 %v2080_v47 }
 0x963   : > { %7925 = vpow2.f32 %v2070_v56  ;;  %v9994_v31 = vpop.eup %7915  ;;  %v12339_v56 = vsub.f32 %v12337_v62, %v12338_v21 }
 0x964   : > { %7927 = vpow2.f32 %v2072_v20  ;;  %v12341_v20 = vld [vmem:[#allocation85_spill] sm:$0xff] }
 0x965   : > { %7361 = vmatpush3.bf16.xpose.msra.mxu1 %v4012_v22  ;;  %7929 = vpow2.f32 %v2074_v44  ;;  %v2078_v44 = vmul.f32 1.442695, %v12344_v25 }
 0x966   : > { %v3178_v18 = vpop.permute.xlu0 %3177  ;;  %7931 = vpow2.f32 %v2084_v0  ;;  %v12345_v0 = vld [vmem:[#allocation84_spill] sm:$0xff] }
 0x967   : > { %v3231_v60 = vsub.f32 %v12335_v2, %v3178_v18  ;;  %v10005_v26 = vpop.eup %7917 }
 0x969   : > { %v3253_v22 = vmul.f32 1.442695, %v3231_v60  ;;  %v12346_v60 = vld [vmem:[#allocation86_spill] sm:$0xff] }
 0x96a   : > { %v3168_v30 = vpop.permute.xlu0 %3167 }
 0x96b   : > { %v3229_v29 = vsub.f32 %v12324_v63, %v3168_v30  ;;  %v10007_v3 = vpop.eup %7919  ;;  %v2076_v30 = vmul.f32 1.442695, %v12339_v56 }
 0x96c   : > { %v3183_v59 = vpop.permute.xlu1 %3182 }
 0x96d   : > { %v3232_v53 = vsub.f32 %v12331_v42, %v3183_v59  ;;  %v3249_v54 = vmul.f32 1.442695, %v3229_v29 }
 0x96e   : > { %2342 = vperm.xlu1 %7736, %v9994_v31   ;;  %v10012_v18 = vpop.eup %7921 }
 0x96f   : > { %v3255_v19 = vmul.f32 1.442695, %v3232_v53  ;;  %7933 = vpow2.f32 %v3249_v54  ;;  %v10017_v35 = vpop.eup %7923 }
 0x970   : > { %v3173_v50 = vpop.permute.xlu1 %3172  ;;  %v10026_v1 = vpop.eup %7925 }
 0x971   : > { %v3230_v47 = vsub.f32 %v12336_v49, %v3173_v50  ;;  %7935 = vpow2.f32 %v3255_v19  ;;  %v12347_v19 = vld [vmem:[#allocation13_spill] sm:$0xff] }
 0x972   : > { %2337 = vperm.xlu0 %7735, %v10007_v3   ;;  %2347 = vperm.xlu1 %7736, %v10005_v26  }
 0x973   : > { %v3251_v33 = vmul.f32 1.442695, %v3230_v47  ;;  %v12348_v47 = vld [vmem:[#allocation67_spill] sm:$0xff] }
 0x974   : > { %v3198_v63 = vpop.permute.xlu1 %3197  ;;  %v3203_v29 = vpop.permute.xlu0 %3202 }
 0x975   : > { %7937 = vpow2.f32 %v3251_v33  ;;  %v3235_v14 = vsub.f32 %v12340_v5, %v3198_v63  ;;  %v3236_v59 = vsub.f32 %v12341_v20, %v3203_v29  ;;  %v12351_v5 = vld [vmem:[#allocation9_spill] sm:$0xff] }
 0x976   : > { %2382 = vperm.xlu0 %7735, %v10017_v35   ;;  %2352 = vperm.xlu1 %7736, %v10012_v18   ;;  %7939 = vpow2.f32 %v3253_v22  ;;  %v12349_v22 = vld [vmem:[#allocation70_spill] sm:$0xff] }
 0x977   : > { %v3261_v42 = vmul.f32 1.442695, %v3235_v14  ;;  %7941 = vpow2.f32 %v2076_v30  ;;  %v3263_v53 = vmul.f32 1.442695, %v3236_v59  ;;  %v12350_v33 = vsub.f32 %v12348_v47, %v12349_v22  ;;  %v10036_v30 = vpop.eup %7927  ;;  %v12352_v59 = vld [vmem:[#allocation59_spill] sm:$0xff] }
 0x978   : > { %v3188_v12 = vpop.permute.xlu1 %3187  ;;  %v3193_v16 = vpop.permute.xlu0 %3192  ;;  %7943 = vpow2.f32 %v2078_v44  ;;  %v12354_v17 = vsub.f32 %v12352_v59, %v12353_v52  ;;  %v12355_v44 = vld [vmem:[#allocation87_spill] sm:$0xff] }
 0x979   : > { %v3233_v2 = vsub.f32 %v12345_v0, %v3188_v12  ;;  %v3234_v54 = vsub.f32 %v12346_v60, %v3193_v16  ;;  %7945 = vpow2.f32 %v3261_v42  ;;  %v2088_v62 = vmul.f32 1.442695, %v12350_v33  ;;  %v10040_v29 = vpop.eup %7929  ;;  %v12356_v0 = vld [vmem:[#allocation90_spill] sm:$0xff]  ;;  %v12357_v60 = vld [vmem:[#allocation88_spill] sm:$0xff] }
 0x97a   : > { %4838 = vrot.lane.b32.xlu0 %v12347_v19, %s8270_s8  ;;  %2357 = vperm.xlu1 %7736, %v10026_v1   ;;  %7947 = vpow2.f32 %v3263_v53  ;;  %v10045_v14 = vpop.eup %7931  ;;  %v2082_v25 = vmul.f32 1.442695, %v12354_v17  ;;  %v12359_v17 = vld [vmem:[#allocation12_spill] sm:$0xff] }
 0x97b   : > { %v3257_v50 = vmul.f32 1.442695, %v3233_v2  ;;  %v3259_v49 = vmul.f32 1.442695, %v3234_v54 }
 0x97c   : > { %v3965_v21 = vpop.permute.xlu1 %3964  ;;  %v3218_v56 = vpop.permute.xlu0 %3217 }
 0x97d   : > { %7949 = vpow2.f32 %v3257_v50  ;;  %7511 = vmatprep.subr.msk.bf16.mxu1 %vm1676_vm8, %v3965_v21  ;;  %v4009_v63 = vsel %vm1676_vm8, %v3965_v21, 0  ;;  %v10047_v20 = vpop.eup %7933  ;;  %v3239_v42 = vsub.f32 %v12355_v44, %v3218_v56 }
 0x97e   : > { %7951 = vpow2.f32 %v3259_v49  ;;  %4832 = vrot.lane.b32.xlu0 %v12351_v5, %s8270_s8  ;;  %2362 = vperm.xlu1 %7736, %v10036_v30   ;;  %v10053_v16 = vpop.eup %7935 }
 0x97f   : > { %7363 = vmatpush3.bf16.xpose.msra.mxu1 %v4009_v63  ;;  %7953 = vpow2.f32 %v2088_v62  ;;  %v3269_v33 = vmul.f32 1.442695, %v3239_v42  ;;  %v12358_v63 = vld [vmem:[#allocation89_spill] sm:$0xff] }
 0x980   : > { %v3213_v53 = vpop.permute.xlu1 %3212  ;;  %v3208_v12 = vpop.permute.xlu0 %3207  ;;  %7955 = vpow2.f32 %v2082_v25 }
 0x981   : > { %v3238_v2 = vsub.f32 %v12356_v0, %v3213_v53  ;;  %v3237_v54 = vsub.f32 %v12357_v60, %v3208_v12  ;;  %v12360_v53 = vld [vmem:[#allocation63_spill] sm:$0xff]  ;;  %v12361_v12 = vld [vmem:[#allocation66_spill] sm:$0xff] }
 0x982   : > { %v10057_v19 = vpop.eup %7937  ;;  %2392 = vperm.xlu0 %7735, %v10045_v14   ;;  %2367 = vperm.xlu1 %7736, %v10040_v29   ;;  %v12362_v0 = vsub.f32 %v12360_v53, %v12361_v12 }
 0x983   : > { %v3267_v50 = vmul.f32 1.442695, %v3238_v2  ;;  %v3265_v49 = vmul.f32 1.442695, %v3237_v54  ;;  %v3484_v47 = vpack.c.bf16 %v10057_v19, %v10047_v20  ;;  %v10063_v22 = vpop.eup %7939 }
 0x984   : > { %v3223_v62 = vpop.permute.xlu1 %3222  ;;  %v3963_v21 = vpop.permute.xlu0 %3962  ;;  %v3485_v59 = vpack.c.bf16 %v10053_v16, %v10063_v22  ;;  %v2092_v2 = vmul.f32 1.442695, %v12362_v0 }
 0x985   : > { %v10065_v56 = vpop.eup %7941  ;;  %7957 = vpow2.f32 %v3267_v50  ;;  %v3240_v5 = vsub.f32 %v12358_v63, %v3223_v62  ;;  %7344 = vmatprep.mubr.bf16.mxu1 %v3484_v47  ;;  %7512 = vmatprep.subr.msk.bf16.mxu1 %vm1676_vm8, %v3963_v21  ;;  %v4006_v52 = vsel %vm1676_vm8, %v3963_v21, 0  ;;  %v12364_v21 = vld [vmem:[#allocation69_spill] sm:$0xff]  ;;  %v12365_v63 = vld [vmem:[#allocation71_spill] sm:$0xff] }
 0x986   : > { %7959 = vpow2.f32 %v3265_v49  ;;  %4830 = vrot.lane.b32.xlu0 %v12359_v17, %s8270_s8  ;;  %2372 = vperm.xlu1 %7736, %v10065_v56   ;;  %v10075_v25 = vpop.eup %7943  ;;  %v12363_v49 = vld [vmem:[#allocation17_spill] sm:$0xff]  ;;  %v12367_v17 = vld [vmem:[#allocation11_spill] sm:$0xff] }
 0x987   : > { %v3271_v44 = vmul.f32 1.442695, %v3240_v5  ;;  %7345 = vmatmul.mubr.bf16.gmra.mxu1 %v3485_v59  ;;  %v10077_v42 = vpop.eup %7945  ;;  %7961 = vpow2.f32 %v3269_v33  ;;  %v12366_v5 = vsub.f32 %v12364_v21, %v12365_v63  ;;  %v12373_v63 = vld [vmem:[#allocation21_spill] sm:$0xff] }
 0x988   : > { %7365 = vmatpush3.bf16.xpose.msra.mxu1 %v4006_v52  ;;  %v3961_v60 = vpop.permute.xlu1 %3960  ;;  %v10082_v54 = vpop.eup %7947 }
 0x989   : > { %7963 = vpow2.f32 %v3271_v44  ;;  %7513 = vmatprep.subr.msk.bf16.mxu1 %vm1676_vm8, %v3961_v60  ;;  %v2086_v59 = vmul.f32 1.442695, %v12366_v5  ;;  %v3487_v52 = vpack.c.bf16 %v10082_v54, %v10077_v42  ;;  %v4003_v44 = vsel %vm1676_vm8, %v3961_v60, 0  ;;  %v3959_v53 = vpop.permute.xlu0 %3958  ;;  %v12374_v5 = vld [vmem:[#allocation10_spill] sm:$0xff] }
 0x98a   : > { %v10085_v50 = vpop.eup %7949  ;;  %4824 = vrot.lane.b32.xlu0 %v12363_v49, %s8270_s8  ;;  %2377 = vperm.xlu1 %7736, %v10075_v25   ;;  %7965 = vpow2.f32 %v2092_v2  ;;  %v12369_v2 = vld [vmem:[#allocation16_spill] sm:$0xff] }
 0x98b   : > { %v10090_v47 = vpop.eup %7951  ;;  %7967 = vpow2.f32 %v2086_v59  ;;  %v4000_v59 = vsel %vm1676_vm8, %v3959_v53, 0 }
 0x98c   : > { %v3486_v33 = vpack.c.bf16 %v10090_v47, %v10085_v50  ;;  %v10094_v62 = vpop.eup %7953 }
 0x98d   : > { %v10105_v12 = vpop.eup %7955 }
 0x98e   : > { %7348 = vmatprep.mubr.bf16.mxu1 %v3486_v33  ;;  %2402 = vperm.xlu0 %7735, %v10094_v62  }
 0x98f   : > { %4836 = vrot.lane.b32.xlu1 %v12367_v17, %s8270_s8  ;;  %7349 = vmatmul.mubr.bf16.gmra.mxu1 %v3487_v52  ;;  %v3933_v17 = vpop.permute.xlu0 %3932 }
 0x990   : > { %7367 = vmatpush3.bf16.xpose.msra.mxu1 %v4003_v44  ;;  %v3957_v44 = vpop.permute.xlu1 %3956 }
 0x991   : > { %7514 = vmatprep.subr.msk.bf16.mxu1 %vm1676_vm8, %v3959_v53  ;;  %v12378_v53 = vld [vmem:[#allocation15_spill] sm:$0xff] }
 0x992   : > { %v10108_v0 = vpop.eup %7957  ;;  %4822 = vrot.lane.b32.xlu0 %v12369_v2, %s8270_s8 }
 0x993   : > { %12368 = vst [vmem:[#allocation39_spill] sm:$0xff] %v10108_v0  ;;  %v10112_v49 = vpop.eup %7959  ;;  %2387 = vperm.xlu1 %7736, %v10105_v12  }
 0x994   : > { %12370 = vst [vmem:[#allocation43_spill] sm:$0xff] %v10112_v49  ;;  %v3488_v33 = vpack.c.bf16 %v10108_v0, %v10112_v49  ;;  %v10117_v60 = vpop.eup %7961  ;;  %v2226_v0 = vld [vmem:[#allocation5 + $0x20] sm:$0xff]  ;;  %v2227_v49 = vld [vmem:[#allocation5 + $0x28] sm:$0xff] }
 0x995   : > { %12371 = vst [vmem:[#allocation36_spill] sm:$0xff] %v10117_v60 }
 0x996   : > { %v10119_v21 = vpop.eup %7963  ;;  %7352 = vmatprep.mubr.bf16.mxu1 %v3488_v33  ;;  %4816 = vrot.lane.b32.xlu0 %v12373_v63, %s8270_s8  ;;  %v2090_v33 = vmul.f32 1.442695, %v12377_v24  ;;  %v3997_v24 = vsel %vm1676_vm8, %v3957_v44, 0 }
 0x997   : > { %12372 = vst [vmem:[#allocation37_spill] sm:$0xff] %v10119_v21  ;;  %4834 = vrot.lane.b32.xlu1 %v12374_v5, %s8270_s8  ;;  %v3489_v52 = vpack.c.bf16 %v10119_v21, %v10117_v60  ;;  %v10128_v2 = vpop.eup %7965  ;;  %v12379_v5 = vld [vmem:[#allocation20_spill] sm:$0xff]  ;;  %v2225_v21 = vld [vmem:[#allocation5 + $0x18] sm:$0xff]  ;;  %v2223_v60 = vld [vmem:[#allocation5 + $0x8] sm:$0xff] }
 0x998   : > { %7369 = vmatpush3.bf16.xpose.msra.mxu1 %v4000_v59  ;;  %7969 = vpow2.f32 %v2090_v33  ;;  %v10138_v63 = vpop.eup %7967  ;;  %v3935_v59 = vpop.permute.xlu1 %3934 }
 0x999   : > { %7515 = vmatprep.subr.msk.bf16.mxu1 %vm1676_vm8, %v3957_v44  ;;  %7353 = vmatmul.mubr.bf16.gmra.mxu1 %v3489_v52  ;;  %v3937_v52 = vpop.permute.xlu0 %3936 }
 0x99a   : > { %2412 = vperm.xlu0 %7735, %v10128_v2   ;;  %7372 = vmatprep.mubr.msk.bf16.mxu1 %vm1676_vm8, %v3933_v17  ;;  %v12382_v17 = vld [vmem:[#allocation19_spill] sm:$0xff] }
 0x99b   : > { %4828 = vrot.lane.b32.xlu1 %v12378_v53, %s8270_s8 }
 0x99c   : > { %v3939_v44 = vpop.permute.xlu1 %3938 }
 0x99d   : > { %v3941_v53 = vpop.permute.xlu0 %3940 }
 0x99e   : > { %4814 = vrot.lane.b32.xlu0 %v12379_v5, %s8270_s8  ;;  %v12383_v5 = vld [vmem:[#allocation18_spill] sm:$0xff] }
 0x99f   : > { %2397 = vperm.xlu1 %7736, %v10138_v63  }
 0x9a0   : > { %7371 = vmatpush3.bf16.xpose.msra.mxu1 %v3997_v24  ;;  %v12384_v24 = vld [vmem:[#allocation23_spill] sm:$0xff] }
 0x9a2   : > { %4808 = vrot.lane.b32.xlu0 %v12380_v15, %s8270_s8  ;;  %v3943_v15 = vpop.permute.xlu1 %3942 }
 0x9a3   : > { %4826 = vrot.lane.b32.xlu1 %v12381_v43, %s8270_s8  ;;  %v3945_v43 = vpop.permute.xlu0 %3944 }
 0x9a5   : > { %v10152_v33 = vpop.eup %7969 }
 0x9a7   : > { %7373 = vmatmul.mubr.msk.bf16.vlgmr.msra.gmra.mxu1 %vm1676_vm8, %v3935_v59  ;;  %4820 = vrot.lane.b32.xlu1 %v12382_v17, %s8270_s8  ;;  %v12385_v59 = vld [vmem:[#allocation22_spill] sm:$0xff] }
 0x9a8   : > { %7376 = vmatprep.mubr.msk.bf16.mxu1 %vm1676_vm8, %v3937_v52  ;;  %v3947_v52 = vpop.permute.xlu1 %3946  ;;  %v2222_v17 = vld [vmem:[#allocation5] sm:$0xff] }
 0x9ab   : > { %2407 = vperm.xlu1 %7736, %v10152_v33  }
 0x9af   : > { %4818 = vrot.lane.b32.xlu1 %v12383_v5, %s8270_s8  ;;  %7377 = vmatmul.mubr.msk.bf16.gmra.mxu1 %vm1676_vm8, %v3939_v44  ;;  %v2238_v44 = vmul.f32 %v10007_v3, %v2222_v17 }
 0x9b0   : > { %7380 = vmatprep.mubr.msk.bf16.mxu1 %vm1676_vm8, %v3941_v53  ;;  %v2224_v53 = vld [vmem:[#allocation5 + $0x10] sm:$0xff] }
 0x9b3   : > { %4812 = vrot.lane.b32.xlu1 %v12384_v24, %s8270_s8  ;;  %v2240_v24 = vmul.f32 %v10005_v26, %v2224_v53  ;;  %v2243_v26 = vmul.f32 %v10036_v30, %v2227_v49 }
 0x9b7   : > { %4810 = vrot.lane.b32.xlu1 %v12385_v59, %s8270_s8  ;;  %7381 = vmatmul.mubr.msk.bf16.gmra.mxu1 %vm1676_vm8, %v3943_v15  ;;  %v2241_v15 = vmul.f32 %v10012_v18, %v2225_v21  ;;  %v2229_v21 = vld [vmem:[#allocation5 + $0x38] sm:$0xff] }
 0x9b8   : > { %7384 = vmatprep.mubr.msk.bf16.mxu1 %vm1676_vm8, %v3945_v43 }
 0x9bf   : > { %7385 = vmatmul.mubr.msk.bf16.gmra.mxu1 %vm1676_vm8, %v3947_v52  ;;  %v2239_v52 = vmul.f32 %v9994_v31, %v2223_v60 }
 0x9c5   : > { %v2255_v5 = vpop.xlane.xlu0 %2254 }
 0x9c6   : > { %v2286_v51 = vadd.f32 %v2255_v5, %v2238_v44  ;;  %v2228_v5 = vld [vmem:[#allocation5 + $0x30] sm:$0xff] }
 0x9c7   : > { %v2244_v31 = vmul.f32 %v10040_v29, %v2228_v5  ;;  %v2232_v29 = vld [vmem:[#allocation5 + $0x50] sm:$0xff] }
 0x9c8   : > { %2303 = vst.msk [vmem:[#allocation5] sm:$0xff] %vm2302_vm9, %v2286_v51  ;;  %v2242_v51 = vmul.f32 %v10026_v1, %v2226_v0  ;;  %v2230_v1 = vld [vmem:[#allocation5 + $0x40] sm:$0xff] }
 0x9c9   : > { %v2259_v4 = vpop.xlane.xlu0 %2258  ;;  %v2246_v30 = vmul.f32 %v10075_v25, %v2230_v1  ;;  %v2234_v25 = vld [vmem:[#allocation5 + $0x60] sm:$0xff] }
 0x9ca   : > { %v2288_v59 = vadd.f32 %v2259_v4, %v2240_v24 }
 0x9cc   : > { %2305 = vst.msk [vmem:[#allocation5 + $0x10] sm:$0xff] %vm2302_vm9, %v2288_v59  ;;  %v2245_v59 = vmul.f32 %v10065_v56, %v2229_v21  ;;  %v2248_v56 = vmul.f32 %v10105_v12, %v2232_v29  ;;  %v2235_v21 = vld [vmem:[#allocation5 + $0x68] sm:$0xff]  ;;  %v2236_v12 = vld [vmem:[#allocation5 + $0x70] sm:$0xff] }
 0x9cd   : > { %v2261_v43 = vpop.xlane.xlu0 %2260 }
 0x9ce   : > { %v2289_v3 = vadd.f32 %v2261_v43, %v2241_v15  ;;  %v2257_v17 = vpop.xlane.xlu1 %2256  ;;  %v2231_v43 = vld [vmem:[#allocation5 + $0x48] sm:$0xff] }
 0x9cf   : > { %v2287_v44 = vadd.f32 %v2257_v17, %v2239_v52 }
 0x9d0   : > { %2306 = vst.msk [vmem:[#allocation5 + $0x18] sm:$0xff] %vm2302_vm9, %v2289_v3  ;;  %v2247_v3 = vmul.f32 %v10017_v35, %v2231_v43  ;;  %v2250_v35 = vmul.f32 %v10138_v63, %v2234_v25  ;;  %v12387_v25 = vld [vmem:[#allocation30_spill] sm:$0xff] }
 0x9d1   : > { %2304 = vst.msk [vmem:[#allocation5 + $0x8] sm:$0xff] %vm2302_vm9, %v2287_v44  ;;  %v2263_v4 = vpop.xlane.xlu0 %2262 }
 0x9d2   : > { %v2290_v53 = vadd.f32 %v2263_v4, %v2242_v51  ;;  %v2265_v18 = vpop.xlane.xlu1 %2264  ;;  %v2233_v51 = vld [vmem:[#allocation5 + $0x58] sm:$0xff] }
 0x9d3   : > { %v2291_v24 = vadd.f32 %v2265_v18, %v2243_v26  ;;  %v2249_v5 = vmul.f32 %v10045_v14, %v2233_v51  ;;  %v2252_v14 = vmul.f32 %v10152_v33, %v2236_v12  ;;  %v12386_v51 = vld [vmem:[#allocation31_spill] sm:$0xff] }
 0x9d4   : > { %2307 = vst.msk [vmem:[#allocation5 + $0x20] sm:$0xff] %vm2302_vm9, %v2290_v53 }
 0x9d5   : > { %2308 = vst.msk [vmem:[#allocation5 + $0x28] sm:$0xff] %vm2302_vm9, %v2291_v24  ;;  %v2267_v60 = vpop.xlane.xlu0 %2266 }
 0x9d6   : > { %v2292_v0 = vadd.f32 %v2267_v60, %v2244_v31  ;;  %v2269_v15 = vpop.xlane.xlu1 %2268  ;;  %v2251_v60 = vmul.f32 %v10094_v62, %v2235_v21  ;;  %v2320_v62 = vld [vmem:[#allocation3 + $0x8] sm:$0xff] }
 0x9d7   : > { %v2293_v52 = vadd.f32 %v2269_v15, %v2245_v59  ;;  %v12388_v21 = vld [vmem:[#allocation27_spill] sm:$0xff] }
 0x9d8   : > { %2309 = vst.msk [vmem:[#allocation5 + $0x30] sm:$0xff] %vm2302_vm9, %v2292_v0  ;;  %v2237_v0 = vld [vmem:[#allocation5 + $0x78] sm:$0xff] }
 0x9d9   : > { %2310 = vst.msk [vmem:[#allocation5 + $0x38] sm:$0xff] %vm2302_vm9, %v2293_v52  ;;  %v2271_v49 = vpop.xlane.xlu0 %2270  ;;  %v2253_v52 = vmul.f32 %v10128_v2, %v2237_v0  ;;  %v2323_v0 = vld [vmem:[#allocation3 + $0x20] sm:$0xff] }
 0x9da   : > { %v2294_v17 = vadd.f32 %v2271_v49, %v2246_v30  ;;  %v2273_v44 = vpop.xlane.xlu1 %2272 }
 0x9db   : > { %v2295_v4 = vadd.f32 %v2273_v44, %v2247_v3  ;;  %v2321_v44 = vld [vmem:[#allocation3 + $0x10] sm:$0xff] }
 0x9dc   : > { %2311 = vst.msk [vmem:[#allocation5 + $0x40] sm:$0xff] %vm2302_vm9, %v2294_v17  ;;  %v2319_v17 = vld [vmem:[#allocation3] sm:$0xff] }
 0x9dd   : > { %2312 = vst.msk [vmem:[#allocation5 + $0x48] sm:$0xff] %vm2302_vm9, %v2295_v4  ;;  %v2275_v26 = vpop.xlane.xlu0 %2274 }
 0x9de   : > { %v2296_v53 = vadd.f32 %v2275_v26, %v2248_v56  ;;  %v2277_v18 = vpop.xlane.xlu1 %2276 }
 0x9df   : > { %v2297_v24 = vadd.f32 %v2277_v18, %v2249_v5  ;;  %v2328_v5 = vld [vmem:[#allocation3 + $0x48] sm:$0xff]  ;;  %v2322_v18 = vld [vmem:[#allocation3 + $0x18] sm:$0xff] }
 0x9e0   : > { %2313 = vst.msk [vmem:[#allocation5 + $0x50] sm:$0xff] %vm2302_vm9, %v2296_v53 }
 0x9e1   : > { %2314 = vst.msk [vmem:[#allocation5 + $0x58] sm:$0xff] %vm2302_vm9, %v2297_v24  ;;  %v2279_v31 = vpop.xlane.xlu0 %2278 }
 0x9e2   : > { %v2298_v59 = vadd.f32 %v2279_v31, %v2250_v35  ;;  %v2281_v1 = vpop.xlane.xlu1 %2280 }
 0x9e3   : > { %v2299_v15 = vadd.f32 %v2281_v1, %v2251_v60 }
 0x9e4   : > { %2315 = vst.msk [vmem:[#allocation5 + $0x60] sm:$0xff] %vm2302_vm9, %v2298_v59  ;;  %v12389_v59 = vld [vmem:[#allocation74_spill] sm:$0xff] }
 0x9e5   : > { %2316 = vst.msk [vmem:[#allocation5 + $0x68] sm:$0xff] %vm2302_vm9, %v2299_v15  ;;  %v2283_v43 = vpop.xlane.xlu0 %2282  ;;  %v12390_v15 = vld [vmem:[#allocation28_spill] sm:$0xff] }
 0x9e6   : > { %v2300_v63 = vadd.f32 %v2283_v43, %v2252_v14  ;;  %v2285_v30 = vpop.xlane.xlu1 %2284 }
 0x9e7   : > { %v2301_v49 = vadd.f32 %v2285_v30, %v2253_v52 }
 0x9e8   : > { %2317 = vst.msk [vmem:[#allocation5 + $0x70] sm:$0xff] %vm2302_vm9, %v2300_v63 }
 0x9e9   : > { %2318 = vst.msk [vmem:[#allocation5 + $0x78] sm:$0xff] %vm2302_vm9, %v2301_v49  ;;  %v2324_v49 = vld [vmem:[#allocation3 + $0x28] sm:$0xff] }
 0x9ea   : > { %v2343_v3 = vpop.permute.xlu1 %2342 }
 0x9eb   : > { %v2416_v29 = vmul.f32 %v2343_v3, %v2320_v62  ;;  %v12391_v62 = vld [vmem:[#allocation32_spill] sm:$0xff] }
 0x9ed   : > { %v2577_v4 = vadd.f32 %v12386_v51, %v2416_v29  ;;  %v2338_v33 = vpop.permute.xlu0 %2337 }
 0x9ee   : > { %v2415_v56 = vmul.f32 %v2338_v33, %v2319_v17  ;;  %v2348_v26 = vpop.permute.xlu1 %2347  ;;  %v2325_v33 = vld [vmem:[#allocation3 + $0x30] sm:$0xff] }
 0x9ef   : > { %2593 = vst.msk [vmem:[#allocation3 + $0x8] sm:$0xff] %vm1676_vm8, %v2577_v4  ;;  %v2417_v2 = vmul.f32 %v2348_v26, %v2321_v44  ;;  %v2330_v4 = vld [vmem:[#allocation3 + $0x58] sm:$0xff] }
 0x9f0   : > { %v2576_v53 = vadd.f32 %v12387_v25, %v2415_v56  ;;  %v12392_v56 = vld [vmem:[#allocation35_spill] sm:$0xff] }
 0x9f1   : > { %v2578_v24 = vadd.f32 %v12388_v21, %v2417_v2  ;;  %v2383_v35 = vpop.permute.xlu0 %2382 }
 0x9f2   : > { %2592 = vst.msk [vmem:[#allocation3] sm:$0xff] %vm1676_vm8, %v2576_v53  ;;  %v2424_v31 = vmul.f32 %v2383_v35, %v2328_v5  ;;  %v2353_v60 = vpop.permute.xlu1 %2352  ;;  %v12394_v35 = vld [vmem:[#allocation29_spill] sm:$0xff] }
 0x9f3   : > { %2594 = vst.msk [vmem:[#allocation3 + $0x10] sm:$0xff] %vm1676_vm8, %v2578_v24  ;;  %v2418_v12 = vmul.f32 %v2353_v60, %v2322_v18  ;;  %v12393_v18 = vld [vmem:[#allocation73_spill] sm:$0xff] }
 0x9f4   : > { %v2585_v1 = vadd.f32 %v12389_v59, %v2424_v31  ;;  %v2326_v24 = vld [vmem:[#allocation3 + $0x38] sm:$0xff] }
 0x9f5   : > { %v2579_v14 = vadd.f32 %v12390_v15, %v2418_v12  ;;  %v4839_v43 = vpop.permute.xlu0 %4838 }
 0x9f6   : > { %2601 = vst.msk [vmem:[#allocation3 + $0x48] sm:$0xff] %vm1676_vm8, %v2585_v1  ;;  %v2358_v52 = vpop.permute.xlu1 %2357  ;;  %v4901_v63 = vsel %vm1676_vm8, %v4839_v43, 0.0  ;;  %v2327_v1 = vld [vmem:[#allocation3 + $0x40] sm:$0xff] }
 0x9f7   : > { %2595 = vst.msk [vmem:[#allocation3 + $0x18] sm:$0xff] %vm1676_vm8, %v2579_v14  ;;  %v2419_v30 = vmul.f32 %v2358_v52, %v2323_v0  ;;  %4902 = vadd.xlane.f32.xlu0 %v4901_v63  ;;  %v12395_v0 = vld [vmem:[#allocation33_spill] sm:$0xff]  ;;  %v2332_v63 = vld [vmem:[#allocation3 + $0x68] sm:$0xff] }
 0x9f9   : > { %v2580_v3 = vadd.f32 %v12391_v62, %v2419_v30  ;;  %v4833_v29 = vpop.permute.xlu0 %4832  ;;  %v12396_v30 = vld [vmem:[#allocation72_spill] sm:$0xff] }
 0x9fa   : > { %v2363_v17 = vpop.permute.xlu1 %2362  ;;  %v4892_v44 = vsel %vm1676_vm8, %v4833_v29, 0.0 }
 0x9fb   : > { %2596 = vst.msk [vmem:[#allocation3 + $0x20] sm:$0xff] %vm1676_vm8, %v2580_v3  ;;  %v2420_v51 = vmul.f32 %v2363_v17, %v2324_v49  ;;  %4893 = vadd.xlane.f32.xlu0 %v4892_v44  ;;  %v12397_v44 = vld [vmem:[#allocation78_spill] sm:$0xff] }
 0x9fd   : > { %v2581_v26 = vadd.f32 %v12392_v56, %v2420_v51  ;;  %v2393_v2 = vpop.permute.xlu0 %2392 }
 0x9fe   : > { %v2426_v5 = vmul.f32 %v2393_v2, %v2330_v4  ;;  %v2368_v25 = vpop.permute.xlu1 %2367  ;;  %v2329_v4 = vld [vmem:[#allocation3 + $0x50] sm:$0xff]  ;;  %v12398_v2 = vld [vmem:[#allocation34_spill] sm:$0xff] }
 0x9ff   : > { %2597 = vst.msk [vmem:[#allocation3 + $0x28] sm:$0xff] %vm1676_vm8, %v2581_v26  ;;  %v2421_v53 = vmul.f32 %v2368_v25, %v2325_v33 }
 0xa00   : > { %v2587_v21 = vadd.f32 %v12393_v18, %v2426_v5 }
 0xa01   : > { %v2582_v31 = vadd.f32 %v12394_v35, %v2421_v53  ;;  %v4831_v60 = vpop.permute.xlu0 %4830 }
 0xa02   : > { %2603 = vst.msk [vmem:[#allocation3 + $0x58] sm:$0xff] %vm1676_vm8, %v2587_v21  ;;  %v2373_v12 = vpop.permute.xlu1 %2372  ;;  %v2334_v21 = vld [vmem:[#allocation3 + $0x78] sm:$0xff] }
 0xa03   : > { %2598 = vst.msk [vmem:[#allocation3 + $0x30] sm:$0xff] %vm1676_vm8, %v2582_v31  ;;  %v2422_v59 = vmul.f32 %v2373_v12, %v2326_v24 }
 0xa05   : > { %v2583_v15 = vadd.f32 %v12395_v0, %v2422_v59  ;;  %v4825_v14 = vpop.permute.xlu0 %4824  ;;  %v4889_v59 = vsel %vm1676_vm8, %v4831_v60, 0.0 }
 0xa06   : > { %v2378_v43 = vpop.permute.xlu1 %2377 }
 0xa07   : > { %2599 = vst.msk [vmem:[#allocation3 + $0x38] sm:$0xff] %vm1676_vm8, %v2583_v15  ;;  %v2423_v52 = vmul.f32 %v2378_v43, %v2327_v1  ;;  %v12399_v1 = vld [vmem:[#allocation77_spill] sm:$0xff]  ;;  %v2331_v15 = vld [vmem:[#allocation3 + $0x60] sm:$0xff] }
 0xa09   : > { %v2584_v49 = vadd.f32 %v12396_v30, %v2423_v52  ;;  %v2403_v62 = vpop.permute.xlu0 %2402  ;;  %v12400_v30 = vld [vmem:[#allocation76_spill] sm:$0xff] }
 0xa0a   : > { %v2428_v3 = vmul.f32 %v2403_v62, %v2332_v63  ;;  %v4837_v29 = vpop.permute.xlu1 %4836  ;;  %v4880_v63 = vsel %vm1676_vm8, %v4825_v14, 0.0 }
 0xa0b   : > { %2600 = vst.msk [vmem:[#allocation3 + $0x40] sm:$0xff] %vm1676_vm8, %v2584_v49  ;;  %v4898_v17 = vsel %vm1676_vm8, %v4837_v29, 0.0 }
 0xa0c   : > { %v2589_v51 = vadd.f32 %v12397_v44, %v2428_v3  ;;  %4899 = vadd.xlane.f32.xlu1 %v4898_v17  ;;  %v2333_v44 = vld [vmem:[#allocation3 + $0x70] sm:$0xff] }
 0xa0d   : > { %v4823_v33 = vpop.permute.xlu0 %4822 }
 0xa0e   : > { %2605 = vst.msk [vmem:[#allocation3 + $0x68] sm:$0xff] %vm1676_vm8, %v2589_v51  ;;  %v2388_v56 = vpop.permute.xlu1 %2387  ;;  %v4877_v17 = vsel %vm1676_vm8, %v4823_v33, 0.0 }
 0xa0f   : > { %v2425_v26 = vmul.f32 %v2388_v56, %v2329_v4  ;;  %v12401_v56 = vld [vmem:[#allocation75_spill] sm:$0xff] }
 0xa11   : > { %v2586_v5 = vadd.f32 %v12398_v2, %v2425_v26  ;;  %v4817_v25 = vpop.permute.xlu0 %4816 }
 0xa12   : > { %v4835_v53 = vpop.permute.xlu1 %4834  ;;  %v4868_v14 = vsel %vm1676_vm8, %v4817_v25, 0.0 }
 0xa13   : > { %2602 = vst.msk [vmem:[#allocation3 + $0x50] sm:$0xff] %vm1676_vm8, %v2586_v5  ;;  %v4895_v18 = vsel %vm1676_vm8, %v4835_v53, 0.0 }
 0xa14   : > { %4896 = vadd.xlane.f32.xlu1 %v4895_v18 }
 0xa15   : > { %v2413_v24 = vpop.permute.xlu0 %2412 }
 0xa16   : > { %v2430_v35 = vmul.f32 %v2413_v24, %v2334_v21  ;;  %v4829_v31 = vpop.permute.xlu1 %4828 }
 0xa17   : > { %v4886_v12 = vsel %vm1676_vm8, %v4829_v31, 0.0 }
 0xa18   : > { %v2591_v0 = vadd.f32 %v12399_v1, %v2430_v35  ;;  %4887 = vadd.xlane.f32.xlu0 %v4886_v12  ;;  %4890 = vadd.xlane.f32.xlu1 %v4889_v59  ;;  %v10246_v12 = vpop.f32.mrf.mxu1 }
 0xa19   : > { %v4815_v2 = vpop.permute.xlu0 %4814  ;;  %12402 = vst [vmem:[#allocation38_spill] sm:$0xff] %v10246_v12 }
 0xa1a   : > { %2607 = vst.msk [vmem:[#allocation3 + $0x78] sm:$0xff] %vm1676_vm8, %v2591_v0  ;;  %v2398_v43 = vpop.permute.xlu1 %2397  ;;  %v4865_v21 = vsel %vm1676_vm8, %v4815_v2, 0.0  ;;  %v10248_v59 = vpop.f32.mrf.mxu1  ;;  %v12418_v2 = vld [vmem:[#allocation25_spill] sm:$0xff] }
 0xa1b   : > { %v2427_v52 = vmul.f32 %v2398_v43, %v2331_v15  ;;  %12403 = vst [vmem:[#allocation40_spill] sm:$0xff] %v10248_v59 }
 0xa1c   : > { %4881 = vadd.xlane.f32.xlu0 %v4880_v63  ;;  %v10250_v1 = vpop.f32.mrf.mxu1 }
 0xa1d   : > { %v2588_v49 = vadd.f32 %v12400_v30, %v2427_v52  ;;  %v4809_v24 = vpop.permute.xlu0 %4808  ;;  %12404 = vst [vmem:[#allocation42_spill] sm:$0xff] %v10250_v1 }
 0xa1e   : > { %v4827_v62 = vpop.permute.xlu1 %4826  ;;  %v4856_v31 = vsel %vm1676_vm8, %v4809_v24, 0.0  ;;  %v10252_v0 = vpop.f32.mrf.mxu1 }
 0xa1f   : > { %2604 = vst.msk [vmem:[#allocation3 + $0x60] sm:$0xff] %vm1676_vm8, %v2588_v49  ;;  %v4883_v3 = vsel %vm1676_vm8, %v4827_v62, 0.0  ;;  %12405 = vst [vmem:[#allocation45_spill] sm:$0xff] %v10252_v0 }
 0xa20   : > { %4884 = vadd.xlane.f32.xlu1 %v4883_v3 }
 0xa22   : > { %v4821_v60 = vpop.permute.xlu1 %4820 }
 0xa23   : > { %v4874_v29 = vsel %vm1676_vm8, %v4821_v60, 0.0 }
 0xa24   : > { %4875 = vadd.xlane.f32.xlu0 %v4874_v29  ;;  %4878 = vadd.xlane.f32.xlu1 %v4877_v17 }
 0xa26   : > { %v2408_v51 = vpop.permute.xlu1 %2407 }
 0xa27   : > { %v2429_v4 = vmul.f32 %v2408_v51, %v2333_v44 }
 0xa28   : > { %4869 = vadd.xlane.f32.xlu0 %v4868_v14 }
 0xa29   : > { %v2590_v26 = vadd.f32 %v12401_v56, %v2429_v4 }
 0xa2a   : > { %v4819_v5 = vpop.permute.xlu1 %4818 }
 0xa2b   : > { %2606 = vst.msk [vmem:[#allocation3 + $0x70] sm:$0xff] %vm1676_vm8, %v2590_v26  ;;  %v4871_v53 = vsel %vm1676_vm8, %v4819_v5, 0.0  ;;  %v12114_v26 = vmov 2   ;;  %v12419_v5 = vld [vmem:[#allocation26_spill] sm:$0xff] }
 0xa2c   : > { %4872 = vadd.xlane.f32.xlu1 %v4871_v53  ;;  %7738 = vset.pattern.permute.xlu0 %v12114_v26 }
 0xa2d   : > { %7737 = vset.pattern.permute.xlu1 %v12114_v26 }
 0xa2e   : > { %v4813_v18 = vpop.permute.xlu1 %4812 }
 0xa2f   : > { %v4862_v33 = vsel %vm1676_vm8, %v4813_v18, 0.0 }
 0xa30   : > { %4863 = vadd.xlane.f32.xlu0 %v4862_v33  ;;  %4866 = vadd.xlane.f32.xlu1 %v4865_v21 }
 0xa32   : > { %v4811_v35 = vpop.permute.xlu1 %4810 }
 0xa33   : > { %v4859_v25 = vsel %vm1676_vm8, %v4811_v35, 0.0 }
 0xa34   : > { %4860 = vadd.xlane.f32.xlu1 %v4859_v25  ;;  %4857 = vadd.xlane.f32.xlu0 %v4856_v31 }
 0xa47   : > { %v10254_v15 = vpop.f32.mrf.mxu1 }
 0xa48   : > { %12406 = vst [vmem:[#allocation55_spill] sm:$0xff] %v10254_v15 }
 0xa49   : > { %v10256_v43 = vpop.f32.mrf.mxu1 }
 0xa4a   : > { %12407 = vst [vmem:[#allocation58_spill] sm:$0xff] %v10256_v43 }
 0xa4b   : > { %v10258_v52 = vpop.f32.mrf.mxu1 }
 0xa4c   : > { %12408 = vst [vmem:[#allocation80_spill] sm:$0xff] %v10258_v52 }
 0xa4d   : > { %v10260_v63 = vpop.f32.mrf.mxu1 }
 0xa4e   : > { %12409 = vst [vmem:[#allocation53_spill] sm:$0xff] %v10260_v63 }
 0xa4f   : > { %v10262_v30 = vpop.f32.mrf.mxu1 }
 0xa50   : > { %12410 = vst [vmem:[#allocation56_spill] sm:$0xff] %v10262_v30 }
 0xa51   : > { %v10264_v49 = vpop.f32.mrf.mxu1 }
 0xa52   : > { %12411 = vst [vmem:[#allocation51_spill] sm:$0xff] %v10264_v49 }
 0xa53   : > { %v10266_v62 = vpop.f32.mrf.mxu1 }
 0xa54   : > { %12412 = vst [vmem:[#allocation54_spill] sm:$0xff] %v10266_v62 }
 0xa55   : > { %v10268_v3 = vpop.f32.mrf.mxu1 }
 0xa56   : > { %12413 = vst [vmem:[#allocation81_spill] sm:$0xff] %v10268_v3 }
 0xa59   : > { %v10270_v60 = vpop.f32.mrf.mxu1 }
 0xa5a   : > { %12414 = vst [vmem:[#allocation57_spill] sm:$0xff] %v10270_v60 }
 0xa5b   : > { %v10272_v29 = vpop.f32.mrf.mxu1 }
 0xa5c   : > { %12415 = vst [vmem:[#allocation60_spill] sm:$0xff] %v10272_v29 }
 0xa5d   : > { %v10274_v17 = vpop.f32.mrf.mxu1 }
 0xa5e   : > { %12416 = vst [vmem:[#allocation79_spill] sm:$0xff] %v10274_v17 }
 0xa5f   : > { %v10276_v44 = vpop.f32.mrf.mxu1 }
 0xa60   : > { %12417 = vst [vmem:[#allocation82_spill] sm:$0xff] %v10276_v44 }
 0xa67   : > { %v10278_v51 = vpop.f32.mrf.mxu1 }
 0xa68   : > { %4137 = vmax.xlane.f32.xlu0 %v10278_v51 }
 0xa69   : > { %v10281_v4 = vpop.f32.mrf.mxu1 }
 0xa6a   : > { %4133 = vmax.xlane.f32.xlu1 %v10281_v4 }
 0xa6b   : > { %v10284_v14 = vpop.f32.mrf.mxu1 }
 0xa6d   : > { %v10286_v56 = vpop.f32.mrf.mxu1 }
 0xa6e   : > { %4139 = vmax.xlane.f32.xlu1 %v10284_v14  ;;  %4135 = vmax.xlane.f32.xlu0 %v10286_v56 }
 0xa6f   : > { %v10296_v53 = vpop.f32.mrf.mxu1 }
 0xa70   : > { %12420 = vst [vmem:[#allocation50_spill] sm:$0xff] %v10296_v53 }
 0xa71   : > { %v10298_v18 = vpop.f32.mrf.mxu1 }
 0xa72   : > { %12421 = vst [vmem:[#allocation52_spill] sm:$0xff] %v10298_v18 }
 0xa73   : > { %v10300_v33 = vpop.f32.mrf.mxu1 }
 0xa74   : > { %12422 = vst [vmem:[#allocation83_spill] sm:$0xff] %v10300_v33 }
 0xa75   : > { %v10302_v21 = vpop.f32.mrf.mxu1 }
 0xa76   : > { %12423 = vst [vmem:[#allocation85_spill] sm:$0xff] %v10302_v21 }
 0xa77   : > { %v10304_v24 = vpop.f32.mrf.mxu1 }
 0xa78   : > { %12424 = vst [vmem:[#allocation62_spill] sm:$0xff] %v10304_v24 }
 0xa79   : > { %v10306_v35 = vpop.f32.mrf.mxu1 }
 0xa7a   : > { %12425 = vst [vmem:[#allocation64_spill] sm:$0xff] %v10306_v35 }
 0xa7b   : > { %v10308_v25 = vpop.f32.mrf.mxu1 }
 0xa7c   : > { %12426 = vst [vmem:[#allocation84_spill] sm:$0xff] %v10308_v25 }
 0xa7d   : > { %v10312_v31 = vpop.f32.mrf.mxu1 }
 0xa7e   : > { %12427 = vst [vmem:[#allocation86_spill] sm:$0xff] %v10312_v31 }
 0xa7f   : > { %4586 = vrot.lane.b32.xlu1 %v12418_v2, %s8272_s9  ;;  %v10316_v26 = vpop.f32.mrf.mxu1 }
 0xa80   : > { %12428 = vst [vmem:[#allocation13_spill] sm:$0xff] %v10316_v26  ;;  %v4903_v44 = vpop.xlane.xlu0 %4902 }
 0xa81   : > { %v10320_v2 = vpop.f32.mrf.mxu1 }
 0xa82   : > { %12429 = vst [vmem:[#allocation67_spill] sm:$0xff] %v10320_v2 }
 0xa84   : > { %4588 = vrot.lane.b32.xlu0 %v12419_v5, %s8272_s9  ;;  %v10324_v5 = vpop.f32.mrf.mxu1  ;;  %v4894_v3 = vpop.xlane.xlu0 %4893 }
 0xa85   : > { %12430 = vst [vmem:[#allocation70_spill] sm:$0xff] %v10324_v5 }
 0xa86   : > { %v10328_v17 = vpop.f32.mrf.mxu1 }
 0xa87   : > { %12431 = vst [vmem:[#allocation9_spill] sm:$0xff] %v10328_v17 }
 0xa95   : > { %v4900_v62 = vpop.xlane.xlu1 %4899 }
 0xa9d   : > { %v4897_v52 = vpop.xlane.xlu1 %4896 }
 0xaa1   : > { %v4888_v63 = vpop.xlane.xlu0 %4887  ;;  %v4891_v60 = vpop.xlane.xlu1 %4890 }
 0xaa3   : > { %4147 = vmax.xlane.f32.xlu1 %v10300_v33  ;;  %4145 = vmax.xlane.f32.xlu0 %v10296_v53  ;;  %v4914_v33 = vmax.f32 %v4888_v63, 1e-24  ;;  %v10367_v63 = vld [vmem:[#allocation4 + $0x18] sm:$0xff] }
 0xaa5   : > { %v4882_v1 = vpop.xlane.xlu0 %4881 }
 0xaa7   : > { %4143 = vmax.xlane.f32.xlu1 %v10302_v21  ;;  %4141 = vmax.xlane.f32.xlu0 %v10298_v18  ;;  %v4915_v18 = vmax.f32 %v4891_v60, 1e-24  ;;  %v10353_v21 = vld [vmem:[#allocation4] sm:$0xff] }
 0xaa9   : > { %v4885_v29 = vpop.xlane.xlu1 %4884 }
 0xaab   : > { %4155 = vmax.xlane.f32.xlu1 %v10308_v25  ;;  %4153 = vmax.xlane.f32.xlu0 %v10304_v24  ;;  %v4917_v25 = vmax.f32 %v4897_v52, 1e-24  ;;  %v4913_v52 = vmax.f32 %v4885_v29, 1e-24 }
 0xaad   : > { %v10332_v0 = vpop.xlane.xlu0 %4875  ;;  %v10334_v30 = vpop.xlane.xlu1 %4878 }
 0xaaf   : > { %4151 = vmax.xlane.f32.xlu1 %v10312_v31  ;;  %4149 = vmax.xlane.f32.xlu0 %v10306_v35  ;;  %v10348_v31 = vld [vmem:[#allocation4 + $0x10] sm:$0xff] }
 0xab1   : > { %v10336_v49 = vpop.xlane.xlu0 %4869 }
 0xab3   : > { %4163 = vmax.xlane.f32.xlu1 %v10324_v5  ;;  %4161 = vmax.xlane.f32.xlu0 %v10316_v26  ;;  %v4918_v26 = vmax.f32 %v4900_v62, 1e-24  ;;  %v4916_v5 = vmax.f32 %v4894_v3, 1e-24 }
 0xab5   : > { %v10338_v15 = vpop.xlane.xlu1 %4872 }
 0xab7   : > { %4159 = vmax.xlane.f32.xlu1 %v10328_v17  ;;  %4157 = vmax.xlane.f32.xlu0 %v10320_v2  ;;  %v4919_v2 = vmax.f32 %v4903_v44, 1e-24 }
 0xab9   : > { %v10340_v43 = vpop.xlane.xlu0 %4863  ;;  %v10342_v12 = vpop.xlane.xlu1 %4866  ;;  %7971 = vrsqrt.f32 %v4919_v2 }
 0xaba   : > { %7973 = vrsqrt.f32 %v4918_v26  ;;  %v10369_v26 = vld [vmem:[#allocation4 + $0x8] sm:$0xff] }
 0xabb   : > { %7975 = vrsqrt.f32 %v4916_v5 }
 0xabc   : > { %7977 = vrsqrt.f32 %v4917_v25 }
 0xabd   : > { %v10344_v59 = vpop.xlane.xlu0 %4857  ;;  %v10346_v17 = vpop.xlane.xlu1 %4860  ;;  %7979 = vrsqrt.f32 %v4915_v18 }
 0xabe   : > { %7981 = vrsqrt.f32 %v4914_v33 }
 0xabf   : > { %7983 = vrsqrt.f32 %v4913_v52 }
 0xac6   : > { %v7972_v25 = vpop.eup %7971 }
 0xac7   : > { %v7974_v52 = vpop.eup %7973  ;;  %v4951_v5 = vmul.f32 %v7972_v25, %v8945_v34 }
 0xaf1   : > { %v4138_v35 = vpop.xlane.xlu0 %4137 }
 0xaf2   : > { %v10351_v24 = vmax.f32 %v10348_v31, %v4138_v35 }
 0xaf3   : > { %v4134_v53 = vpop.xlane.xlu1 %4133 }
 0xaf4   : > { %4794 = vst.msk [vmem:[#allocation4 + $0x10] sm:$0xff] %vm4437_vm11, %v10351_v24  ;;  %v10360_v62 = vmax.f32 %v10353_v21, %v4134_v53  ;;  %4241 = vperm.xlu1 %7737, %v10351_v24   ;;  %v4912_v53 = vmax.f32 %v4882_v1, 1e-24 }
 0xaf6   : > { %4792 = vst.msk [vmem:[#allocation4] sm:$0xff] %vm4437_vm11, %v10360_v62  ;;  %7985 = vrsqrt.f32 %v4912_v53 }
 0xaf7   : > { %v4140_v60 = vpop.xlane.xlu1 %4139  ;;  %v4136_v2 = vpop.xlane.xlu0 %4135 }
 0xaf8   : > { %v10372_v35 = vmax.f32 %v10367_v63, %v4140_v60  ;;  %v10375_v29 = vmax.f32 %v10369_v26, %v4136_v2  ;;  %4231 = vperm.xlu1 %7737, %v10360_v62   ;;  %v7976_v60 = vpop.eup %7975 }
 0xaf9   : > { %v7978_v2 = vpop.eup %7977 }
 0xafa   : > { %4795 = vst.msk [vmem:[#allocation4 + $0x18] sm:$0xff] %vm4437_vm11, %v10372_v35  ;;  %4793 = vst.msk [vmem:[#allocation4 + $0x8] sm:$0xff] %vm4437_vm11, %v10375_v29  ;;  %4236 = vperm.xlu0 %7738, %v10375_v29   ;;  %v7980_v53 = vpop.eup %7979  ;;  %v4949_v3 = vmul.f32 %v7978_v2, %v12280_v32 }
 0xafb   : > { %v4589_v1 = vpop.permute.xlu0 %4588  ;;  %v4587_v33 = vpop.permute.xlu1 %4586 }
 0xafc   : > { %4246 = vperm.xlu1 %7737, %v10372_v35   ;;  %7388 = vmatprep.subr.bf16.mxu0 %v4589_v1  ;;  %v7982_v18 = vpop.eup %7981 }
 0xafd   : > { %7389 = vmatpush3.bf16.msra.mxu0 %v4589_v1  ;;  %v4950_v1 = vmul.f32 %v7974_v52, %v8953_v11 }
 0xafe   : > { %4584 = vrot.lane.b32.xlu0 %v9300_v61, %s8272_s9  ;;  %7390 = vmatprep.subr.bf16.mxu0 %v4587_v33 }
 0xaff   : > { %v4959_v44 = vpack.c.bf16 %v4951_v5, %v4950_v1 }
 0xb00   : > { %4582 = vrot.lane.b32.xlu1 %v12279_v45, %s8272_s9  ;;  %v4946_v45 = vmul.f32 %v7982_v18, %v8935_v10  ;;  %v4911_v10 = vmax.f32 %v10334_v30, 1e-24  ;;  %v10441_v18 = vld [vmem:[#allocation4 + $0x20] sm:$0xff] }
 0xb01   : > { %7391 = vmatpush3.bf16.msra.mxu0 %v4587_v33  ;;  %v7984_v33 = vpop.eup %7983  ;;  %v10522_v30 = vld [vmem:[#allocation4 + $0x60] sm:$0xff] }
 0xb02   : > { %4580 = vrot.lane.b32.xlu0 %v9307_v58, %s8272_s9  ;;  %v4948_v58 = vmul.f32 %v7976_v60, %v12282_v36  ;;  %v4909_v36 = vmax.f32 %v10338_v15, 1e-24  ;;  %7987 = vrsqrt.f32 %v4911_v10  ;;  %v4904_v60 = vmax.f32 %v10344_v59, 1e-24  ;;  %v10460_v59 = vld [vmem:[#allocation4 + $0x58] sm:$0xff]  ;;  %12441 = vst [vmem:[#allocation66_spill] sm:$0xff] %v10522_v30 }
 0xb03   : > { %v7986_v11 = vpop.eup %7985 }
 0xb04   : > { %4578 = vrot.lane.b32.xlu1 %v9273_v39, %s8272_s9  ;;  %v12432_v39 = vld [vmem:[#allocation6_spill] sm:$0xff]  ;;  %v4958_v52 = vpack.c.bf16 %v4949_v3, %v4948_v58  ;;  %v4944_v32 = vmul.f32 %v7986_v11, %v8931_v28  ;;  %v10462_v11 = vld [vmem:[#allocation4 + $0x50] sm:$0xff] }
 0xb05   : > { %v4947_v61 = vmul.f32 %v7980_v53, %v12432_v39  ;;  %v4910_v39 = vmax.f32 %v10332_v0, 1e-24  ;;  %v4906_v0 = vmax.f32 %v10340_v43, 1e-24  ;;  %v10439_v43 = vld [vmem:[#allocation4 + $0x28] sm:$0xff]  ;;  %12433 = vst [vmem:[#allocation59_spill] sm:$0xff] %v10462_v11 }
 0xb06   : > { %4576 = vrot.lane.b32.xlu0 %v9313_v48, %s8272_s9  ;;  %v4945_v48 = vmul.f32 %v7984_v33, %v8929_v7  ;;  %v10417_v7 = vld [vmem:[#allocation4 + $0x30] sm:$0xff] }
 0xb07   : > { %v4957_v34 = vpack.c.bf16 %v4947_v61, %v4946_v45  ;;  %v4908_v61 = vmax.f32 %v10336_v49, 1e-24  ;;  %v4907_v45 = vmax.f32 %v10342_v12, 1e-24  ;;  %7989 = vrsqrt.f32 %v4910_v39  ;;  %v10480_v39 = vld [vmem:[#allocation4 + $0x48] sm:$0xff] }
 0xb08   : > { %4574 = vrot.lane.b32.xlu1 %v12281_v57, %s8272_s9  ;;  %v4956_v5 = vpack.c.bf16 %v4945_v48, %v4944_v32  ;;  %7991 = vrsqrt.f32 %v4909_v36  ;;  %v4905_v12 = vmax.f32 %v10346_v17, 1e-24 }
 0xb09   : > { %7993 = vrsqrt.f32 %v4908_v61 }
 0xb0a   : > { %5054 = vrot.lane.b32.xlu0 %v4959_v44, %s8270_s8  ;;  %v10415_v44 = vld [vmem:[#allocation4 + $0x38] sm:$0xff]  ;;  %7995 = vrsqrt.f32 %v4907_v45 }
 0xb0b   : > { %7997 = vrsqrt.f32 %v4906_v0 }
 0xb0c   : > { %5052 = vrot.lane.b32.xlu1 %v4958_v52, %s8270_s8  ;;  %7999 = vrsqrt.f32 %v4905_v12 }
 0xb0d   : > { %8001 = vrsqrt.f32 %v4904_v60  ;;  %v10500_v60 = vld [vmem:[#allocation4 + $0x78] sm:$0xff] }
 0xb0e   : > { %5050 = vrot.lane.b32.xlu0 %v4957_v34, %s8270_s8  ;;  %12436 = vst [vmem:[#allocation90_spill] sm:$0xff] %v10500_v60 }
 0xb0f   : > { %v7988_v0 = vpop.eup %7987 }
 0xb10   : > { %5048 = vrot.lane.b32.xlu1 %v4956_v5, %s8270_s8  ;;  %v4943_v15 = vmul.f32 %v7988_v0, %v8925_v38  ;;  %v12444_v0 = vmov 1  }
 0xb2c   : > { %v4148_v58 = vpop.xlane.xlu1 %4147  ;;  %v4146_v3 = vpop.xlane.xlu0 %4145 }
 0xb2d   : > { %v10421_v28 = vmax.f32 %v10415_v44, %v4148_v58  ;;  %v10424_v48 = vmax.f32 %v10417_v7, %v4146_v3  ;;  %v10482_v58 = vld [vmem:[#allocation4 + $0x40] sm:$0xff] }
 0xb2f   : > { %4799 = vst.msk [vmem:[#allocation4 + $0x38] sm:$0xff] %vm4437_vm11, %v10421_v28  ;;  %4798 = vst.msk [vmem:[#allocation4 + $0x30] sm:$0xff] %vm4437_vm11, %v10424_v48  ;;  %4266 = vperm.xlu1 %7737, %v10421_v28   ;;  %4261 = vperm.xlu0 %7738, %v10424_v48  }
 0xb30   : > { %v4144_v49 = vpop.xlane.xlu1 %4143  ;;  %v4142_v25 = vpop.xlane.xlu0 %4141 }
 0xb31   : > { %v10445_v2 = vmax.f32 %v10439_v43, %v4144_v49  ;;  %v10448_v53 = vmax.f32 %v10441_v18, %v4142_v25  ;;  %v7990_v25 = vpop.eup %7989 }
 0xb33   : > { %4797 = vst.msk [vmem:[#allocation4 + $0x28] sm:$0xff] %vm4437_vm11, %v10445_v2  ;;  %4796 = vst.msk [vmem:[#allocation4 + $0x20] sm:$0xff] %vm4437_vm11, %v10448_v53  ;;  %4256 = vperm.xlu1 %7737, %v10445_v2   ;;  %4251 = vperm.xlu0 %7738, %v10448_v53  }
 0xb34   : > { %v4156_v33 = vpop.xlane.xlu1 %4155  ;;  %v4154_v52 = vpop.xlane.xlu0 %4153 }
 0xb35   : > { %v10465_v34 = vmax.f32 %v10460_v59, %v4156_v33  ;;  %v10468_v32 = vmax.f32 %v10462_v11, %v4154_v52  ;;  %v10502_v52 = vld [vmem:[#allocation4 + $0x70] sm:$0xff] }
 0xb36   : > { %12437 = vst [vmem:[#allocation88_spill] sm:$0xff] %v10502_v52 }
 0xb37   : > { %12434 = vst [vmem:[#allocation61_spill] sm:$0xff] %v10468_v32  ;;  %4803 = vst.msk [vmem:[#allocation4 + $0x58] sm:$0xff] %vm4437_vm11, %v10465_v34  ;;  %4286 = vperm.xlu0 %7738, %v10465_v34   ;;  %4281 = vperm.xlu1 %7737, %v10468_v32  }
 0xb38   : > { %4802 = vst.msk [vmem:[#allocation4 + $0x50] sm:$0xff] %vm4437_vm11, %v10468_v32  ;;  %v4152_v36 = vpop.xlane.xlu1 %4151  ;;  %v4150_v3 = vpop.xlane.xlu0 %4149 }
 0xb39   : > { %v10485_v61 = vmax.f32 %v10480_v39, %v4152_v36  ;;  %v10488_v45 = vmax.f32 %v10482_v58, %v4150_v3  ;;  %v7992_v3 = vpop.eup %7991 }
 0xb3a   : > { %v7994_v5 = vpop.eup %7993  ;;  %v4941_v57 = vmul.f32 %v7992_v3, %v8921_v9  ;;  %v12514_v9 = vld [vmem:[#allocation56_spill] sm:$0xff] }
 0xb3b   : > { %12435 = vst [vmem:[#allocation87_spill] sm:$0xff] %v10488_v45  ;;  %4801 = vst.msk [vmem:[#allocation4 + $0x48] sm:$0xff] %vm4437_vm11, %v10485_v61  ;;  %4276 = vperm.xlu0 %7738, %v10485_v61   ;;  %4271 = vperm.xlu1 %7737, %v10488_v45   ;;  %v7996_v12 = vpop.eup %7995  ;;  %v4940_v11 = vmul.f32 %v7994_v5, %v8923_v37 }
 0xb3c   : > { %4800 = vst.msk [vmem:[#allocation4 + $0x40] sm:$0xff] %vm4437_vm11, %v10488_v45  ;;  %v4164_v33 = vpop.xlane.xlu1 %4163  ;;  %v4162_v36 = vpop.xlane.xlu0 %4161  ;;  %v4939_v5 = vmul.f32 %v7996_v12, %v8917_v6  ;;  %v7773_v6 = vld [vmem:[#allocation2 + $0x18] sm:$0xff]   ;;  %v7778_v12 = vld [vmem:[#allocation2 + $0x30] sm:$0xff]  }
 0xb3d   : > { %v10505_v10 = vmax.f32 %v10500_v60, %v4164_v33  ;;  %v10508_v49 = vmax.f32 %v10502_v52, %v4162_v36  ;;  %v7998_v33 = vpop.eup %7997  ;;  %v10520_v36 = vld [vmem:[#allocation4 + $0x68] sm:$0xff]  ;;  %v4942_v60 = vmul.f32 %v7990_v25, %v8927_v40  ;;  %v4954_v38 = vpack.c.bf16 %v4941_v57, %v4940_v11  ;;  %v7777_v11 = vld [vmem:[#allocation2 + $0x38] sm:$0xff]  }
 0xb3e   : > { %12440 = vst [vmem:[#allocation63_spill] sm:$0xff] %v10520_v36  ;;  %v8000_v52 = vpop.eup %7999  ;;  %v7775_v57 = vld [vmem:[#allocation2 + $0x28] sm:$0xff]  }
 0xb3f   : > { %12438 = vst [vmem:[#allocation89_spill] sm:$0xff] %v10505_v10  ;;  %12439 = vst [vmem:[#allocation12_spill] sm:$0xff] %v10508_v49  ;;  %4306 = vperm.xlu1 %7737, %v10505_v10   ;;  %4301 = vperm.xlu0 %7738, %v10508_v49   ;;  %v4955_v40 = vpack.c.bf16 %v4943_v15, %v4942_v60  ;;  %v7776_v15 = vld [vmem:[#allocation2 + $0x20] sm:$0xff]  }
 0xb40   : > { %4807 = vst.msk [vmem:[#allocation4 + $0x78] sm:$0xff] %vm4437_vm11, %v10505_v10  ;;  %4806 = vst.msk [vmem:[#allocation4 + $0x70] sm:$0xff] %vm4437_vm11, %v10508_v49  ;;  %v4160_v1 = vpop.xlane.xlu1 %4159  ;;  %v4158_v17 = vpop.xlane.xlu0 %4157 }
 0xb41   : > { %v10528_v32 = vmax.f32 %v10520_v36, %v4160_v1  ;;  %v10531_v10 = vmax.f32 %v10522_v30, %v4158_v17  ;;  %v8002_v49 = vpop.eup %8001  ;;  %v4937_v17 = vmul.f32 %v8000_v52, %v8913_v23  ;;  %v4938_v1 = vmul.f32 %v7998_v33, %v8919_v8  ;;  %v7772_v23 = vld [vmem:[#allocation2] sm:$0xff]   ;;  %v7774_v8 = vld [vmem:[#allocation2 + $0x10] sm:$0xff]  }
 0xb42   : > { %v4936_v37 = vmul.f32 %v8002_v49, %v8915_v27  ;;  %v7771_v27 = vld [vmem:[#allocation2 + $0x8] sm:$0xff]   ;;  %v12516_v30 = vld [vmem:[#allocation60_spill] sm:$0xff]  ;;  %v3277_v36 = vld [vmem:[#allocation5 + $0x20] sm:$0xff] }
 0xb43   : > { %12442 = vst [vmem:[#allocation17_spill] sm:$0xff] %v10528_v32  ;;  %12443 = vst [vmem:[#allocation69_spill] sm:$0xff] %v10531_v10  ;;  %4296 = vperm.xlu1 %7737, %v10528_v32   ;;  %4291 = vperm.xlu0 %7738, %v10531_v10   ;;  %v4953_v3 = vpack.c.bf16 %v4939_v5, %v4938_v1 }
 0xb44   : > { %4805 = vst.msk [vmem:[#allocation4 + $0x68] sm:$0xff] %vm4437_vm11, %v10528_v32  ;;  %4804 = vst.msk [vmem:[#allocation4 + $0x60] sm:$0xff] %vm4437_vm11, %v10531_v10  ;;  %v4952_v25 = vpack.c.bf16 %v4937_v17, %v4936_v37  ;;  %v12520_v32 = vld [vmem:[#allocation80_spill] sm:$0xff] }
 0xb47   : > { %5044 = vrot.lane.b32.xlu1 %v4954_v38, %s8270_s8  ;;  %5046 = vrot.lane.b32.xlu0 %v4955_v40, %s8270_s8 }
 0xb48   : > { %7739 = vset.pattern.permute.xlu1 %v12444_v0  ;;  %7740 = vset.pattern.permute.xlu0 %v12444_v0 }
 0xb4b   : > { %5040 = vrot.lane.b32.xlu1 %v4952_v25, %s8270_s8  ;;  %5042 = vrot.lane.b32.xlu0 %v4953_v3, %s8270_s8 }
 0xb4f   : > { %5018 = vrot.lane.b32.xlu1 %v7771_v27, %s8270_s8  ;;  %5016 = vrot.lane.b32.xlu0 %v7772_v23, %s8270_s8  ;;  %v12445_v23 = vld [vmem:[#allocation43_spill] sm:$0xff] }
 0xb53   : > { %5022 = vrot.lane.b32.xlu1 %v7773_v6, %s8270_s8  ;;  %5020 = vrot.lane.b32.xlu0 %v7774_v8, %s8270_s8  ;;  %v12447_v6 = vld [vmem:[#allocation94_spill] sm:$0xff] }
 0xb57   : > { %5026 = vrot.lane.b32.xlu1 %v7775_v57, %s8270_s8  ;;  %5024 = vrot.lane.b32.xlu0 %v7776_v15, %s8270_s8  ;;  %v12449_v57 = vld [vmem:[#allocation39_spill] sm:$0xff]  ;;  %v12450_v15 = vld [vmem:[#allocation36_spill] sm:$0xff] }
 0xb5b   : > { %5030 = vrot.lane.b32.xlu1 %v7777_v11, %s8270_s8  ;;  %5028 = vrot.lane.b32.xlu0 %v7778_v12, %s8270_s8  ;;  %v12451_v11 = vld [vmem:[#allocation91_spill] sm:$0xff]  ;;  %v12452_v12 = vld [vmem:[#allocation92_spill] sm:$0xff] }
 0xb6f   : > { %v4242_v49 = vpop.permute.xlu1 %4241 }
 0xb70   : > { %v4311_v0 = vsub.f32 %v10278_v51, %v4242_v49 }
 0xb73   : > { %v4232_v60 = vpop.permute.xlu1 %4231 }
 0xb74   : > { %v4309_v52 = vsub.f32 %v10281_v4, %v4232_v60  ;;  %v4329_v4 = vmul.f32 1.442695, %v4311_v0  ;;  %v12454_v60 = vld [vmem:[#allocation37_spill] sm:$0xff] }
 0xb75   : > { %v4237_v33 = vpop.permute.xlu0 %4236 }
 0xb76   : > { %v4325_v38 = vmul.f32 1.442695, %v4309_v52  ;;  %v4310_v40 = vsub.f32 %v10286_v56, %v4237_v33 }
 0xb77   : > { %v4247_v37 = vpop.permute.xlu1 %4246 }
 0xb78   : > { %v4327_v17 = vmul.f32 1.442695, %v4310_v40  ;;  %v4312_v1 = vsub.f32 %v10284_v14, %v4247_v37  ;;  %8003 = vpow2.f32 %v4325_v38  ;;  %v12455_v38 = vld [vmem:[#allocation95_spill] sm:$0xff]  ;;  %v12456_v40 = vld [vmem:[#allocation96_spill] sm:$0xff] }
 0xb79   : > { %v4585_v5 = vpop.permute.xlu0 %4584  ;;  %v12457_v37 = vsub.f32 %v12455_v38, %v12456_v40 }
 0xb7a   : > { %8005 = vpow2.f32 %v4327_v17  ;;  %3305 = vadd.xlane.f32.xlu0 %v9942_v55  ;;  %7392 = vmatprep.subr.bf16.mxu0 %v4585_v5  ;;  %v4331_v3 = vmul.f32 1.442695, %v4312_v1  ;;  %v12458_v1 = vld [vmem:[#allocation97_spill] sm:$0xff] }
 0xb7b   : > { %v4583_v25 = vpop.permute.xlu1 %4582  ;;  %7393 = vmatpush3.bf16.msra.mxu0 %v4585_v5  ;;  %v3119_v17 = vmul.f32 1.442695, %v12457_v37  ;;  %v12459_v5 = vld [vmem:[#allocation98_spill] sm:$0xff] }
 0xb7c   : > { %7394 = vmatprep.subr.bf16.mxu0 %v4583_v25  ;;  %8007 = vpow2.f32 %v4331_v3  ;;  %v12460_v0 = vsub.f32 %v12458_v1, %v12459_v5  ;;  %v12461_v3 = vld [vmem:[#allocation99_spill] sm:$0xff] }
 0xb7d   : > { %v4581_v56 = vpop.permute.xlu0 %4580  ;;  %8009 = vpow2.f32 %v4329_v4  ;;  %v12462_v4 = vld [vmem:[#allocation100_spill] sm:$0xff] }
 0xb7e   : > { %3309 = vadd.xlane.f32.xlu0 %v9955_v41 }
 0xb7f   : > { %3307 = vadd.xlane.f32.xlu1 %v9945_v13  ;;  %7395 = vmatpush3.bf16.msra.mxu0 %v4583_v25  ;;  %v4579_v51 = vpop.permute.xlu1 %4578  ;;  %v3115_v25 = vmul.f32 1.442695, %v12460_v0  ;;  %v12479_v0 = vld [vmem:[#allocation83_spill] sm:$0xff] }
 0xb80   : > { %7396 = vmatprep.subr.bf16.mxu0 %v4581_v56 }
 0xb81   : > { %v4577_v41 = vpop.permute.xlu0 %4576 }
 0xb82   : > { %3311 = vadd.xlane.f32.xlu0 %v9952_v46 }
 0xb83   : > { %3313 = vadd.xlane.f32.xlu1 %v10047_v20  ;;  %7397 = vmatpush3.bf16.msra.mxu0 %v4581_v56  ;;  %v4575_v46 = vpop.permute.xlu1 %4574  ;;  %v12463_v56 = vsub.f32 %v12461_v3, %v12462_v4  ;;  %v12480_v3 = vld [vmem:[#allocation50_spill] sm:$0xff] }
 0xb84   : > { %7398 = vmatprep.subr.bf16.mxu0 %v4579_v51 }
 0xb85   : > { %v10571_v55 = vpop.eup %8003 }
 0xb86   : > { %3315 = vadd.xlane.f32.xlu0 %v10057_v19 }
 0xb87   : > { %v10574_v14 = vpop.eup %8005  ;;  %3317 = vadd.xlane.f32.xlu1 %v10063_v22  ;;  %7399 = vmatpush3.bf16.msra.mxu0 %v4579_v51  ;;  %v5055_v22 = vpop.permute.xlu0 %5054  ;;  %v3121_v51 = vmul.f32 1.442695, %v12463_v56  ;;  %v12481_v56 = vld [vmem:[#allocation101_spill] sm:$0xff] }
 0xb88   : > { %7400 = vmatprep.subr.bf16.mxu0 %v4577_v41  ;;  %v4566_v13 = vpack.c.bf16 %v10574_v14, %v10571_v55  ;;  %v5053_v27 = vpop.permute.xlu1 %5052 }
 0xb89   : > { %v10581_v20 = vpop.eup %8007  ;;  %v5099_v52 = vsel %vm1676_vm8, %v5053_v27, 0 }
 0xb8a   : > { %3319 = vadd.xlane.f32.xlu0 %v10053_v16  ;;  %7404 = vmatprep.mubr.bf16.mxu0 %v4566_v13  ;;  %v10584_v19 = vpop.eup %8009  ;;  %v12465_v13 = vld [vmem:[#allocation104_spill] sm:$0xff] }
 0xb8b   : > { %3321 = vadd.xlane.f32.xlu1 %v10085_v50  ;;  %7401 = vmatpush3.bf16.msra.mxu0 %v4577_v41  ;;  %v4567_v16 = vpack.c.bf16 %v10581_v20, %v10584_v19  ;;  %v5102_v50 = vsel %vm1676_vm8, %v5055_v22, 0  ;;  %v5051_v33 = vpop.permute.xlu0 %5050  ;;  %v12464_v41 = vld [vmem:[#allocation103_spill] sm:$0xff] }
 0xb8c   : > { %7402 = vmatprep.subr.bf16.mxu0 %v4575_v46 }
 0xb8e   : > { %3323 = vadd.xlane.f32.xlu0 %v10090_v47  ;;  %v12446_v47 = vld [vmem:[#allocation93_spill] sm:$0xff] }
 0xb8f   : > { %3325 = vadd.xlane.f32.xlu1 %v10077_v42  ;;  %7403 = vmatpush3.bf16.msra.mxu0 %v4575_v46  ;;  %v12448_v42 = vsub.f32 %v12446_v47, %v12447_v6  ;;  %v12466_v46 = vsub.f32 %v12464_v41, %v12465_v13 }
 0xb90   : > { %7516 = vmatprep.subr.msk.bf16.mxu0 %vm1676_vm8, %v5055_v22 }
 0xb91   : > { %v3113_v8 = vmul.f32 1.442695, %v12448_v42  ;;  %v3133_v22 = vmul.f32 1.442695, %v12466_v46  ;;  %v12470_v42 = vld [vmem:[#allocation115_spill] sm:$0xff] }
 0xb92   : > { %3327 = vadd.xlane.f32.xlu0 %v10082_v54  ;;  %7405 = vmatmul.mubr.bf16.vlgmr.msra.gmra.mxu0 %v4567_v16  ;;  %v12453_v54 = vsub.f32 %v12451_v11, %v12452_v12  ;;  %v5096_v16 = vsel %vm1676_vm8, %v5051_v33, 0  ;;  %v12473_v12 = vld [vmem:[#allocation7_spill] sm:$0xff] }
 0xb93   : > { %3329 = vadd.xlane.f32.xlu1 %v12445_v23  ;;  %7421 = vmatpush3.bf16.xpose.msra.mxu0 %v5102_v50  ;;  %8011 = vpow2.f32 %v3113_v8  ;;  %v5049_v50 = vpop.permute.xlu1 %5048  ;;  %v12468_v23 = vld [vmem:[#allocation106_spill] sm:$0xff]  ;;  %v12471_v8 = vld [vmem:[#allocation116_spill] sm:$0xff] }
 0xb94   : > { %7517 = vmatprep.subr.msk.bf16.mxu0 %vm1676_vm8, %v5053_v27  ;;  %v3117_v49 = vmul.f32 1.442695, %v12453_v54  ;;  %v12467_v27 = vld [vmem:[#allocation105_spill] sm:$0xff]  ;;  %v12474_v54 = vld [vmem:[#allocation8_spill] sm:$0xff]  ;;  %v5093_v1 = vsel %vm1676_vm8, %v5049_v50, 0 }
 0xb95   : > { %v12469_v47 = vsub.f32 %v12467_v27, %v12468_v23 }
 0xb96   : > { %3331 = vadd.xlane.f32.xlu0 %v12449_v57  ;;  %8013 = vpow2.f32 %v3117_v49  ;;  %v12472_v57 = vsub.f32 %v12470_v42, %v12471_v8  ;;  %v12475_v49 = vsub.f32 %v12473_v12, %v12474_v54  ;;  %v12485_v42 = vld [vmem:[#allocation52_spill] sm:$0xff]  ;;  %v12486_v54 = vld [vmem:[#allocation107_spill] sm:$0xff] }
 0xb97   : > { %3333 = vadd.xlane.f32.xlu1 %v12450_v15  ;;  %8015 = vpow2.f32 %v3119_v17  ;;  %v3123_v6 = vmul.f32 1.442695, %v12469_v47  ;;  %v12484_v47 = vld [vmem:[#allocation85_spill] sm:$0xff] }
 0xb98   : > { %8017 = vpow2.f32 %v3115_v25  ;;  %v3137_v15 = vmul.f32 1.442695, %v12472_v57 }
 0xb99   : > { %8019 = vpow2.f32 %v3121_v51  ;;  %v12482_v51 = vld [vmem:[#allocation102_spill] sm:$0xff] }
 0xb9a   : > { %3335 = vadd.xlane.f32.xlu0 %v12454_v60  ;;  %8021 = vpow2.f32 %v3133_v22  ;;  %v3125_v60 = vmul.f32 1.442695, %v12475_v49  ;;  %v12483_v41 = vsub.f32 %v12481_v56, %v12482_v51  ;;  %v12487_v49 = vld [vmem:[#allocation108_spill] sm:$0xff] }
 0xb9b   : > { %7423 = vmatpush3.bf16.xpose.msra.mxu0 %v5099_v52  ;;  %8023 = vpow2.f32 %v3123_v6  ;;  %v12476_v52 = vld [vmem:[#allocation111_spill] sm:$0xff] }
 0xb9c   : > { %7518 = vmatprep.subr.msk.bf16.mxu0 %vm1676_vm8, %v5051_v33  ;;  %v12477_v33 = vld [vmem:[#allocation112_spill] sm:$0xff]  ;;  %8025 = vpow2.f32 %v3137_v15  ;;  %v3127_v13 = vmul.f32 1.442695, %v12483_v41 }
 0xb9d   : > { %v12478_v38 = vsub.f32 %v12476_v52, %v12477_v33  ;;  %8027 = vpow2.f32 %v3125_v60  ;;  %v12488_v60 = vsub.f32 %v12486_v54, %v12487_v49  ;;  %v12496_v54 = vld [vmem:[#allocation109_spill] sm:$0xff]  ;;  %v12497_v49 = vld [vmem:[#allocation110_spill] sm:$0xff] }
 0xb9f   : > { %v3141_v40 = vmul.f32 1.442695, %v12478_v38  ;;  %v3129_v52 = vmul.f32 1.442695, %v12488_v60  ;;  %v12498_v60 = vsub.f32 %v12496_v54, %v12497_v49  ;;  %v12505_v49 = vld [vmem:[#allocation67_spill] sm:$0xff] }
 0xba0   : > { %v10625_v11 = vpop.eup %8011 }
 0xba1   : > { %8029 = vpow2.f32 %v3141_v40 }
 0xba2   : > { %8031 = vpow2.f32 %v3127_v13 }
 0xba3   : > { %7425 = vmatpush3.bf16.xpose.msra.mxu0 %v5096_v16  ;;  %v10635_v5 = vpop.eup %8013 }
 0xba4   : > { %7519 = vmatprep.subr.msk.bf16.mxu0 %vm1676_vm8, %v5049_v50  ;;  %v10643_v22 = vpop.eup %8015 }
 0xba5   : > { %v10645_v23 = vpop.eup %8017 }
 0xba6   : > { %v10651_v12 = vpop.eup %8019 }
 0xba7   : > { %v10656_v40 = vpop.eup %8021 }
 0xba8   : > { %3388 = vperm.xlu1 %7739, %v10625_v11   ;;  %v10665_v41 = vpop.eup %8023 }
 0xbaa   : > { %v4267_v37 = vpop.permute.xlu1 %4266  ;;  %v4262_v17 = vpop.permute.xlu0 %4261 }
 0xbab   : > { %v4316_v25 = vsub.f32 %v12479_v0, %v4267_v37  ;;  %v4315_v4 = vsub.f32 %v12480_v3, %v4262_v17  ;;  %7427 = vmatpush3.bf16.xpose.msra.mxu0 %v5093_v1  ;;  %v12489_v37 = vld [vmem:[#allocation62_spill] sm:$0xff]  ;;  %v12490_v1 = vld [vmem:[#allocation84_spill] sm:$0xff] }
 0xbac   : > { %3398 = vperm.xlu1 %7739, %v10635_v5   ;;  %v12492_v3 = vld [vmem:[#allocation114_spill] sm:$0xff] }
 0xbad   : > { %v4339_v46 = vmul.f32 1.442695, %v4316_v25  ;;  %v4337_v16 = vmul.f32 1.442695, %v4315_v4  ;;  %v12491_v25 = vld [vmem:[#allocation113_spill] sm:$0xff] }
 0xbae   : > { %v4257_v50 = vpop.permute.xlu1 %4256  ;;  %v4252_v27 = vpop.permute.xlu0 %4251  ;;  %v12493_v4 = vsub.f32 %v12491_v25, %v12492_v3  ;;  %v12501_v3 = vld [vmem:[#allocation119_spill] sm:$0xff] }
 0xbaf   : > { %v4314_v6 = vsub.f32 %v12484_v47, %v4257_v50  ;;  %v4313_v8 = vsub.f32 %v12485_v42, %v4252_v27  ;;  %8033 = vpow2.f32 %v4339_v46  ;;  %v10667_v50 = vpop.eup %8025  ;;  %v12494_v27 = vld [vmem:[#allocation64_spill] sm:$0xff] }
 0xbb0   : > { %3403 = vperm.xlu1 %7739, %v10643_v22   ;;  %3393 = vperm.xlu0 %7740, %v10645_v23   ;;  %8035 = vpow2.f32 %v4337_v16  ;;  %v3131_v56 = vmul.f32 1.442695, %v12493_v4  ;;  %v12502_v4 = vld [vmem:[#allocation120_spill] sm:$0xff] }
 0xbb1   : > { %v4335_v57 = vmul.f32 1.442695, %v4314_v6  ;;  %v4333_v15 = vmul.f32 1.442695, %v4313_v8  ;;  %v12495_v6 = vld [vmem:[#allocation86_spill] sm:$0xff] }
 0xbb2   : > { %v4282_v33 = vpop.permute.xlu1 %4281  ;;  %v4287_v38 = vpop.permute.xlu0 %4286 }
 0xbb3   : > { %8037 = vpow2.f32 %v4335_v57  ;;  %v4319_v17 = vsub.f32 %v12489_v37, %v4282_v33  ;;  %v4320_v0 = vsub.f32 %v12490_v1, %v4287_v38 }
 0xbb4   : > { %8039 = vpow2.f32 %v4333_v15  ;;  %3408 = vperm.xlu1 %7739, %v10651_v12   ;;  %3438 = vperm.xlu0 %7740, %v10656_v40   ;;  %v10673_v15 = vpop.eup %8027 }
 0xbb5   : > { %v4345_v51 = vmul.f32 1.442695, %v4319_v17  ;;  %8041 = vpow2.f32 %v3129_v52  ;;  %v4347_v13 = vmul.f32 1.442695, %v4320_v0  ;;  %v3135_v52 = vmul.f32 1.442695, %v12498_v60  ;;  %v10678_v37 = vpop.eup %8029 }
 0xbb6   : > { %v4272_v46 = vpop.permute.xlu1 %4271  ;;  %v4277_v16 = vpop.permute.xlu0 %4276  ;;  %8043 = vpow2.f32 %v3131_v56  ;;  %v12499_v17 = vld [vmem:[#allocation70_spill] sm:$0xff]  ;;  %v12500_v0 = vld [vmem:[#allocation13_spill] sm:$0xff]  ;;  %v12503_v56 = vsub.f32 %v12501_v3, %v12502_v4 }
 0xbb7   : > { %v4317_v47 = vsub.f32 %v12494_v27, %v4272_v46  ;;  %v4318_v42 = vsub.f32 %v12495_v6, %v4277_v16  ;;  %8045 = vpow2.f32 %v4345_v51  ;;  %v10687_v46 = vpop.eup %8031 }
 0xbb8   : > { %3413 = vperm.xlu1 %7739, %v10665_v41   ;;  %3448 = vperm.xlu0 %7740, %v10667_v50   ;;  %8047 = vpow2.f32 %v4347_v13  ;;  %v3139_v51 = vmul.f32 1.442695, %v12503_v56 }
 0xbb9   : > { %v4341_v8 = vmul.f32 1.442695, %v4317_v47  ;;  %v4343_v57 = vmul.f32 1.442695, %v4318_v42 }
 0xbba   : > { %v4307_v33 = vpop.permute.xlu1 %4306  ;;  %v4302_v38 = vpop.permute.xlu0 %4301 }
 0xbbb   : > { %8049 = vpow2.f32 %v4341_v8  ;;  %v4324_v1 = vsub.f32 %v12499_v17, %v4307_v33  ;;  %v4323_v25 = vsub.f32 %v12500_v0, %v4302_v38  ;;  %v12504_v8 = vld [vmem:[#allocation9_spill] sm:$0xff]  ;;  %v12506_v33 = vld [vmem:[#allocation40_spill] sm:$0xff]  ;;  %v12508_v0 = vld [vmem:[#allocation118_spill] sm:$0xff] }
 0xbbc   : > { %8051 = vpow2.f32 %v4343_v57  ;;  %3418 = vperm.xlu1 %7739, %v10673_v15   ;;  %3458 = vperm.xlu0 %7740, %v10678_v37   ;;  %v10689_v16 = vpop.eup %8033 }
 0xbbd   : > { %v4355_v13 = vmul.f32 1.442695, %v4324_v1  ;;  %8053 = vpow2.f32 %v3135_v52  ;;  %v4353_v27 = vmul.f32 1.442695, %v4323_v25  ;;  %v10691_v42 = vpop.eup %8035  ;;  %v12507_v1 = vld [vmem:[#allocation117_spill] sm:$0xff] }
 0xbbe   : > { %v4297_v47 = vpop.permute.xlu1 %4296  ;;  %v4292_v6 = vpop.permute.xlu0 %4291  ;;  %8055 = vpow2.f32 %v3139_v51  ;;  %v12509_v25 = vsub.f32 %v12507_v1, %v12508_v0 }
 0xbbf   : > { %v4322_v54 = vsub.f32 %v12504_v8, %v4297_v47  ;;  %v4321_v60 = vsub.f32 %v12505_v49, %v4292_v6  ;;  %8057 = vpow2.f32 %v4355_v13  ;;  %v4569_v47 = vpack.c.bf16 %v10689_v16, %v10691_v42 }
 0xbc0   : > { %v10695_v57 = vpop.eup %8037  ;;  %3423 = vperm.xlu1 %7739, %v10687_v46   ;;  %3627 = vrot.lane.b32.xlu0 %v12506_v33, %s8273_s11  ;;  %v3143_v3 = vmul.f32 1.442695, %v12509_v25  ;;  %8059 = vpow2.f32 %v4353_v27  ;;  %v12510_v27 = vld [vmem:[#allocation38_spill] sm:$0xff] }
 0xbc1   : > { %v10700_v38 = vpop.eup %8039  ;;  %v4351_v52 = vmul.f32 1.442695, %v4322_v54  ;;  %v4349_v17 = vmul.f32 1.442695, %v4321_v60 }
 0xbc2   : > { %v5047_v4 = vpop.permute.xlu0 %5046  ;;  %v4568_v56 = vpack.c.bf16 %v10695_v57, %v10700_v38  ;;  %v10707_v51 = vpop.eup %8041 }
 0xbc3   : > { %8061 = vpow2.f32 %v4351_v52  ;;  %7520 = vmatprep.subr.msk.bf16.mxu0 %vm1676_vm8, %v5047_v4  ;;  %v5090_v13 = vsel %vm1676_vm8, %v5047_v4, 0  ;;  %v10714_v6 = vpop.eup %8043  ;;  %v5045_v54 = vpop.permute.xlu1 %5044  ;;  %v12511_v52 = vld [vmem:[#allocation58_spill] sm:$0xff] }
 0xbc4   : > { %8063 = vpow2.f32 %v4349_v17  ;;  %7408 = vmatprep.mubr.bf16.mxu0 %v4568_v56  ;;  %3428 = vperm.xlu1 %7739, %v10707_v51   ;;  %v10718_v8 = vpop.eup %8045  ;;  %v5087_v4 = vsel %vm1676_vm8, %v5045_v54, 0 }
 0xbc5   : > { %3631 = vrot.lane.b32.xlu0 %v12510_v27, %s8273_s11  ;;  %7409 = vmatmul.mubr.bf16.gmra.mxu0 %v4569_v47  ;;  %8065 = vpow2.f32 %v3143_v3  ;;  %v10720_v49 = vpop.eup %8047  ;;  %v12512_v3 = vld [vmem:[#allocation55_spill] sm:$0xff] }
 0xbc6   : > { %7429 = vmatpush3.bf16.xpose.msra.mxu0 %v5090_v13  ;;  %v4571_v0 = vpack.c.bf16 %v10720_v49, %v10718_v8  ;;  %v5043_v47 = vpop.permute.xlu0 %5042 }
 0xbc7   : > { %7521 = vmatprep.subr.msk.bf16.mxu0 %vm1676_vm8, %v5045_v54  ;;  %v5084_v45 = vsel %vm1676_vm8, %v5043_v47, 0  ;;  %v5041_v10 = vpop.permute.xlu1 %5040 }
 0xbc8   : > { %v10723_v60 = vpop.eup %8049  ;;  %3433 = vperm.xlu1 %7739, %v10714_v6  }
 0xbc9   : > { %v10726_v33 = vpop.eup %8051  ;;  %3635 = vrot.lane.b32.xlu0 %v12511_v52, %s8273_s11 }
 0xbca   : > { %v4570_v17 = vpack.c.bf16 %v10726_v33, %v10723_v60  ;;  %v10732_v1 = vpop.eup %8053 }
 0xbcb   : > { %v10737_v25 = vpop.eup %8055 }
 0xbcc   : > { %7412 = vmatprep.mubr.bf16.mxu0 %v4570_v17  ;;  %3443 = vperm.xlu1 %7739, %v10732_v1   ;;  %v10742_v56 = vpop.eup %8057  ;;  %v12513_v17 = vld [vmem:[#allocation51_spill] sm:$0xff] }
 0xbcd   : > { %3639 = vrot.lane.b32.xlu0 %v12512_v3, %s8273_s11  ;;  %7413 = vmatmul.mubr.bf16.gmra.mxu0 %v4571_v0  ;;  %v10744_v13 = vpop.eup %8059 }
 0xbce   : > { %7431 = vmatpush3.bf16.xpose.msra.mxu0 %v5087_v4  ;;  %v4573_v3 = vpack.c.bf16 %v10742_v56, %v10744_v13  ;;  %v5017_v4 = vpop.permute.xlu0 %5016 }
 0xbcf   : > { %7522 = vmatprep.subr.msk.bf16.mxu0 %vm1676_vm8, %v5043_v47  ;;  %v5081_v47 = vsel %vm1676_vm8, %v5041_v10, 0 }
 0xbd0   : > { %v10747_v27 = vpop.eup %8061  ;;  %3453 = vperm.xlu1 %7739, %v10737_v25  }
 0xbd1   : > { %v10750_v52 = vpop.eup %8063  ;;  %3643 = vrot.lane.b32.xlu0 %v12513_v17, %s8273_s11  ;;  %v12515_v17 = vld [vmem:[#allocation45_spill] sm:$0xff] }
 0xbd2   : > { %v4572_v54 = vpack.c.bf16 %v10747_v27, %v10750_v52  ;;  %v10756_v0 = vpop.eup %8065 }
 0xbd4   : > { %7416 = vmatprep.mubr.bf16.mxu0 %v4572_v54  ;;  %3463 = vperm.xlu1 %7739, %v10756_v0   ;;  %v12517_v54 = vld [vmem:[#allocation42_spill] sm:$0xff] }
 0xbd5   : > { %3647 = vrot.lane.b32.xlu0 %v12514_v9, %s8273_s11  ;;  %7417 = vmatmul.mubr.bf16.gmra.mxu0 %v4573_v3  ;;  %v12518_v9 = vld [vmem:[#allocation57_spill] sm:$0xff]  ;;  %v5019_v3 = vpop.permute.xlu1 %5018 }
 0xbd6   : > { %7433 = vmatpush3.bf16.xpose.msra.mxu0 %v5084_v45  ;;  %7436 = vmatprep.mubr.msk.bf16.mxu0 %vm1676_vm8, %v5017_v4  ;;  %v12519_v45 = vld [vmem:[#allocation53_spill] sm:$0xff]  ;;  %v5021_v4 = vpop.permute.xlu0 %5020 }
 0xbd7   : > { %7523 = vmatprep.subr.msk.bf16.mxu0 %vm1676_vm8, %v5041_v10  ;;  %v12522_v10 = vld [vmem:[#allocation54_spill] sm:$0xff] }
 0xbd8   : > { %3629 = vrot.lane.b32.xlu1 %v12515_v17, %s8273_s11 }
 0xbd9   : > { %3651 = vrot.lane.b32.xlu0 %v12516_v30, %s8273_s11  ;;  %v12521_v30 = vld [vmem:[#allocation81_spill] sm:$0xff]  ;;  %v5023_v17 = vpop.permute.xlu1 %5022 }
 0xbdc   : > { %3633 = vrot.lane.b32.xlu1 %v12517_v54, %s8273_s11  ;;  %v5025_v54 = vpop.permute.xlu0 %5024 }
 0xbdd   : > { %3655 = vrot.lane.b32.xlu0 %v12518_v9, %s8273_s11  ;;  %v12523_v9 = vld [vmem:[#allocation82_spill] sm:$0xff] }
 0xbde   : > { %7435 = vmatpush3.bf16.xpose.msra.mxu0 %v5081_v47 }
 0xbe0   : > { %3637 = vrot.lane.b32.xlu1 %v12519_v45, %s8273_s11  ;;  %v5029_v47 = vpop.permute.xlu0 %5028  ;;  %v12524_v45 = vld [vmem:[#allocation79_spill] sm:$0xff] }
 0xbe4   : > { %3641 = vrot.lane.b32.xlu1 %v12520_v32, %s8273_s11  ;;  %v5027_v32 = vpop.permute.xlu1 %5026 }
 0xbe5   : > { %7437 = vmatmul.mubr.msk.bf16.vlgmr.msra.gmra.mxu0 %vm1676_vm8, %v5019_v3 }
 0xbe6   : > { %7440 = vmatprep.mubr.msk.bf16.mxu0 %vm1676_vm8, %v5021_v4  ;;  %v3273_v4 = vld [vmem:[#allocation5] sm:$0xff] }
 0xbe8   : > { %3645 = vrot.lane.b32.xlu1 %v12521_v30, %s8273_s11  ;;  %v5031_v3 = vpop.permute.xlu1 %5030  ;;  %v3289_v30 = vmul.f32 %v10625_v11, %v3273_v4 }
 0xbec   : > { %3649 = vrot.lane.b32.xlu1 %v12522_v10, %s8273_s11 }
 0xbed   : > { %7441 = vmatmul.mubr.msk.bf16.gmra.mxu0 %vm1676_vm8, %v5023_v17 }
 0xbee   : > { %7444 = vmatprep.mubr.msk.bf16.mxu0 %vm1676_vm8, %v5025_v54  ;;  %v3275_v54 = vld [vmem:[#allocation5 + $0x10] sm:$0xff] }
 0xbf0   : > { %3653 = vrot.lane.b32.xlu1 %v12523_v9, %s8273_s11  ;;  %v3274_v9 = vld [vmem:[#allocation5 + $0x8] sm:$0xff] }
 0xbf4   : > { %3657 = vrot.lane.b32.xlu1 %v12524_v45, %s8273_s11  ;;  %v3276_v45 = vld [vmem:[#allocation5 + $0x18] sm:$0xff] }
 0xbf5   : > { %7445 = vmatmul.mubr.msk.bf16.gmra.mxu0 %vm1676_vm8, %v5027_v32  ;;  %v3291_v32 = vmul.f32 %v10635_v5, %v3275_v54  ;;  %v3278_v5 = vld [vmem:[#allocation5 + $0x28] sm:$0xff]  ;;  %v3279_v54 = vld [vmem:[#allocation5 + $0x30] sm:$0xff] }
 0xbf6   : > { %7448 = vmatprep.mubr.msk.bf16.mxu0 %vm1676_vm8, %v5029_v47 }
 0xbfc   : > { %4393 = vadd.xlane.f32.xlu0 %v10584_v19  ;;  %v3290_v19 = vmul.f32 %v10645_v23, %v3274_v9 }
 0xbfd   : > { %7449 = vmatmul.mubr.msk.bf16.gmra.mxu0 %vm1676_vm8, %v5031_v3 }
 0xc00   : > { %4389 = vadd.xlane.f32.xlu0 %v10571_v55 }
 0xc03   : > { %v3306_v17 = vpop.xlane.xlu0 %3305 }
 0xc04   : > { %4395 = vadd.xlane.f32.xlu0 %v10581_v20  ;;  %v3337_v10 = vadd.f32 %v3306_v17, %v3289_v30  ;;  %v3292_v20 = vmul.f32 %v10643_v22, %v3276_v45  ;;  %v3293_v30 = vmul.f32 %v10651_v12, %v3277_v36  ;;  %v3295_v22 = vmul.f32 %v10673_v15, %v3279_v54  ;;  %v3281_v36 = vld [vmem:[#allocation5 + $0x40] sm:$0xff] }
 0xc06   : > { %3354 = vst.msk [vmem:[#allocation5] sm:$0xff] %vm3353_vm10, %v3337_v10  ;;  %v3294_v10 = vmul.f32 %v10665_v41, %v3278_v5  ;;  %v3282_v41 = vld [vmem:[#allocation5 + $0x48] sm:$0xff] }
 0xc07   : > { %v3310_v47 = vpop.xlane.xlu0 %3309  ;;  %v3298_v15 = vmul.f32 %v10714_v6, %v3282_v41 }
 0xc08   : > { %4401 = vadd.xlane.f32.xlu0 %v10691_v42  ;;  %v3339_v3 = vadd.f32 %v3310_v47, %v3291_v32  ;;  %v3308_v55 = vpop.xlane.xlu1 %3307  ;;  %v3280_v32 = vld [vmem:[#allocation5 + $0x38] sm:$0xff] }
 0xc09   : > { %v3338_v11 = vadd.f32 %v3308_v55, %v3290_v19 }
 0xc0a   : > { %3356 = vst.msk [vmem:[#allocation5 + $0x10] sm:$0xff] %vm3353_vm10, %v3339_v3  ;;  %v3297_v3 = vmul.f32 %v10707_v51, %v3281_v36  ;;  %v3285_v51 = vld [vmem:[#allocation5 + $0x60] sm:$0xff]  ;;  %v3288_v36 = vld [vmem:[#allocation5 + $0x78] sm:$0xff] }
 0xc0b   : > { %3355 = vst.msk [vmem:[#allocation5 + $0x8] sm:$0xff] %vm3353_vm10, %v3338_v11  ;;  %v3312_v4 = vpop.xlane.xlu0 %3311  ;;  %v3301_v6 = vmul.f32 %v10667_v50, %v3285_v51  ;;  %v3372_v51 = vld [vmem:[#allocation3 + $0x10] sm:$0xff] }
 0xc0c   : > { %4397 = vadd.xlane.f32.xlu0 %v10700_v38  ;;  %v3340_v23 = vadd.f32 %v3312_v4, %v3292_v20  ;;  %v3314_v17 = vpop.xlane.xlu1 %3313  ;;  %v3296_v38 = vmul.f32 %v10687_v46, %v3280_v32  ;;  %v3283_v20 = vld [vmem:[#allocation5 + $0x50] sm:$0xff]  ;;  %v3284_v46 = vld [vmem:[#allocation5 + $0x58] sm:$0xff] }
 0xc0d   : > { %v3341_v42 = vadd.f32 %v3314_v17, %v3293_v30  ;;  %v3299_v5 = vmul.f32 %v10656_v40, %v3283_v20  ;;  %v3287_v40 = vld [vmem:[#allocation5 + $0x70] sm:$0xff] }
 0xc0e   : > { %3357 = vst.msk [vmem:[#allocation5 + $0x18] sm:$0xff] %vm3353_vm10, %v3340_v23 }
 0xc0f   : > { %3358 = vst.msk [vmem:[#allocation5 + $0x20] sm:$0xff] %vm3353_vm10, %v3341_v42  ;;  %v3316_v9 = vpop.xlane.xlu0 %3315  ;;  %v3300_v42 = vmul.f32 %v10732_v1, %v3284_v46  ;;  %v3303_v1 = vmul.f32 %v10678_v37, %v3287_v40 }
 0xc10   : > { %v3342_v47 = vadd.f32 %v3316_v9, %v3294_v10  ;;  %v3318_v19 = vpop.xlane.xlu1 %3317  ;;  %v3286_v9 = vld [vmem:[#allocation5 + $0x68] sm:$0xff] }
 0xc11   : > { %v3343_v12 = vadd.f32 %v3318_v19, %v3295_v22 }
 0xc12   : > { %3359 = vst.msk [vmem:[#allocation5 + $0x28] sm:$0xff] %vm3353_vm10, %v3342_v47 }
 0xc13   : > { %3360 = vst.msk [vmem:[#allocation5 + $0x30] sm:$0xff] %vm3353_vm10, %v3343_v12  ;;  %v3320_v45 = vpop.xlane.xlu0 %3319 }
 0xc14   : > { %v3344_v55 = vadd.f32 %v3320_v45, %v3296_v38  ;;  %v3322_v11 = vpop.xlane.xlu1 %3321 }
 0xc15   : > { %v3345_v4 = vadd.f32 %v3322_v11, %v3297_v3 }
 0xc16   : > { %3361 = vst.msk [vmem:[#allocation5 + $0x38] sm:$0xff] %vm3353_vm10, %v3344_v55 }
 0xc17   : > { %3362 = vst.msk [vmem:[#allocation5 + $0x40] sm:$0xff] %vm3353_vm10, %v3345_v4  ;;  %v3324_v30 = vpop.xlane.xlu0 %3323 }
 0xc18   : > { %v3346_v23 = vadd.f32 %v3324_v30, %v3298_v15  ;;  %v3326_v17 = vpop.xlane.xlu1 %3325  ;;  %4391 = vadd.xlane.f32.xlu1 %v10574_v14  ;;  %v3302_v14 = vmul.f32 %v10737_v25, %v3286_v9  ;;  %v3374_v9 = vld [vmem:[#allocation3 + $0x20] sm:$0xff] }
 0xc19   : > { %v3347_v54 = vadd.f32 %v3326_v17, %v3299_v5  ;;  %v3370_v5 = vld [vmem:[#allocation3] sm:$0xff] }
 0xc1a   : > { %3363 = vst.msk [vmem:[#allocation5 + $0x48] sm:$0xff] %vm3353_vm10, %v3346_v23 }
 0xc1b   : > { %3364 = vst.msk [vmem:[#allocation5 + $0x50] sm:$0xff] %vm3353_vm10, %v3347_v54  ;;  %v3328_v10 = vpop.xlane.xlu0 %3327 }
 0xc1c   : > { %v3348_v22 = vadd.f32 %v3328_v10, %v3300_v42  ;;  %v3330_v32 = vpop.xlane.xlu1 %3329  ;;  %4403 = vadd.xlane.f32.xlu1 %v10689_v16  ;;  %v3304_v16 = vmul.f32 %v10756_v0, %v3288_v36 }
 0xc1d   : > { %v3349_v47 = vadd.f32 %v3330_v32, %v3301_v6 }
 0xc1e   : > { %3365 = vst.msk [vmem:[#allocation5 + $0x58] sm:$0xff] %vm3353_vm10, %v3348_v22 }
 0xc1f   : > { %3366 = vst.msk [vmem:[#allocation5 + $0x60] sm:$0xff] %vm3353_vm10, %v3349_v47  ;;  %v3332_v19 = vpop.xlane.xlu0 %3331 }
 0xc20   : > { %v3350_v12 = vadd.f32 %v3332_v19, %v3302_v14  ;;  %v3334_v38 = vpop.xlane.xlu1 %3333  ;;  %4399 = vadd.xlane.f32.xlu1 %v10695_v57  ;;  %v3376_v14 = vld [vmem:[#allocation3 + $0x30] sm:$0xff] }
 0xc21   : > { %v3351_v50 = vadd.f32 %v3334_v38, %v3303_v1  ;;  %v3378_v38 = vld [vmem:[#allocation3 + $0x40] sm:$0xff] }
 0xc22   : > { %3367 = vst.msk [vmem:[#allocation5 + $0x68] sm:$0xff] %vm3353_vm10, %v3350_v12 }
 0xc23   : > { %3368 = vst.msk [vmem:[#allocation5 + $0x70] sm:$0xff] %vm3353_vm10, %v3351_v50  ;;  %v3336_v45 = vpop.xlane.xlu0 %3335 }
 0xc24   : > { %v3352_v3 = vadd.f32 %v3336_v45, %v3304_v16  ;;  %v3389_v25 = vpop.permute.xlu1 %3388 }
 0xc25   : > { %v3466_v46 = vmul.f32 %v3389_v25, %v3370_v5  ;;  %v3380_v25 = vld [vmem:[#allocation3 + $0x50] sm:$0xff] }
 0xc26   : > { %3369 = vst.msk [vmem:[#allocation5 + $0x78] sm:$0xff] %vm3353_vm10, %v3352_v3 }
 0xc28   : > { %v3399_v41 = vpop.permute.xlu1 %3398 }
 0xc29   : > { %v3468_v54 = vmul.f32 %v3399_v41, %v3372_v51 }
 0xc2b   : > { %v3394_v55 = vpop.permute.xlu0 %3393 }
 0xc2c   : > { %v3404_v37 = vpop.permute.xlu1 %3403 }
 0xc2f   : > { %v3439_v11 = vpop.permute.xlu0 %3438 }
 0xc30   : > { %v3409_v20 = vpop.permute.xlu1 %3408  ;;  %v3476_v41 = vmul.f32 %v3439_v11, %v3380_v25 }
 0xc31   : > { %v3470_v22 = vmul.f32 %v3409_v20, %v3374_v9 }
 0xc33   : > { %v3449_v4 = vpop.permute.xlu0 %3448 }
 0xc34   : > { %v3414_v15 = vpop.permute.xlu1 %3413 }
 0xc37   : > { %v3459_v57 = vpop.permute.xlu0 %3458 }
 0xc38   : > { %v3419_v30 = vpop.permute.xlu1 %3418 }
 0xc39   : > { %v3472_v19 = vmul.f32 %v3419_v30, %v3376_v14  ;;  %v3382_v30 = vld [vmem:[#allocation3 + $0x60] sm:$0xff] }
 0xc3b   : > { %v3628_v23 = vpop.permute.xlu0 %3627 }
 0xc3c   : > { %v3675_v0 = vadd.f32 %v3628_v23, %v3466_v46  ;;  %v3424_v17 = vpop.permute.xlu1 %3423  ;;  %v3371_v23 = vld [vmem:[#allocation3 + $0x8] sm:$0xff] }
 0xc3d   : > { %v3467_v51 = vmul.f32 %v3394_v55, %v3371_v23 }
 0xc3e   : > { %3692 = vst.msk [vmem:[#allocation3] sm:$0xff] %vm3691_vm12, %v3675_v0  ;;  %v3478_v0 = vmul.f32 %v3449_v4, %v3382_v30  ;;  %v3375_v4 = vld [vmem:[#allocation3 + $0x28] sm:$0xff] }
 0xc3f   : > { %v3632_v42 = vpop.permute.xlu0 %3631  ;;  %v3471_v55 = vmul.f32 %v3414_v15, %v3375_v4 }
 0xc40   : > { %v3677_v10 = vadd.f32 %v3632_v42, %v3468_v54  ;;  %v3429_v6 = vpop.permute.xlu1 %3428 }
 0xc41   : > { %v3474_v50 = vmul.f32 %v3429_v6, %v3378_v38  ;;  %v3384_v6 = vld [vmem:[#allocation3 + $0x70] sm:$0xff] }
 0xc42   : > { %3694 = vst.msk [vmem:[#allocation3 + $0x10] sm:$0xff] %vm3691_vm12, %v3677_v10 }
 0xc43   : > { %v3636_v32 = vpop.permute.xlu0 %3635 }
 0xc44   : > { %v3679_v40 = vadd.f32 %v3636_v32, %v3470_v22  ;;  %v3434_v47 = vpop.permute.xlu1 %3433  ;;  %v3373_v22 = vld [vmem:[#allocation3 + $0x18] sm:$0xff]  ;;  %v3480_v32 = vmul.f32 %v3459_v57, %v3384_v6 }
 0xc45   : > { %v3469_v11 = vmul.f32 %v3404_v37, %v3373_v22 }
 0xc46   : > { %3696 = vst.msk [vmem:[#allocation3 + $0x20] sm:$0xff] %vm3691_vm12, %v3679_v40 }
 0xc47   : > { %v3640_v1 = vpop.permute.xlu0 %3639 }
 0xc48   : > { %v3681_v36 = vadd.f32 %v3640_v1, %v3472_v19  ;;  %v3444_v12 = vpop.permute.xlu1 %3443 }
 0xc4a   : > { %3698 = vst.msk [vmem:[#allocation3 + $0x30] sm:$0xff] %vm3691_vm12, %v3681_v36 }
 0xc4b   : > { %v3644_v16 = vpop.permute.xlu0 %3643 }
 0xc4c   : > { %v3683_v45 = vadd.f32 %v3644_v16, %v3474_v50  ;;  %v3454_v3 = vpop.permute.xlu1 %3453  ;;  %v3377_v50 = vld [vmem:[#allocation3 + $0x38] sm:$0xff] }
 0xc4d   : > { %v3473_v16 = vmul.f32 %v3424_v17, %v3377_v50 }
 0xc4e   : > { %3700 = vst.msk [vmem:[#allocation3 + $0x40] sm:$0xff] %vm3691_vm12, %v3683_v45  ;;  %v3379_v45 = vld [vmem:[#allocation3 + $0x48] sm:$0xff] }
 0xc4f   : > { %v3648_v20 = vpop.permute.xlu0 %3647  ;;  %v3475_v25 = vmul.f32 %v3434_v47, %v3379_v45 }
 0xc50   : > { %v3685_v5 = vadd.f32 %v3648_v20, %v3476_v41  ;;  %v3464_v46 = vpop.permute.xlu1 %3463 }
 0xc52   : > { %3702 = vst.msk [vmem:[#allocation3 + $0x50] sm:$0xff] %vm3691_vm12, %v3685_v5  ;;  %v3381_v5 = vld [vmem:[#allocation3 + $0x58] sm:$0xff] }
 0xc53   : > { %v3652_v54 = vpop.permute.xlu0 %3651  ;;  %v3477_v30 = vmul.f32 %v3444_v12, %v3381_v5  ;;  %v4363_v5 = vld [vmem:[#allocation5 + $0x30] sm:$0xff] }
 0xc54   : > { %v3687_v42 = vadd.f32 %v3652_v54, %v3478_v0  ;;  %v3630_v10 = vpop.permute.xlu1 %3629  ;;  %v3383_v0 = vld [vmem:[#allocation3 + $0x68] sm:$0xff] }
 0xc55   : > { %v3676_v9 = vadd.f32 %v3630_v10, %v3467_v51  ;;  %v3479_v51 = vmul.f32 %v3454_v3, %v3383_v0  ;;  %v12526_v3 = vsub.f32 %v10353_v21, %v10360_v62  ;;  %v12530_v21 = vsub.f32 %v10441_v18, %v10448_v53 }
 0xc56   : > { %3704 = vst.msk [vmem:[#allocation3 + $0x60] sm:$0xff] %vm3691_vm12, %v3687_v42  ;;  %v3385_v42 = vld [vmem:[#allocation3 + $0x78] sm:$0xff] }
 0xc57   : > { %3693 = vst.msk [vmem:[#allocation3 + $0x8] sm:$0xff] %vm3691_vm12, %v3676_v9  ;;  %v3656_v40 = vpop.permute.xlu0 %3655  ;;  %v3481_v10 = vmul.f32 %v3464_v46, %v3385_v42  ;;  %v12525_v9 = vsub.f32 %v10348_v31, %v10351_v24  ;;  %v4197_v22 = vmul.f32 1.442695, %v12526_v3  ;;  %v12527_v46 = vsub.f32 %v10367_v63, %v10372_v35 }
 0xc58   : > { %v3689_v14 = vadd.f32 %v3656_v40, %v3480_v32  ;;  %v3634_v19 = vpop.permute.xlu1 %3633  ;;  %v10856_v32 = vpop.f32.mrf.mxu0  ;;  %v12528_v24 = vsub.f32 %v10417_v7, %v10424_v48  ;;  %v4205_v62 = vmul.f32 1.442695, %v12530_v21 }
 0xc59   : > { %v3678_v1 = vadd.f32 %v3634_v19, %v3469_v11  ;;  %v4201_v12 = vmul.f32 1.442695, %v12525_v9  ;;  %v4203_v11 = vmul.f32 1.442695, %v12527_v46  ;;  %v4359_v19 = vld [vmem:[#allocation5 + $0x10] sm:$0xff] }
 0xc5a   : > { %3706 = vst.msk [vmem:[#allocation3 + $0x70] sm:$0xff] %vm3691_vm12, %v3689_v14  ;;  %v10861_v40 = vpop.f32.mrf.mxu0  ;;  %v4209_v31 = vmul.f32 1.442695, %v12528_v24 }
 0xc5b   : > { %3695 = vst.msk [vmem:[#allocation3 + $0x18] sm:$0xff] %vm3691_vm12, %v3678_v1  ;;  %8067 = vpow2.f32 %v4201_v12 }
 0xc5c   : > { %v3638_v36 = vpop.permute.xlu1 %3637  ;;  %8069 = vpow2.f32 %v4197_v22  ;;  %v10866_v14 = vpop.f32.mrf.mxu0  ;;  %v12538_v22 = vsub.f32 %v10439_v43, %v10445_v2 }
 0xc5d   : > { %v3680_v38 = vadd.f32 %v3638_v36, %v3471_v55  ;;  %8071 = vpow2.f32 %v4203_v11  ;;  %12529 = vst [vmem:[#allocation71_spill] sm:$0xff] %v10866_v14  ;;  %v4357_v36 = vld [vmem:[#allocation5] sm:$0xff]  ;;  %v4370_v14 = vld [vmem:[#allocation5 + $0x68] sm:$0xff] }
 0xc5e   : > { %8073 = vpow2.f32 %v4209_v31  ;;  %v10873_v4 = vpop.f32.mrf.mxu0  ;;  %v4207_v46 = vmul.f32 1.442695, %v12538_v22 }
 0xc5f   : > { %3697 = vst.msk [vmem:[#allocation3 + $0x28] sm:$0xff] %vm3691_vm12, %v3680_v38  ;;  %12531 = vst [vmem:[#allocation11_spill] sm:$0xff] %v10873_v4  ;;  %8075 = vpow2.f32 %v4205_v62 }
 0xc60   : > { %v3642_v57 = vpop.permute.xlu1 %3641 }
 0xc61   : > { %v3682_v37 = vadd.f32 %v3642_v57, %v3473_v16  ;;  %v4360_v16 = vld [vmem:[#allocation5 + $0x18] sm:$0xff] }
 0xc63   : > { %3699 = vst.msk [vmem:[#allocation3 + $0x38] sm:$0xff] %vm3691_vm12, %v3682_v37 }
 0xc64   : > { %v3646_v41 = vpop.permute.xlu1 %3645 }
 0xc65   : > { %v3684_v20 = vadd.f32 %v3646_v41, %v3475_v25 }
 0xc67   : > { %3701 = vst.msk [vmem:[#allocation3 + $0x48] sm:$0xff] %vm3691_vm12, %v3684_v20 }
 0xc68   : > { %v3650_v15 = vpop.permute.xlu1 %3649  ;;  %v10871_v1 = vpop.eup %8067 }
 0xc69   : > { %v3686_v23 = vadd.f32 %v3650_v15, %v3477_v30  ;;  %v4375_v63 = vmul.f32 %v10871_v1, %v4359_v19  ;;  %v10878_v48 = vpop.eup %8069  ;;  %v12534_v30 = vsub.f32 %v10369_v26, %v10375_v29 }
 0xc6a   : > { %v4373_v18 = vmul.f32 %v10878_v48, %v4357_v36  ;;  %v10886_v37 = vpop.eup %8071 }
 0xc6b   : > { %3703 = vst.msk [vmem:[#allocation3 + $0x58] sm:$0xff] %vm3691_vm12, %v3686_v23  ;;  %v4376_v25 = vmul.f32 %v10886_v37, %v4360_v16  ;;  %v4199_v15 = vmul.f32 1.442695, %v12534_v30  ;;  %v10897_v0 = vpop.eup %8073 }
 0xc6c   : > { %v3654_v17 = vpop.permute.xlu1 %3653  ;;  %v10908_v29 = vpop.eup %8075 }
 0xc6d   : > { %v3688_v54 = vadd.f32 %v3654_v17, %v3479_v51  ;;  %v4379_v17 = vmul.f32 %v10897_v0, %v4363_v5  ;;  %8077 = vpow2.f32 %v4199_v15 }
 0xc6f   : > { %3705 = vst.msk [vmem:[#allocation3 + $0x68] sm:$0xff] %vm3691_vm12, %v3688_v54 }
 0xc70   : > { %v3658_v47 = vpop.permute.xlu1 %3657 }
 0xc71   : > { %v3690_v6 = vadd.f32 %v3658_v47, %v3481_v10  ;;  %v4361_v10 = vld [vmem:[#allocation5 + $0x20] sm:$0xff]  ;;  %v12536_v47 = vsub.f32 %v10415_v44, %v10421_v28  ;;  %v4358_v28 = vld [vmem:[#allocation5 + $0x8] sm:$0xff] }
 0xc72   : > { %v4377_v12 = vmul.f32 %v10908_v29, %v4361_v10 }
 0xc73   : > { %3707 = vst.msk [vmem:[#allocation3 + $0x78] sm:$0xff] %vm3691_vm12, %v3690_v6  ;;  %v4211_v6 = vmul.f32 1.442695, %v12536_v47  ;;  %v12145_v47 = vmov 3  }
 0xc74   : > { %7741 = vset.pattern.permute.xlu1 %v12145_v47  ;;  %7742 = vset.pattern.permute.xlu0 %v12145_v47 }
 0xc75   : > { %8079 = vpow2.f32 %v4211_v6 }
 0xc76   : > { %8081 = vpow2.f32 %v4207_v46 }
 0xc7a   : > { %v10922_v31 = vpop.eup %8077 }
 0xc7b   : > { %v4374_v21 = vmul.f32 %v10922_v31, %v4358_v28  ;;  %v12550_v28 = vld [vmem:[#allocation26_spill] sm:$0xff] }
 0xc82   : > { %v10927_v43 = vpop.eup %8079 }
 0xc85   : > { %v10876_v35 = vpop.f32.mrf.mxu0  ;;  %v4394_v55 = vpop.xlane.xlu0 %4393 }
 0xc86   : > { %v4423_v7 = vadd.f32 %v4394_v55, %v4375_v63  ;;  %v4364_v63 = vld [vmem:[#allocation5 + $0x38] sm:$0xff] }
 0xc87   : > { %v10880_v38 = vpop.f32.mrf.mxu0  ;;  %v4380_v36 = vmul.f32 %v10927_v43, %v4364_v63  ;;  %v12562_v63 = vld [vmem:[#allocation87_spill] sm:$0xff] }
 0xc88   : > { %4440 = vst.msk [vmem:[#allocation5 + $0x10] sm:$0xff] %vm4437_vm11, %v4423_v7 }
 0xc89   : > { %v10884_v53 = vpop.f32.mrf.mxu0  ;;  %v4390_v50 = vpop.xlane.xlu0 %4389 }
 0xc8a   : > { %12532 = vst [vmem:[#allocation16_spill] sm:$0xff] %v10884_v53  ;;  %v4421_v57 = vadd.f32 %v4390_v50, %v4373_v18  ;;  %v4362_v50 = vld [vmem:[#allocation5 + $0x28] sm:$0xff] }
 0xc8b   : > { %v10888_v45 = vpop.f32.mrf.mxu0 }
 0xc8c   : > { %12533 = vst [vmem:[#allocation21_spill] sm:$0xff] %v10888_v45  ;;  %4438 = vst.msk [vmem:[#allocation5] sm:$0xff] %vm4437_vm11, %v4421_v57  ;;  %v10936_v57 = vpop.eup %8081 }
 0xc8d   : > { %v10892_v41 = vpop.f32.mrf.mxu0  ;;  %v4396_v20 = vpop.xlane.xlu0 %4395 }
 0xc8e   : > { %v4424_v23 = vadd.f32 %v4396_v20, %v4376_v25  ;;  %v4378_v20 = vmul.f32 %v10936_v57, %v4362_v50 }
 0xc8f   : > { %v10899_v51 = vpop.f32.mrf.mxu0 }
 0xc90   : > { %4441 = vst.msk [vmem:[#allocation5 + $0x18] sm:$0xff] %vm4437_vm11, %v4424_v23 }
 0xc91   : > { %v10903_v54 = vpop.f32.mrf.mxu0  ;;  %v4402_v42 = vpop.xlane.xlu0 %4401 }
 0xc92   : > { %12535 = vst [vmem:[#allocation10_spill] sm:$0xff] %v10903_v54  ;;  %v4427_v26 = vadd.f32 %v4402_v42, %v4379_v17 }
 0xc93   : > { %v10910_v9 = vpop.f32.mrf.mxu0 }
 0xc94   : > { %12537 = vst [vmem:[#allocation65_spill] sm:$0xff] %v10910_v9  ;;  %4444 = vst.msk [vmem:[#allocation5 + $0x30] sm:$0xff] %vm4437_vm11, %v4427_v26 }
 0xc95   : > { %v4398_v3 = vpop.xlane.xlu0 %4397  ;;  %v10917_v24 = vpop.f32.mrf.mxu0 }
 0xc96   : > { %v4425_v11 = vadd.f32 %v4398_v3, %v4377_v12 }
 0xc97   : > { %v10920_v44 = vpop.f32.mrf.mxu0 }
 0xc98   : > { %4442 = vst.msk [vmem:[#allocation5 + $0x20] sm:$0xff] %vm4437_vm11, %v4425_v11 }
 0xc99   : > { %v10924_v19 = vpop.f32.mrf.mxu0 }
 0xc9a   : > { %12539 = vst [vmem:[#allocation68_spill] sm:$0xff] %v10924_v19 }
 0xc9b   : > { %v10929_v2 = vpop.f32.mrf.mxu0 }
 0xc9c   : > { %12540 = vst [vmem:[#allocation15_spill] sm:$0xff] %v10929_v2  ;;  %v12575_v2 = vld [vmem:[#allocation69_spill] sm:$0xff] }
 0xca1   : > { %v4392_v62 = vpop.xlane.xlu1 %4391 }
 0xca2   : > { %v4422_v55 = vadd.f32 %v4392_v62, %v4374_v21 }
 0xca4   : > { %4439 = vst.msk [vmem:[#allocation5 + $0x8] sm:$0xff] %vm4437_vm11, %v4422_v55  ;;  %v11018_v55 = vld [vmem:[#allocation4 + $0x18] sm:$0xff] }
 0xca5   : > { %v10933_v7 = vpop.f32.mrf.mxu0  ;;  %v4404_v18 = vpop.xlane.xlu1 %4403 }
 0xca6   : > { %5221 = vmax.xlane.f32.xlu0 %v10933_v7  ;;  %v4428_v16 = vadd.f32 %v4404_v18, %v4380_v36  ;;  %v11020_v18 = vld [vmem:[#allocation4] sm:$0xff] }
 0xca7   : > { %v10938_v25 = vpop.f32.mrf.mxu0  ;;  %12558 = vst [vmem:[#allocation28_spill] sm:$0xff] %v11020_v18 }
 0xca8   : > { %4445 = vst.msk [vmem:[#allocation5 + $0x38] sm:$0xff] %vm4437_vm11, %v4428_v16 }
 0xca9   : > { %v10942_v5 = vpop.f32.mrf.mxu0  ;;  %v4400_v30 = vpop.xlane.xlu1 %4399 }
 0xcaa   : > { %5217 = vmax.xlane.f32.xlu0 %v10938_v25  ;;  %5223 = vmax.xlane.f32.xlu1 %v10942_v5  ;;  %v4426_v15 = vadd.f32 %v4400_v30, %v4378_v20 }
 0xcab   : > { %v10946_v23 = vpop.f32.mrf.mxu0 }
 0xcac   : > { %4443 = vst.msk [vmem:[#allocation5 + $0x28] sm:$0xff] %vm4437_vm11, %v4426_v15 }
 0xcad   : > { %v10949_v17 = vpop.f32.mrf.mxu0 }
 0xcae   : > { %12541 = vst [vmem:[#allocation20_spill] sm:$0xff] %v10949_v17  ;;  %5219 = vmax.xlane.f32.xlu1 %v10946_v23  ;;  %5229 = vmax.xlane.f32.xlu0 %v10949_v17  ;;  %v4369_v17 = vld [vmem:[#allocation5 + $0x60] sm:$0xff] }
 0xcaf   : > { %v10953_v42 = vpop.f32.mrf.mxu0 }
 0xcb1   : > { %v10955_v10 = vpop.f32.mrf.mxu0 }
 0xcb2   : > { %12542 = vst [vmem:[#allocation24_spill] sm:$0xff] %v10955_v10  ;;  %5225 = vmax.xlane.f32.xlu0 %v10953_v42  ;;  %5231 = vmax.xlane.f32.xlu1 %v10955_v10  ;;  %v4372_v10 = vld [vmem:[#allocation5 + $0x78] sm:$0xff] }
 0xcb3   : > { %v10961_v6 = vpop.f32.mrf.mxu0 }
 0xcb4   : > { %12543 = vst [vmem:[#allocation14_spill] sm:$0xff] %v10961_v6 }
 0xcb5   : > { %v10963_v26 = vpop.f32.mrf.mxu0 }
 0xcb6   : > { %12544 = vst [vmem:[#allocation19_spill] sm:$0xff] %v10963_v26  ;;  %5227 = vmax.xlane.f32.xlu1 %v10961_v6  ;;  %5237 = vmax.xlane.f32.xlu0 %v10963_v26 }
 0xcb7   : > { %v10967_v12 = vpop.f32.mrf.mxu0 }
 0xcb8   : > { %12545 = vst [vmem:[#allocation18_spill] sm:$0xff] %v10967_v12 }
 0xcb9   : > { %v10969_v3 = vpop.f32.mrf.mxu0 }
 0xcba   : > { %12546 = vst [vmem:[#allocation23_spill] sm:$0xff] %v10969_v3  ;;  %5233 = vmax.xlane.f32.xlu0 %v10967_v12  ;;  %5239 = vmax.xlane.f32.xlu1 %v10969_v3  ;;  %v4367_v3 = vld [vmem:[#allocation5 + $0x50] sm:$0xff] }
 0xcbb   : > { %v10973_v22 = vpop.f32.mrf.mxu0 }
 0xcbc   : > { %12547 = vst [vmem:[#allocation22_spill] sm:$0xff] %v10973_v22 }
 0xcbd   : > { %v10975_v46 = vpop.f32.mrf.mxu0 }
 0xcbe   : > { %12548 = vst [vmem:[#allocation31_spill] sm:$0xff] %v10975_v46  ;;  %5235 = vmax.xlane.f32.xlu1 %v10973_v22  ;;  %5245 = vmax.xlane.f32.xlu0 %v10975_v46 }
 0xcbf   : > { %v10979_v11 = vpop.f32.mrf.mxu0 }
 0xcc0   : > { %12549 = vst [vmem:[#allocation30_spill] sm:$0xff] %v10979_v11 }
 0xcc2   : > { %4407 = vadd.xlane.f32.xlu1 %v10726_v33  ;;  %5241 = vmax.xlane.f32.xlu0 %v10979_v11  ;;  %v12551_v33 = vld [vmem:[#allocation25_spill] sm:$0xff] }
 0xcc6   : > { %4411 = vadd.xlane.f32.xlu1 %v10720_v49  ;;  %4405 = vadd.xlane.f32.xlu0 %v10723_v60  ;;  %v12552_v49 = vld [vmem:[#allocation47_spill] sm:$0xff]  ;;  %v12553_v60 = vld [vmem:[#allocation44_spill] sm:$0xff] }
 0xcca   : > { %4415 = vadd.xlane.f32.xlu1 %v10747_v27  ;;  %4409 = vadd.xlane.f32.xlu0 %v10718_v8  ;;  %v12554_v8 = vld [vmem:[#allocation41_spill] sm:$0xff] }
 0xcce   : > { %4419 = vadd.xlane.f32.xlu1 %v10742_v56  ;;  %4413 = vadd.xlane.f32.xlu0 %v10750_v52  ;;  %v12555_v56 = vld [vmem:[#allocation48_spill] sm:$0xff] }
 0xccf   : > { %v11008_v52 = vld [vmem:[#allocation4 + $0x10] sm:$0xff] }
 0xcd2   : > { %4417 = vadd.xlane.f32.xlu0 %v10744_v13  ;;  %v11002_v13 = vpop.f32.mrf.mxu0 }
 0xcd3   : > { %12556 = vst [vmem:[#allocation27_spill] sm:$0xff] %v11002_v13 }
 0xcd4   : > { %v11005_v27 = vpop.f32.mrf.mxu0 }
 0xcd5   : > { %12557 = vst [vmem:[#allocation74_spill] sm:$0xff] %v11005_v27 }
 0xcdf   : > { %5672 = vrot.lane.b32.xlu1 %v12550_v28, %s8275_s13  ;;  %v11037_v28 = vld [vmem:[#allocation4 + $0x8] sm:$0xff] }
 0xce3   : > { %5670 = vrot.lane.b32.xlu1 %v12551_v33, %s8275_s13 }
 0xce7   : > { %5668 = vrot.lane.b32.xlu1 %v12552_v49, %s8275_s13  ;;  %v11039_v49 = vld [vmem:[#allocation4 + $0x30] sm:$0xff] }
 0xce8   : > { %5662 = vrot.lane.b32.xlu0 %v12553_v60, %s8275_s13 }
 0xceb   : > { %5666 = vrot.lane.b32.xlu1 %v12554_v8, %s8275_s13  ;;  %v12560_v8 = vsub.f32 %v10480_v39, %v10485_v61  ;;  %v12561_v39 = vsub.f32 %v10460_v59, %v10465_v34  ;;  %v12567_v34 = vld [vmem:[#allocation63_spill] sm:$0xff] }
 0xced   : > { %v4219_v61 = vmul.f32 1.442695, %v12561_v39 }
 0xcef   : > { %5664 = vrot.lane.b32.xlu1 %v12555_v56, %s8275_s13  ;;  %v4215_v56 = vmul.f32 1.442695, %v12560_v8  ;;  %v11064_v8 = vld [vmem:[#allocation4 + $0x20] sm:$0xff] }
 0xcf1   : > { %8083 = vpow2.f32 %v4215_v56 }
 0xcf2   : > { %8085 = vpow2.f32 %v4219_v61 }
 0xd13   : > { %5247 = vmax.xlane.f32.xlu1 %v11002_v13 }
 0xd17   : > { %5243 = vmax.xlane.f32.xlu1 %v11005_v27  ;;  %v12568_v27 = vld [vmem:[#allocation17_spill] sm:$0xff] }
 0xd18   : > { %v12569_v46 = vsub.f32 %v12567_v34, %v12568_v27  ;;  %v12571_v27 = vld [vmem:[#allocation89_spill] sm:$0xff] }
 0xd19   : > { %v11114_v34 = vld [vmem:[#allocation4 + $0x58] sm:$0xff] }
 0xd1a   : > { %v4223_v11 = vmul.f32 1.442695, %v12569_v46  ;;  %v12570_v46 = vld [vmem:[#allocation90_spill] sm:$0xff]  ;;  %12573 = vst [vmem:[#allocation35_spill] sm:$0xff] %v11114_v34 }
 0xd2f   : > { %v5222_v21 = vpop.xlane.xlu0 %5221 }
 0xd30   : > { %v11011_v62 = vmax.f32 %v11008_v52, %v5222_v21 }
 0xd32   : > { %5878 = vst.msk [vmem:[#allocation4 + $0x10] sm:$0xff] %vm5521_vm13, %v11011_v62  ;;  %5325 = vperm.xlu1 %7741, %v11011_v62  }
 0xd33   : > { %v5224_v36 = vpop.xlane.xlu1 %5223  ;;  %v5218_v50 = vpop.xlane.xlu0 %5217 }
 0xd34   : > { %v11023_v16 = vmax.f32 %v11018_v55, %v5224_v36  ;;  %v11026_v20 = vmax.f32 %v11020_v18, %v5218_v50  ;;  %v12563_v50 = vsub.f32 %v10482_v58, %v12562_v63  ;;  %v12564_v58 = vld [vmem:[#allocation59_spill] sm:$0xff]  ;;  %v12565_v63 = vld [vmem:[#allocation61_spill] sm:$0xff] }
 0xd36   : > { %12559 = vst [vmem:[#allocation32_spill] sm:$0xff] %v11026_v20  ;;  %5879 = vst.msk [vmem:[#allocation4 + $0x18] sm:$0xff] %vm5521_vm13, %v11023_v16  ;;  %5315 = vperm.xlu1 %7741, %v11026_v20   ;;  %v4213_v15 = vmul.f32 1.442695, %v12563_v50  ;;  %v11088_v50 = vld [vmem:[#allocation4 + $0x28] sm:$0xff] }
 0xd37   : > { %5876 = vst.msk [vmem:[#allocation4] sm:$0xff] %vm5521_vm13, %v11026_v20  ;;  %v5220_v33 = vpop.xlane.xlu1 %5219  ;;  %v5230_v60 = vpop.xlane.xlu0 %5229 }
 0xd38   : > { %v11045_v21 = vmax.f32 %v11037_v28, %v5220_v33  ;;  %v11048_v36 = vmax.f32 %v11039_v49, %v5230_v60  ;;  %v11062_v33 = vld [vmem:[#allocation4 + $0x38] sm:$0xff]  ;;  %8087 = vpow2.f32 %v4213_v15  ;;  %v12572_v15 = vsub.f32 %v12570_v46, %v12571_v27 }
 0xd3a   : > { %5877 = vst.msk [vmem:[#allocation4 + $0x8] sm:$0xff] %vm5521_vm13, %v11045_v21  ;;  %5882 = vst.msk [vmem:[#allocation4 + $0x30] sm:$0xff] %vm5521_vm13, %v11048_v36  ;;  %5330 = vperm.xlu1 %7741, %v11023_v16  }
 0xd3b   : > { %v5232_v60 = vpop.xlane.xlu1 %5231  ;;  %v5226_v30 = vpop.xlane.xlu0 %5225 }
 0xd3c   : > { %v11070_v47 = vmax.f32 %v11062_v33, %v5232_v60  ;;  %v11073_v13 = vmax.f32 %v11064_v8, %v5226_v30  ;;  %v12566_v30 = vsub.f32 %v12564_v58, %v12565_v63  ;;  %v11090_v60 = vld [vmem:[#allocation4 + $0x50] sm:$0xff]  ;;  %v12574_v63 = vld [vmem:[#allocation66_spill] sm:$0xff] }
 0xd3d   : > { %v12576_v54 = vsub.f32 %v12574_v63, %v12575_v2  ;;  %v4366_v63 = vld [vmem:[#allocation5 + $0x48] sm:$0xff] }
 0xd3e   : > { %5883 = vst.msk [vmem:[#allocation4 + $0x38] sm:$0xff] %vm5521_vm13, %v11070_v47  ;;  %5880 = vst.msk [vmem:[#allocation4 + $0x20] sm:$0xff] %vm5521_vm13, %v11073_v13  ;;  %5320 = vperm.xlu1 %7741, %v11045_v21   ;;  %5335 = vperm.xlu0 %7742, %v11073_v13   ;;  %v4217_v56 = vmul.f32 1.442695, %v12566_v30 }
 0xd3f   : > { %v5228_v39 = vpop.xlane.xlu1 %5227  ;;  %v5238_v59 = vpop.xlane.xlu0 %5237  ;;  %v4221_v9 = vmul.f32 1.442695, %v12576_v54  ;;  %v11137_v54 = vld [vmem:[#allocation4 + $0x48] sm:$0xff] }
 0xd40   : > { %v11096_v19 = vmax.f32 %v11088_v50, %v5228_v39  ;;  %v11099_v61 = vmax.f32 %v11090_v60, %v5238_v59  ;;  %8089 = vpow2.f32 %v4217_v56  ;;  %v4227_v59 = vmul.f32 1.442695, %v12572_v15  ;;  %v11116_v39 = vld [vmem:[#allocation4 + $0x40] sm:$0xff]  ;;  %12578 = vst [vmem:[#allocation29_spill] sm:$0xff] %v11137_v54  ;;  %v12579_v15 = vld [vmem:[#allocation88_spill] sm:$0xff] }
 0xd41   : > { %8091 = vpow2.f32 %v4223_v11  ;;  %v11139_v11 = vld [vmem:[#allocation4 + $0x70] sm:$0xff] }
 0xd42   : > { %5881 = vst.msk [vmem:[#allocation4 + $0x28] sm:$0xff] %vm5521_vm13, %v11096_v19  ;;  %5886 = vst.msk [vmem:[#allocation4 + $0x50] sm:$0xff] %vm5521_vm13, %v11099_v61  ;;  %5345 = vperm.xlu1 %7741, %v11048_v36   ;;  %5350 = vperm.xlu0 %7742, %v11070_v47   ;;  %8093 = vpow2.f32 %v4227_v59 }
 0xd43   : > { %v5240_v30 = vpop.xlane.xlu1 %5239  ;;  %v5234_v58 = vpop.xlane.xlu0 %5233  ;;  %8095 = vpow2.f32 %v4221_v9 }
 0xd44   : > { %v11122_v20 = vmax.f32 %v11114_v34, %v5240_v30  ;;  %v11125_v56 = vmax.f32 %v11116_v39, %v5234_v58  ;;  %v12580_v30 = vld [vmem:[#allocation12_spill] sm:$0xff] }
 0xd45   : > { %v12581_v46 = vsub.f32 %v12579_v15, %v12580_v30  ;;  %v4368_v15 = vld [vmem:[#allocation5 + $0x58] sm:$0xff]  ;;  %v4365_v30 = vld [vmem:[#allocation5 + $0x40] sm:$0xff] }
 0xd46   : > { %12577 = vst [vmem:[#allocation73_spill] sm:$0xff] %v11122_v20  ;;  %5887 = vst.msk [vmem:[#allocation4 + $0x58] sm:$0xff] %vm5521_vm13, %v11122_v20  ;;  %5340 = vperm.xlu1 %7741, %v11096_v19   ;;  %5370 = vperm.xlu0 %7742, %v11122_v20   ;;  %v11150_v20 = vpop.eup %8083 }
 0xd47   : > { %5884 = vst.msk [vmem:[#allocation4 + $0x40] sm:$0xff] %vm5521_vm13, %v11125_v56  ;;  %v5236_v2 = vpop.xlane.xlu1 %5235  ;;  %v5246_v58 = vpop.xlane.xlu0 %5245  ;;  %v4225_v34 = vmul.f32 1.442695, %v12581_v46  ;;  %v4382_v9 = vmul.f32 %v11150_v20, %v4366_v63 }
 0xd48   : > { %v11145_v27 = vmax.f32 %v11137_v54, %v5236_v2  ;;  %v11148_v18 = vmax.f32 %v11139_v11, %v5246_v58  ;;  %v11163_v2 = vld [vmem:[#allocation4 + $0x60] sm:$0xff]  ;;  %v11165_v59 = vpop.eup %8085 }
 0xd49   : > { %12583 = vst [vmem:[#allocation72_spill] sm:$0xff] %v11165_v59  ;;  %8097 = vpow2.f32 %v4225_v34  ;;  %v11170_v45 = vpop.eup %8087  ;;  %v4384_v34 = vmul.f32 %v11165_v59, %v4368_v15 }
 0xd4a   : > { %12582 = vst [vmem:[#allocation33_spill] sm:$0xff] %v11145_v27  ;;  %5885 = vst.msk [vmem:[#allocation4 + $0x48] sm:$0xff] %vm5521_vm13, %v11145_v27  ;;  %5360 = vperm.xlu0 %7742, %v11145_v27   ;;  %5365 = vperm.xlu1 %7741, %v11099_v61   ;;  %v12584_v27 = vld [vmem:[#allocation46_spill] sm:$0xff] }
 0xd4b   : > { %5890 = vst.msk [vmem:[#allocation4 + $0x70] sm:$0xff] %vm5521_vm13, %v11148_v18  ;;  %v4408_v46 = vpop.xlane.xlu1 %4407  ;;  %v5242_v58 = vpop.xlane.xlu0 %5241 }
 0xd4c   : > { %v4430_v54 = vadd.f32 %v4408_v46, %v4382_v9  ;;  %v11168_v53 = vmax.f32 %v11163_v2, %v5242_v58  ;;  %v4381_v9 = vmul.f32 %v11170_v45, %v4365_v30 }
 0xd4e   : > { %4447 = vst.msk [vmem:[#allocation5 + $0x48] sm:$0xff] %vm4437_vm11, %v4430_v54  ;;  %5658 = vrot.lane.b32.xlu0 %v12584_v27, %s8275_s13  ;;  %5355 = vperm.xlu1 %7741, %v11125_v56   ;;  %v8090_v54 = vpop.eup %8089  ;;  %v12586_v27 = vld [vmem:[#allocation49_spill] sm:$0xff] }
 0xd4f   : > { %5888 = vst.msk [vmem:[#allocation4 + $0x60] sm:$0xff] %vm5521_vm13, %v11168_v53  ;;  %v4412_v46 = vpop.xlane.xlu1 %4411  ;;  %v4406_v58 = vpop.xlane.xlu0 %4405  ;;  %v4383_v12 = vmul.f32 %v8090_v54, %v4367_v3 }
 0xd50   : > { %v4432_v4 = vadd.f32 %v4412_v46, %v4384_v34  ;;  %v4429_v26 = vadd.f32 %v4406_v58, %v4381_v9  ;;  %v11182_v63 = vpop.eup %8091  ;;  %v4371_v58 = vld [vmem:[#allocation5 + $0x70] sm:$0xff] }
 0xd51   : > { %12585 = vst [vmem:[#allocation78_spill] sm:$0xff] %v11182_v63  ;;  %v4386_v15 = vmul.f32 %v11182_v63, %v4370_v14  ;;  %v11189_v6 = vpop.eup %8093 }
 0xd52   : > { %4449 = vst.msk [vmem:[#allocation5 + $0x58] sm:$0xff] %vm4437_vm11, %v4432_v4  ;;  %4446 = vst.msk [vmem:[#allocation5 + $0x40] sm:$0xff] %vm4437_vm11, %v4429_v26  ;;  %5660 = vrot.lane.b32.xlu1 %v12586_v27, %s8275_s13  ;;  %v8096_v46 = vpop.eup %8095  ;;  %v4388_v4 = vmul.f32 %v11189_v6, %v4372_v10 }
 0xd53   : > { %v4416_v30 = vpop.xlane.xlu1 %4415  ;;  %v4410_v22 = vpop.xlane.xlu0 %4409  ;;  %v4385_v26 = vmul.f32 %v8096_v46, %v4369_v17  ;;  %v12587_v17 = vmov 2  }
 0xd54   : > { %v4434_v34 = vadd.f32 %v4416_v30, %v4386_v15  ;;  %v4431_v9 = vadd.f32 %v4410_v22, %v4383_v12 }
 0xd56   : > { %4451 = vst.msk [vmem:[#allocation5 + $0x68] sm:$0xff] %vm4437_vm11, %v4434_v34  ;;  %4448 = vst.msk [vmem:[#allocation5 + $0x50] sm:$0xff] %vm4437_vm11, %v4431_v9  ;;  %5375 = vperm.xlu1 %7741, %v11168_v53   ;;  %v8098_v59 = vpop.eup %8097 }
 0xd57   : > { %v4420_v14 = vpop.xlane.xlu1 %4419  ;;  %v4414_v3 = vpop.xlane.xlu0 %4413  ;;  %v4387_v12 = vmul.f32 %v8098_v59, %v4371_v58 }
 0xd58   : > { %v4436_v27 = vadd.f32 %v4420_v14, %v4388_v4  ;;  %v4433_v63 = vadd.f32 %v4414_v3, %v4385_v26 }
 0xd5a   : > { %4453 = vst.msk [vmem:[#allocation5 + $0x78] sm:$0xff] %vm4437_vm11, %v4436_v27  ;;  %4450 = vst.msk [vmem:[#allocation5 + $0x60] sm:$0xff] %vm4437_vm11, %v4433_v63  ;;  %5385 = vperm.xlu1 %7741, %v11148_v18  }
 0xd5b   : > { %v5673_v22 = vpop.permute.xlu1 %5672  ;;  %v4418_v15 = vpop.xlane.xlu0 %4417 }
 0xd5c   : > { %v4435_v30 = vadd.f32 %v4418_v15, %v4387_v12  ;;  %7452 = vmatprep.subr.bf16.mxu1 %v5673_v22 }
 0xd5d   : > { %7453 = vmatpush3.bf16.msra.mxu1 %v5673_v22 }
 0xd5e   : > { %4452 = vst.msk [vmem:[#allocation5 + $0x70] sm:$0xff] %vm4437_vm11, %v4435_v30  ;;  %7744 = vset.pattern.permute.xlu1 %v12587_v17 }
 0xd5f   : > { %v5671_v10 = vpop.permute.xlu1 %5670  ;;  %4477 = vperm.xlu1 %7744, %v10922_v31   ;;  %v5663_v4 = vpop.permute.xlu0 %5662  ;;  %v11234_v31 = vld [vmem:[#allocation4 + $0x78] sm:$0xff] }
 0xd60   : > { %7454 = vmatprep.subr.bf16.mxu1 %v5671_v10 }
 0xd61   : > { %7455 = vmatpush3.bf16.msra.mxu1 %v5671_v10 }
 0xd63   : > { %v5669_v34 = vpop.permute.xlu1 %5668  ;;  %4487 = vperm.xlu1 %7744, %v10886_v37   ;;  %v12588_v37 = vmov 3  }
 0xd64   : > { %7456 = vmatprep.subr.bf16.mxu1 %v5669_v34 }
 0xd65   : > { %7457 = vmatpush3.bf16.msra.mxu1 %v5669_v34 }
 0xd67   : > { %v5667_v63 = vpop.permute.xlu1 %5666  ;;  %4492 = vperm.xlu1 %7744, %v10908_v29  }
 0xd68   : > { %7458 = vmatprep.subr.bf16.mxu1 %v5667_v63 }
 0xd69   : > { %7459 = vmatpush3.bf16.msra.mxu1 %v5667_v63 }
 0xd6b   : > { %v5665_v9 = vpop.permute.xlu1 %5664  ;;  %4502 = vperm.xlu1 %7744, %v10897_v0  }
 0xd6c   : > { %7460 = vmatprep.subr.bf16.mxu1 %v5665_v9 }
 0xd6d   : > { %7461 = vmatpush3.bf16.msra.mxu1 %v5665_v9 }
 0xd6e   : > { %7462 = vmatprep.subr.bf16.mxu1 %v5663_v4 }
 0xd6f   : > { %4512 = vperm.xlu1 %7744, %v11170_v45   ;;  %v12589_v45 = vsub.f32 %v11037_v28, %v11045_v21  ;;  %v12594_v28 = vsub.f32 %v11062_v33, %v11070_v47  ;;  %v12595_v47 = vsub.f32 %v11088_v50, %v11096_v19  ;;  %v12597_v19 = vsub.f32 %v11116_v39, %v11125_v56 }
 0xd71   : > { %7463 = vmatpush3.bf16.msra.mxu1 %v5663_v4  ;;  %v5283_v0 = vmul.f32 1.442695, %v12589_v45  ;;  %v5291_v33 = vmul.f32 1.442695, %v12595_v47  ;;  %v5297_v50 = vmul.f32 1.442695, %v12597_v19 }
 0xd73   : > { %4522 = vperm.xlu1 %7744, %v8090_v54   ;;  %8099 = vpow2.f32 %v5283_v0  ;;  %v12596_v54 = vsub.f32 %v11090_v60, %v11099_v61  ;;  %v12598_v60 = vsub.f32 %v11139_v11, %v11148_v18 }
 0xd75   : > { %v5309_v61 = vmul.f32 1.442695, %v12598_v60 }
 0xd77   : > { %4532 = vperm.xlu1 %7744, %v8096_v46   ;;  %v5301_v46 = vmul.f32 1.442695, %v12596_v54  ;;  %v12606_v54 = vld [vmem:[#allocation18_spill] sm:$0xff] }
 0xd7b   : > { %4542 = vperm.xlu1 %7744, %v8098_v59  }
 0xd7f   : > { %4711 = vrot.lane.b32.xlu1 %v10861_v40, %s8276_s14  ;;  %v12590_v40 = vsub.f32 %v11008_v52, %v11011_v62 }
 0xd80   : > { %7746 = vset.pattern.permute.xlu1 %v12588_v37 }
 0xd81   : > { %v5285_v29 = vmul.f32 1.442695, %v12590_v40  ;;  %v12603_v40 = vld [vmem:[#allocation24_spill] sm:$0xff] }
 0xd83   : > { %4715 = vrot.lane.b32.xlu1 %v10856_v32, %s8276_s14  ;;  %8101 = vpow2.f32 %v5285_v29  ;;  %v12591_v32 = vsub.f32 %v11018_v55, %v11023_v16 }
 0xd87   : > { %4719 = vrot.lane.b32.xlu1 %v10880_v38, %s8276_s14  ;;  %v12592_v38 = vsub.f32 %v11064_v8, %v11073_v13 }
 0xd8b   : > { %4723 = vrot.lane.b32.xlu1 %v10876_v35, %s8276_s14  ;;  %v5287_v35 = vmul.f32 1.442695, %v12591_v32 }
 0xd8d   : > { %8103 = vpow2.f32 %v5287_v35  ;;  %v12604_v35 = vld [vmem:[#allocation78_spill] sm:$0xff] }
 0xd8f   : > { %4727 = vrot.lane.b32.xlu1 %v10899_v51, %s8276_s14  ;;  %v5289_v51 = vmul.f32 1.442695, %v12592_v38 }
 0xd91   : > { %8105 = vpow2.f32 %v5289_v51 }
 0xd93   : > { %4731 = vrot.lane.b32.xlu1 %v10892_v41, %s8276_s14  ;;  %v12593_v41 = vsub.f32 %v11039_v49, %v11048_v36  ;;  %v5295_v49 = vmul.f32 1.442695, %v12594_v28 }
 0xd95   : > { %v5293_v62 = vmul.f32 1.442695, %v12593_v41  ;;  %v12605_v41 = vld [vmem:[#allocation22_spill] sm:$0xff] }
 0xd97   : > { %4735 = vrot.lane.b32.xlu1 %v10920_v44, %s8276_s14  ;;  %v11242_v44 = vpop.eup %8099  ;;  %8107 = vpow2.f32 %v5293_v62 }
 0xd98   : > { %v11257_v36 = vpop.eup %8101  ;;  %8109 = vpow2.f32 %v5295_v49 }
 0xd99   : > { %8111 = vpow2.f32 %v5291_v33 }
 0xd9a   : > { %v11268_v59 = vpop.eup %8103  ;;  %8113 = vpow2.f32 %v5301_v46 }
 0xd9b   : > { %4739 = vrot.lane.b32.xlu1 %v10917_v24, %s8276_s14  ;;  %v11249_v24 = vld [vmem:[#allocation4 + $0x68] sm:$0xff]  ;;  %8115 = vpow2.f32 %v5297_v50 }
 0xd9c   : > { %v5248_v52 = vpop.xlane.xlu1 %5247  ;;  %8117 = vpow2.f32 %v5309_v61  ;;  %v12607_v50 = vld [vmem:[#allocation19_spill] sm:$0xff] }
 0xd9d   : > { %v11240_v55 = vmax.f32 %v11234_v31, %v5248_v52  ;;  %v12608_v61 = vld [vmem:[#allocation11_spill] sm:$0xff] }
 0xd9e   : > { %v11275_v26 = vpop.eup %8105 }
 0xd9f   : > { %v5280_v13 = vsub.f32 %v11234_v31, %v11240_v55  ;;  %5891 = vst.msk [vmem:[#allocation4 + $0x78] sm:$0xff] %vm5521_vm13, %v11240_v55  ;;  %5561 = vperm.xlu1 %7746, %v11242_v44  }
 0xda0   : > { %v5244_v16 = vpop.xlane.xlu1 %5243 }
 0xda1   : > { %v11255_v21 = vmax.f32 %v11249_v24, %v5244_v16 }
 0xda3   : > { %v5278_v8 = vsub.f32 %v11249_v24, %v11255_v21  ;;  %5889 = vst.msk [vmem:[#allocation4 + $0x68] sm:$0xff] %vm5521_vm13, %v11255_v21  ;;  %5380 = vperm.xlu0 %7742, %v11255_v21   ;;  %5566 = vperm.xlu1 %7746, %v11257_v36  }
 0xda4   : > { %v11283_v3 = vpop.eup %8107 }
 0xda5   : > { %v11290_v27 = vpop.eup %8109 }
 0xda6   : > { %v11298_v12 = vpop.eup %8111 }
 0xda7   : > { %5390 = vperm.xlu0 %7742, %v11240_v55   ;;  %5571 = vperm.xlu1 %7746, %v11268_v59   ;;  %v11302_v15 = vpop.eup %8113 }
 0xda8   : > { %v11310_v10 = vpop.eup %8115 }
 0xda9   : > { %v11314_v4 = vpop.eup %8117 }
 0xdab   : > { %7743 = vset.pattern.permute.xlu0 %v12587_v17  ;;  %5576 = vperm.xlu1 %7746, %v11275_v26  }
 0xdac   : > { %4472 = vperm.xlu0 %7743, %v10878_v48   ;;  %v12599_v48 = vsub.f32 %v11163_v2, %v11168_v53 }
 0xdad   : > { %v5326_v14 = vpop.permute.xlu1 %5325 }
 0xdae   : > { %v5305_v39 = vmul.f32 1.442695, %v12599_v48  ;;  %v5395_v53 = vsub.f32 %v10933_v7, %v5326_v14  ;;  %v12600_v7 = vld [vmem:[#allocation72_spill] sm:$0xff]  ;;  %v12609_v48 = vld [vmem:[#allocation23_spill] sm:$0xff] }
 0xdaf   : > { %5586 = vperm.xlu1 %7746, %v11283_v3  }
 0xdb0   : > { %4482 = vperm.xlu0 %7743, %v10871_v1   ;;  %8119 = vpow2.f32 %v5305_v39  ;;  %v5413_v34 = vmul.f32 1.442695, %v5395_v53 }
 0xdb1   : > { %v5316_v58 = vpop.permute.xlu1 %5315 }
 0xdb2   : > { %v5393_v56 = vsub.f32 %v10938_v25, %v5316_v58 }
 0xdb3   : > { %5591 = vperm.xlu1 %7746, %v11290_v27  }
 0xdb4   : > { %4497 = vperm.xlu0 %7743, %v10936_v57   ;;  %v5409_v18 = vmul.f32 1.442695, %v5393_v56 }
 0xdb5   : > { %v5331_v1 = vpop.permute.xlu1 %5330 }
 0xdb6   : > { %v5396_v25 = vsub.f32 %v10942_v5, %v5331_v1  ;;  %8121 = vpow2.f32 %v5409_v18 }
 0xdb7   : > { %5581 = vperm.xlu1 %7746, %v11298_v12  }
 0xdb8   : > { %4507 = vperm.xlu0 %7743, %v10927_v43  }
 0xdb9   : > { %v5321_v11 = vpop.permute.xlu1 %5320  ;;  %v5336_v22 = vpop.permute.xlu0 %5335 }
 0xdba   : > { %v5394_v57 = vsub.f32 %v10946_v23, %v5321_v11  ;;  %v5397_v43 = vsub.f32 %v10953_v42, %v5336_v22  ;;  %v5415_v23 = vmul.f32 1.442695, %v5396_v25  ;;  %v12602_v42 = vld [vmem:[#allocation20_spill] sm:$0xff]  ;;  %v12610_v11 = vld [vmem:[#allocation71_spill] sm:$0xff] }
 0xdbb   : > { %5606 = vperm.xlu1 %7746, %v11302_v15  }
 0xdbc   : > { %v5411_v2 = vmul.f32 1.442695, %v5394_v57  ;;  %4517 = vperm.xlu0 %7743, %v11150_v20   ;;  %v5417_v63 = vmul.f32 1.442695, %v5397_v43  ;;  %v12601_v20 = vld [vmem:[#allocation14_spill] sm:$0xff] }
 0xdbd   : > { %v5346_v30 = vpop.permute.xlu1 %5345  ;;  %v5351_v17 = vpop.permute.xlu0 %5350 }
 0xdbe   : > { %8123 = vpow2.f32 %v5411_v2  ;;  %v5399_v0 = vsub.f32 %v12602_v42, %v5346_v30  ;;  %v5400_v29 = vsub.f32 %v12603_v40, %v5351_v17  ;;  %v11321_v52 = vpop.eup %8119  ;;  %v12611_v2 = vld [vmem:[#allocation21_spill] sm:$0xff] }
 0xdbf   : > { %5596 = vperm.xlu1 %7746, %v11310_v10   ;;  %8125 = vpow2.f32 %v5413_v34  ;;  %v12616_v40 = vld [vmem:[#allocation65_spill] sm:$0xff] }
 0xdc0   : > { %4527 = vperm.xlu0 %7743, %v12600_v7   ;;  %8127 = vpow2.f32 %v5415_v23  ;;  %v5421_v16 = vmul.f32 1.442695, %v5399_v0  ;;  %v5423_v28 = vmul.f32 1.442695, %v5400_v29  ;;  %v12612_v23 = vld [vmem:[#allocation16_spill] sm:$0xff] }
 0xdc1   : > { %v5341_v9 = vpop.permute.xlu1 %5340  ;;  %v5371_v5 = vpop.permute.xlu0 %5370  ;;  %8129 = vpow2.f32 %v5417_v63 }
 0xdc2   : > { %v5398_v45 = vsub.f32 %v12601_v20, %v5341_v9  ;;  %v5404_v39 = vsub.f32 %v12609_v48, %v5371_v5  ;;  %v12613_v9 = vld [vmem:[#allocation28_spill] sm:$0xff] }
 0xdc3   : > { %5626 = vperm.xlu1 %7746, %v11314_v4   ;;  %v11326_v33 = vpop.eup %8121  ;;  %v12614_v5 = vld [vmem:[#allocation32_spill] sm:$0xff] }
 0xdc4   : > { %v5419_v32 = vmul.f32 1.442695, %v5398_v45  ;;  %4537 = vperm.xlu0 %7743, %v12604_v35   ;;  %v12615_v20 = vsub.f32 %v12613_v9, %v12614_v5  ;;  %v12617_v35 = vld [vmem:[#allocation35_spill] sm:$0xff]  ;;  %v12625_v48 = vld [vmem:[#allocation68_spill] sm:$0xff]  ;;  %v4462_v5 = vld [vmem:[#allocation3 + $0x40] sm:$0xff] }
 0xdc5   : > { %v5366_v38 = vpop.permute.xlu1 %5365  ;;  %v5361_v51 = vpop.permute.xlu0 %5360 }
 0xdc6   : > { %8131 = vpow2.f32 %v5419_v32  ;;  %v5402_v62 = vsub.f32 %v12605_v41, %v5361_v51  ;;  %v5403_v14 = vsub.f32 %v12607_v50, %v5366_v38  ;;  %v5281_v45 = vmul.f32 1.442695, %v12615_v20  ;;  %v12618_v38 = vld [vmem:[#allocation73_spill] sm:$0xff] }
 0xdc7   : > { %5616 = vperm.xlu1 %7746, %v11321_v52   ;;  %8133 = vpow2.f32 %v5421_v16  ;;  %v12619_v51 = vsub.f32 %v12617_v35, %v12618_v38  ;;  %v12620_v16 = vld [vmem:[#allocation10_spill] sm:$0xff] }
 0xdc8   : > { %4547 = vperm.xlu0 %7743, %v11189_v6   ;;  %v5427_v49 = vmul.f32 1.442695, %v5402_v62  ;;  %8135 = vpow2.f32 %v5423_v28  ;;  %v5429_v18 = vmul.f32 1.442695, %v5403_v14  ;;  %v4466_v38 = vld [vmem:[#allocation3 + $0x60] sm:$0xff] }
 0xdc9   : > { %v5356_v47 = vpop.permute.xlu1 %5355  ;;  %v5659_v56 = vpop.permute.xlu0 %5658  ;;  %v5303_v41 = vmul.f32 1.442695, %v12619_v51 }
 0xdca   : > { %v5401_v46 = vsub.f32 %v12606_v54, %v5356_v47  ;;  %8137 = vpow2.f32 %v5427_v49  ;;  %v12621_v49 = vld [vmem:[#allocation29_spill] sm:$0xff] }
 0xdcb   : > { %v11329_v19 = vpop.eup %8123  ;;  %v12622_v47 = vld [vmem:[#allocation33_spill] sm:$0xff] }
 0xdcc   : > { %v5425_v60 = vmul.f32 1.442695, %v5401_v46  ;;  %4713 = vrot.lane.b32.xlu0 %v12608_v61, %s8276_s14  ;;  %v5650_v58 = vpack.c.bf16 %v11329_v19, %v11326_v33  ;;  %v11338_v1 = vpop.eup %8125  ;;  %v12623_v54 = vsub.f32 %v12621_v49, %v12622_v47  ;;  %v4468_v49 = vld [vmem:[#allocation3 + $0x70] sm:$0xff] }
 0xdcd   : > { %v5661_v6 = vpop.permute.xlu1 %5660  ;;  %7745 = vset.pattern.permute.xlu0 %v12588_v37  ;;  %v8128_v22 = vpop.eup %8127  ;;  %v5431_v37 = vmul.f32 1.442695, %v5404_v39  ;;  %v5307_v39 = vmul.f32 1.442695, %v5278_v8 }
 0xdce   : > { %8139 = vpow2.f32 %v5425_v60  ;;  %7464 = vmatprep.subr.bf16.mxu1 %v5661_v6  ;;  %7468 = vmatprep.mubr.bf16.mxu1 %v5650_v58  ;;  %v11344_v53 = vpop.eup %8129  ;;  %v5651_v43 = vpack.c.bf16 %v8128_v22, %v11338_v1  ;;  %v5299_v46 = vmul.f32 1.442695, %v12623_v54  ;;  %v12624_v60 = vld [vmem:[#allocation15_spill] sm:$0xff]  ;;  %v5311_v58 = vmul.f32 1.442695, %v5280_v13 }
 0xdcf   : > { %7465 = vmatpush3.bf16.msra.mxu1 %v5661_v6  ;;  %8141 = vpow2.f32 %v5429_v18 }
 0xdd0   : > { %4717 = vrot.lane.b32.xlu0 %v12610_v11, %s8276_s14  ;;  %7466 = vmatprep.subr.bf16.mxu1 %v5659_v56  ;;  %8143 = vpow2.f32 %v5431_v37  ;;  %v4458_v37 = vld [vmem:[#allocation3 + $0x20] sm:$0xff] }
 0xdd1   : > { %v11342_v57 = vpop.permute.xlu1 %5375  ;;  %8145 = vpow2.f32 %v5281_v45 }
 0xdd2   : > { %8147 = vpow2.f32 %v5303_v41 }
 0xdd3   : > { %v8132_v25 = vpop.eup %8131  ;;  %7467 = vmatpush3.bf16.msra.mxu1 %v5659_v56  ;;  %8149 = vpow2.f32 %v5299_v46 }
 0xdd4   : > { %4721 = vrot.lane.b32.xlu0 %v12611_v2, %s8276_s14  ;;  %v5652_v30 = vpack.c.bf16 %v8132_v25, %v11344_v53  ;;  %v11352_v34 = vpop.eup %8133  ;;  %8151 = vpow2.f32 %v5311_v58 }
 0xdd5   : > { %v11350_v17 = vpop.permute.xlu1 %5385  ;;  %v8136_v7 = vpop.eup %8135  ;;  %8153 = vpow2.f32 %v5307_v39 }
 0xdd6   : > { %7469 = vmatmul.mubr.bf16.vlgmr.msra.gmra.mxu1 %v5651_v43  ;;  %v5653_v29 = vpack.c.bf16 %v8136_v7, %v11352_v34 }
 0xdd7   : > { %7472 = vmatprep.mubr.bf16.mxu1 %v5652_v30  ;;  %v8138_v63 = vpop.eup %8137 }
 0xdd8   : > { %4725 = vrot.lane.b32.xlu0 %v12612_v23, %s8276_s14  ;;  %v4460_v23 = vld [vmem:[#allocation3 + $0x30] sm:$0xff] }
 0xdda   : > { %v11359_v42 = vpop.permute.xlu1 %4477 }
 0xddb   : > { %v11361_v0 = vpop.eup %8139 }
 0xddc   : > { %4729 = vrot.lane.b32.xlu0 %v12616_v40, %s8276_s14  ;;  %v5654_v32 = vpack.c.bf16 %v8138_v63, %v11361_v0  ;;  %v11374_v28 = vpop.eup %8141 }
 0xddd   : > { %v8144_v14 = vpop.eup %8143 }
 0xdde   : > { %v11370_v62 = vpop.permute.xlu1 %4487  ;;  %7473 = vmatmul.mubr.bf16.gmra.mxu1 %v5653_v29  ;;  %v5655_v61 = vpack.c.bf16 %v8144_v14, %v11374_v28  ;;  %v11390_v18 = vpop.eup %8145  ;;  %v4464_v29 = vld [vmem:[#allocation3 + $0x50] sm:$0xff] }
 0xddf   : > { %7476 = vmatprep.mubr.bf16.mxu1 %v5654_v32  ;;  %v11394_v55 = vpop.eup %8147 }
 0xde0   : > { %4733 = vrot.lane.b32.xlu0 %v12620_v16, %s8276_s14  ;;  %v11397_v11 = vpop.eup %8149 }
 0xde1   : > { %v11400_v21 = vpop.eup %8151 }
 0xde2   : > { %v4493_v50 = vpop.permute.xlu1 %4492 }
 0xde3   : > { %v4554_v2 = vmul.f32 %v4493_v50, %v4458_v37  ;;  %v12626_v50 = vld [vmem:[#allocation30_spill] sm:$0xff] }
 0xde4   : > { %4737 = vrot.lane.b32.xlu0 %v12624_v60, %s8276_s14  ;;  %v12627_v60 = vld [vmem:[#allocation31_spill] sm:$0xff] }
 0xde6   : > { %v4503_v6 = vpop.permute.xlu1 %4502  ;;  %7477 = vmatmul.mubr.bf16.gmra.mxu1 %v5655_v61  ;;  %v5407_v61 = vsub.f32 %v12627_v60, %v11350_v17 }
 0xde8   : > { %4741 = vrot.lane.b32.xlu0 %v12625_v48, %s8276_s14  ;;  %v12628_v48 = vld [vmem:[#allocation74_spill] sm:$0xff] }
 0xdea   : > { %v4513_v56 = vpop.permute.xlu1 %4512 }
 0xdeb   : > { %5473 = vadd.xlane.f32.xlu1 %v11326_v33  ;;  %v11403_v33 = vpop.eup %8153  ;;  %v4558_v20 = vmul.f32 %v4513_v56, %v4462_v5  ;;  %v5437_v56 = vmul.f32 1.442695, %v5407_v61 }
 0xdec   : > { %5556 = vperm.xlu0 %7745, %v11390_v18  }
 0xdee   : > { %v4523_v31 = vpop.permute.xlu1 %4522 }
 0xdef   : > { %5479 = vadd.xlane.f32.xlu1 %v8128_v22  ;;  %v4560_v32 = vmul.f32 %v4523_v31, %v4464_v29 }
 0xdf0   : > { %5611 = vperm.xlu0 %7745, %v11394_v55  }
 0xdf2   : > { %v4533_v13 = vpop.permute.xlu1 %4532 }
 0xdf3   : > { %5487 = vadd.xlane.f32.xlu1 %v8136_v7  ;;  %v4556_v7 = vmul.f32 %v4503_v6, %v4460_v23  ;;  %v4562_v51 = vmul.f32 %v4533_v13, %v4466_v38 }
 0xdf4   : > { %5601 = vperm.xlu0 %7745, %v11397_v11  }
 0xdf6   : > { %v4543_v24 = vpop.permute.xlu1 %4542 }
 0xdf7   : > { %5483 = vadd.xlane.f32.xlu1 %v8132_v25  ;;  %v4564_v47 = vmul.f32 %v4543_v24, %v4468_v49  ;;  %v12629_v24 = vld [vmem:[#allocation27_spill] sm:$0xff]  ;;  %v4457_v49 = vld [vmem:[#allocation3 + $0x18] sm:$0xff] }
 0xdf8   : > { %5631 = vperm.xlu0 %7745, %v11400_v21  }
 0xdfa   : > { %v4712_v8 = vpop.permute.xlu1 %4711 }
 0xdfb   : > { %5495 = vadd.xlane.f32.xlu1 %v8144_v14  ;;  %v5405_v14 = vsub.f32 %v12626_v50, %v11342_v57  ;;  %v4454_v57 = vld [vmem:[#allocation3] sm:$0xff] }
 0xdfc   : > { %5621 = vperm.xlu0 %7745, %v11403_v33  }
 0xdfd   : > { %v5433_v58 = vmul.f32 1.442695, %v5405_v14  ;;  %v4459_v14 = vld [vmem:[#allocation3 + $0x28] sm:$0xff] }
 0xdfe   : > { %v4716_v22 = vpop.permute.xlu1 %4715 }
 0xdff   : > { %5491 = vadd.xlane.f32.xlu1 %v8138_v63  ;;  %8155 = vpow2.f32 %v5433_v58 }
 0xe02   : > { %v4720_v43 = vpop.permute.xlu1 %4719 }
 0xe03   : > { %v4763_v30 = vadd.f32 %v4720_v43, %v4554_v2 }
 0xe05   : > { %4780 = vst.msk [vmem:[#allocation3 + $0x20] sm:$0xff] %vm4775_vm14, %v4763_v30 }
 0xe06   : > { %v4724_v25 = vpop.permute.xlu1 %4723 }
 0xe07   : > { %v4765_v9 = vadd.f32 %v4724_v25, %v4556_v7 }
 0xe09   : > { %4782 = vst.msk [vmem:[#allocation3 + $0x30] sm:$0xff] %vm4775_vm14, %v4765_v9 }
 0xe0a   : > { %v4728_v45 = vpop.permute.xlu1 %4727 }
 0xe0b   : > { %v4767_v40 = vadd.f32 %v4728_v45, %v4558_v20 }
 0xe0c   : > { %v8156_v25 = vpop.eup %8155 }
 0xe0d   : > { %4784 = vst.msk [vmem:[#allocation3 + $0x40] sm:$0xff] %vm4775_vm14, %v4767_v40 }
 0xe0e   : > { %v4732_v63 = vpop.permute.xlu1 %4731 }
 0xe0f   : > { %v4769_v35 = vadd.f32 %v4732_v63, %v4560_v32 }
 0xe11   : > { %4786 = vst.msk [vmem:[#allocation3 + $0x50] sm:$0xff] %vm4775_vm14, %v4769_v35  ;;  %v4455_v35 = vld [vmem:[#allocation3 + $0x8] sm:$0xff] }
 0xe12   : > { %v4736_v41 = vpop.permute.xlu1 %4735  ;;  %v4551_v38 = vmul.f32 %v11359_v42, %v4455_v35  ;;  %v4461_v42 = vld [vmem:[#allocation3 + $0x38] sm:$0xff] }
 0xe13   : > { %v4771_v16 = vadd.f32 %v4736_v41, %v4562_v51  ;;  %v5444_v35 = vld [vmem:[#allocation5 + $0x18] sm:$0xff] }
 0xe15   : > { %4788 = vst.msk [vmem:[#allocation3 + $0x60] sm:$0xff] %vm4775_vm14, %v4771_v16 }
 0xe16   : > { %v4740_v54 = vpop.permute.xlu1 %4739 }
 0xe17   : > { %v4773_v46 = vadd.f32 %v4740_v54, %v4564_v47  ;;  %v4553_v47 = vmul.f32 %v11370_v62, %v4457_v49 }
 0xe19   : > { %4790 = vst.msk [vmem:[#allocation3 + $0x70] sm:$0xff] %vm4775_vm14, %v4773_v46 }
 0xe1b   : > { %5477 = vadd.xlane.f32.xlu0 %v11338_v1 }
 0xe1e   : > { %v5381_v6 = vpop.permute.xlu0 %5380 }
 0xe1f   : > { %v5406_v39 = vsub.f32 %v12628_v48, %v5381_v6  ;;  %5475 = vadd.xlane.f32.xlu0 %v11329_v19  ;;  %v4456_v19 = vld [vmem:[#allocation3 + $0x10] sm:$0xff] }
 0xe21   : > { %v5435_v31 = vmul.f32 1.442695, %v5406_v39 }
 0xe22   : > { %v5391_v13 = vpop.permute.xlu0 %5390 }
 0xe23   : > { %8157 = vpow2.f32 %v5435_v31  ;;  %v5408_v37 = vsub.f32 %v12629_v24, %v5391_v13  ;;  %5485 = vadd.xlane.f32.xlu0 %v11352_v34 }
 0xe24   : > { %8159 = vpow2.f32 %v5437_v56  ;;  %v4463_v56 = vld [vmem:[#allocation3 + $0x48] sm:$0xff] }
 0xe25   : > { %v5439_v1 = vmul.f32 1.442695, %v5408_v37 }
 0xe27   : > { %8161 = vpow2.f32 %v5439_v1  ;;  %5481 = vadd.xlane.f32.xlu0 %v11344_v53  ;;  %v4473_v17 = vpop.permute.xlu0 %4472  ;;  %v4465_v1 = vld [vmem:[#allocation3 + $0x58] sm:$0xff] }
 0xe28   : > { %v4550_v2 = vmul.f32 %v4473_v17, %v4454_v57 }
 0xe2a   : > { %v4759_v43 = vadd.f32 %v4712_v8, %v4550_v2 }
 0xe2b   : > { %5493 = vadd.xlane.f32.xlu0 %v11374_v28  ;;  %v4483_v30 = vpop.permute.xlu0 %4482  ;;  %v11426_v28 = vpop.permute.xlu1 %5561 }
 0xe2c   : > { %4776 = vst.msk [vmem:[#allocation3] sm:$0xff] %vm4775_vm14, %v4759_v43  ;;  %v4552_v23 = vmul.f32 %v4483_v30, %v4456_v19  ;;  %v4467_v43 = vld [vmem:[#allocation3 + $0x68] sm:$0xff] }
 0xe2e   : > { %v4761_v7 = vadd.f32 %v4716_v22, %v4552_v23 }
 0xe2f   : > { %5489 = vadd.xlane.f32.xlu0 %v11361_v0  ;;  %v4498_v34 = vpop.permute.xlu0 %4497  ;;  %v11428_v40 = vpop.permute.xlu1 %5566 }
 0xe30   : > { %v8158_v9 = vpop.eup %8157  ;;  %4778 = vst.msk [vmem:[#allocation3 + $0x10] sm:$0xff] %vm4775_vm14, %v4761_v7  ;;  %v4555_v60 = vmul.f32 %v4498_v34, %v4459_v14 }
 0xe31   : > { %v5656_v53 = vpack.c.bf16 %v8158_v9, %v8156_v25  ;;  %v8160_v5 = vpop.eup %8159 }
 0xe33   : > { %5501 = vadd.xlane.f32.xlu0 %v8160_v5  ;;  %7480 = vmatprep.mubr.bf16.mxu1 %v5656_v53  ;;  %v4508_v8 = vpop.permute.xlu0 %4507  ;;  %v11430_v32 = vpop.permute.xlu1 %5571 }
 0xe34   : > { %v8162_v20 = vpop.eup %8161  ;;  %v4557_v48 = vmul.f32 %v4508_v8, %v4461_v42 }
 0xe35   : > { %5503 = vadd.xlane.f32.xlu1 %v8162_v20  ;;  %v5657_v45 = vpack.c.bf16 %v8162_v20, %v8160_v5 }
 0xe37   : > { %5497 = vadd.xlane.f32.xlu0 %v8156_v25  ;;  %7481 = vmatmul.mubr.bf16.gmra.mxu1 %v5657_v45  ;;  %v4518_v22 = vpop.permute.xlu0 %4517  ;;  %v11433_v51 = vpop.permute.xlu1 %5576  ;;  %v4469_v25 = vld [vmem:[#allocation3 + $0x78] sm:$0xff]  ;;  %v5441_v45 = vld [vmem:[#allocation5] sm:$0xff] }
 0xe38   : > { %v4559_v31 = vmul.f32 %v4518_v22, %v4463_v56  ;;  %v5457_v22 = vmul.f32 %v11390_v18, %v5441_v45 }
 0xe39   : > { %5499 = vadd.xlane.f32.xlu1 %v8158_v9 }
 0xe3b   : > { %v4528_v0 = vpop.permute.xlu0 %4527  ;;  %v11437_v46 = vpop.permute.xlu1 %5586 }
 0xe3c   : > { %v4561_v57 = vmul.f32 %v4528_v0, %v4465_v1 }
 0xe3f   : > { %v4538_v29 = vpop.permute.xlu0 %4537  ;;  %v11440_v6 = vpop.permute.xlu1 %5591 }
 0xe40   : > { %v4563_v30 = vmul.f32 %v4538_v29, %v4467_v43 }
 0xe43   : > { %v4548_v63 = vpop.permute.xlu0 %4547  ;;  %v11444_v24 = vpop.permute.xlu1 %5581 }
 0xe44   : > { %v4565_v34 = vmul.f32 %v4548_v63, %v4469_v25  ;;  %v5460_v63 = vmul.f32 %v11268_v59, %v5444_v35 }
 0xe47   : > { %v4714_v41 = vpop.permute.xlu0 %4713  ;;  %v11447_v19 = vpop.permute.xlu1 %5606 }
 0xe48   : > { %v4760_v16 = vadd.f32 %v4714_v41, %v4551_v38 }
 0xe4a   : > { %4777 = vst.msk [vmem:[#allocation3 + $0x8] sm:$0xff] %vm4775_vm14, %v4760_v16  ;;  %v5448_v16 = vld [vmem:[#allocation5 + $0x38] sm:$0xff] }
 0xe4b   : > { %v4718_v54 = vpop.permute.xlu0 %4717  ;;  %v11451_v53 = vpop.permute.xlu1 %5596  ;;  %v5464_v49 = vmul.f32 %v11290_v27, %v5448_v16 }
 0xe4c   : > { %v4762_v50 = vadd.f32 %v4718_v54, %v4553_v47 }
 0xe4e   : > { %4779 = vst.msk [vmem:[#allocation3 + $0x18] sm:$0xff] %vm4775_vm14, %v4762_v50  ;;  %v5446_v50 = vld [vmem:[#allocation5 + $0x28] sm:$0xff] }
 0xe4f   : > { %v4722_v61 = vpop.permute.xlu0 %4721  ;;  %v11454_v8 = vpop.permute.xlu1 %5626  ;;  %v5462_v18 = vmul.f32 %v11298_v12, %v5446_v50 }
 0xe50   : > { %v4764_v58 = vadd.f32 %v4722_v61, %v4555_v60  ;;  %v5452_v60 = vld [vmem:[#allocation5 + $0x58] sm:$0xff] }
 0xe51   : > { %v5468_v59 = vmul.f32 %v11394_v55, %v5452_v60  ;;  %v5449_v60 = vld [vmem:[#allocation5 + $0x40] sm:$0xff] }
 0xe52   : > { %4781 = vst.msk [vmem:[#allocation3 + $0x28] sm:$0xff] %vm4775_vm14, %v4764_v58 }
 0xe53   : > { %v4726_v39 = vpop.permute.xlu0 %4725  ;;  %v11456_v20 = vpop.permute.xlu1 %5616 }
 0xe54   : > { %v4766_v62 = vadd.f32 %v4726_v39, %v4557_v48  ;;  %v5450_v48 = vld [vmem:[#allocation5 + $0x48] sm:$0xff] }
 0xe55   : > { %v5466_v27 = vmul.f32 %v11397_v11, %v5450_v48 }
 0xe56   : > { %4783 = vst.msk [vmem:[#allocation3 + $0x38] sm:$0xff] %vm4775_vm14, %v4766_v62 }
 0xe57   : > { %v4730_v13 = vpop.permute.xlu0 %4729 }
 0xe58   : > { %v4768_v37 = vadd.f32 %v4730_v13, %v4559_v31 }
 0xe5a   : > { %4785 = vst.msk [vmem:[#allocation3 + $0x48] sm:$0xff] %vm4775_vm14, %v4768_v37 }
 0xe5b   : > { %v4734_v17 = vpop.permute.xlu0 %4733 }
 0xe5c   : > { %v4770_v2 = vadd.f32 %v4734_v17, %v4561_v57 }
 0xe5e   : > { %4787 = vst.msk [vmem:[#allocation3 + $0x58] sm:$0xff] %vm4775_vm14, %v4770_v2 }
 0xe5f   : > { %v4738_v23 = vpop.permute.xlu0 %4737 }
 0xe60   : > { %v4772_v7 = vadd.f32 %v4738_v23, %v4563_v30  ;;  %v5443_v30 = vld [vmem:[#allocation5 + $0x10] sm:$0xff] }
 0xe61   : > { %v5459_v23 = vmul.f32 %v11257_v36, %v5443_v30 }
 0xe62   : > { %4789 = vst.msk [vmem:[#allocation3 + $0x68] sm:$0xff] %vm4775_vm14, %v4772_v7 }
 0xe63   : > { %v4742_v9 = vpop.permute.xlu0 %4741 }
 0xe64   : > { %v4774_v5 = vadd.f32 %v4742_v9, %v4565_v34 }
 0xe66   : > { %4791 = vst.msk [vmem:[#allocation3 + $0x78] sm:$0xff] %vm4775_vm14, %v4774_v5  ;;  %v5442_v5 = vld [vmem:[#allocation5 + $0x8] sm:$0xff] }
 0xe67   : > { %v11469_v39 = vpop.permute.xlu0 %5556  ;;  %v5458_v45 = vmul.f32 %v11242_v44, %v5442_v5  ;;  %v5538_v5 = vld [vmem:[#allocation3] sm:$0xff] }
 0xe6b   : > { %v11472_v12 = vpop.permute.xlu0 %5611 }
 0xe6f   : > { %v11474_v31 = vpop.permute.xlu0 %5601 }
 0xe73   : > { %v11477_v37 = vpop.permute.xlu0 %5631 }
 0xe74   : > { %v5474_v0 = vpop.xlane.xlu1 %5473 }
 0xe75   : > { %v5505_v29 = vadd.f32 %v5474_v0, %v5457_v22 }
 0xe77   : > { %5522 = vst.msk [vmem:[#allocation5] sm:$0xff] %vm5521_vm13, %v5505_v29  ;;  %v11483_v17 = vpop.permute.xlu0 %5621 }
 0xe78   : > { %v5480_v38 = vpop.xlane.xlu1 %5479 }
 0xe79   : > { %v5508_v41 = vadd.f32 %v5480_v38, %v5460_v63  ;;  %v5447_v63 = vld [vmem:[#allocation5 + $0x30] sm:$0xff] }
 0xe7a   : > { %v5463_v36 = vmul.f32 %v11283_v3, %v5447_v63 }
 0xe7b   : > { %5525 = vst.msk [vmem:[#allocation5 + $0x18] sm:$0xff] %vm5521_vm13, %v5508_v41 }
 0xe7c   : > { %v5488_v47 = vpop.xlane.xlu1 %5487 }
 0xe7d   : > { %v5512_v54 = vadd.f32 %v5488_v47, %v5464_v49  ;;  %v5445_v49 = vld [vmem:[#allocation5 + $0x20] sm:$0xff] }
 0xe7e   : > { %v5461_v44 = vmul.f32 %v11275_v26, %v5445_v49  ;;  %v5545_v49 = vld [vmem:[#allocation3 + $0x38] sm:$0xff] }
 0xe7f   : > { %5529 = vst.msk [vmem:[#allocation5 + $0x38] sm:$0xff] %vm5521_vm13, %v5512_v54  ;;  %v5451_v54 = vld [vmem:[#allocation5 + $0x50] sm:$0xff] }
 0xe80   : > { %v5484_v14 = vpop.xlane.xlu1 %5483 }
 0xe81   : > { %v5510_v61 = vadd.f32 %v5484_v14, %v5462_v18  ;;  %v5467_v18 = vmul.f32 %v11302_v15, %v5451_v54 }
 0xe83   : > { %5527 = vst.msk [vmem:[#allocation5 + $0x28] sm:$0xff] %vm5521_vm13, %v5510_v61  ;;  %v5465_v61 = vmul.f32 %v11310_v10, %v5449_v60 }
 0xe84   : > { %v5496_v58 = vpop.xlane.xlu1 %5495 }
 0xe85   : > { %v5516_v42 = vadd.f32 %v5496_v58, %v5468_v59  ;;  %v5455_v58 = vld [vmem:[#allocation5 + $0x70] sm:$0xff] }
 0xe86   : > { %v5471_v26 = vmul.f32 %v11314_v4, %v5455_v58 }
 0xe87   : > { %5533 = vst.msk [vmem:[#allocation5 + $0x58] sm:$0xff] %vm5521_vm13, %v5516_v42 }
 0xe88   : > { %v5492_v62 = vpop.xlane.xlu1 %5491 }
 0xe89   : > { %v5514_v56 = vadd.f32 %v5492_v62, %v5466_v27  ;;  %v5456_v27 = vld [vmem:[#allocation5 + $0x78] sm:$0xff]  ;;  %v5453_v62 = vld [vmem:[#allocation5 + $0x60] sm:$0xff] }
 0xe8a   : > { %v5472_v15 = vmul.f32 %v11400_v21, %v5456_v27 }
 0xe8b   : > { %5531 = vst.msk [vmem:[#allocation5 + $0x48] sm:$0xff] %vm5521_vm13, %v5514_v56 }
 0xe96   : > { %v7470_v13 = vpop.f32.mrf.mxu1 }
 0xe97   : > { %5799 = vrot.lane.b32.xlu1 %v7470_v13, %s8277_s22 }
 0xe98   : > { %v5716_v55 = vpop.f32.mrf.mxu1 }
 0xe9a   : > { %v7471_v1 = vpop.f32.mrf.mxu1 }
 0xe9b   : > { %5801 = vrot.lane.b32.xlu0 %v7471_v1, %s8277_s22  ;;  %5795 = vrot.lane.b32.xlu1 %v5716_v55, %s8277_s22  ;;  %v5469_v1 = vmul.f32 %v11321_v52, %v5453_v62  ;;  %v5540_v52 = vld [vmem:[#allocation3 + $0x10] sm:$0xff] }
 0xe9c   : > { %v5719_v11 = vpop.f32.mrf.mxu1 }
 0xe9e   : > { %v7474_v57 = vpop.f32.mrf.mxu1 }
 0xe9f   : > { %5797 = vrot.lane.b32.xlu0 %v5719_v11, %s8277_s22  ;;  %5807 = vrot.lane.b32.xlu1 %v7474_v57, %s8277_s22  ;;  %v5454_v11 = vld [vmem:[#allocation5 + $0x68] sm:$0xff] }
 0xea0   : > { %v5732_v2 = vpop.f32.mrf.mxu1 }
 0xea2   : > { %v7475_v43 = vpop.f32.mrf.mxu1 }
 0xea3   : > { %5809 = vrot.lane.b32.xlu0 %v7475_v43, %s8277_s22  ;;  %5803 = vrot.lane.b32.xlu1 %v5732_v2, %s8277_s22  ;;  %v5470_v2 = vmul.f32 %v11403_v33, %v5454_v11  ;;  %v5636_v33 = vmul.f32 %v11428_v40, %v5540_v52  ;;  %v5553_v52 = vld [vmem:[#allocation3 + $0x78] sm:$0xff] }
 0xea4   : > { %v5735_v7 = vpop.f32.mrf.mxu1  ;;  %v5478_v25 = vpop.xlane.xlu0 %5477 }
 0xea5   : > { %v5507_v34 = vadd.f32 %v5478_v25, %v5459_v23 }
 0xea6   : > { %v7478_v9 = vpop.f32.mrf.mxu1 }
 0xea7   : > { %5524 = vst.msk [vmem:[#allocation5 + $0x10] sm:$0xff] %vm5521_vm13, %v5507_v34  ;;  %5805 = vrot.lane.b32.xlu0 %v5735_v7, %s8277_s22  ;;  %5815 = vrot.lane.b32.xlu1 %v7478_v9, %s8277_s22  ;;  %v5541_v34 = vld [vmem:[#allocation3 + $0x18] sm:$0xff] }
 0xea8   : > { %v5748_v22 = vpop.f32.mrf.mxu1  ;;  %v5476_v0 = vpop.xlane.xlu0 %5475 }
 0xea9   : > { %v5506_v29 = vadd.f32 %v5476_v0, %v5458_v45  ;;  %v5634_v45 = vmul.f32 %v11469_v39, %v5538_v5 }
 0xeaa   : > { %v7479_v35 = vpop.f32.mrf.mxu1 }
 0xeab   : > { %5523 = vst.msk [vmem:[#allocation5 + $0x8] sm:$0xff] %vm5521_vm13, %v5506_v29  ;;  %5817 = vrot.lane.b32.xlu0 %v7479_v35, %s8277_s22  ;;  %5811 = vrot.lane.b32.xlu1 %v5748_v22, %s8277_s22  ;;  %v5637_v22 = vmul.f32 %v11430_v32, %v5541_v34  ;;  %v5539_v35 = vld [vmem:[#allocation3 + $0x8] sm:$0xff]  ;;  %v5542_v32 = vld [vmem:[#allocation3 + $0x20] sm:$0xff] }
 0xeac   : > { %v5486_v38 = vpop.xlane.xlu0 %5485  ;;  %v5751_v16 = vpop.f32.mrf.mxu1  ;;  %v5635_v40 = vmul.f32 %v11426_v28, %v5539_v35  ;;  %v5638_v54 = vmul.f32 %v11433_v51, %v5542_v32  ;;  %v5548_v28 = vld [vmem:[#allocation3 + $0x50] sm:$0xff] }
 0xead   : > { %v5511_v41 = vadd.f32 %v5486_v38, %v5463_v36  ;;  %v5544_v38 = vld [vmem:[#allocation3 + $0x30] sm:$0xff] }
 0xeaf   : > { %5528 = vst.msk [vmem:[#allocation5 + $0x30] sm:$0xff] %vm5521_vm13, %v5511_v41  ;;  %5813 = vrot.lane.b32.xlu0 %v5751_v16, %s8277_s22  ;;  %v5640_v41 = vmul.f32 %v11437_v46, %v5544_v38  ;;  %v5641_v46 = vmul.f32 %v11440_v6, %v5545_v49  ;;  %v5549_v6 = vld [vmem:[#allocation3 + $0x58] sm:$0xff] }
 0xeb0   : > { %v5482_v47 = vpop.xlane.xlu0 %5481  ;;  %v5645_v62 = vmul.f32 %v11472_v12, %v5549_v6 }
 0xeb1   : > { %v5509_v50 = vadd.f32 %v5482_v47, %v5461_v44 }
 0xeb3   : > { %5526 = vst.msk [vmem:[#allocation5 + $0x20] sm:$0xff] %vm5521_vm13, %v5509_v50 }
 0xeb4   : > { %v5494_v14 = vpop.xlane.xlu0 %5493 }
 0xeb5   : > { %v5515_v3 = vadd.f32 %v5494_v14, %v5467_v18  ;;  %v5543_v14 = vld [vmem:[#allocation3 + $0x28] sm:$0xff] }
 0xeb6   : > { %v5639_v51 = vmul.f32 %v11444_v24, %v5543_v14 }
 0xeb7   : > { %5532 = vst.msk [vmem:[#allocation5 + $0x50] sm:$0xff] %vm5521_vm13, %v5515_v3 }
 0xeb8   : > { %v5490_v59 = vpop.xlane.xlu0 %5489 }
 0xeb9   : > { %v5513_v42 = vadd.f32 %v5490_v59, %v5465_v61  ;;  %v5644_v61 = vmul.f32 %v11447_v19, %v5548_v28 }
 0xebb   : > { %5530 = vst.msk [vmem:[#allocation5 + $0x40] sm:$0xff] %vm5521_vm13, %v5513_v42 }
 0xebc   : > { %v5502_v48 = vpop.xlane.xlu0 %5501 }
 0xebd   : > { %v5519_v56 = vadd.f32 %v5502_v48, %v5471_v26  ;;  %v5546_v48 = vld [vmem:[#allocation3 + $0x40] sm:$0xff] }
 0xebe   : > { %v5504_v13 = vpop.xlane.xlu1 %5503  ;;  %v5642_v27 = vmul.f32 %v11451_v53, %v5546_v48  ;;  %v5550_v53 = vld [vmem:[#allocation3 + $0x60] sm:$0xff] }
 0xebf   : > { %5536 = vst.msk [vmem:[#allocation5 + $0x70] sm:$0xff] %vm5521_vm13, %v5519_v56  ;;  %v5520_v55 = vadd.f32 %v5504_v13, %v5472_v15  ;;  %v5646_v12 = vmul.f32 %v11456_v20, %v5550_v53 }
 0xec0   : > { %v5498_v10 = vpop.xlane.xlu0 %5497 }
 0xec1   : > { %5537 = vst.msk [vmem:[#allocation5 + $0x78] sm:$0xff] %vm5521_vm13, %v5520_v55  ;;  %v5517_v57 = vadd.f32 %v5498_v10, %v5469_v1  ;;  %v5547_v55 = vld [vmem:[#allocation3 + $0x48] sm:$0xff] }
 0xec2   : > { %v5500_v4 = vpop.xlane.xlu1 %5499  ;;  %v5643_v24 = vmul.f32 %v11474_v31, %v5547_v55 }
 0xec3   : > { %5534 = vst.msk [vmem:[#allocation5 + $0x60] sm:$0xff] %vm5521_vm13, %v5517_v57  ;;  %v5518_v43 = vadd.f32 %v5500_v4, %v5470_v2  ;;  %v5552_v2 = vld [vmem:[#allocation3 + $0x70] sm:$0xff]  ;;  %v5551_v4 = vld [vmem:[#allocation3 + $0x68] sm:$0xff] }
 0xec5   : > { %5535 = vst.msk [vmem:[#allocation5 + $0x68] sm:$0xff] %vm5521_vm13, %v5518_v43  ;;  %v5648_v43 = vmul.f32 %v11454_v8, %v5552_v2 }
 0xef7   : > { %v7482_v21 = vpop.f32.mrf.mxu1 }
 0xef9   : > { %v5764_v30 = vpop.f32.mrf.mxu1 }
 0xefa   : > { %5819 = vrot.lane.b32.xlu1 %v5764_v30, %s8277_s22 }
 0xefb   : > { %v7483_v23 = vpop.f32.mrf.mxu1 }
 0xefd   : > { %v5767_v7 = vpop.f32.mrf.mxu1 }
 0xefe   : > { %5823 = vrot.lane.b32.xlu1 %v7482_v21, %s8277_s22  ;;  %5821 = vrot.lane.b32.xlu0 %v5767_v7, %s8277_s22  ;;  %v5647_v21 = vmul.f32 %v11483_v17, %v5551_v4 }
 0xf02   : > { %5825 = vrot.lane.b32.xlu0 %v7483_v23, %s8277_s22 }
 0xf09   : > { %v5800_v25 = vpop.permute.xlu1 %5799 }
 0xf0a   : > { %v5845_v9 = vadd.f32 %v5800_v25, %v5636_v33  ;;  %v5649_v33 = vmul.f32 %v11477_v37, %v5553_v52 }
 0xf0c   : > { %5862 = vst.msk [vmem:[#allocation3 + $0x10] sm:$0xff] %vm5859_vm15, %v5845_v9 }
 0xf0d   : > { %v5796_v0 = vpop.permute.xlu1 %5795  ;;  %v5802_v29 = vpop.permute.xlu0 %5801 }
 0xf0e   : > { %v5843_v63 = vadd.f32 %v5796_v0, %v5634_v45  ;;  %v5846_v36 = vadd.f32 %v5802_v29, %v5637_v22 }
 0xf10   : > { %5860 = vst.msk [vmem:[#allocation3] sm:$0xff] %vm5859_vm15, %v5843_v63  ;;  %5863 = vst.msk [vmem:[#allocation3 + $0x18] sm:$0xff] %vm5859_vm15, %v5846_v36 }
 0xf11   : > { %v5808_v16 = vpop.permute.xlu1 %5807  ;;  %v5798_v39 = vpop.permute.xlu0 %5797 }
 0xf12   : > { %v5849_v44 = vadd.f32 %v5808_v16, %v5640_v41  ;;  %v5844_v47 = vadd.f32 %v5798_v39, %v5635_v40 }
 0xf14   : > { %5866 = vst.msk [vmem:[#allocation3 + $0x30] sm:$0xff] %vm5859_vm15, %v5849_v44  ;;  %5861 = vst.msk [vmem:[#allocation3 + $0x8] sm:$0xff] %vm5859_vm15, %v5844_v47 }
 0xf15   : > { %v5804_v50 = vpop.permute.xlu1 %5803  ;;  %v5810_v18 = vpop.permute.xlu0 %5809 }
 0xf16   : > { %v5847_v60 = vadd.f32 %v5804_v50, %v5638_v54  ;;  %v5850_v3 = vadd.f32 %v5810_v18, %v5641_v46 }
 0xf18   : > { %5864 = vst.msk [vmem:[#allocation3 + $0x20] sm:$0xff] %vm5859_vm15, %v5847_v60  ;;  %5867 = vst.msk [vmem:[#allocation3 + $0x38] sm:$0xff] %vm5859_vm15, %v5850_v3 }
 0xf19   : > { %v5816_v59 = vpop.permute.xlu1 %5815  ;;  %v5806_v58 = vpop.permute.xlu0 %5805 }
 0xf1a   : > { %v5853_v42 = vadd.f32 %v5816_v59, %v5644_v61  ;;  %v5848_v26 = vadd.f32 %v5806_v58, %v5639_v51 }
 0xf1c   : > { %5870 = vst.msk [vmem:[#allocation3 + $0x50] sm:$0xff] %vm5859_vm15, %v5853_v42  ;;  %5865 = vst.msk [vmem:[#allocation3 + $0x28] sm:$0xff] %vm5859_vm15, %v5848_v26 }
 0xf1d   : > { %v5812_v19 = vpop.permute.xlu1 %5811  ;;  %v5818_v56 = vpop.permute.xlu0 %5817 }
 0xf1e   : > { %v5851_v15 = vadd.f32 %v5812_v19, %v5642_v27  ;;  %v5854_v13 = vadd.f32 %v5818_v56, %v5645_v62 }
 0xf20   : > { %5868 = vst.msk [vmem:[#allocation3 + $0x40] sm:$0xff] %vm5859_vm15, %v5851_v15  ;;  %5871 = vst.msk [vmem:[#allocation3 + $0x58] sm:$0xff] %vm5859_vm15, %v5854_v13 }
 0xf21   : > { %v5814_v1 = vpop.permute.xlu0 %5813 }
 0xf22   : > { %v5852_v10 = vadd.f32 %v5814_v1, %v5643_v24 }
 0xf24   : > { %5869 = vst.msk [vmem:[#allocation3 + $0x48] sm:$0xff] %vm5859_vm15, %v5852_v10 }
 0xf6c   : > { %v5820_v11 = vpop.permute.xlu1 %5819 }
 0xf6d   : > { %v5855_v57 = vadd.f32 %v5820_v11, %v5646_v12 }
 0xf6f   : > { %5872 = vst.msk [vmem:[#allocation3 + $0x60] sm:$0xff] %vm5859_vm15, %v5855_v57 }
 0xf70   : > { %v5824_v31 = vpop.permute.xlu1 %5823  ;;  %v5822_v30 = vpop.permute.xlu0 %5821 }
 0xf71   : > { %v5857_v23 = vadd.f32 %v5824_v31, %v5648_v43  ;;  %v5856_v7 = vadd.f32 %v5822_v30, %v5647_v21 }
 0xf73   : > { %5874 = vst.msk [vmem:[#allocation3 + $0x70] sm:$0xff] %vm5859_vm15, %v5857_v23  ;;  %5873 = vst.msk [vmem:[#allocation3 + $0x68] sm:$0xff] %vm5859_vm15, %v5856_v7  ;;  %5895 = sbr.rel (%p6917_p10) target bundleno = 4235 (0x108b), region = 40 }
 0xf74   : > { %v5826_v20 = vpop.permute.xlu0 %5825 }
 0xf75   : > { %v5858_v25 = vadd.f32 %v5826_v20, %v5649_v33 }
 0xf77   : > { %5875 = vst.msk [vmem:[#allocation3 + $0x78] sm:$0xff] %vm5859_vm15, %v5858_v25 }
 0xf78   : > { %v5914_v8 = vld [vmem:[#allocation5 + $0x10] sm:$0xff]  ;;  %v5912_v17 = vld [vmem:[#allocation5] sm:$0xff]  ;;  %v5915_v34 = vld [vmem:[#allocation5 + $0x18] sm:$0xff]  ;;  %v8278_v9 = vmov 0   ;;  %v8279_v58 = vmov 1   ;;  %v8280_v42 = vmov 2  }
 0xf79   : > { %8164 = vset.pattern.permute.xlu1 %v8278_v9  ;;  %8163 = vset.pattern.permute.xlu0 %v8278_v9  ;;  %8171 = vrcp.f32 %v5914_v8  ;;  %v5913_v5 = vld [vmem:[#allocation5 + $0x8] sm:$0xff]  ;;  %v5916_v45 = vld [vmem:[#allocation5 + $0x20] sm:$0xff]  ;;  %v5919_v22 = vld [vmem:[#allocation5 + $0x38] sm:$0xff]  ;;  %v8281_v26 = vmov 3  }
 0xf7a   : > { %8173 = vrcp.f32 %v5912_v17  ;;  %v5917_v37 = vld [vmem:[#allocation5 + $0x28] sm:$0xff]  ;;  %v5918_v0 = vld [vmem:[#allocation5 + $0x30] sm:$0xff]  ;;  %v5920_v35 = vld [vmem:[#allocation5 + $0x40] sm:$0xff] }
 0xf7b   : > { %8175 = vrcp.f32 %v5915_v34  ;;  %v5921_v29 = vld [vmem:[#allocation5 + $0x48] sm:$0xff]  ;;  %v5923_v41 = vld [vmem:[#allocation5 + $0x58] sm:$0xff]  ;;  %v5922_v16 = vld [vmem:[#allocation5 + $0x50] sm:$0xff] }
 0xf7c   : > { %8177 = vrcp.f32 %v5913_v5  ;;  %v5925_v49 = vld [vmem:[#allocation5 + $0x68] sm:$0xff]  ;;  %v5924_v47 = vld [vmem:[#allocation5 + $0x60] sm:$0xff]  ;;  %v5927_v54 = vld [vmem:[#allocation5 + $0x78] sm:$0xff] }
 0xf7d   : > { %8179 = vrcp.f32 %v5917_v37  ;;  %v5926_v50 = vld [vmem:[#allocation5 + $0x70] sm:$0xff]  ;;  %v11631_v6 = vld [vmem:[#allocation3] sm:$0xff]  ;;  %v11643_v55 = vld [vmem:[#allocation3 + $0x18] sm:$0xff] }
 0xf7e   : > { %8181 = vrcp.f32 %v5916_v45  ;;  %v11629_v48 = vld [vmem:[#allocation3 + $0x10] sm:$0xff]  ;;  %v11640_v15 = vld [vmem:[%s8350_s29] sm:$0xff]  ;;  %v11646_v1 = vld [vmem:[#allocation3 + $0x8] sm:$0xff] }
 0xf7f   : > { %8183 = vrcp.f32 %v5919_v22  ;;  %v11635_v62 = vld [vmem:[%s8350_s29 + $0x10] sm:$0xff]  ;;  %v11651_v12 = vld [vmem:[%s8350_s29 + $0x18] sm:$0xff]  ;;  %v11657_v2 = vld [vmem:[%s8350_s29 + $0x8] sm:$0xff] }
 0xf80   : > { %8185 = vrcp.f32 %v5918_v0  ;;  %v11662_v43 = vld [vmem:[#allocation3 + $0x28] sm:$0xff]  ;;  %v11665_v31 = vld [vmem:[#allocation3 + $0x20] sm:$0xff]  ;;  %v11681_v8 = vld [vmem:[#allocation3 + $0x38] sm:$0xff] }
 0xf81   : > { %8187 = vrcp.f32 %v5921_v29  ;;  %v11670_v7 = vld [vmem:[%s8350_s29 + $0x28] sm:$0xff]  ;;  %v11676_v20 = vld [vmem:[%s8350_s29 + $0x20] sm:$0xff]  ;;  %v11684_v34 = vld [vmem:[#allocation3 + $0x30] sm:$0xff] }
 0xf82   : > { %8189 = vrcp.f32 %v5920_v35  ;;  %v11688_v37 = vld [vmem:[%s8350_s29 + $0x38] sm:$0xff]  ;;  %v11694_v0 = vld [vmem:[%s8350_s29 + $0x30] sm:$0xff]  ;;  %v11699_v35 = vld [vmem:[#allocation3 + $0x48] sm:$0xff] }
 0xf83   : > { %8191 = vrcp.f32 %v5923_v41 }
 0xf84   : > { %8193 = vrcp.f32 %v5922_v16 }
 0xf85   : > { %8195 = vrcp.f32 %v5925_v49  ;;  %v11712_v49 = vld [vmem:[%s8350_s29 + $0x40] sm:$0xff] }
 0xf86   : > { %v11549_v63 = vpop.eup %8171  ;;  %8197 = vrcp.f32 %v5924_v47  ;;  %v11717_v47 = vld [vmem:[#allocation3 + $0x58] sm:$0xff] }
 0xf87   : > { %v11551_v36 = vpop.eup %8173  ;;  %5972 = vperm.xlu1 %8164, %v11549_v63   ;;  %8199 = vrcp.f32 %v5927_v54  ;;  %v11720_v54 = vld [vmem:[#allocation3 + $0x50] sm:$0xff] }
 0xf88   : > { %v11554_v38 = vpop.eup %8175  ;;  %5962 = vperm.xlu0 %8163, %v11551_v36   ;;  %8201 = vrcp.f32 %v5926_v50 }
 0xf89   : > { %v11557_v40 = vpop.eup %8177 }
 0xf8a   : > { %v11560_v39 = vpop.eup %8179 }
 0xf8b   : > { %5977 = vperm.xlu1 %8164, %v11554_v38   ;;  %v11563_v44 = vpop.eup %8181 }
 0xf8c   : > { %5967 = vperm.xlu0 %8163, %v11557_v40   ;;  %v11566_v32 = vpop.eup %8183 }
 0xf8d   : > { %v11569_v46 = vpop.eup %8185 }
 0xf8e   : > { %v11572_v18 = vpop.eup %8187 }
 0xf8f   : > { %5987 = vperm.xlu1 %8164, %v11560_v39   ;;  %v11575_v14 = vpop.eup %8189 }
 0xf90   : > { %5982 = vperm.xlu0 %8163, %v11563_v44   ;;  %v8192_v60 = vpop.eup %8191 }
 0xf91   : > { %v11579_v3 = vpop.eup %8193 }
 0xf92   : > { %v8196_v28 = vpop.eup %8195 }
 0xf93   : > { %5997 = vperm.xlu1 %8164, %v11566_v32   ;;  %v11582_v61 = vpop.eup %8197 }
 0xf94   : > { %5992 = vperm.xlu0 %8163, %v11569_v46   ;;  %v11584_v51 = vpop.eup %8199 }
 0xf95   : > { %v11587_v59 = vpop.eup %8201 }
 0xf97   : > { %6007 = vperm.xlu1 %8164, %v11572_v18  }
 0xf98   : > { %6002 = vperm.xlu0 %8163, %v11575_v14  }
 0xf9b   : > { %6017 = vperm.xlu1 %8164, %v8192_v60  }
 0xf9c   : > { %6012 = vperm.xlu0 %8163, %v11579_v3  }
 0xf9f   : > { %6027 = vperm.xlu1 %8164, %v8196_v28  }
 0xfa0   : > { %6022 = vperm.xlu0 %8163, %v11582_v61  }
 0xfa3   : > { %6037 = vperm.xlu1 %8164, %v11584_v51  }
 0xfa4   : > { %6032 = vperm.xlu0 %8163, %v11587_v59  }
 0xfa7   : > { %8166 = vset.pattern.permute.xlu1 %v8279_v58 }
 0xfa8   : > { %8165 = vset.pattern.permute.xlu0 %v8279_v58  ;;  %6143 = vperm.xlu1 %8166, %v11557_v40  }
 0xfa9   : > { %6138 = vperm.xlu0 %8165, %v11551_v36  }
 0xfac   : > { %6148 = vperm.xlu1 %8166, %v11549_v63  }
 0xfad   : > { %6153 = vperm.xlu0 %8165, %v11554_v38  }
 0xfb0   : > { %6158 = vperm.xlu1 %8166, %v11563_v44  }
 0xfb1   : > { %6163 = vperm.xlu0 %8165, %v11560_v39  }
 0xfb4   : > { %6168 = vperm.xlu1 %8166, %v11569_v46  }
 0xfb5   : > { %6173 = vperm.xlu0 %8165, %v11566_v32  }
 0xfb8   : > { %6178 = vperm.xlu1 %8166, %v11575_v14  }
 0xfb9   : > { %6183 = vperm.xlu0 %8165, %v11572_v18  }
 0xfbc   : > { %6188 = vperm.xlu1 %8166, %v11579_v3  }
 0xfbd   : > { %6193 = vperm.xlu0 %8165, %v8192_v60  }
 0xfc0   : > { %6198 = vperm.xlu1 %8166, %v11582_v61  }
 0xfc1   : > { %6203 = vperm.xlu0 %8165, %v8196_v28  }
 0xfc4   : > { %6208 = vperm.xlu1 %8166, %v11587_v59  }
 0xfc5   : > { %6213 = vperm.xlu0 %8165, %v11584_v51  }
 0xfc8   : > { %8167 = vset.pattern.permute.xlu1 %v8280_v42 }
 0xfc9   : > { %8168 = vset.pattern.permute.xlu0 %v8280_v42  ;;  %6314 = vperm.xlu1 %8167, %v11551_v36  }
 0xfca   : > { %6319 = vperm.xlu0 %8168, %v11557_v40  }
 0xfcd   : > { %6324 = vperm.xlu1 %8167, %v11549_v63  }
 0xfce   : > { %6334 = vperm.xlu0 %8168, %v11563_v44  }
 0xfd1   : > { %6329 = vperm.xlu1 %8167, %v11554_v38  }
 0xfd2   : > { %6344 = vperm.xlu0 %8168, %v11569_v46  }
 0xfd5   : > { %6339 = vperm.xlu1 %8167, %v11560_v39  }
 0xfd6   : > { %6354 = vperm.xlu0 %8168, %v11575_v14  }
 0xfd9   : > { %6349 = vperm.xlu1 %8167, %v11566_v32  }
 0xfda   : > { %6364 = vperm.xlu0 %8168, %v11579_v3  }
 0xfdd   : > { %6359 = vperm.xlu1 %8167, %v11572_v18  }
 0xfde   : > { %6374 = vperm.xlu0 %8168, %v11582_v61  }
 0xfe1   : > { %6369 = vperm.xlu1 %8167, %v8192_v60  }
 0xfe2   : > { %6384 = vperm.xlu0 %8168, %v11587_v59  }
 0xfe5   : > { %6379 = vperm.xlu1 %8167, %v8196_v28  }
 0xfe6   : > { %8169 = vset.pattern.permute.xlu0 %v8281_v26 }
 0xfe7   : > { %6490 = vperm.xlu0 %8169, %v11551_v36   ;;  %v11702_v36 = vld [vmem:[#allocation3 + $0x40] sm:$0xff] }
 0xfe9   : > { %6389 = vperm.xlu1 %8167, %v11584_v51  }
 0xfeb   : > { %6505 = vperm.xlu0 %8169, %v11554_v38  }
 0xfed   : > { %8170 = vset.pattern.permute.xlu1 %v8281_v26  ;;  %v11742_v26 = vld [vmem:[%s8350_s29 + $0x68] sm:$0xff] }
 0xfee   : > { %6495 = vperm.xlu1 %8170, %v11557_v40   ;;  %v11706_v40 = vld [vmem:[%s8350_s29 + $0x48] sm:$0xff] }
 0xfef   : > { %6515 = vperm.xlu0 %8169, %v11560_v39  }
 0xff2   : > { %6500 = vperm.xlu1 %8170, %v11549_v63  }
 0xff3   : > { %6525 = vperm.xlu0 %8169, %v11566_v32  }
 0xff6   : > { %6510 = vperm.xlu1 %8170, %v11563_v44  }
 0xff7   : > { %6535 = vperm.xlu0 %8169, %v11572_v18   ;;  %v11724_v18 = vld [vmem:[%s8350_s29 + $0x58] sm:$0xff] }
 0xffa   : > { %6520 = vperm.xlu1 %8170, %v11569_v46  }
 0xffb   : > { %6545 = vperm.xlu0 %8169, %v8192_v60  }
 0xffe   : > { %6530 = vperm.xlu1 %8170, %v11575_v14  }
 0xfff   : > { %6555 = vperm.xlu0 %8169, %v8196_v28  }
0x1002   : > { %6540 = vperm.xlu1 %8170, %v11579_v3   ;;  %v5973_v27 = vpop.permute.xlu1 %5972  ;;  %v11730_v3 = vld [vmem:[%s8350_s29 + $0x50] sm:$0xff] }
0x1003   : > { %v6042_v19 = vmul.f32 %v5973_v27, %v11629_v48  ;;  %6565 = vperm.xlu0 %8169, %v11584_v51   ;;  %v5963_v56 = vpop.permute.xlu0 %5962 }
0x1004   : > { %v6040_v13 = vmul.f32 %v5963_v56, %v11631_v6  ;;  %v11748_v56 = vld [vmem:[%s8350_s29 + $0x60] sm:$0xff] }
0x1005   : > { %v6058_v24 = vadd.f32 %v6042_v19, %v11635_v62 }
0x1006   : > { %v6056_v10 = vadd.f32 %v6040_v13, %v11640_v15  ;;  %6550 = vperm.xlu1 %8170, %v11582_v61   ;;  %v5978_v53 = vpop.permute.xlu1 %5977  ;;  %v11735_v61 = vld [vmem:[#allocation3 + $0x68] sm:$0xff] }
0x1007   : > { %6074 = vst.msk [vmem:[%s8355_s5 + $0x10] sm:$0xff] %vm1676_vm8, %v6058_v24  ;;  %v6043_v11 = vmul.f32 %v5978_v53, %v11643_v55  ;;  %v5968_v57 = vpop.permute.xlu0 %5967  ;;  %v11753_v24 = vld [vmem:[#allocation3 + $0x78] sm:$0xff]  ;;  %v11756_v53 = vld [vmem:[#allocation3 + $0x70] sm:$0xff] }
0x1008   : > { %6072 = vst.msk [vmem:[%s8355_s5] sm:$0xff] %vm1676_vm8, %v6056_v10  ;;  %v6041_v4 = vmul.f32 %v5968_v57, %v11646_v1 }
0x1009   : > { %v6059_v21 = vadd.f32 %v6043_v11, %v11651_v12 }
0x100a   : > { %v6057_v30 = vadd.f32 %v6041_v4, %v11657_v2  ;;  %6560 = vperm.xlu1 %8170, %v11587_v59   ;;  %v5988_v23 = vpop.permute.xlu1 %5987  ;;  %v11738_v59 = vld [vmem:[#allocation3 + $0x60] sm:$0xff]  ;;  %v11760_v4 = vld [vmem:[%s8350_s29 + $0x78] sm:$0xff] }
0x100b   : > { %6075 = vst.msk [vmem:[%s8355_s5 + $0x18] sm:$0xff] %vm1676_vm8, %v6059_v21  ;;  %v6045_v52 = vmul.f32 %v5988_v23, %v11662_v43  ;;  %v5983_v33 = vpop.permute.xlu0 %5982  ;;  %v11766_v23 = vld [vmem:[%s8350_s29 + $0x70] sm:$0xff] }
0x100c   : > { %6073 = vst.msk [vmem:[%s8355_s5 + $0x8] sm:$0xff] %vm1676_vm8, %v6057_v30  ;;  %v6044_v25 = vmul.f32 %v5983_v33, %v11665_v31 }
0x100d   : > { %v6061_v17 = vadd.f32 %v6045_v52, %v11670_v7 }
0x100e   : > { %v6060_v9 = vadd.f32 %v6044_v25, %v11676_v20  ;;  %v5998_v5 = vpop.permute.xlu1 %5997 }
0x100f   : > { %6077 = vst.msk [vmem:[%s8355_s5 + $0x28] sm:$0xff] %vm1676_vm8, %v6061_v17  ;;  %v6047_v45 = vmul.f32 %v5998_v5, %v11681_v8  ;;  %v5993_v22 = vpop.permute.xlu0 %5992 }
0x1010   : > { %6076 = vst.msk [vmem:[%s8355_s5 + $0x20] sm:$0xff] %vm1676_vm8, %v6060_v9  ;;  %v6046_v29 = vmul.f32 %v5993_v22, %v11684_v34 }
0x1011   : > { %v6063_v63 = vadd.f32 %v6047_v45, %v11688_v37 }
0x1012   : > { %v6062_v38 = vadd.f32 %v6046_v29, %v11694_v0  ;;  %v6008_v41 = vpop.permute.xlu1 %6007 }
0x1013   : > { %6079 = vst.msk [vmem:[%s8355_s5 + $0x38] sm:$0xff] %vm1676_vm8, %v6063_v63  ;;  %v6049_v16 = vmul.f32 %v6008_v41, %v11699_v35  ;;  %v6003_v39 = vpop.permute.xlu0 %6002 }
0x1014   : > { %6078 = vst.msk [vmem:[%s8355_s5 + $0x30] sm:$0xff] %vm1676_vm8, %v6062_v38  ;;  %v6048_v44 = vmul.f32 %v6003_v39, %v11702_v36 }
0x1015   : > { %v6065_v32 = vadd.f32 %v6049_v16, %v11706_v40 }
0x1016   : > { %v6064_v46 = vadd.f32 %v6048_v44, %v11712_v49  ;;  %v6018_v50 = vpop.permute.xlu1 %6017 }
0x1017   : > { %6081 = vst.msk [vmem:[%s8355_s5 + $0x48] sm:$0xff] %vm1676_vm8, %v6065_v32  ;;  %v6051_v14 = vmul.f32 %v6018_v50, %v11717_v47  ;;  %v6013_v60 = vpop.permute.xlu0 %6012 }
0x1018   : > { %6080 = vst.msk [vmem:[%s8355_s5 + $0x40] sm:$0xff] %vm1676_vm8, %v6064_v46  ;;  %v6050_v28 = vmul.f32 %v6013_v60, %v11720_v54 }
0x1019   : > { %v6067_v51 = vadd.f32 %v6051_v14, %v11724_v18 }
0x101a   : > { %v6066_v58 = vadd.f32 %v6050_v28, %v11730_v3  ;;  %v6028_v42 = vpop.permute.xlu1 %6027 }
0x101b   : > { %6083 = vst.msk [vmem:[%s8355_s5 + $0x58] sm:$0xff] %vm1676_vm8, %v6067_v51  ;;  %v6053_v27 = vmul.f32 %v6028_v42, %v11735_v61  ;;  %v6023_v19 = vpop.permute.xlu0 %6022 }
0x101c   : > { %6082 = vst.msk [vmem:[%s8355_s5 + $0x50] sm:$0xff] %vm1676_vm8, %v6066_v58  ;;  %v6052_v13 = vmul.f32 %v6023_v19, %v11738_v59 }
0x101d   : > { %v6069_v10 = vadd.f32 %v6053_v27, %v11742_v26 }
0x101e   : > { %v6068_v11 = vadd.f32 %v6052_v13, %v11748_v56  ;;  %v6038_v57 = vpop.permute.xlu1 %6037 }
0x101f   : > { %6085 = vst.msk [vmem:[%s8355_s5 + $0x68] sm:$0xff] %vm1676_vm8, %v6069_v10  ;;  %v6055_v21 = vmul.f32 %v6038_v57, %v11753_v24  ;;  %v6033_v30 = vpop.permute.xlu0 %6032 }
0x1020   : > { %6084 = vst.msk [vmem:[%s8355_s5 + $0x60] sm:$0xff] %vm1676_vm8, %v6068_v11  ;;  %v6054_v52 = vmul.f32 %v6033_v30, %v11756_v53 }
0x1021   : > { %v6071_v33 = vadd.f32 %v6055_v21, %v11760_v4 }
0x1022   : > { %v6070_v25 = vadd.f32 %v6054_v52, %v11766_v23 }
0x1023   : > { %6087 = vst.msk [vmem:[%s8355_s5 + $0x78] sm:$0xff] %vm1676_vm8, %v6071_v33  ;;  %v6144_v17 = vpop.permute.xlu1 %6143 }
0x1024   : > { %6086 = vst.msk [vmem:[%s8355_s5 + $0x70] sm:$0xff] %vm1676_vm8, %v6070_v25  ;;  %v6217_v9 = vmul.f32 %v6144_v17, %v11646_v1  ;;  %v6139_v5 = vpop.permute.xlu0 %6138 }
0x1025   : > { %v6216_v45 = vmul.f32 %v6139_v5, %v11631_v6 }
0x1026   : > { %v6233_v22 = vadd.f32 %v6217_v9, %v11657_v2 }
0x1027   : > { %v6232_v29 = vadd.f32 %v6216_v45, %v11640_v15  ;;  %v6149_v63 = vpop.permute.xlu1 %6148 }
0x1028   : > { %6249 = vst.msk [vmem:[%s8355_s5 + $0x8] sm:$0xff] %vm3691_vm12, %v6233_v22  ;;  %v6218_v38 = vmul.f32 %v6149_v63, %v11629_v48  ;;  %v6154_v41 = vpop.permute.xlu0 %6153 }
0x1029   : > { %6248 = vst.msk [vmem:[%s8355_s5] sm:$0xff] %vm3691_vm12, %v6232_v29  ;;  %v6219_v16 = vmul.f32 %v6154_v41, %v11643_v55 }
0x102a   : > { %v6234_v39 = vadd.f32 %v6218_v38, %v11635_v62 }
0x102b   : > { %v6235_v44 = vadd.f32 %v6219_v16, %v11651_v12  ;;  %v6159_v32 = vpop.permute.xlu1 %6158 }
0x102c   : > { %6250 = vst.msk [vmem:[%s8355_s5 + $0x10] sm:$0xff] %vm3691_vm12, %v6234_v39  ;;  %v6220_v46 = vmul.f32 %v6159_v32, %v11665_v31  ;;  %v6164_v50 = vpop.permute.xlu0 %6163 }
0x102d   : > { %6251 = vst.msk [vmem:[%s8355_s5 + $0x18] sm:$0xff] %vm3691_vm12, %v6235_v44  ;;  %v6221_v14 = vmul.f32 %v6164_v50, %v11662_v43 }
0x102e   : > { %v6236_v60 = vadd.f32 %v6220_v46, %v11676_v20 }
0x102f   : > { %v6237_v28 = vadd.f32 %v6221_v14, %v11670_v7  ;;  %v6169_v51 = vpop.permute.xlu1 %6168 }
0x1030   : > { %6252 = vst.msk [vmem:[%s8355_s5 + $0x20] sm:$0xff] %vm3691_vm12, %v6236_v60  ;;  %v6222_v58 = vmul.f32 %v6169_v51, %v11684_v34  ;;  %v6174_v42 = vpop.permute.xlu0 %6173 }
0x1031   : > { %6253 = vst.msk [vmem:[%s8355_s5 + $0x28] sm:$0xff] %vm3691_vm12, %v6237_v28  ;;  %v6223_v27 = vmul.f32 %v6174_v42, %v11681_v8 }
0x1032   : > { %v6238_v19 = vadd.f32 %v6222_v58, %v11694_v0 }
0x1033   : > { %v6239_v13 = vadd.f32 %v6223_v27, %v11688_v37  ;;  %v6179_v10 = vpop.permute.xlu1 %6178 }
0x1034   : > { %6254 = vst.msk [vmem:[%s8355_s5 + $0x30] sm:$0xff] %vm3691_vm12, %v6238_v19  ;;  %v6224_v11 = vmul.f32 %v6179_v10, %v11702_v36  ;;  %v6184_v57 = vpop.permute.xlu0 %6183 }
0x1035   : > { %6255 = vst.msk [vmem:[%s8355_s5 + $0x38] sm:$0xff] %vm3691_vm12, %v6239_v13  ;;  %v6225_v21 = vmul.f32 %v6184_v57, %v11699_v35 }
0x1036   : > { %v6240_v30 = vadd.f32 %v6224_v11, %v11712_v49 }
0x1037   : > { %v6241_v52 = vadd.f32 %v6225_v21, %v11706_v40  ;;  %v6189_v33 = vpop.permute.xlu1 %6188 }
0x1038   : > { %6256 = vst.msk [vmem:[%s8355_s5 + $0x40] sm:$0xff] %vm3691_vm12, %v6240_v30  ;;  %v6226_v25 = vmul.f32 %v6189_v33, %v11720_v54  ;;  %v6194_v17 = vpop.permute.xlu0 %6193 }
0x1039   : > { %6257 = vst.msk [vmem:[%s8355_s5 + $0x48] sm:$0xff] %vm3691_vm12, %v6241_v52  ;;  %v6227_v9 = vmul.f32 %v6194_v17, %v11717_v47 }
0x103a   : > { %v6242_v5 = vadd.f32 %v6226_v25, %v11730_v3 }
0x103b   : > { %v6243_v45 = vadd.f32 %v6227_v9, %v11724_v18  ;;  %v6199_v22 = vpop.permute.xlu1 %6198 }
0x103c   : > { %6258 = vst.msk [vmem:[%s8355_s5 + $0x50] sm:$0xff] %vm3691_vm12, %v6242_v5  ;;  %v6228_v29 = vmul.f32 %v6199_v22, %v11738_v59  ;;  %v6204_v63 = vpop.permute.xlu0 %6203 }
0x103d   : > { %6259 = vst.msk [vmem:[%s8355_s5 + $0x58] sm:$0xff] %vm3691_vm12, %v6243_v45  ;;  %v6229_v38 = vmul.f32 %v6204_v63, %v11735_v61 }
0x103e   : > { %v6244_v41 = vadd.f32 %v6228_v29, %v11748_v56 }
0x103f   : > { %v6245_v16 = vadd.f32 %v6229_v38, %v11742_v26  ;;  %v6209_v39 = vpop.permute.xlu1 %6208 }
0x1040   : > { %6260 = vst.msk [vmem:[%s8355_s5 + $0x60] sm:$0xff] %vm3691_vm12, %v6244_v41  ;;  %v6230_v44 = vmul.f32 %v6209_v39, %v11756_v53  ;;  %v6214_v32 = vpop.permute.xlu0 %6213 }
0x1041   : > { %6261 = vst.msk [vmem:[%s8355_s5 + $0x68] sm:$0xff] %vm3691_vm12, %v6245_v16  ;;  %v6231_v46 = vmul.f32 %v6214_v32, %v11753_v24 }
0x1042   : > { %v6246_v50 = vadd.f32 %v6230_v44, %v11766_v23 }
0x1043   : > { %v6247_v14 = vadd.f32 %v6231_v46, %v11760_v4 }
0x1044   : > { %6262 = vst.msk [vmem:[%s8355_s5 + $0x70] sm:$0xff] %vm3691_vm12, %v6246_v50  ;;  %v6315_v60 = vpop.permute.xlu1 %6314 }
0x1045   : > { %6263 = vst.msk [vmem:[%s8355_s5 + $0x78] sm:$0xff] %vm3691_vm12, %v6247_v14  ;;  %v6392_v28 = vmul.f32 %v6315_v60, %v11631_v6  ;;  %v6320_v51 = vpop.permute.xlu0 %6319 }
0x1046   : > { %v6393_v58 = vmul.f32 %v6320_v51, %v11646_v1 }
0x1047   : > { %v6408_v42 = vadd.f32 %v6392_v28, %v11640_v15 }
0x1048   : > { %v6409_v27 = vadd.f32 %v6393_v58, %v11657_v2  ;;  %v6325_v19 = vpop.permute.xlu1 %6324 }
0x1049   : > { %6424 = vst.msk [vmem:[%s8355_s5] sm:$0xff] %vm4775_vm14, %v6408_v42  ;;  %v6394_v13 = vmul.f32 %v6325_v19, %v11629_v48  ;;  %v6335_v10 = vpop.permute.xlu0 %6334 }
0x104a   : > { %6425 = vst.msk [vmem:[%s8355_s5 + $0x8] sm:$0xff] %vm4775_vm14, %v6409_v27  ;;  %v6396_v11 = vmul.f32 %v6335_v10, %v11665_v31 }
0x104b   : > { %v6410_v57 = vadd.f32 %v6394_v13, %v11635_v62 }
0x104c   : > { %v6412_v21 = vadd.f32 %v6396_v11, %v11676_v20  ;;  %v6330_v30 = vpop.permute.xlu1 %6329 }
0x104d   : > { %6426 = vst.msk [vmem:[%s8355_s5 + $0x10] sm:$0xff] %vm4775_vm14, %v6410_v57  ;;  %v6395_v52 = vmul.f32 %v6330_v30, %v11643_v55  ;;  %v6345_v33 = vpop.permute.xlu0 %6344 }
0x104e   : > { %6428 = vst.msk [vmem:[%s8355_s5 + $0x20] sm:$0xff] %vm4775_vm14, %v6412_v21  ;;  %v6398_v25 = vmul.f32 %v6345_v33, %v11684_v34 }
0x104f   : > { %v6411_v17 = vadd.f32 %v6395_v52, %v11651_v12 }
0x1050   : > { %v6414_v9 = vadd.f32 %v6398_v25, %v11694_v0  ;;  %v6340_v5 = vpop.permute.xlu1 %6339 }
0x1051   : > { %6427 = vst.msk [vmem:[%s8355_s5 + $0x18] sm:$0xff] %vm4775_vm14, %v6411_v17  ;;  %v6397_v45 = vmul.f32 %v6340_v5, %v11662_v43  ;;  %v6355_v22 = vpop.permute.xlu0 %6354 }
0x1052   : > { %6430 = vst.msk [vmem:[%s8355_s5 + $0x30] sm:$0xff] %vm4775_vm14, %v6414_v9  ;;  %v6400_v29 = vmul.f32 %v6355_v22, %v11702_v36 }
0x1053   : > { %v6413_v63 = vadd.f32 %v6397_v45, %v11670_v7 }
0x1054   : > { %v6416_v38 = vadd.f32 %v6400_v29, %v11712_v49  ;;  %v6350_v41 = vpop.permute.xlu1 %6349 }
0x1055   : > { %6429 = vst.msk [vmem:[%s8355_s5 + $0x28] sm:$0xff] %vm4775_vm14, %v6413_v63  ;;  %v6399_v16 = vmul.f32 %v6350_v41, %v11681_v8  ;;  %v6365_v39 = vpop.permute.xlu0 %6364 }
0x1056   : > { %6432 = vst.msk [vmem:[%s8355_s5 + $0x40] sm:$0xff] %vm4775_vm14, %v6416_v38  ;;  %v6402_v44 = vmul.f32 %v6365_v39, %v11720_v54 }
0x1057   : > { %v6415_v32 = vadd.f32 %v6399_v16, %v11688_v37 }
0x1058   : > { %v6418_v46 = vadd.f32 %v6402_v44, %v11730_v3  ;;  %v6360_v50 = vpop.permute.xlu1 %6359 }
0x1059   : > { %6431 = vst.msk [vmem:[%s8355_s5 + $0x38] sm:$0xff] %vm4775_vm14, %v6415_v32  ;;  %v6401_v14 = vmul.f32 %v6360_v50, %v11699_v35  ;;  %v6375_v60 = vpop.permute.xlu0 %6374 }
0x105a   : > { %6434 = vst.msk [vmem:[%s8355_s5 + $0x50] sm:$0xff] %vm4775_vm14, %v6418_v46  ;;  %v6404_v28 = vmul.f32 %v6375_v60, %v11738_v59 }
0x105b   : > { %v6417_v51 = vadd.f32 %v6401_v14, %v11706_v40 }
0x105c   : > { %v6420_v58 = vadd.f32 %v6404_v28, %v11748_v56  ;;  %v6370_v42 = vpop.permute.xlu1 %6369 }
0x105d   : > { %6433 = vst.msk [vmem:[%s8355_s5 + $0x48] sm:$0xff] %vm4775_vm14, %v6417_v51  ;;  %v6403_v27 = vmul.f32 %v6370_v42, %v11717_v47  ;;  %v6385_v19 = vpop.permute.xlu0 %6384 }
0x105e   : > { %6436 = vst.msk [vmem:[%s8355_s5 + $0x60] sm:$0xff] %vm4775_vm14, %v6420_v58  ;;  %v6406_v13 = vmul.f32 %v6385_v19, %v11756_v53 }
0x105f   : > { %v6419_v10 = vadd.f32 %v6403_v27, %v11724_v18 }
0x1060   : > { %v6422_v11 = vadd.f32 %v6406_v13, %v11766_v23  ;;  %v6380_v57 = vpop.permute.xlu1 %6379 }
0x1061   : > { %6435 = vst.msk [vmem:[%s8355_s5 + $0x58] sm:$0xff] %vm4775_vm14, %v6419_v10  ;;  %v6405_v21 = vmul.f32 %v6380_v57, %v11735_v61 }
0x1062   : > { %6438 = vst.msk [vmem:[%s8355_s5 + $0x70] sm:$0xff] %vm4775_vm14, %v6422_v11  ;;  %v6491_v30 = vpop.permute.xlu0 %6490 }
0x1063   : > { %v6421_v52 = vadd.f32 %v6405_v21, %v11742_v26  ;;  %v6568_v33 = vmul.f32 %v6491_v30, %v11631_v6 }
0x1064   : > { %v6390_v25 = vpop.permute.xlu1 %6389 }
0x1065   : > { %6437 = vst.msk [vmem:[%s8355_s5 + $0x68] sm:$0xff] %vm4775_vm14, %v6421_v52  ;;  %v6584_v17 = vadd.f32 %v6568_v33, %v11640_v15  ;;  %v6407_v9 = vmul.f32 %v6390_v25, %v11753_v24 }
0x1066   : > { %v6506_v5 = vpop.permute.xlu0 %6505 }
0x1067   : > { %6600 = vst.msk [vmem:[%s8355_s5] sm:$0xff] %vm5859_vm15, %v6584_v17  ;;  %v6423_v45 = vadd.f32 %v6407_v9, %v11760_v4  ;;  %v6571_v22 = vmul.f32 %v6506_v5, %v11643_v55 }
0x1069   : > { %6439 = vst.msk [vmem:[%s8355_s5 + $0x78] sm:$0xff] %vm4775_vm14, %v6423_v45  ;;  %v6587_v6 = vadd.f32 %v6571_v22, %v11651_v12  ;;  %v6496_v29 = vpop.permute.xlu1 %6495 }
0x106a   : > { %v6569_v63 = vmul.f32 %v6496_v29, %v11646_v1  ;;  %v6516_v15 = vpop.permute.xlu0 %6515 }
0x106b   : > { %6603 = vst.msk [vmem:[%s8355_s5 + $0x18] sm:$0xff] %vm5859_vm15, %v6587_v6  ;;  %v6573_v38 = vmul.f32 %v6516_v15, %v11662_v43 }
0x106c   : > { %v6585_v41 = vadd.f32 %v6569_v63, %v11657_v2 }
0x106d   : > { %v6589_v16 = vadd.f32 %v6573_v38, %v11670_v7  ;;  %v6501_v39 = vpop.permute.xlu1 %6500 }
0x106e   : > { %6601 = vst.msk [vmem:[%s8355_s5 + $0x8] sm:$0xff] %vm5859_vm15, %v6585_v41  ;;  %v6570_v55 = vmul.f32 %v6501_v39, %v11629_v48  ;;  %v6526_v12 = vpop.permute.xlu0 %6525 }
0x106f   : > { %6605 = vst.msk [vmem:[%s8355_s5 + $0x28] sm:$0xff] %vm5859_vm15, %v6589_v16  ;;  %v6575_v1 = vmul.f32 %v6526_v12, %v11681_v8 }
0x1070   : > { %v6586_v44 = vadd.f32 %v6570_v55, %v11635_v62 }
0x1071   : > { %v6591_v43 = vadd.f32 %v6575_v1, %v11688_v37  ;;  %v6511_v32 = vpop.permute.xlu1 %6510 }
0x1072   : > { %6602 = vst.msk [vmem:[%s8355_s5 + $0x10] sm:$0xff] %vm5859_vm15, %v6586_v44  ;;  %v6572_v2 = vmul.f32 %v6511_v32, %v11665_v31  ;;  %v6536_v7 = vpop.permute.xlu0 %6535 }
0x1073   : > { %6607 = vst.msk [vmem:[%s8355_s5 + $0x38] sm:$0xff] %vm5859_vm15, %v6591_v43  ;;  %v6577_v48 = vmul.f32 %v6536_v7, %v11699_v35 }
0x1074   : > { %v6588_v46 = vadd.f32 %v6572_v2, %v11676_v20 }
0x1075   : > { %v6593_v8 = vadd.f32 %v6577_v48, %v11706_v40  ;;  %v6521_v50 = vpop.permute.xlu1 %6520 }
0x1076   : > { %6604 = vst.msk [vmem:[%s8355_s5 + $0x20] sm:$0xff] %vm5859_vm15, %v6588_v46  ;;  %v6574_v62 = vmul.f32 %v6521_v50, %v11684_v34  ;;  %v6546_v37 = vpop.permute.xlu0 %6545 }
0x1077   : > { %6609 = vst.msk [vmem:[%s8355_s5 + $0x48] sm:$0xff] %vm5859_vm15, %v6593_v8  ;;  %v6579_v31 = vmul.f32 %v6546_v37, %v11717_v47 }
0x1078   : > { %v6590_v14 = vadd.f32 %v6574_v62, %v11694_v0 }
0x1079   : > { %v6595_v35 = vadd.f32 %v6579_v31, %v11724_v18  ;;  %v6531_v60 = vpop.permute.xlu1 %6530 }
0x107a   : > { %6606 = vst.msk [vmem:[%s8355_s5 + $0x30] sm:$0xff] %vm5859_vm15, %v6590_v14  ;;  %v6576_v20 = vmul.f32 %v6531_v60, %v11702_v36  ;;  %v6556_v40 = vpop.permute.xlu0 %6555 }
0x107b   : > { %6611 = vst.msk [vmem:[%s8355_s5 + $0x58] sm:$0xff] %vm5859_vm15, %v6595_v35  ;;  %v6581_v34 = vmul.f32 %v6556_v40, %v11735_v61 }
0x107c   : > { %v6592_v28 = vadd.f32 %v6576_v20, %v11712_v49 }
0x107d   : > { %v6597_v47 = vadd.f32 %v6581_v34, %v11742_v26  ;;  %v6541_v0 = vpop.permute.xlu1 %6540 }
0x107e   : > { %6608 = vst.msk [vmem:[%s8355_s5 + $0x40] sm:$0xff] %vm5859_vm15, %v6592_v28  ;;  %v6578_v18 = vmul.f32 %v6541_v0, %v11720_v54  ;;  %v6566_v51 = vpop.permute.xlu0 %6565 }
0x107f   : > { %6613 = vst.msk [vmem:[%s8355_s5 + $0x68] sm:$0xff] %vm5859_vm15, %v6597_v47  ;;  %v6583_v36 = vmul.f32 %v6566_v51, %v11753_v24 }
0x1080   : > { %v6594_v58 = vadd.f32 %v6578_v18, %v11730_v3 }
0x1081   : > { %v6599_v61 = vadd.f32 %v6583_v36, %v11760_v4  ;;  %v6551_v42 = vpop.permute.xlu1 %6550 }
0x1082   : > { %6610 = vst.msk [vmem:[%s8355_s5 + $0x50] sm:$0xff] %vm5859_vm15, %v6594_v58  ;;  %v6580_v49 = vmul.f32 %v6551_v42, %v11738_v59 }
0x1083   : > { %6615 = vst.msk [vmem:[%s8355_s5 + $0x78] sm:$0xff] %vm5859_vm15, %v6599_v61 }
0x1084   : > { %v6596_v26 = vadd.f32 %v6580_v49, %v11748_v56 }
0x1085   : > { %v6561_v27 = vpop.permute.xlu1 %6560 }
0x1086   : > { %6612 = vst.msk [vmem:[%s8355_s5 + $0x60] sm:$0xff] %vm5859_vm15, %v6596_v26  ;;  %v6582_v54 = vmul.f32 %v6561_v27, %v11756_v53 }
0x1088   : > { %v6598_v24 = vadd.f32 %v6582_v54, %v11766_v23 }
0x108a   : > { %6614 = vst.msk [vmem:[%s8355_s5 + $0x70] sm:$0xff] %vm5859_vm15, %v6598_v24 }
0x108b PF: > { %s13_s18 = sadd.s32 1, %s8257_s18   ;;  %s12630_s12 = smov %s8245_s15 }
0x108c   : > { %p10_p11 = scmp.ge.s32.totalorder %s13_s18, 10   ;;  %s12631_s13 = smov %s8249_s16 }
0x108d   : > { %s12632_s14 = smov %s8253_s17  ;;  %s12633_s15 = smov %s12637_s19 }
0x108e   : > { %s12634_s16 = smov %s12641_s20  ;;  %s12635_s17 = smov %s12645_s21 }
0x108f   :  { %12 = sbr.rel (!%p10_p11) target bundleno = 4 (0x4), region = 73 }

</bundles_post_ra>
